<compile_context>
chip_gen: v7x
topology: tpu7x:2x2x1
jax: 0.10.0
libtpu: 0.0.40
codegen_flags: <defaults>
</compile_context>

<pallas_src>
import functools

import jax
import jax.numpy as jnp
from jax import lax
from jax.experimental import pallas as pl
from jax.experimental.pallas import tpu as pltpu

BN_EPS = 1e-5
KH = KW = 3
PAD = 1


# --------------------------------------------------------------------------- #
# Kernels
# --------------------------------------------------------------------------- #
def _conv_stats_kernel(*refs, th, wo, ho, fuse_input):
    """One (n, h-tile) grid step: 3x3 conv as ONE packed MXU contraction plus
    per-tile BatchNorm partial statistics of the conv output.

    Refs (fuse_input=False):  xh, w, y, ssum, ssq
    Refs (fuse_input=True):   xh, w, in_scale, in_shift, y, ssum, ssq

      xh   : [KH, th, Wp, Cin]    kh-shifted zero-padded input slabs (halo-free tile)
      w    : [Cout, KH*KW*Cin]    packed weights, K ordered as (kh, kw, cin)
      y    : [1, Cout, th*wo]     conv output, channel-major / lane-dense (== NCHW)
      ssum, ssq : [1, 1, Cout, 1] per-tile partial sum / sum-of-squares
      in_scale, in_shift : [1, Cin]  folded BN affine of the PREVIOUS block; when
        present the kernel applies relu(x*scale + shift) to the loaded tile (fused
        hand-off) and re-zeroes the conv halo so the zero padding stays exact.
    """
    if fuse_input:
        xh_ref, w_ref, isc_ref, ish_ref, y_ref, ssum_ref, ssq_ref = refs
    else:
        xh_ref, w_ref, y_ref, ssum_ref, ssq_ref = refs

    kh, _, wp, cin = xh_ref.shape
    tm = th * wo

    x_all = xh_ref[...]                                     # [KH, th, wp, cin]
    if fuse_input:
        hi = pl.program_id(1)
        v = jnp.maximum(
            x_all * isc_ref[...].reshape(1, 1, 1, cin)
            + ish_ref[...].reshape(1, 1, 1, cin), 0.0)
        # Padded-row index of each slab element: slab i, tile-local row h maps to
        # padded row (hi*th + h + i); rows 0 / ho+1 and cols 0 / wp-1 are halo.
        row = (hi * th
               + lax.broadcasted_iota(jnp.int32, (kh, th, wp, 1), 0)
               + lax.broadcasted_iota(jnp.int32, (kh, th, wp, 1), 1))
        col = lax.broadcasted_iota(jnp.int32, (kh, th, wp, 1), 2)
        valid = (row >= 1) & (row <= ho) & (col >= 1) & (col <= wp - 2)
        x_all = jnp.where(valid, v, 0.0)

    # im2col in VMEM: 9 shifted windows; the (th, wo, cin) -> (tm, cin) flatten is
    # layout-trivial when wo % 8 == 0, and the pieces are lane-concatenated along
    # the contraction axis so the whole conv is a single K = 9*Cin matmul.
    wins = []
    for i in range(KH):
        for j in range(KW):
            wins.append(x_all[i, :, j:j + wo, :].reshape(tm, cin))
    rhs_t = jnp.concatenate(wins, axis=1)                   # [tm, KH*KW*cin]

    # Weights as LHS, transposed-RHS contraction -> lane-dense [Cout, tm] result
    # (no [tm, Cout] vreg waste, no output transpose, single MXU issue per tile).
    acc = lax.dot_general(w_ref[...], rhs_t,
                          dimension_numbers=(((1,), (1,)), ((), ())),
                          preferred_element_type=jnp.float32)

    y_ref[0] = acc.astype(y_ref.dtype)
    ssum_ref[0, 0] = jnp.sum(acc, axis=1, keepdims=True)
    ssq_ref[0, 0] = jnp.sum(acc * acc, axis=1, keepdims=True)


def _bn_relu_kernel(y_ref, scale_ref, shift_ref, o_ref):
    """relu(y * scale + shift) on a lane-dense [Cout, TS] tile (final block only)."""
    o_ref[0] = jnp.maximum(
        y_ref[0] * scale_ref[...] + shift_ref[...], 0.0).astype(o_ref.dtype)


# --------------------------------------------------------------------------- #
# Generation-aware tiling helpers
# --------------------------------------------------------------------------- #
def _vmem_limits():
    """(scoped vmem_limit_bytes to request, tile-selection budget) per generation."""
    try:
        cap = int(pltpu.get_tpu_info().vmem_capacity_bytes)
    except Exception:
        cap = 64 * 1024 * 1024            # conservative: v7x physical VMEM
    limit = min(cap // 2, 64 * 1024 * 1024)
    return limit, (3 * limit) // 4


def _padded_bytes(shape, itemsize=4):
    """VMEM footprint of a block: last two dims padded to the (8, 128) vreg tile."""
    shape = tuple(shape)
    if len(shape) < 2:
        shape = (1,) + shape
    lead = 1
    for d in shape[:-2]:
        lead *= d
    sub = -(-shape[-2] // 8) * 8
    lane = -(-shape[-1] // 128) * 128
    return lead * sub * lane * itemsize


def _conv_tile_footprint(th, wo, cin, cout, itemsize):
    wp = wo + 2 * PAD
    tm = th * wo
    k9 = KH * KW * cin
    dbuf = 2                                       # Pallas double-buffers each block
    return (dbuf * _padded_bytes((KH, th, wp, cin), itemsize)    # input slab block
            + dbuf * _padded_bytes((cout, k9), itemsize)         # packed weights
            + dbuf * _padded_bytes((cout, tm))                   # y output block
            + 4 * dbuf * _padded_bytes((cout, 1))                # stats blocks
            + _padded_bytes((tm, k9), itemsize)                  # im2col RHS (live)
            + _padded_bytes((cout, tm)))                         # f32 accumulator


def _pick_tile_h(ho, wo, cin, cout, itemsize, budget, prefer_multi_tile):
    """Largest H-tile `th` with th | ho, lane-dense stores ((th*wo) % 128 == 0),
    sublane-aligned th, and a double-buffered VMEM footprint within `budget`."""
    cands = [th for th in range(1, ho + 1)
             if ho % th == 0
             and (th * wo) % 128 == 0
             and (th % 8 == 0 or th == ho)
             and _conv_tile_footprint(th, wo, cin, cout, itemsize) <= budget]
    if prefer_multi_tile:                          # v7x megacore: keep both TCs busy
        multi = [th for th in cands if ho // th >= 2]
        if multi:
            return max(multi)
    if cands:
        return max(cands)
    # TODO(synk): W-tiling (halo DMA via memory_space=pl.ANY) for shapes where no
    # H divisor gives a 128-multiple spatial tile; the guarded full-H fallback
    # below stays legal (block == full dims) but loses lane-dense stores.
    if _conv_tile_footprint(ho, wo, cin, cout, itemsize) > budget:
        raise ValueError(
            f"conv tile exceeds the VMEM budget ({budget} B) for H={ho}, W={wo}, "
            f"Cin={cin}, Cout={cout}; W-tiling is not implemented")
    return ho


# --------------------------------------------------------------------------- #
# Wrappers
# --------------------------------------------------------------------------- #
def _conv_stats(x_nchw, weight, in_scale=None, in_shift=None,
                *, slab_dtype=jnp.float32):
    """Conv2d(3x3, pad=1) of (optionally BN+ReLU-transformed) x, plus per-tile BN
    partial statistics of the conv output.

    If `in_scale`/`in_shift` are given, the kernel applies relu(x*scale + shift) to
    every loaded tile (fused hand-off from the previous conv block) before the
    convolution, so the activated intermediate never round-trips through HBM.

    Returns y [N, Cout, H*W] float32 (channel-major == flattened NCHW) and per-tile
    partial stats ssum / ssq of shape [N, hb, Cout, 1].
    """
    n, cin, h, w = x_nchw.shape
    cout = weight.shape[0]
    ho, wo = h, w                                  # stride 1, pad 1, k 3
    wp = w + 2 * PAD
    s = ho * wo
    k9 = KH * KW * cin
    fuse_input = in_scale is not None
    itemsize = jnp.dtype(slab_dtype).itemsize

    # ---- XLA prep: kh-shifted slabs (3x expansion, not the 9x im2col).
    # TODO(synk): a manual halo-DMA variant (memory_space=pl.ANY) would avoid the
    # 3x expansion and this staging copy; bf16 slabs would halve the bytes at a
    # small accuracy cost.
    xpad = jnp.pad(jnp.transpose(x_nchw, (0, 2, 3, 1)).astype(slab_dtype),
                   ((0, 0), (PAD, PAD), (PAD, PAD), (0, 0)))
    xh = jnp.stack([xpad[:, i:i + ho, :, :] for i in range(KH)], axis=1)
    xh = xh.reshape(n * KH, ho, wp, cin)

    # Packed weights [Cout, (kh, kw, cin)]: the whole conv is ONE K = 9*Cin matmul.
    w_packed = jnp.transpose(weight, (0, 2, 3, 1)).reshape(cout, k9)
    w_packed = w_packed.astype(slab_dtype)

    vmem_limit, budget = _vmem_limits()
    th = _pick_tile_h(ho, wo, cin, cout, itemsize, budget,
                      prefer_multi_tile=(n == 1))
    hb = ho // th
    tm = th * wo

    kernel = functools.partial(_conv_stats_kernel, th=th, wo=wo, ho=ho,
                               fuse_input=fuse_input)

    in_specs = [
        pl.BlockSpec((KH, th, wp, cin), lambda ni, hi: (ni, hi, 0, 0)),
        pl.BlockSpec((cout, k9), lambda ni, hi: (0, 0)),
    ]
    args = [xh, w_packed]
    if fuse_input:
        in_specs += [
            pl.BlockSpec((1, cin), lambda ni, hi: (0, 0)),
            pl.BlockSpec((1, cin), lambda ni, hi: (0, 0)),
        ]
        args += [in_scale.astype(jnp.float32).reshape(1, cin),
                 in_shift.astype(jnp.float32).reshape(1, cin)]

    cost = pl.CostEstimate(
        flops=2 * n * s * k9 * cout + (3 * n * KH * s * cin if fuse_input else 0),
        transcendentals=0,
        bytes_accessed=(xh.size * itemsize + w_packed.size * itemsize
                        + n * cout * s * 4 + 4 * n * hb * cout * 4
                        + (2 * cin * 4 if fuse_input else 0)),
    )

    y, ssum, ssq = pl.pallas_call(
        kernel,
        out_shape=(
            jax.ShapeDtypeStruct((n, cout, s), jnp.float32),
            jax.ShapeDtypeStruct((n, hb, cout, 1), jnp.float32),
            jax.ShapeDtypeStruct((n, hb, cout, 1), jnp.float32),
        ),
        grid=(n, hb),
        in_specs=in_specs,
        out_specs=(
            pl.BlockSpec((1, cout, tm), lambda ni, hi: (ni, 0, hi)),
            pl.BlockSpec((1, 1, cout, 1), lambda ni, hi: (ni, hi, 0, 0)),
            pl.BlockSpec((1, 1, cout, 1), lambda ni, hi: (ni, hi, 0, 0)),
        ),
        compiler_params=pltpu.CompilerParams(
            dimension_semantics=("parallel", "parallel"),
            vmem_limit_bytes=vmem_limit),
        cost_estimate=cost,
    )(*args)
    return y, ssum, ssq


def _fold_bn(ssum, ssq, gamma, beta, count, eps=BN_EPS):
    """Fold train-mode batch statistics + the BN affine into one scale/shift pair."""
    # Single-pass E[x^2] - E[x]^2 in f32 with a non-negativity guard.
    # TODO(synk): switch to mean-centered per-tile partials (Chan combine) if
    # activation magnitudes ever make the single-pass form lose precision.
    mean = jnp.sum(ssum, axis=(0, 1)).reshape(-1) / count
    ex2 = jnp.sum(ssq, axis=(0, 1)).reshape(-1) / count
    var = jnp.maximum(ex2 - mean * mean, 0.0)      # biased (train-mode) variance
    scale = gamma.astype(jnp.float32) * lax.rsqrt(var + eps)
    shift = beta.astype(jnp.float32) - mean * scale
    return scale, shift


def _bn_relu_apply(y, scale, shift):
    """relu(y * scale + shift) on the lane-dense [N, Cout, S] conv output."""
    n, cout, s = y.shape
    vmem_limit, budget = _vmem_limits()
    ts = s
    if s % 128 == 0:
        cands = [t for t in range(128, s + 1, 128)
                 if s % t == 0 and 4 * _padded_bytes((cout, t)) <= budget]
        if cands:
            ts = max(cands)
    cost = pl.CostEstimate(flops=3 * n * cout * s, transcendentals=0,
                           bytes_accessed=2 * n * cout * s * 4 + 2 * cout * 4)
    return pl.pallas_call(
        _bn_relu_kernel,
        out_shape=jax.ShapeDtypeStruct((n, cout, s), jnp.float32),
        grid=(n, s // ts),
        in_specs=[
            pl.BlockSpec((1, cout, ts), lambda ni, si: (ni, 0, si)),
            pl.BlockSpec((cout, 1), lambda ni, si: (0, 0)),
            pl.BlockSpec((cout, 1), lambda ni, si: (0, 0)),
        ],
        out_specs=pl.BlockSpec((1, cout, ts), lambda ni, si: (ni, 0, si)),
        compiler_params=pltpu.CompilerParams(
            dimension_semantics=("parallel", "parallel"),
            vmem_limit_bytes=vmem_limit),
        cost_estimate=cost,
    )(y, scale.reshape(cout, 1), shift.reshape(cout, 1))


def domain_double_conv_forward(x, params, domain_id):
    """Forward of domain_double_conv with train-mode BatchNorm (batch statistics)
    and domain-selected BN affine params: x [N, in_ch, H, W] -> [N, out_ch, H, W].

    The conv biases in `params` are kept for parity with the PyTorch module but are
    provably cancelled by the train-mode BN mean subtraction, so the kernels never
    add them.  NOTE: that identity holds ONLY for batch-stats BN; reusing these
    kernels with running statistics (eval mode) would require the bias back.
    TODO(synk): BN running_mean/var momentum updates (training bookkeeping) are not
    produced; the forward output does not depend on them.
    """
    n, _, h, w = x.shape
    s = h * w
    g1 = params["gamma1"][domain_id]
    b1 = params["beta1"][domain_id]
    g2 = params["gamma2"][domain_id]
    b2 = params["beta2"][domain_id]
    cout1 = params["conv1_w"].shape[0]

    # Block 1: conv + per-tile BN partial stats (BN/ReLU application deferred and
    # fused into block 2's input path below -- no extra HBM round trip).
    y1, ssum1, ssq1 = _conv_stats(x, params["conv1_w"])
    scale1, shift1 = _fold_bn(ssum1, ssq1, g1, b1, n * s)

    # Block 2: conv with BN1+ReLU fused into the tile load, plus BN2 partial stats.
    y2, ssum2, ssq2 = _conv_stats(y1.reshape(n, cout1, h, w), params["conv2_w"],
                                  in_scale=scale1, in_shift=shift1)
    scale2, shift2 = _fold_bn(ssum2, ssq2, g2, b2, n * s)

    # Final BN2 + ReLU apply on the lane-dense conv output.
    z2 = _bn_relu_apply(y2, scale2, shift2)
    return z2.reshape(n, -1, h, w)


# --------------------------------------------------------------------------- #
# Pure-JAX reference (PyTorch module in training mode, biases included)
# --------------------------------------------------------------------------- #
def _reference(x, params, domain_id, eps=BN_EPS):
    def block(xi, wgt, bias, gamma, beta):
        y = lax.conv_general_dilated(
            xi.astype(jnp.float32), wgt.astype(jnp.float32),
            window_strides=(1, 1), padding=((PAD, PAD), (PAD, PAD)),
            dimension_numbers=("NCHW", "OIHW", "NCHW"),
        ) + bias.reshape(1, -1, 1, 1)
        mean = jnp.mean(y, axis=(0, 2, 3), keepdims=True)
        var = jnp.mean((y - mean) ** 2, axis=(0, 2, 3), keepdims=True)
        yh = (y - mean) * lax.rsqrt(var + eps)
        return jnp.maximum(
            yh * gamma.reshape(1, -1, 1, 1) + beta.reshape(1, -1, 1, 1), 0.0)

    z1 = block(x, params["conv1_w"], params["conv1_b"],
               params["gamma1"][domain_id], params["beta1"][domain_id])
    return block(z1, params["conv2_w"], params["conv2_b"],
                 params["gamma2"][domain_id], params["beta2"][domain_id])


if __name__ == "__main__":
    # domain_double_conv(in_ch=4, out_ch=8, num_domains=2); x: [2, 4, 16, 16]; domain_id=1
    N, CIN, COUT, H, W = 2, 4, 8, 16, 16
    NUM_DOMAINS, DOMAIN_ID = 2, 1

    key = jax.random.PRNGKey(0)
    ks = jax.random.split(key, 9)
    x = jax.random.normal(ks[0], (N, CIN, H, W), dtype=jnp.float32)

    fan1 = CIN * KH * KW
    fan2 = COUT * KH * KW
    params = {
        "conv1_w": jax.random.normal(ks[1], (COUT, CIN, KH, KW), jnp.float32) * (2.0 / fan1) ** 0.5,
        "conv1_b": 0.1 * jax.random.normal(ks[2], (COUT,), jnp.float32),
        "conv2_w": jax.random.normal(ks[3], (COUT, COUT, KH, KW), jnp.float32) * (2.0 / fan2) ** 0.5,
        "conv2_b": 0.1 * jax.random.normal(ks[4], (COUT,), jnp.float32),
        "gamma1": 1.0 + 0.1 * jax.random.normal(ks[5], (NUM_DOMAINS, COUT), jnp.float32),
        "beta1": 0.1 * jax.random.normal(ks[6], (NUM_DOMAINS, COUT), jnp.float32),
        "gamma2": 1.0 + 0.1 * jax.random.normal(ks[7], (NUM_DOMAINS, COUT), jnp.float32),
        "beta2": 0.1 * jax.random.normal(ks[8], (NUM_DOMAINS, COUT), jnp.float32),
    }

    fwd = jax.jit(domain_double_conv_forward, static_argnums=2)
    out = jax.block_until_ready(fwd(x, params, DOMAIN_ID))
    ref = jax.block_until_ready(_reference(x, params, DOMAIN_ID))

    assert out.shape == (N, COUT, H, W)
    err = float(jnp.max(jnp.abs(out - ref)))
    assert err < 2e-3, f"max abs err {err}"
    print("KERNEL_OK")
</pallas_src>

<mosaic_0001>
module attributes {stable_mosaic.version = 11 : i64} {
  func.func @_conv_stats_kernel(%arg0: i32, %arg1: i32, %arg2: memref<3x16x18x4xf32, #tpu.memory_space<vmem>>, %arg3: memref<8x36xf32, #tpu.memory_space<vmem>>, %arg4: memref<1x8x256xf32, #tpu.memory_space<vmem>>, %arg5: memref<1x1x8x1xf32, #tpu.memory_space<vmem>>, %arg6: memref<1x1x8x1xf32, #tpu.memory_space<vmem>>) attributes {dimension_semantics = [#tpu.dimension_semantics<parallel>, #tpu.dimension_semantics<parallel>], iteration_bounds = array<i64: 2, 1>, scalar_prefetch = 0 : i64, scratch_operands = 0 : i64, tpu.core_type = #tpu.core_type<tc>, window_params = [{transform_indices = @transform_0, window_bounds = array<i64: 3, 16, 18, 4>}, {pipeline_mode = #tpu.pipeline_mode<synchronous>, transform_indices = @transform_1, window_bounds = array<i64: 8, 36>}, {transform_indices = @transform_2, window_bounds = array<i64: 1, 8, 256>}, {transform_indices = @transform_3, window_bounds = array<i64: 1, 1, 8, 1>}, {transform_indices = @transform_4, window_bounds = array<i64: 1, 1, 8, 1>}]} {
    %c0 = arith.constant 0 : index
    %c0_0 = arith.constant 0 : index
    %c0_1 = arith.constant 0 : index
    %c0_2 = arith.constant 0 : index
    %0 = vector.load %arg2[%c0, %c0_0, %c0_1, %c0_2] : memref<3x16x18x4xf32, #tpu.memory_space<vmem>>, vector<3x16x18x4xf32>
    %1 = vector.extract_strided_slice %0 {offsets = [0, 0, 0, 0], sizes = [1, 16, 16, 4], strides = [1, 1, 1, 1]} : vector<3x16x18x4xf32> to vector<1x16x16x4xf32>
    %2 = vector.shape_cast %1 : vector<1x16x16x4xf32> to vector<16x16x4xf32>
    %3 = vector.shape_cast %2 : vector<16x16x4xf32> to vector<256x4xf32>
    %4 = vector.extract_strided_slice %0 {offsets = [0, 0, 1, 0], sizes = [1, 16, 16, 4], strides = [1, 1, 1, 1]} : vector<3x16x18x4xf32> to vector<1x16x16x4xf32>
    %5 = vector.shape_cast %4 : vector<1x16x16x4xf32> to vector<16x16x4xf32>
    %6 = vector.shape_cast %5 : vector<16x16x4xf32> to vector<256x4xf32>
    %7 = vector.extract_strided_slice %0 {offsets = [0, 0, 2, 0], sizes = [1, 16, 16, 4], strides = [1, 1, 1, 1]} : vector<3x16x18x4xf32> to vector<1x16x16x4xf32>
    %8 = vector.shape_cast %7 : vector<1x16x16x4xf32> to vector<16x16x4xf32>
    %9 = vector.shape_cast %8 : vector<16x16x4xf32> to vector<256x4xf32>
    %10 = vector.extract_strided_slice %0 {offsets = [1, 0, 0, 0], sizes = [1, 16, 16, 4], strides = [1, 1, 1, 1]} : vector<3x16x18x4xf32> to vector<1x16x16x4xf32>
    %11 = vector.shape_cast %10 : vector<1x16x16x4xf32> to vector<16x16x4xf32>
    %12 = vector.shape_cast %11 : vector<16x16x4xf32> to vector<256x4xf32>
    %13 = vector.extract_strided_slice %0 {offsets = [1, 0, 1, 0], sizes = [1, 16, 16, 4], strides = [1, 1, 1, 1]} : vector<3x16x18x4xf32> to vector<1x16x16x4xf32>
    %14 = vector.shape_cast %13 : vector<1x16x16x4xf32> to vector<16x16x4xf32>
    %15 = vector.shape_cast %14 : vector<16x16x4xf32> to vector<256x4xf32>
    %16 = vector.extract_strided_slice %0 {offsets = [1, 0, 2, 0], sizes = [1, 16, 16, 4], strides = [1, 1, 1, 1]} : vector<3x16x18x4xf32> to vector<1x16x16x4xf32>
    %17 = vector.shape_cast %16 : vector<1x16x16x4xf32> to vector<16x16x4xf32>
    %18 = vector.shape_cast %17 : vector<16x16x4xf32> to vector<256x4xf32>
    %19 = vector.extract_strided_slice %0 {offsets = [2, 0, 0, 0], sizes = [1, 16, 16, 4], strides = [1, 1, 1, 1]} : vector<3x16x18x4xf32> to vector<1x16x16x4xf32>
    %20 = vector.shape_cast %19 : vector<1x16x16x4xf32> to vector<16x16x4xf32>
    %21 = vector.shape_cast %20 : vector<16x16x4xf32> to vector<256x4xf32>
    %22 = vector.extract_strided_slice %0 {offsets = [2, 0, 1, 0], sizes = [1, 16, 16, 4], strides = [1, 1, 1, 1]} : vector<3x16x18x4xf32> to vector<1x16x16x4xf32>
    %23 = vector.shape_cast %22 : vector<1x16x16x4xf32> to vector<16x16x4xf32>
    %24 = vector.shape_cast %23 : vector<16x16x4xf32> to vector<256x4xf32>
    %25 = vector.extract_strided_slice %0 {offsets = [2, 0, 2, 0], sizes = [1, 16, 16, 4], strides = [1, 1, 1, 1]} : vector<3x16x18x4xf32> to vector<1x16x16x4xf32>
    %26 = vector.shape_cast %25 : vector<1x16x16x4xf32> to vector<16x16x4xf32>
    %27 = vector.shape_cast %26 : vector<16x16x4xf32> to vector<256x4xf32>
    %28 = tpu.concatenate %3, %6, %9, %12, %15, %18, %21, %24, %27 in 1 : vector<256x4xf32>, vector<256x4xf32>, vector<256x4xf32>, vector<256x4xf32>, vector<256x4xf32>, vector<256x4xf32>, vector<256x4xf32>, vector<256x4xf32>, vector<256x4xf32> -> vector<256x36xf32>
    %c0_3 = arith.constant 0 : index
    %c0_4 = arith.constant 0 : index
    %29 = vector.load %arg3[%c0_3, %c0_4] : memref<8x36xf32, #tpu.memory_space<vmem>>, vector<8x36xf32>
    %cst = arith.constant dense<0.000000e+00> : vector<8x256xf32>
    %30 = tpu.matmul %29, %28, %cst {dimension_numbers = #tpu.dot_dimension_numbers<[1], [1], [0], [0], [0, 0, 1, 0], [], []>} : vector<8x36xf32>, vector<256x36xf32>, vector<8x256xf32> -> vector<8x256xf32>
    %c0_5 = arith.constant 0 : index
    %c0_6 = arith.constant 0 : index
    %c0_7 = arith.constant 0 : index
    %31 = vector.load %arg4[%c0_5, %c0_6, %c0_7] : memref<1x8x256xf32, #tpu.memory_space<vmem>>, vector<1x8x256xf32>
    %32 = vector.shape_cast %31 : vector<1x8x256xf32> to vector<8x256xf32>
    %33 = vector.shape_cast %30 : vector<8x256xf32> to vector<1x8x256xf32>
    tpu.vector_store %arg4[%c0_5, %c0_6, %c0_7], %33 {strides = array<i32>} : memref<1x8x256xf32, #tpu.memory_space<vmem>>, vector<1x8x256xf32>,
    %cst_8 = arith.constant dense<0.000000e+00> : vector<8xf32>
    %34 = vector.multi_reduction <add>, %30, %cst_8 [1] : vector<8x256xf32> to vector<8xf32>
    %35 = vector.shape_cast %34 : vector<8xf32> to vector<8x1xf32>
    %c0_9 = arith.constant 0 : index
    %c0_10 = arith.constant 0 : index
    %c0_11 = arith.constant 0 : index
    %c0_12 = arith.constant 0 : index
    %36 = vector.load %arg5[%c0_9, %c0_10, %c0_11, %c0_12] : memref<1x1x8x1xf32, #tpu.memory_space<vmem>>, vector<1x1x8x1xf32>
    %37 = vector.shape_cast %36 : vector<1x1x8x1xf32> to vector<8x1xf32>
    %38 = vector.shape_cast %35 : vector<8x1xf32> to vector<1x1x8x1xf32>
    tpu.vector_store %arg5[%c0_9, %c0_10, %c0_11, %c0_12], %38 {strides = array<i32>} : memref<1x1x8x1xf32, #tpu.memory_space<vmem>>, vector<1x1x8x1xf32>,
    %39 = arith.mulf %30, %30 : vector<8x256xf32>
    %cst_13 = arith.constant dense<0.000000e+00> : vector<8xf32>
    %40 = vector.multi_reduction <add>, %39, %cst_13 [1] : vector<8x256xf32> to vector<8xf32>
    %41 = vector.shape_cast %40 : vector<8xf32> to vector<8x1xf32>
    %c0_14 = arith.constant 0 : index
    %c0_15 = arith.constant 0 : index
    %c0_16 = arith.constant 0 : index
    %c0_17 = arith.constant 0 : index
    %42 = vector.load %arg6[%c0_14, %c0_15, %c0_16, %c0_17] : memref<1x1x8x1xf32, #tpu.memory_space<vmem>>, vector<1x1x8x1xf32>
    %43 = vector.shape_cast %42 : vector<1x1x8x1xf32> to vector<8x1xf32>
    %44 = vector.shape_cast %41 : vector<8x1xf32> to vector<1x1x8x1xf32>
    tpu.vector_store %arg6[%c0_14, %c0_15, %c0_16, %c0_17], %44 {strides = array<i32>} : memref<1x1x8x1xf32, #tpu.memory_space<vmem>>, vector<1x1x8x1xf32>,
    return
  }
  func.func @transform_0(%arg0: i32, %arg1: i32) -> (i32, i32, i32, i32) {
    %c0_i32 = arith.constant 0 : i32
    %c0_i32_0 = arith.constant 0 : i32
    %c0_i32_1 = arith.constant 0 : i32
    return %arg0, %arg1, %c0_i32, %c0_i32_0 : i32, i32, i32, i32
  }
  func.func @transform_1(%arg0: i32, %arg1: i32) -> (i32, i32) {
    %c0_i32 = arith.constant 0 : i32
    %c0_i32_0 = arith.constant 0 : i32
    %c0_i32_1 = arith.constant 0 : i32
    return %c0_i32, %c0_i32_0 : i32, i32
  }
  func.func @transform_2(%arg0: i32, %arg1: i32) -> (i32, i32, i32) {
    %c0_i32 = arith.constant 0 : i32
    %c0_i32_0 = arith.constant 0 : i32
    return %arg0, %c0_i32, %arg1 : i32, i32, i32
  }
  func.func @transform_3(%arg0: i32, %arg1: i32) -> (i32, i32, i32, i32) {
    %c0_i32 = arith.constant 0 : i32
    %c0_i32_0 = arith.constant 0 : i32
    %c0_i32_1 = arith.constant 0 : i32
    return %arg0, %arg1, %c0_i32, %c0_i32_0 : i32, i32, i32, i32
  }
  func.func @transform_4(%arg0: i32, %arg1: i32) -> (i32, i32, i32, i32) {
    %c0_i32 = arith.constant 0 : i32
    %c0_i32_0 = arith.constant 0 : i32
    %c0_i32_1 = arith.constant 0 : i32
    return %arg0, %arg1, %c0_i32, %c0_i32_0 : i32, i32, i32, i32
  }
}

module attributes {stable_mosaic.version = 11 : i64} {
  func.func @_conv_stats_kernel(%arg0: i32, %arg1: i32, %arg2: memref<3x16x18x8xf32, #tpu.memory_space<vmem>>, %arg3: memref<8x72xf32, #tpu.memory_space<vmem>>, %arg4: memref<1x8xf32, #tpu.memory_space<vmem>>, %arg5: memref<1x8xf32, #tpu.memory_space<vmem>>, %arg6: memref<1x8x256xf32, #tpu.memory_space<vmem>>, %arg7: memref<1x1x8x1xf32, #tpu.memory_space<vmem>>, %arg8: memref<1x1x8x1xf32, #tpu.memory_space<vmem>>) attributes {dimension_semantics = [#tpu.dimension_semantics<parallel>, #tpu.dimension_semantics<parallel>], iteration_bounds = array<i64: 2, 1>, scalar_prefetch = 0 : i64, scratch_operands = 0 : i64, tpu.core_type = #tpu.core_type<tc>, window_params = [{transform_indices = @transform_0, window_bounds = array<i64: 3, 16, 18, 8>}, {pipeline_mode = #tpu.pipeline_mode<synchronous>, transform_indices = @transform_1, window_bounds = array<i64: 8, 72>}, {pipeline_mode = #tpu.pipeline_mode<synchronous>, transform_indices = @transform_2, window_bounds = array<i64: 1, 8>}, {pipeline_mode = #tpu.pipeline_mode<synchronous>, transform_indices = @transform_3, window_bounds = array<i64: 1, 8>}, {transform_indices = @transform_4, window_bounds = array<i64: 1, 8, 256>}, {transform_indices = @transform_5, window_bounds = array<i64: 1, 1, 8, 1>}, {transform_indices = @transform_6, window_bounds = array<i64: 1, 1, 8, 1>}]} {
    %c0 = arith.constant 0 : index
    %c0_0 = arith.constant 0 : index
    %c0_1 = arith.constant 0 : index
    %c0_2 = arith.constant 0 : index
    %0 = vector.load %arg2[%c0, %c0_0, %c0_1, %c0_2] : memref<3x16x18x8xf32, #tpu.memory_space<vmem>>, vector<3x16x18x8xf32>
    %c0_3 = arith.constant 0 : index
    %c0_4 = arith.constant 0 : index
    %1 = vector.load %arg4[%c0_3, %c0_4] : memref<1x8xf32, #tpu.memory_space<vmem>>, vector<1x8xf32>
    %2 = vector.shape_cast %1 : vector<1x8xf32> to vector<1x1x1x8xf32>
    %3 = vector.broadcast %2 : vector<1x1x1x8xf32> to vector<3x16x18x8xf32>
    %4 = arith.mulf %0, %3 : vector<3x16x18x8xf32>
    %c0_5 = arith.constant 0 : index
    %c0_6 = arith.constant 0 : index
    %5 = vector.load %arg5[%c0_5, %c0_6] : memref<1x8xf32, #tpu.memory_space<vmem>>, vector<1x8xf32>
    %6 = vector.shape_cast %5 : vector<1x8xf32> to vector<1x1x1x8xf32>
    %7 = vector.broadcast %6 : vector<1x1x1x8xf32> to vector<3x16x18x8xf32>
    %8 = arith.addf %4, %7 : vector<3x16x18x8xf32>
    %cst = arith.constant 0.000000e+00 : f32
    %9 = vector.broadcast %cst : f32 to vector<3x16x18x8xf32>
    %10 = arith.maximumf %8, %9 : vector<3x16x18x8xf32>
    %c16_i32 = arith.constant 16 : i32
    %11 = arith.muli %arg1, %c16_i32 : i32
    %12 = tpu.iota {dimensions = array<i32: 0>} : vector<3x16x18x1xi32>
    %13 = vector.broadcast %11 : i32 to vector<3x16x18x1xi32>
    %14 = arith.addi %13, %12 : vector<3x16x18x1xi32>
    %15 = tpu.iota {dimensions = array<i32: 1>} : vector<3x16x18x1xi32>
    %16 = arith.addi %14, %15 : vector<3x16x18x1xi32>
    %17 = tpu.iota {dimensions = array<i32: 2>} : vector<3x16x18x1xi32>
    %c1_i32 = arith.constant 1 : i32
    %18 = vector.broadcast %c1_i32 : i32 to vector<3x16x18x1xi32>
    %19 = arith.cmpi sge, %16, %18 : vector<3x16x18x1xi32>
    %c16_i32_7 = arith.constant 16 : i32
    %20 = vector.broadcast %c16_i32_7 : i32 to vector<3x16x18x1xi32>
    %21 = arith.cmpi sle, %16, %20 : vector<3x16x18x1xi32>
    %22 = arith.andi %19, %21 : vector<3x16x18x1xi1>
    %c1_i32_8 = arith.constant 1 : i32
    %23 = vector.broadcast %c1_i32_8 : i32 to vector<3x16x18x1xi32>
    %24 = arith.cmpi sge, %17, %23 : vector<3x16x18x1xi32>
    %25 = arith.andi %22, %24 : vector<3x16x18x1xi1>
    %c16_i32_9 = arith.constant 16 : i32
    %26 = vector.broadcast %c16_i32_9 : i32 to vector<3x16x18x1xi32>
    %27 = arith.cmpi sle, %17, %26 : vector<3x16x18x1xi32>
    %28 = arith.andi %25, %27 : vector<3x16x18x1xi1>
    %cst_10 = arith.constant 0.000000e+00 : f32
    %29 = vector.shape_cast %28 : vector<3x16x18x1xi1> to vector<3x16x18x1xi1>
    %30 = vector.broadcast %29 : vector<3x16x18x1xi1> to vector<3x16x18x8xi1>
    %31 = vector.broadcast %cst_10 : f32 to vector<3x16x18x8xf32>
    %32 = arith.select %30, %10, %31 : vector<3x16x18x8xi1>, vector<3x16x18x8xf32>
    %33 = vector.extract_strided_slice %32 {offsets = [0, 0, 0, 0], sizes = [1, 16, 16, 8], strides = [1, 1, 1, 1]} : vector<3x16x18x8xf32> to vector<1x16x16x8xf32>
    %34 = vector.shape_cast %33 : vector<1x16x16x8xf32> to vector<16x16x8xf32>
    %35 = vector.shape_cast %34 : vector<16x16x8xf32> to vector<256x8xf32>
    %36 = vector.extract_strided_slice %32 {offsets = [0, 0, 1, 0], sizes = [1, 16, 16, 8], strides = [1, 1, 1, 1]} : vector<3x16x18x8xf32> to vector<1x16x16x8xf32>
    %37 = vector.shape_cast %36 : vector<1x16x16x8xf32> to vector<16x16x8xf32>
    %38 = vector.shape_cast %37 : vector<16x16x8xf32> to vector<256x8xf32>
    %39 = vector.extract_strided_slice %32 {offsets = [0, 0, 2, 0], sizes = [1, 16, 16, 8], strides = [1, 1, 1, 1]} : vector<3x16x18x8xf32> to vector<1x16x16x8xf32>
    %40 = vector.shape_cast %39 : vector<1x16x16x8xf32> to vector<16x16x8xf32>
    %41 = vector.shape_cast %40 : vector<16x16x8xf32> to vector<256x8xf32>
    %42 = vector.extract_strided_slice %32 {offsets = [1, 0, 0, 0], sizes = [1, 16, 16, 8], strides = [1, 1, 1, 1]} : vector<3x16x18x8xf32> to vector<1x16x16x8xf32>
    %43 = vector.shape_cast %42 : vector<1x16x16x8xf32> to vector<16x16x8xf32>
    %44 = vector.shape_cast %43 : vector<16x16x8xf32> to vector<256x8xf32>
    %45 = vector.extract_strided_slice %32 {offsets = [1, 0, 1, 0], sizes = [1, 16, 16, 8], strides = [1, 1, 1, 1]} : vector<3x16x18x8xf32> to vector<1x16x16x8xf32>
    %46 = vector.shape_cast %45 : vector<1x16x16x8xf32> to vector<16x16x8xf32>
    %47 = vector.shape_cast %46 : vector<16x16x8xf32> to vector<256x8xf32>
    %48 = vector.extract_strided_slice %32 {offsets = [1, 0, 2, 0], sizes = [1, 16, 16, 8], strides = [1, 1, 1, 1]} : vector<3x16x18x8xf32> to vector<1x16x16x8xf32>
    %49 = vector.shape_cast %48 : vector<1x16x16x8xf32> to vector<16x16x8xf32>
    %50 = vector.shape_cast %49 : vector<16x16x8xf32> to vector<256x8xf32>
    %51 = vector.extract_strided_slice %32 {offsets = [2, 0, 0, 0], sizes = [1, 16, 16, 8], strides = [1, 1, 1, 1]} : vector<3x16x18x8xf32> to vector<1x16x16x8xf32>
    %52 = vector.shape_cast %51 : vector<1x16x16x8xf32> to vector<16x16x8xf32>
    %53 = vector.shape_cast %52 : vector<16x16x8xf32> to vector<256x8xf32>
    %54 = vector.extract_strided_slice %32 {offsets = [2, 0, 1, 0], sizes = [1, 16, 16, 8], strides = [1, 1, 1, 1]} : vector<3x16x18x8xf32> to vector<1x16x16x8xf32>
    %55 = vector.shape_cast %54 : vector<1x16x16x8xf32> to vector<16x16x8xf32>
    %56 = vector.shape_cast %55 : vector<16x16x8xf32> to vector<256x8xf32>
    %57 = vector.extract_strided_slice %32 {offsets = [2, 0, 2, 0], sizes = [1, 16, 16, 8], strides = [1, 1, 1, 1]} : vector<3x16x18x8xf32> to vector<1x16x16x8xf32>
    %58 = vector.shape_cast %57 : vector<1x16x16x8xf32> to vector<16x16x8xf32>
    %59 = vector.shape_cast %58 : vector<16x16x8xf32> to vector<256x8xf32>
    %60 = tpu.concatenate %35, %38, %41, %44, %47, %50, %53, %56, %59 in 1 : vector<256x8xf32>, vector<256x8xf32>, vector<256x8xf32>, vector<256x8xf32>, vector<256x8xf32>, vector<256x8xf32>, vector<256x8xf32>, vector<256x8xf32>, vector<256x8xf32> -> vector<256x72xf32>
    %c0_11 = arith.constant 0 : index
    %c0_12 = arith.constant 0 : index
    %61 = vector.load %arg3[%c0_11, %c0_12] : memref<8x72xf32, #tpu.memory_space<vmem>>, vector<8x72xf32>
    %cst_13 = arith.constant dense<0.000000e+00> : vector<8x256xf32>
    %62 = tpu.matmul %61, %60, %cst_13 {dimension_numbers = #tpu.dot_dimension_numbers<[1], [1], [0], [0], [0, 0, 1, 0], [], []>} : vector<8x72xf32>, vector<256x72xf32>, vector<8x256xf32> -> vector<8x256xf32>
    %c0_14 = arith.constant 0 : index
    %c0_15 = arith.constant 0 : index
    %c0_16 = arith.constant 0 : index
    %63 = vector.load %arg6[%c0_14, %c0_15, %c0_16] : memref<1x8x256xf32, #tpu.memory_space<vmem>>, vector<1x8x256xf32>
    %64 = vector.shape_cast %63 : vector<1x8x256xf32> to vector<8x256xf32>
    %65 = vector.shape_cast %62 : vector<8x256xf32> to vector<1x8x256xf32>
    tpu.vector_store %arg6[%c0_14, %c0_15, %c0_16], %65 {strides = array<i32>} : memref<1x8x256xf32, #tpu.memory_space<vmem>>, vector<1x8x256xf32>,
    %cst_17 = arith.constant dense<0.000000e+00> : vector<8xf32>
    %66 = vector.multi_reduction <add>, %62, %cst_17 [1] : vector<8x256xf32> to vector<8xf32>
    %67 = vector.shape_cast %66 : vector<8xf32> to vector<8x1xf32>
    %c0_18 = arith.constant 0 : index
    %c0_19 = arith.constant 0 : index
    %c0_20 = arith.constant 0 : index
    %c0_21 = arith.constant 0 : index
    %68 = vector.load %arg7[%c0_18, %c0_19, %c0_20, %c0_21] : memref<1x1x8x1xf32, #tpu.memory_space<vmem>>, vector<1x1x8x1xf32>
    %69 = vector.shape_cast %68 : vector<1x1x8x1xf32> to vector<8x1xf32>
    %70 = vector.shape_cast %67 : vector<8x1xf32> to vector<1x1x8x1xf32>
    tpu.vector_store %arg7[%c0_18, %c0_19, %c0_20, %c0_21], %70 {strides = array<i32>} : memref<1x1x8x1xf32, #tpu.memory_space<vmem>>, vector<1x1x8x1xf32>,
    %71 = arith.mulf %62, %62 : vector<8x256xf32>
    %cst_22 = arith.constant dense<0.000000e+00> : vector<8xf32>
    %72 = vector.multi_reduction <add>, %71, %cst_22 [1] : vector<8x256xf32> to vector<8xf32>
    %73 = vector.shape_cast %72 : vector<8xf32> to vector<8x1xf32>
    %c0_23 = arith.constant 0 : index
    %c0_24 = arith.constant 0 : index
    %c0_25 = arith.constant 0 : index
    %c0_26 = arith.constant 0 : index
    %74 = vector.load %arg8[%c0_23, %c0_24, %c0_25, %c0_26] : memref<1x1x8x1xf32, #tpu.memory_space<vmem>>, vector<1x1x8x1xf32>
    %75 = vector.shape_cast %74 : vector<1x1x8x1xf32> to vector<8x1xf32>
    %76 = vector.shape_cast %73 : vector<8x1xf32> to vector<1x1x8x1xf32>
    tpu.vector_store %arg8[%c0_23, %c0_24, %c0_25, %c0_26], %76 {strides = array<i32>} : memref<1x1x8x1xf32, #tpu.memory_space<vmem>>, vector<1x1x8x1xf32>,
    return
  }
  func.func @transform_0(%arg0: i32, %arg1: i32) -> (i32, i32, i32, i32) {
    %c0_i32 = arith.constant 0 : i32
    %c0_i32_0 = arith.constant 0 : i32
    %c0_i32_1 = arith.constant 0 : i32
    return %arg0, %arg1, %c0_i32, %c0_i32_0 : i32, i32, i32, i32
  }
  func.func @transform_1(%arg0: i32, %arg1: i32) -> (i32, i32) {
    %c0_i32 = arith.constant 0 : i32
    %c0_i32_0 = arith.constant 0 : i32
    %c0_i32_1 = arith.constant 0 : i32
    return %c0_i32, %c0_i32_0 : i32, i32
  }
  func.func @transform_2(%arg0: i32, %arg1: i32) -> (i32, i32) {
    %c0_i32 = arith.constant 0 : i32
    %c0_i32_0 = arith.constant 0 : i32
    %c0_i32_1 = arith.constant 0 : i32
    return %c0_i32, %c0_i32_0 : i32, i32
  }
  func.func @transform_3(%arg0: i32, %arg1: i32) -> (i32, i32) {
    %c0_i32 = arith.constant 0 : i32
    %c0_i32_0 = arith.constant 0 : i32
    %c0_i32_1 = arith.constant 0 : i32
    return %c0_i32, %c0_i32_0 : i32, i32
  }
  func.func @transform_4(%arg0: i32, %arg1: i32) -> (i32, i32, i32) {
    %c0_i32 = arith.constant 0 : i32
    %c0_i32_0 = arith.constant 0 : i32
    return %arg0, %c0_i32, %arg1 : i32, i32, i32
  }
  func.func @transform_5(%arg0: i32, %arg1: i32) -> (i32, i32, i32, i32) {
    %c0_i32 = arith.constant 0 : i32
    %c0_i32_0 = arith.constant 0 : i32
    %c0_i32_1 = arith.constant 0 : i32
    return %arg0, %arg1, %c0_i32, %c0_i32_0 : i32, i32, i32, i32
  }
  func.func @transform_6(%arg0: i32, %arg1: i32) -> (i32, i32, i32, i32) {
    %c0_i32 = arith.constant 0 : i32
    %c0_i32_0 = arith.constant 0 : i32
    %c0_i32_1 = arith.constant 0 : i32
    return %arg0, %arg1, %c0_i32, %c0_i32_0 : i32, i32, i32, i32
  }
}

module attributes {stable_mosaic.version = 11 : i64} {
  func.func @_bn_relu_kernel(%arg0: i32, %arg1: i32, %arg2: memref<1x8x256xf32, #tpu.memory_space<vmem>>, %arg3: memref<8x1xf32, #tpu.memory_space<vmem>>, %arg4: memref<8x1xf32, #tpu.memory_space<vmem>>, %arg5: memref<1x8x256xf32, #tpu.memory_space<vmem>>) attributes {dimension_semantics = [#tpu.dimension_semantics<parallel>, #tpu.dimension_semantics<parallel>], iteration_bounds = array<i64: 2, 1>, scalar_prefetch = 0 : i64, scratch_operands = 0 : i64, tpu.core_type = #tpu.core_type<tc>, window_params = [{transform_indices = @transform_0, window_bounds = array<i64: 1, 8, 256>}, {pipeline_mode = #tpu.pipeline_mode<synchronous>, transform_indices = @transform_1, window_bounds = array<i64: 8, 1>}, {pipeline_mode = #tpu.pipeline_mode<synchronous>, transform_indices = @transform_2, window_bounds = array<i64: 8, 1>}, {transform_indices = @transform_3, window_bounds = array<i64: 1, 8, 256>}]} {
    %c0 = arith.constant 0 : index
    %c0_0 = arith.constant 0 : index
    %c0_1 = arith.constant 0 : index
    %0 = vector.load %arg2[%c0, %c0_0, %c0_1] : memref<1x8x256xf32, #tpu.memory_space<vmem>>, vector<1x8x256xf32>
    %1 = vector.shape_cast %0 : vector<1x8x256xf32> to vector<8x256xf32>
    %c0_2 = arith.constant 0 : index
    %c0_3 = arith.constant 0 : index
    %2 = vector.load %arg3[%c0_2, %c0_3] : memref<8x1xf32, #tpu.memory_space<vmem>>, vector<8x1xf32>
    %3 = vector.broadcast %2 : vector<8x1xf32> to vector<8x256xf32>
    %4 = arith.mulf %1, %3 : vector<8x256xf32>
    %c0_4 = arith.constant 0 : index
    %c0_5 = arith.constant 0 : index
    %5 = vector.load %arg4[%c0_4, %c0_5] : memref<8x1xf32, #tpu.memory_space<vmem>>, vector<8x1xf32>
    %6 = vector.broadcast %5 : vector<8x1xf32> to vector<8x256xf32>
    %7 = arith.addf %4, %6 : vector<8x256xf32>
    %cst = arith.constant 0.000000e+00 : f32
    %8 = vector.broadcast %cst : f32 to vector<8x256xf32>
    %9 = arith.maximumf %7, %8 : vector<8x256xf32>
    %c0_6 = arith.constant 0 : index
    %c0_7 = arith.constant 0 : index
    %c0_8 = arith.constant 0 : index
    %10 = vector.load %arg5[%c0_6, %c0_7, %c0_8] : memref<1x8x256xf32, #tpu.memory_space<vmem>>, vector<1x8x256xf32>
    %11 = vector.shape_cast %10 : vector<1x8x256xf32> to vector<8x256xf32>
    %12 = vector.shape_cast %9 : vector<8x256xf32> to vector<1x8x256xf32>
    tpu.vector_store %arg5[%c0_6, %c0_7, %c0_8], %12 {strides = array<i32>} : memref<1x8x256xf32, #tpu.memory_space<vmem>>, vector<1x8x256xf32>,
    return
  }
  func.func @transform_0(%arg0: i32, %arg1: i32) -> (i32, i32, i32) {
    %c0_i32 = arith.constant 0 : i32
    %c0_i32_0 = arith.constant 0 : i32
    return %arg0, %c0_i32, %arg1 : i32, i32, i32
  }
  func.func @transform_1(%arg0: i32, %arg1: i32) -> (i32, i32) {
    %c0_i32 = arith.constant 0 : i32
    %c0_i32_0 = arith.constant 0 : i32
    %c0_i32_1 = arith.constant 0 : i32
    return %c0_i32, %c0_i32_0 : i32, i32
  }
  func.func @transform_2(%arg0: i32, %arg1: i32) -> (i32, i32) {
    %c0_i32 = arith.constant 0 : i32
    %c0_i32_0 = arith.constant 0 : i32
    %c0_i32_1 = arith.constant 0 : i32
    return %c0_i32, %c0_i32_0 : i32, i32
  }
  func.func @transform_3(%arg0: i32, %arg1: i32) -> (i32, i32, i32) {
    %c0_i32 = arith.constant 0 : i32
    %c0_i32_0 = arith.constant 0 : i32
    return %arg0, %c0_i32, %arg1 : i32, i32, i32
  }
}

</mosaic_0001>

<bundles_post_ra>
// kernel: domain_double_conv_forward.3
= control target key start
LH: loop header
LB: loop body
LE: loop exit
PB: predicated region body
PF: predicated region fallthrough
CT: control target
= control target key end

     0   :  { %s3338_s15 = smov 0   ;;  %s3340_s16 = smov 0   ;;  %s5149_s0 = inlined_call_operand.vmem [shape: f32[6,16,18,4], index: 0, kind: input, shape index: {}]   ;;  %s5150_s1 = inlined_call_operand.vmem [shape: f32[8,36], index: 1, kind: input, shape index: {}]   ;;  %s5151_s2 = inlined_call_operand.vmem [shape: f32[2,8,256], index: 2, kind: output, shape index: {0}]   ;;  %s5152_s3 = inlined_call_operand.vmem [shape: f32[2,1,8,1], index: 3, kind: output, shape index: {1}]   ;;  %s5153_s4 = inlined_call_operand.vmem [shape: f32[2,1,8,1], index: 4, kind: output, shape index: {2}]  }
   0x1   :  { %s3342_s17 = smov 0  }
   0x2 LB: > { %s27_s18 = sadd.s32 1, %s3299_s16  ;;  %p2445_p0 = scmp.ge.s32.totalorder %s3303_s17, 1  ;;  %s3303_s17 = sphi %s3342_s17, %s15_s17   ;;  %s3299_s16 = sphi %s3340_s16, %s5295_s16   ;;  %s3295_s15 = sphi %s3338_s15, %s5294_s15  }
   0x3   : > { %p29_p1 = scmp.ge.s32.totalorder %s27_s18, 2  ;;  %p195_p2 = scmp.lt.s32.totalorder %s3303_s17, 3 }
   0x5   : > { %s5297_s18 = smov (%p29_p1, %s27_s18), 0  ;;  %p196_p3 = pnand %p2445_p0, %p195_p2 }
   0x7   : > { %199 = sbr.rel (%p196_p3) target bundleno = 773 (0x305), region = 28 }
   0xe   : > { %s245_s19 = smul.u32 3, %s3295_s15  ;;  %vm474_vm0 = vcmask 1046528   ;;  %s3305_s24 = smov 4   ;;  %vm555_vm1 = vcmask 1045504   ;;  %vm1820_vm2 = vcmask 31744   ;;  %vm1853_vm3 = vcmask 64512  }
   0xf   : > { %s3306_s25 = smov 8   ;;  %s3307_s26 = smov 12   ;;  %vm1886_vm4 = vcmask 97280   ;;  %vm1919_vm5 = vcmask 130048   ;;  %vm1952_vm6 = vcmask 162816   ;;  %vm1985_vm7 = vcmask 195584  }
  0x10   : > { %p247_p4 = scmp.lt.s32.totalorder %s245_s19, 5  ;;  %s3308_s27 = smov 16   ;;  %vm2018_vm8 = vcmask 228352   ;;  %vm2051_vm9 = vcmask 261120   ;;  %vm2085_vm10 = vcmask 293888   ;;  %vm2261_vm12 = vcmask 7168  }
  0x11   : > { %s3309_s28 = smov 20   ;;  %s3310_s29 = smov 24   ;;  %vm4413_vm11 = vmpackc.low %vm2085_vm10, %vm2085_vm10 }
  0x12   : > { %s5299_s19 = smov (!%p247_p4, %s245_s19), 5  ;;  %s3311_s30 = smov 28  }
  0x13   : > { %s2569_s20 = smul.u32 384, %s5299_s19  ;;  %s3312_s5 = smov 32  }
  0x14   : > { %p259_p5 = scmp.lt.s32.totalorder %s3295_s15, 1 }
  0x15   : > { %s3362_s23 = scalar_lea.vmem %s5149_s0, %s2569_s20 }
  0x16   : > { %v3365_v0 = vld [vmem:[%s3362_s23 + $0x30] sm:$0xff]  ;;  %v3368_v1 = vld [vmem:[%s3362_s23 + $0x38] sm:$0xff]  ;;  %v3371_v2 = vld [vmem:[%s3362_s23 + $0x40] sm:$0x3]  ;;  %s5301_s15 = smov (!%p259_p5, %s3295_s15), 1 }
  0x17   : > { %v485_v3 = vrot.slane %v3365_v0, 1  ;;  %v486_v4 = vrot.slane %v3368_v1, 1  ;;  %v488_v5 = vrot.slane %v3371_v2, 1  ;;  %v3377_v6 = vld [vmem:[%s3362_s23] sm:$0xff]  ;;  %v3380_v7 = vld [vmem:[%s3362_s23 + $0x8] sm:$0xff]  ;;  %v3391_v12 = vld [vmem:[%s3362_s23 + $0x50] sm:$0xff] }
  0x18   : > { %v3383_v8 = vld [vmem:[%s3362_s23 + $0x10] sm:$0x3]  ;;  %v475_v9 = vrot.slane %v3377_v6, 1  ;;  %v476_v10 = vrot.slane %v3380_v7, 1  ;;  %v3388_v11 = vld [vmem:[%s3362_s23 + $0x48] sm:$0xff]  ;;  %v3400_v17 = vld [vmem:[%s3362_s23 + $0x18] sm:$0xff] }
  0x19   : > { %v487_v13 = vsel %vm474_vm0, %v485_v3, %v486_v4  ;;  %v489_v14 = vsel %vm474_vm0, %v486_v4, %v488_v5  ;;  %v478_v15 = vrot.slane %v3383_v8, 1  ;;  %v3397_v16 = vld [vmem:[%s3362_s23 + $0x58] sm:$0x3]  ;;  %v3403_v18 = vld [vmem:[%s3362_s23 + $0x20] sm:$0xff]  ;;  %v490_v21 = vrot.slane %v3388_v11, 1  ;;  %v3432_v36 = vld [vmem:[%s3362_s23 + $0x68] sm:$0xff] }
  0x1a   : > { %v2612_v19 = vpack.i.bf16 %v489_v14, %v487_v13  ;;  %v477_v20 = vsel %vm474_vm0, %v475_v9, %v476_v10  ;;  %v491_v22 = vrot.slane %v3391_v12, 1  ;;  %v3409_v23 = vld [vmem:[%s3362_s23 + $0x28] sm:$0x3]  ;;  %v3412_v24 = vld [vmem:[%s3362_s23 + $0x78] sm:$0xff]  ;;  %v3415_v25 = vld [vmem:[%s3362_s23 + $0x80] sm:$0xff]  ;;  %v493_v27 = vrot.slane %v3397_v16, 1 }
  0x1b   : > { %v479_v26 = vsel %vm474_vm0, %v476_v10, %v478_v15  ;;  %v480_v28 = vrot.slane %v3400_v17, 1  ;;  %v481_v29 = vrot.slane %v3403_v18, 1  ;;  %v3422_v30 = vld [vmem:[%s3362_s23 + $0x88] sm:$0x3]  ;;  %v3425_v31 = vld [vmem:[%s3362_s23 + $0x60] sm:$0xff]  ;;  %v483_v34 = vrot.slane %v3409_v23, 1 }
  0x1c   : > { %2613 = vrot.lane.b32.xlu1 %v2612_v19, %s3305_s24  ;;  %v2602_v32 = vpack.i.bf16 %v479_v26, %v477_v20  ;;  %v492_v33 = vsel %vm474_vm0, %v490_v21, %v491_v22  ;;  %v500_v35 = vrot.slane %v3412_v24, 1  ;;  %v3435_v37 = vld [vmem:[%s3362_s23 + $0x70] sm:$0x3]  ;;  %v494_v38 = vsel %vm474_vm0, %v491_v22, %v493_v27  ;;  %v3442_v42 = vld [vmem:[%s3362_s23 + $0xa8] sm:$0xff]  ;;  %v3452_v48 = vld [vmem:[%s3362_s23 + $0xb8] sm:$0x3] }
  0x1d   : > { %v482_v39 = vsel %vm474_vm0, %v480_v28, %v481_v29  ;;  %v501_v40 = vrot.slane %v3415_v25, 1  ;;  %v503_v41 = vrot.slane %v3422_v30, 1  ;;  %v3445_v43 = vld [vmem:[%s3362_s23 + $0xb0] sm:$0xff]  ;;  %v2617_v44 = vpack.i.bf16 %v494_v38, %v492_v33  ;;  %v3458_v50 = vld [vmem:[%s3362_s23 + $0x98] sm:$0xff]  ;;  %v3464_v55 = vld [vmem:[%s3362_s23 + $0xa0] sm:$0x3] }
  0x1e   : > { %2603 = vrot.lane.b32.xlu0 %v2602_v32, %s3305_s24  ;;  %v484_v45 = vsel %vm474_vm0, %v481_v29, %v483_v34  ;;  %v495_v46 = vrot.slane %v3425_v31, 1  ;;  %v496_v47 = vrot.slane %v3432_v36, 1  ;;  %v3455_v49 = vld [vmem:[%s3362_s23 + $0x90] sm:$0xff]  ;;  %v498_v54 = vrot.slane %v3435_v37, 1  ;;  %v3467_v56 = vld [vmem:[%s3362_s23 + $0xd8] sm:$0xff]  ;;  %v3474_v61 = vld [vmem:[%s3362_s23 + $0xe0] sm:$0xff] }
  0x1f   : > { %v2607_v51 = vpack.i.bf16 %v484_v45, %v482_v39  ;;  %v502_v52 = vsel %vm474_vm0, %v500_v35, %v501_v40  ;;  %v504_v53 = vsel %vm474_vm0, %v501_v40, %v503_v41  ;;  %v510_v59 = vrot.slane %v3442_v42, 1  ;;  %v3477_v62 = vld [vmem:[%s3362_s23 + $0xe8] sm:$0x3]  ;;  %v3484_v9 = vld [vmem:[%s3362_s23 + $0xc0] sm:$0xff]  ;;  %v3494_v20 = vld [vmem:[%s3362_s23 + $0xd0] sm:$0x3] }
  0x20   : > { %2618 = vrot.lane.b32.xlu1 %v2617_v44, %s3305_s24  ;;  %v2627_v57 = vpack.i.bf16 %v504_v53, %v502_v52  ;;  %v497_v58 = vsel %vm474_vm0, %v495_v46, %v496_v47  ;;  %v511_v60 = vrot.slane %v3445_v43, 1  ;;  %v499_v63 = vsel %vm474_vm0, %v496_v47, %v498_v54  ;;  %v3487_v10 = vld [vmem:[%s3362_s23 + $0xc8] sm:$0xff]  ;;  %v3504_v29 = vld [vmem:[%s3362_s23 + $0x110] sm:$0xff]  ;;  %v3511_v38 = vld [vmem:[%s3362_s23 + $0x118] sm:$0x3]  ;;  %s2486_s8 = sshll.u32 %s5301_s15, 4 }
  0x21   : > { %v513_v3 = vrot.slane %v3452_v48, 1  ;;  %v505_v4 = vrot.slane %v3455_v49, 1  ;;  %v506_v5 = vrot.slane %v3458_v50, 1  ;;  %v2622_v13 = vpack.i.bf16 %v499_v63, %v497_v58  ;;  %v3501_v28 = vld [vmem:[%s3362_s23 + $0x108] sm:$0xff]  ;;  %v3514_v39 = vld [vmem:[%s3362_s23 + $0xf0] sm:$0xff]  ;;  %v3517_v40 = vld [vmem:[%s3362_s23 + $0xf8] sm:$0xff]  ;;  %s266_s11 = scalar_lea.vmem %s5151_s2, %s2486_s8 }
  0x22   : > { %2608 = vrot.lane.b32.xlu0 %v2607_v51, %s3305_s24  ;;  %v512_v14 = vsel %vm474_vm0, %v510_v59, %v511_v60  ;;  %v508_v15 = vrot.slane %v3464_v55, 1  ;;  %v520_v19 = vrot.slane %v3467_v56, 1  ;;  %v521_v26 = vrot.slane %v3474_v61, 1  ;;  %v3523_v46 = vld [vmem:[%s3362_s23 + $0x100] sm:$0x3]  ;;  %v321_v47 = vld [vmem:[%s3362_s23 + $0x138] sm:$0xff] }
  0x23   : > { %v514_v21 = vsel %vm474_vm0, %v511_v60, %v513_v3  ;;  %v507_v22 = vsel %vm474_vm0, %v505_v4, %v506_v5  ;;  %v523_v27 = vrot.slane %v3477_v62, 1  ;;  %v515_v34 = vrot.slane %v3484_v9, 1  ;;  %v323_v58 = vld [vmem:[%s3362_s23 + $0x148] sm:$0x3]  ;;  %v3537_v4 = vld [vmem:[%s3362_s23 + $0x120] sm:$0xff]  ;;  %s2449_s12 = sshll.u32 %s5301_s15, 3 }
  0x24   : > { %2628 = vrot.lane.b32.xlu1 %v2627_v57, %s3305_s24  ;;  %v2637_v32 = vpack.i.bf16 %v514_v21, %v512_v14  ;;  %v509_v33 = vsel %vm474_vm0, %v506_v5, %v508_v15  ;;  %v516_v35 = vrot.slane %v3487_v10, 1  ;;  %v522_v41 = vsel %vm474_vm0, %v520_v19, %v521_v26  ;;  %v322_v57 = vld [vmem:[%s3362_s23 + $0x140] sm:$0xff]  ;;  %5180 = vst [vmem:[#allocation2_spill] sm:$0xff] %v3537_v4  ;;  %v3540_v5 = vld [vmem:[%s3362_s23 + $0x128] sm:$0xff]  ;;  %v3545_v19 = vld [vmem:[%s3362_s23 + $0x130] sm:$0x3]  ;;  %s274_s19 = scalar_lea.vmem %s5152_s3, %s2449_s12  ;;  %s281_s22 = scalar_lea.vmem %s5153_s4, %s2449_s12 }
  0x25   : > { %v524_v44 = vsel %vm474_vm0, %v521_v26, %v523_v27  ;;  %v518_v45 = vrot.slane %v3494_v20, 1  ;;  %v2632_v51 = vpack.i.bf16 %v509_v33, %v507_v22  ;;  %v530_v53 = vrot.slane %v3501_v28, 1  ;;  %5181 = vst [vmem:[#allocation3_spill] sm:$0xff] %v3540_v5 }
  0x26   : > { %2623 = vrot.lane.b32.xlu0 %v2622_v13, %s3305_s24  ;;  %v517_v52 = vsel %vm474_vm0, %v515_v34, %v516_v35  ;;  %v531_v54 = vrot.slane %v3504_v29, 1  ;;  %v533_v60 = vrot.slane %v3511_v38, 1  ;;  %v525_v63 = vrot.slane %v3514_v39, 1 }
  0x27   : > { %v519_v59 = vsel %vm474_vm0, %v516_v35, %v518_v45  ;;  %v526_v3 = vrot.slane %v3517_v40, 1  ;;  %v2647_v13 = vpack.i.bf16 %v524_v44, %v522_v41  ;;  %v528_v14 = vrot.slane %v3523_v46, 1  ;;  %v327_v35 = vld [vmem:[%s3362_s23 + $0x168] sm:$0xff]  ;;  %v328_v41 = vld [vmem:[%s3362_s23 + $0x170] sm:$0xff]  ;;  %v3555_v44 = vld [vmem:[%s3362_s23 + $0x178] sm:$0x3] }
  0x28   : > { %2638 = vrot.lane.b32.xlu1 %v2637_v32, %s3305_s24  ;;  %v540_v15 = vrot.slane %v321_v47, 1  ;;  %v532_v21 = vsel %vm474_vm0, %v530_v53, %v531_v54  ;;  %v534_v22 = vsel %vm474_vm0, %v531_v54, %v533_v60  ;;  %v541_v26 = vrot.slane %v322_v57, 1  ;;  %5182 = vst [vmem:[#allocation4_spill] sm:$0xff] %v3555_v44  ;;  %v325_v57 = vld [vmem:[%s3362_s23 + $0x158] sm:$0xff] }
  0x29   : > { %v543_v27 = vrot.slane %v323_v58, 1  ;;  %v2642_v33 = vpack.i.bf16 %v519_v59, %v517_v52  ;;  %v535_v32 = vrot.slane %v3537_v4, 1  ;;  %v536_v34 = vrot.slane %v3540_v5, 1  ;;  %v324_v52 = vld [vmem:[%s3362_s23 + $0x150] sm:$0xff]  ;;  %v3565_v58 = vld [vmem:[%s3362_s23 + $0x160] sm:$0x3] }
  0x2a   : > { %2633 = vrot.lane.b32.xlu0 %v2632_v51, %s3305_s24  ;;  %v527_v45 = vsel %vm474_vm0, %v525_v63, %v526_v3  ;;  %v529_v47 = vsel %vm474_vm0, %v526_v3, %v528_v14  ;;  %v538_v53 = vrot.slane %v3545_v19, 1  ;;  %v2657_v54 = vpack.i.bf16 %v534_v22, %v532_v21 }
  0x2b   : > { %v542_v51 = vsel %vm474_vm0, %v540_v15, %v541_v26  ;;  %v544_v59 = vsel %vm474_vm0, %v541_v26, %v543_v27  ;;  %v550_v60 = vrot.slane %v327_v35, 1  ;;  %v551_v5 = vrot.slane %v328_v41, 1 }
  0x2c   : > { %2648 = vrot.lane.b32.xlu1 %v2647_v13, %s3305_s24  ;;  %v553_v4 = vrot.slane %v3555_v44, 1  ;;  %v2652_v63 = vpack.i.bf16 %v529_v47, %v527_v45  ;;  %v537_v3 = vsel %vm474_vm0, %v535_v32, %v536_v34  ;;  %v539_v13 = vsel %vm474_vm0, %v536_v34, %v538_v53  ;;  %v4135_v44 = vld [vmem:[%s3362_s23 + $0x2d8] sm:$0xff] }
  0x2d   : > { %v545_v14 = vrot.slane %v324_v52, 1  ;;  %v546_v21 = vrot.slane %v325_v57, 1  ;;  %v548_v15 = vrot.slane %v3565_v58, 1  ;;  %v2667_v22 = vpack.i.bf16 %v544_v59, %v542_v51 }
  0x2e   : > { %2643 = vrot.lane.b32.xlu0 %v2642_v33, %s3305_s24  ;;  %v561_v26 = vrot.slane %v3400_v17, 2  ;;  %v562_v27 = vrot.slane %v3403_v18, 2  ;;  %v552_v35 = vsel %vm474_vm0, %v550_v60, %v551_v5  ;;  %v554_v33 = vsel %vm474_vm0, %v551_v5, %v553_v4 }
  0x2f   : > { %v564_v32 = vrot.slane %v3409_v23, 2  ;;  %v559_v34 = vrot.slane %v3383_v8, 2  ;;  %v2662_v41 = vpack.i.bf16 %v539_v13, %v537_v3  ;;  %v547_v45 = vsel %vm474_vm0, %v545_v14, %v546_v21 }
  0x30   : > { %2658 = vrot.lane.b32.xlu1 %v2657_v54, %s3305_s24  ;;  %v549_v47 = vsel %vm474_vm0, %v546_v21, %v548_v15  ;;  %v556_v17 = vrot.slane %v3377_v6, 2  ;;  %v557_v18 = vrot.slane %v3380_v7, 2  ;;  %v2677_v53 = vpack.i.bf16 %v554_v33, %v552_v35 }
  0x31   : > { %v563_v4 = vsel %vm555_vm1, %v561_v26, %v562_v27  ;;  %v565_v23 = vsel %vm555_vm1, %v562_v27, %v564_v32  ;;  %v571_v8 = vrot.slane %v3388_v11, 2  ;;  %v572_v5 = vrot.slane %v3391_v12, 2 }
  0x32   : > { %2653 = vrot.lane.b32.xlu0 %v2652_v63, %s3305_s24  ;;  %v574_v54 = vrot.slane %v3397_v16, 2  ;;  %v569_v51 = vrot.slane %v3371_v2, 2  ;;  %v2672_v6 = vpack.i.bf16 %v549_v47, %v547_v45  ;;  %v558_v7 = vsel %vm555_vm1, %v556_v17, %v557_v18 }
  0x33   : > { %v560_v52 = vsel %vm555_vm1, %v557_v18, %v559_v34  ;;  %v566_v57 = vrot.slane %v3365_v0, 2  ;;  %v567_v59 = vrot.slane %v3368_v1, 2  ;;  %v2687_v11 = vpack.i.bf16 %v565_v23, %v563_v4 }
  0x34   : > { %2668 = vrot.lane.b32.xlu1 %v2667_v22, %s3305_s24  ;;  %v581_v12 = vrot.slane %v3412_v24, 2  ;;  %v582_v16 = vrot.slane %v3415_v25, 2  ;;  %v573_v2 = vsel %vm555_vm1, %v571_v8, %v572_v5  ;;  %v575_v60 = vsel %vm555_vm1, %v572_v5, %v574_v54 }
  0x35   : > { %v584_v63 = vrot.slane %v3422_v30, 2  ;;  %v2682_v3 = vpack.i.bf16 %v560_v52, %v558_v7  ;;  %v576_v0 = vrot.slane %v3425_v31, 2  ;;  %v577_v1 = vrot.slane %v3432_v36, 2  ;;  %v354_v52 = vld [vmem:[%s3362_s23 + $0x240] sm:$0xff] }
  0x36   : > { %2663 = vrot.lane.b32.xlu0 %v2662_v41, %s3305_s24  ;;  %v568_v13 = vsel %vm555_vm1, %v566_v57, %v567_v59  ;;  %v570_v14 = vsel %vm555_vm1, %v567_v59, %v569_v51  ;;  %v579_v24 = vrot.slane %v3435_v37, 2  ;;  %v2697_v25 = vpack.i.bf16 %v575_v60, %v573_v2  ;;  %v330_v51 = vld [vmem:[%s3362_s23 + $0x180] sm:$0xff]  ;;  %v355_v57 = vld [vmem:[%s3362_s23 + $0x248] sm:$0xff]  ;;  %v356_v59 = vld [vmem:[%s3362_s23 + $0x250] sm:$0x3] }
  0x37   : > { %v583_v21 = vsel %vm555_vm1, %v581_v12, %v582_v16  ;;  %v585_v30 = vsel %vm555_vm1, %v582_v16, %v584_v63  ;;  %v591_v15 = vrot.slane %v3442_v42, 2  ;;  %v592_v31 = vrot.slane %v3445_v43, 2 }
  0x38   : > { %2678 = vrot.lane.b32.xlu1 %v2677_v53, %s3305_s24  ;;  %v594_v36 = vrot.slane %v3452_v48, 2  ;;  %v2692_v22 = vpack.i.bf16 %v570_v14, %v568_v13  ;;  %v578_v26 = vsel %vm555_vm1, %v576_v0, %v577_v1  ;;  %v580_v37 = vsel %vm555_vm1, %v577_v1, %v579_v24 }
  0x39   : > { %v586_v27 = vrot.slane %v3455_v49, 2  ;;  %v587_v35 = vrot.slane %v3458_v50, 2  ;;  %v589_v33 = vrot.slane %v3464_v55, 2  ;;  %v2707_v42 = vpack.i.bf16 %v585_v30, %v583_v21 }
  0x3a   : > { %2673 = vrot.lane.b32.xlu0 %v2672_v6, %s3305_s24  ;;  %v601_v43 = vrot.slane %v3467_v56, 2  ;;  %v602_v48 = vrot.slane %v3474_v61, 2  ;;  %v593_v32 = vsel %vm555_vm1, %v591_v15, %v592_v31  ;;  %v595_v34 = vsel %vm555_vm1, %v592_v31, %v594_v36  ;;  %v331_v6 = vld [vmem:[%s3362_s23 + $0x188] sm:$0xff] }
  0x3b   : > { %v604_v41 = vrot.slane %v3477_v62, 2  ;;  %v2702_v49 = vpack.i.bf16 %v580_v37, %v578_v26  ;;  %v596_v50 = vrot.slane %v3484_v9, 2  ;;  %v597_v55 = vrot.slane %v3487_v10, 2 }
  0x3c   : > { %2688 = vrot.lane.b32.xlu1 %v2687_v11, %s3306_s25  ;;  %v588_v45 = vsel %vm555_vm1, %v586_v27, %v587_v35  ;;  %v590_v47 = vsel %vm555_vm1, %v587_v35, %v589_v33  ;;  %v599_v56 = vrot.slane %v3494_v20, 2  ;;  %v2717_v61 = vpack.i.bf16 %v595_v34, %v593_v32  ;;  %v378_v33 = vld [vmem:[%s3362_s23 + $0x300] sm:$0xff] }
  0x3d   : > { %v603_v17 = vsel %vm555_vm1, %v601_v43, %v602_v48  ;;  %v605_v62 = vsel %vm555_vm1, %v602_v48, %v604_v41  ;;  %v611_v18 = vrot.slane %v3501_v28, 2  ;;  %v612_v9 = vrot.slane %v3504_v29, 2  ;;  %v380_v43 = vld [vmem:[%s3362_s23 + $0x310] sm:$0x3]  ;;  %v402_v41 = vld [vmem:[%s3362_s23 + $0x3c0] sm:$0xff] }
  0x3e   : > { %2683 = vrot.lane.b32.xlu0 %v2682_v3, %s3306_s25  ;;  %v614_v10 = vrot.slane %v3511_v38, 2  ;;  %v2712_v53 = vpack.i.bf16 %v590_v47, %v588_v45  ;;  %v598_v20 = vsel %vm555_vm1, %v596_v50, %v597_v55  ;;  %v600_v4 = vsel %vm555_vm1, %v597_v55, %v599_v56  ;;  %v404_v50 = vld [vmem:[%s3362_s23 + $0x3d0] sm:$0x3] }
  0x3f   : > { %v606_v23 = vrot.slane %v3514_v39, 2  ;;  %v607_v8 = vrot.slane %v3517_v40, 2  ;;  %v609_v28 = vrot.slane %v3523_v46, 2  ;;  %v2727_v29 = vpack.i.bf16 %v605_v62, %v603_v17  ;;  %v332_v39 = vld [vmem:[%s3362_s23 + $0x190] sm:$0x3] }
  0x40   : > { %2698 = vrot.lane.b32.xlu1 %v2697_v25, %s3306_s25  ;;  %v613_v38 = vsel %vm555_vm1, %v611_v18, %v612_v9  ;;  %v615_v5 = vsel %vm555_vm1, %v612_v9, %v614_v10  ;;  %v2722_v54 = vpack.i.bf16 %v600_v4, %v598_v20  ;;  %v685_v11 = vrot.slane %v331_v6, 1 }
  0x41   : > { %v608_v7 = vsel %vm555_vm1, %v606_v23, %v607_v8  ;;  %v610_v40 = vsel %vm555_vm1, %v607_v8, %v609_v28  ;;  %v2737_v46 = vpack.i.bf16 %v615_v5, %v613_v38  ;;  %v684_v12 = vrot.slane %v330_v51, 1 }
  0x42   : > { %2693 = vrot.lane.b32.xlu0 %v2692_v22, %s3306_s25  ;;  %v687_v16 = vrot.slane %v332_v39, 1  ;;  %v2732_v2 = vpack.i.bf16 %v610_v40, %v608_v7  ;;  %v725_v60 = vrot.slane %v355_v57, 1  ;;  %v724_v63 = vrot.slane %v354_v52, 1  ;;  %v333_v7 = vld [vmem:[%s3362_s23 + $0x198] sm:$0xff]  ;;  %v334_v40 = vld [vmem:[%s3362_s23 + $0x1a0] sm:$0xff] }
  0x43   : > { %v727_v3 = vrot.slane %v356_v59, 1  ;;  %v765_v0 = vrot.slane %v331_v6, 2  ;;  %v2747_v1 = vpack.i.bf16 %v331_v6, %v330_v51  ;;  %v764_v13 = vrot.slane %v330_v51, 2 }
  0x44   : > { %2708 = vrot.lane.b32.xlu1 %v2707_v42, %s3306_s25  ;;  %v686_v14 = vsel %vm474_vm0, %v684_v12, %v685_v11  ;;  %v688_v24 = vsel %vm474_vm0, %v685_v11, %v687_v16  ;;  %v767_v25 = vrot.slane %v332_v39, 2  ;;  %v805_v21 = vrot.slane %v355_v57, 2  ;;  %v379_v42 = vld [vmem:[%s3362_s23 + $0x308] sm:$0xff]  ;;  %v357_v11 = vld [vmem:[%s3362_s23 + $0x258] sm:$0xff]  ;;  %v358_v12 = vld [vmem:[%s3362_s23 + $0x260] sm:$0xff] }
  0x45   : > { %v2742_v30 = vpack.i.bf16 %v355_v57, %v354_v52  ;;  %v804_v15 = vrot.slane %v354_v52, 2  ;;  %v726_v31 = vsel %vm474_vm0, %v724_v63, %v725_v60  ;;  %v728_v36 = vsel %vm474_vm0, %v725_v60, %v727_v3  ;;  %v359_v16 = vld [vmem:[%s3362_s23 + $0x268] sm:$0x3] }
  0x46   : > { %2703 = vrot.lane.b32.xlu0 %v2702_v49, %s3306_s25  ;;  %v807_v22 = vrot.slane %v356_v59, 2  ;;  %v2757_v26 = vpack.i.bf16 %v688_v24, %v686_v14  ;;  %v766_v37 = vsel %vm555_vm1, %v764_v13, %v765_v0  ;;  %v768_v27 = vsel %vm555_vm1, %v765_v0, %v767_v25  ;;  %v403_v49 = vld [vmem:[%s3362_s23 + $0x3c8] sm:$0xff] }
  0x47   : > { %v2752_v35 = vpack.i.bf16 %v728_v36, %v726_v31  ;;  %v806_v48 = vsel %vm555_vm1, %v804_v15, %v805_v21  ;;  %v2767_v34 = vpack.i.bf16 %v768_v27, %v766_v37  ;;  %v893_v55 = vrot.slane %v379_v42, 1 }
  0x48   : > { %2718 = vrot.lane.b32.xlu1 %v2717_v61, %s3306_s25  ;;  %v808_v32 = vsel %vm555_vm1, %v805_v21, %v807_v22  ;;  %v892_v45 = vrot.slane %v378_v33, 1  ;;  %v895_v47 = vrot.slane %v380_v43, 1  ;;  %v933_v61 = vrot.slane %v403_v49, 1 }
  0x49   : > { %v2762_v56 = vpack.i.bf16 %v808_v32, %v806_v48  ;;  %v932_v17 = vrot.slane %v402_v41, 1  ;;  %v935_v62 = vrot.slane %v404_v50, 1  ;;  %v973_v18 = vrot.slane %v379_v42, 2  ;;  %v381_v48 = vld [vmem:[%s3362_s23 + $0x318] sm:$0xff]  ;;  %v382_v32 = vld [vmem:[%s3362_s23 + $0x320] sm:$0xff] }
  0x4a   : > { %2713 = vrot.lane.b32.xlu0 %v2712_v53, %s3306_s25  ;;  %v2777_v9 = vpack.i.bf16 %v379_v42, %v378_v33  ;;  %v972_v10 = vrot.slane %v378_v33, 2  ;;  %v894_v53 = vsel %vm474_vm0, %v892_v45, %v893_v55  ;;  %v896_v20 = vsel %vm474_vm0, %v893_v55, %v895_v47  ;;  %v405_v55 = vld [vmem:[%s3362_s23 + $0x3d8] sm:$0xff]  ;;  %v406_v45 = vld [vmem:[%s3362_s23 + $0x3e0] sm:$0xff]  ;;  %v407_v47 = vld [vmem:[%s3362_s23 + $0x3e8] sm:$0x3] }
  0x4b   : > { %v975_v4 = vrot.slane %v380_v43, 2  ;;  %v1013_v23 = vrot.slane %v403_v49, 2  ;;  %v2772_v8 = vpack.i.bf16 %v403_v49, %v402_v41  ;;  %v1012_v28 = vrot.slane %v402_v41, 2 }
  0x4c   : > { %2728 = vrot.lane.b32.xlu1 %v2727_v29, %s3306_s25  ;;  %v934_v29 = vsel %vm474_vm0, %v932_v17, %v933_v61  ;;  %v936_v38 = vsel %vm474_vm0, %v933_v61, %v935_v62  ;;  %v1015_v5 = vrot.slane %v404_v50, 2  ;;  %v974_v51 = vsel %vm555_vm1, %v972_v10, %v973_v18 }
  0x4d   : > { %v976_v6 = vsel %vm555_vm1, %v973_v18, %v975_v4  ;;  %v2782_v39 = vpack.i.bf16 %v936_v38, %v934_v29  ;;  %v1014_v52 = vsel %vm555_vm1, %v1012_v28, %v1013_v23  ;;  %v689_v60 = vrot.slane %v333_v7, 1 }
  0x4e   : > { %2723 = vrot.lane.b32.xlu0 %v2722_v54, %s3306_s25  ;;  %v2787_v54 = vpack.i.bf16 %v896_v20, %v894_v53  ;;  %v1016_v57 = vsel %vm555_vm1, %v1013_v23, %v1015_v5  ;;  %v2797_v59 = vpack.i.bf16 %v976_v6, %v974_v51  ;;  %v730_v0 = vrot.slane %v358_v12, 1 }
  0x4f   : > { %v2792_v3 = vpack.i.bf16 %v1016_v57, %v1014_v52  ;;  %v732_v13 = vrot.slane %v359_v16, 1  ;;  %v770_v14 = vrot.slane %v334_v40, 2  ;;  %v2807_v24 = vpack.i.bf16 %v334_v40, %v333_v7  ;;  %v336_v52 = vld [vmem:[%s3362_s23 + $0x1b0] sm:$0xff]  ;;  %v337_v57 = vld [vmem:[%s3362_s23 + $0x1b8] sm:$0xff] }
  0x50   : > { %2738 = vrot.lane.b32.xlu1 %v2737_v46, %s3306_s25  ;;  %v335_v46 = vld [vmem:[%s3362_s23 + $0x1a8] sm:$0x3]  ;;  %v769_v25 = vrot.slane %v333_v7, 2  ;;  %v810_v31 = vrot.slane %v358_v12, 2  ;;  %v2802_v36 = vpack.i.bf16 %v358_v12, %v357_v11  ;;  %v809_v22 = vrot.slane %v357_v11, 2 }
  0x51   : > { %v692_v63 = vrot.slane %v335_v46, 1  ;;  %v772_v15 = vrot.slane %v335_v46, 2  ;;  %v733_v37 = vsel %vm474_vm0, %v730_v0, %v732_v13  ;;  %v812_v27 = vrot.slane %v359_v16, 2 }
  0x52   : > { %2733 = vrot.lane.b32.xlu0 %v2732_v2, %s3306_s25  ;;  %v690_v2 = vrot.slane %v334_v40, 1  ;;  %v771_v33 = vsel %vm555_vm1, %v769_v25, %v770_v14  ;;  %v811_v41 = vsel %vm555_vm1, %v809_v22, %v810_v31  ;;  %v897_v61 = vrot.slane %v381_v48, 1 }
  0x53   : > { %v773_v42 = vsel %vm555_vm1, %v770_v14, %v772_v15  ;;  %v813_v49 = vsel %vm555_vm1, %v810_v31, %v812_v27  ;;  %v938_v18 = vrot.slane %v406_v45, 1  ;;  %v940_v10 = vrot.slane %v407_v47, 1 }
  0x54   : > { %2748 = vrot.lane.b32.xlu1 %v2747_v1, %s3307_s26  ;;  %v729_v1 = vrot.slane %v357_v11, 1  ;;  %v691_v21 = vsel %vm474_vm0, %v689_v60, %v690_v2  ;;  %v2827_v50 = vpack.i.bf16 %v773_v42, %v771_v33  ;;  %v2822_v62 = vpack.i.bf16 %v813_v49, %v811_v41  ;;  %v361_v60 = vld [vmem:[%s3362_s23 + $0x278] sm:$0xff]  ;;  %v384_v41 = vld [vmem:[%s3362_s23 + $0x330] sm:$0xff] }
  0x55   : > { %v978_v53 = vrot.slane %v382_v32, 2  ;;  %v2837_v20 = vpack.i.bf16 %v382_v32, %v381_v48  ;;  %v977_v4 = vrot.slane %v381_v48, 2  ;;  %v1018_v29 = vrot.slane %v406_v45, 2  ;;  %v385_v49 = vld [vmem:[%s3362_s23 + $0x338] sm:$0xff] }
  0x56   : > { %2743 = vrot.lane.b32.xlu0 %v2742_v30, %s3307_s26  ;;  %v693_v30 = vsel %vm474_vm0, %v690_v2, %v692_v63  ;;  %v2832_v38 = vpack.i.bf16 %v406_v45, %v405_v55  ;;  %v1017_v5 = vrot.slane %v405_v55, 2  ;;  %v941_v51 = vsel %vm474_vm0, %v938_v18, %v940_v10  ;;  %v360_v2 = vld [vmem:[%s3362_s23 + $0x270] sm:$0xff]  ;;  %v362_v63 = vld [vmem:[%s3362_s23 + $0x280] sm:$0x3] }
  0x57   : > { %v1020_v6 = vrot.slane %v407_v47, 2  ;;  %v979_v7 = vsel %vm555_vm1, %v977_v4, %v978_v53  ;;  %v735_v14 = vrot.slane %v361_v60, 1  ;;  %v737_v25 = vrot.slane %v362_v63, 1 }
  0x58   : > { %2758 = vrot.lane.b32.xlu1 %v2757_v26, %s3308_s27  ;;  %v731_v26 = vsel %vm474_vm0, %v729_v1, %v730_v0  ;;  %v1019_v11 = vsel %vm555_vm1, %v1017_v5, %v1018_v29  ;;  %v694_v0 = vrot.slane %v336_v52, 1  ;;  %v774_v15 = vrot.slane %v336_v52, 2 }
  0x59   : > { %v2812_v43 = vpack.i.bf16 %v733_v37, %v731_v26  ;;  %v1021_v12 = vsel %vm555_vm1, %v1018_v29, %v1020_v6  ;;  %v815_v26 = vrot.slane %v361_v60, 2  ;;  %v2862_v37 = vpack.i.bf16 %v361_v60, %v360_v2  ;;  %v340_v60 = vld [vmem:[%s3362_s23 + $0x1d0] sm:$0xff] }
  0x5a   : > { %2753 = vrot.lane.b32.xlu0 %v2752_v35, %s3308_s27  ;;  %v2817_v35 = vpack.i.bf16 %v693_v30, %v691_v21  ;;  %v2852_v13 = vpack.i.bf16 %v1021_v12, %v1019_v11  ;;  %v775_v21 = vrot.slane %v337_v57, 2  ;;  %v2867_v30 = vpack.i.bf16 %v337_v57, %v336_v52 }
  0x5b   : > { %v814_v27 = vrot.slane %v360_v2, 2  ;;  %v738_v33 = vsel %vm474_vm0, %v735_v14, %v737_v25  ;;  %v817_v42 = vrot.slane %v362_v63, 2  ;;  %v341_v63 = vld [vmem:[%s3362_s23 + $0x1d8] sm:$0x3] }
  0x5c   : > { %2768 = vrot.lane.b32.xlu1 %v2767_v34, %s3309_s28  ;;  %v383_v34 = vld [vmem:[%s3362_s23 + $0x328] sm:$0x3]  ;;  %v776_v48 = vsel %vm555_vm1, %v774_v15, %v775_v21  ;;  %v365_v25 = vld [vmem:[%s3362_s23 + $0x298] sm:$0x3]  ;;  %v702_v15 = vrot.slane %v341_v63, 1 }
  0x5d   : > { %v900_v17 = vrot.slane %v383_v34, 1  ;;  %v980_v28 = vrot.slane %v383_v34, 2  ;;  %v818_v45 = vsel %vm555_vm1, %v815_v26, %v817_v42 }
  0x5e   : > { %2763 = vrot.lane.b32.xlu0 %v2762_v56, %s3309_s28  ;;  %v898_v56 = vrot.slane %v382_v32, 1 }
  0x5f   : > { %v981_v40 = vsel %vm555_vm1, %v978_v53, %v980_v28  ;;  %v982_v28 = vrot.slane %v384_v41, 2 }
  0x60   : > { %2778 = vrot.lane.b32.xlu1 %v2777_v9, %s3310_s29  ;;  %v937_v9 = vrot.slane %v405_v55, 1  ;;  %v899_v23 = vsel %vm474_vm0, %v897_v61, %v898_v56  ;;  %v2857_v16 = vpack.i.bf16 %v981_v40, %v979_v7  ;;  %v816_v55 = vsel %vm555_vm1, %v814_v27, %v815_v26  ;;  %v409_v61 = vld [vmem:[%s3362_s23 + $0x3f8] sm:$0xff] }
  0x61   : > { %v2882_v10 = vpack.i.bf16 %v818_v45, %v816_v55  ;;  %v943_v53 = vrot.slane %v409_v61, 1  ;;  %v822_v55 = vrot.slane %v365_v25, 2 }
  0x62   : > { %2773 = vrot.lane.b32.xlu0 %v2772_v8, %s3310_s29  ;;  %v901_v8 = vsel %vm474_vm0, %v898_v56, %v900_v17  ;;  %v408_v56 = vld [vmem:[%s3362_s23 + $0x3f0] sm:$0xff]  ;;  %v410_v17 = vld [vmem:[%s3362_s23 + $0x400] sm:$0x3] }
  0x63   : > { %v945_v4 = vrot.slane %v410_v17, 1  ;;  %v2892_v6 = vpack.i.bf16 %v409_v61, %v408_v56 }
  0x64   : > { %2788 = vrot.lane.b32.xlu1 %v2787_v54, %s3311_s30  ;;  %v939_v54 = vsel %vm474_vm0, %v937_v9, %v938_v18  ;;  %v902_v18 = vrot.slane %v384_v41, 1 }
  0x65   : > { %v2842_v46 = vpack.i.bf16 %v941_v51, %v939_v54  ;;  %v1023_v51 = vrot.slane %v409_v61, 2  ;;  %v946_v40 = vsel %vm474_vm0, %v943_v53, %v945_v4 }
  0x66   : > { %2783 = vrot.lane.b32.xlu0 %v2782_v39, %s3311_s30  ;;  %v2847_v39 = vpack.i.bf16 %v901_v8, %v899_v23  ;;  %v983_v23 = vrot.slane %v385_v49, 2  ;;  %v2897_v8 = vpack.i.bf16 %v385_v49, %v384_v41 }
  0x68   : > { %2798 = vrot.lane.b32.xlu1 %v2797_v59, %s3312_s5  ;;  %v338_v59 = vld [vmem:[%s3362_s23 + $0x1c0] sm:$0x3] }
  0x69   : > { %v697_v1 = vrot.slane %v338_v59, 1  ;;  %v777_v22 = vrot.slane %v338_v59, 2  ;;  %v984_v59 = vsel %vm555_vm1, %v982_v28, %v983_v23 }
  0x6a   : > { %2793 = vrot.lane.b32.xlu0 %v2792_v3, %s3312_s5  ;;  %v695_v3 = vrot.slane %v337_v57, 1 }
  0x6b   : > { %v778_v32 = vsel %vm555_vm1, %v775_v21, %v777_v22  ;;  %v700_v21 = vrot.slane %v340_v60, 1 }
  0x6c   : > { %2808 = vrot.lane.b32.xlu1 %v2807_v24, %s3307_s26  ;;  %v734_v24 = vrot.slane %v360_v2, 1  ;;  %v696_v31 = vsel %vm474_vm0, %v694_v0, %v695_v3  ;;  %v2887_v47 = vpack.i.bf16 %v778_v32, %v776_v48  ;;  %v339_v2 = vld [vmem:[%s3362_s23 + $0x1c8] sm:$0xff]  ;;  %v782_v32 = vrot.slane %v341_v63, 2 }
  0x6d   : > { %v779_v42 = vrot.slane %v339_v2, 2  ;;  %v703_v48 = vsel %vm474_vm0, %v700_v21, %v702_v15 }
  0x6e   : > { %2803 = vrot.lane.b32.xlu0 %v2802_v36, %s3307_s26  ;;  %v698_v36 = vsel %vm474_vm0, %v695_v3, %v697_v1 }
  0x70   : > { %2818 = vrot.lane.b32.xlu1 %v2817_v35, %s3308_s27  ;;  %v736_v35 = vsel %vm474_vm0, %v734_v24, %v735_v14  ;;  %v363_v14 = vld [vmem:[%s3362_s23 + $0x288] sm:$0xff]  ;;  %v364_v24 = vld [vmem:[%s3362_s23 + $0x290] sm:$0xff] }
  0x71   : > { %v2872_v34 = vpack.i.bf16 %v738_v33, %v736_v35  ;;  %v740_v22 = vrot.slane %v364_v24, 1  ;;  %v739_v26 = vrot.slane %v363_v14, 1  ;;  %v780_v35 = vrot.slane %v340_v60, 2 }
  0x72   : > { %2813 = vrot.lane.b32.xlu0 %v2812_v43, %s3308_s27  ;;  %v2877_v43 = vpack.i.bf16 %v698_v36, %v696_v31  ;;  %v2927_v33 = vpack.i.bf16 %v340_v60, %v339_v2  ;;  %v820_v41 = vrot.slane %v364_v24, 2 }
  0x73   : > { %v741_v45 = vsel %vm474_vm0, %v739_v26, %v740_v22 }
  0x74   : > { %2828 = vrot.lane.b32.xlu1 %v2827_v50, %s3309_s28  ;;  %v386_v50 = vld [vmem:[%s3362_s23 + $0x340] sm:$0x3] }
  0x75   : > { %v905_v9 = vrot.slane %v386_v50, 1  ;;  %v985_v5 = vrot.slane %v386_v50, 2  ;;  %v819_v50 = vrot.slane %v363_v14, 2 }
  0x76   : > { %2823 = vrot.lane.b32.xlu0 %v2822_v62, %s3309_s28  ;;  %v903_v62 = vrot.slane %v385_v49, 1  ;;  %v2922_v49 = vpack.i.bf16 %v364_v24, %v363_v14  ;;  %v368_v14 = vld [vmem:[%s3362_s23 + $0x2b0] sm:$0x3] }
  0x77   : > { %v986_v11 = vsel %vm555_vm1, %v983_v23, %v985_v5  ;;  %v821_v4 = vsel %vm555_vm1, %v819_v50, %v820_v41  ;;  %v823_v23 = vsel %vm555_vm1, %v820_v41, %v822_v55  ;;  %v413_v5 = vld [vmem:[%s3362_s23 + $0x418] sm:$0x3]  ;;  %v3841_v41 = vld [vmem:[%s3362_s23 + $0x1e0] sm:$0xff] }
  0x78   : > { %2838 = vrot.lane.b32.xlu1 %v2837_v20, %s3310_s29  ;;  %v942_v20 = vrot.slane %v408_v56, 1  ;;  %v904_v29 = vsel %vm474_vm0, %v902_v18, %v903_v62  ;;  %v387_v18 = vld [vmem:[%s3362_s23 + $0x348] sm:$0xff] }
  0x7a   : > { %2833 = vrot.lane.b32.xlu0 %v2832_v38, %s3310_s29  ;;  %v906_v38 = vsel %vm474_vm0, %v903_v62, %v905_v9  ;;  %v944_v7 = vsel %vm474_vm0, %v942_v20, %v943_v53  ;;  %v783_v62 = vsel %vm555_vm1, %v780_v35, %v782_v32  ;;  %v388_v9 = vld [vmem:[%s3362_s23 + $0x350] sm:$0xff]  ;;  %v747_v32 = vrot.slane %v368_v14, 1 }
  0x7b   : > { %v2907_v57 = vpack.i.bf16 %v906_v38, %v904_v29  ;;  %v411_v38 = vld [vmem:[%s3362_s23 + $0x408] sm:$0xff]  ;;  %v2957_v24 = vpack.i.bf16 %v388_v9, %v387_v18  ;;  %v3966_v29 = vld [vmem:[%s3362_s23 + $0x2b8] sm:$0xff] }
  0x7c   : > { %2848 = vrot.lane.b32.xlu1 %v2847_v39, %s3311_s30  ;;  %v1022_v39 = vrot.slane %v408_v56, 2 }
  0x7e   : > { %2843 = vrot.lane.b32.xlu0 %v2842_v46, %s3311_s30  ;;  %v1025_v46 = vrot.slane %v410_v17, 2  ;;  %v1024_v3 = vsel %vm555_vm1, %v1022_v39, %v1023_v51  ;;  %v781_v17 = vsel %vm555_vm1, %v779_v42, %v780_v35  ;;  %v908_v39 = vrot.slane %v388_v9, 1  ;;  %v5189_v35 = vld [vmem:[#allocation2_spill] sm:$0xff]  ;;  %v5190_v42 = vld [vmem:[#allocation3_spill] sm:$0xff] }
  0x80   : > { %2858 = vrot.lane.b32.xlu1 %v2857_v16, %s3312_s5  ;;  %v2902_v16 = vpack.i.bf16 %v946_v40, %v944_v7  ;;  %v1026_v0 = vsel %vm555_vm1, %v1023_v51, %v1025_v46  ;;  %v907_v7 = vrot.slane %v387_v18, 1  ;;  %v2942_v46 = vpack.i.bf16 %v823_v23, %v821_v4 }
  0x81   : > { %v2912_v36 = vpack.i.bf16 %v1026_v0, %v1024_v3  ;;  %v947_v3 = vrot.slane %v411_v38, 1  ;;  %v1027_v0 = vrot.slane %v411_v38, 2 }
  0x82   : > { %2853 = vrot.lane.b32.xlu0 %v2852_v13, %s3312_s5  ;;  %v2917_v13 = vpack.i.bf16 %v986_v11, %v984_v59  ;;  %v987_v59 = vrot.slane %v387_v18, 2 }
  0x84   : > { %2868 = vrot.lane.b32.xlu1 %v2867_v30, %s3307_s26  ;;  %v699_v30 = vrot.slane %v339_v2, 1  ;;  %v3824_v2 = vld [vmem:[%s3362_s23 + $0x2a8] sm:$0xff] }
  0x85   : > { %v745_v26 = vrot.slane %v3824_v2, 1  ;;  %v825_v18 = vrot.slane %v3824_v2, 2 }
  0x86   : > { %2863 = vrot.lane.b32.xlu0 %v2862_v37, %s3307_s26  ;;  %v742_v37 = vrot.slane %v365_v25, 1 }
  0x88   : > { %2878 = vrot.lane.b32.xlu1 %v2877_v43, %s3308_s27  ;;  %v701_v43 = vsel %vm474_vm0, %v699_v30, %v700_v21  ;;  %v1030_v30 = vrot.slane %v413_v5, 2 }
  0x89   : > { %v2937_v61 = vpack.i.bf16 %v703_v48, %v701_v43  ;;  %v617_v43 = vrot.slane %v5190_v42, 2  ;;  %v619_v48 = vrot.slane %v3545_v19, 2  ;;  %v392_v42 = vld [vmem:[%s3362_s23 + $0x370] sm:$0x3] }
  0x8a   : > { %2873 = vrot.lane.b32.xlu0 %v2872_v34, %s3308_s27 }
  0x8c   : > { %2888 = vrot.lane.b32.xlu1 %v2887_v47, %s3309_s28  ;;  %v743_v47 = vsel %vm474_vm0, %v740_v22, %v742_v37 }
  0x8d   : > { %v2932_v20 = vpack.i.bf16 %v743_v47, %v741_v45 }
  0x8e   : > { %2883 = vrot.lane.b32.xlu0 %v2882_v10, %s3309_s28  ;;  %v3763_v54 = vpop.permute.xlu1 %2613  ;;  %v389_v10 = vld [vmem:[%s3362_s23 + $0x358] sm:$0x3] }
  0x8f   : > { %v910_v40 = vrot.slane %v389_v10, 1  ;;  %v990_v21 = vrot.slane %v389_v10, 2 }
  0x90   : > { %v3767_v52 = vpop.permute.xlu0 %2603  ;;  %2898 = vrot.lane.b32.xlu1 %v2897_v8, %s3310_s29  ;;  %v412_v8 = vld [vmem:[%s3362_s23 + $0x410] sm:$0xff] }
  0x91   : > { %v948_v11 = vrot.slane %v412_v8, 1  ;;  %v1028_v63 = vrot.slane %v412_v8, 2  ;;  %v2952_v25 = vpack.i.bf16 %v412_v8, %v411_v38  ;;  %v911_v22 = vsel %vm474_vm0, %v908_v39, %v910_v40 }
  0x92   : > { %2893 = vrot.lane.b32.xlu0 %v2892_v6, %s3310_s29  ;;  %v3773_v12 = vpop.permute.xlu1 %2618  ;;  %v2947_v6 = vpack.i.bf16 %v783_v62, %v781_v17  ;;  %v704_v8 = vrot.slane %v3841_v41, 1 }
  0x93   : > { %5183 = vst [vmem:[#allocation5_spill] sm:$0xff] %v3773_v12  ;;  %v949_v55 = vsel %vm474_vm0, %v947_v3, %v948_v11  ;;  %v1031_v62 = vsel %vm555_vm1, %v1028_v63, %v1030_v30 }
  0x94   : > { %v3780_v1 = vpop.permute.xlu0 %2608  ;;  %2908 = vrot.lane.b32.xlu1 %v2907_v57, %s3311_s30  ;;  %v988_v57 = vrot.slane %v388_v9, 2  ;;  %v3859_v9 = vld [vmem:[%s3362_s23 + $0x1f0] sm:$0x3] }
  0x96   : > { %2903 = vrot.lane.b32.xlu0 %v2902_v16, %s3311_s30  ;;  %v3787_v31 = vpop.permute.xlu1 %2628  ;;  %v3821_v16 = vld [vmem:[%s3362_s23 + $0x2a0] sm:$0xff]  ;;  %v989_v47 = vsel %vm555_vm1, %v987_v59, %v988_v57  ;;  %v991_v19 = vsel %vm555_vm1, %v988_v57, %v990_v21  ;;  %v707_v59 = vrot.slane %v3859_v9, 1 }
  0x97   : > { %5184 = vst [vmem:[#allocation6_spill] sm:$0xff] %v3787_v31  ;;  %v744_v37 = vrot.slane %v3821_v16, 1  ;;  %v2987_v57 = vpack.i.bf16 %v3824_v2, %v3821_v16 }
  0x98   : > { %v3789_v27 = vpop.permute.xlu0 %2623  ;;  %2918 = vrot.lane.b32.xlu1 %v2917_v13, %s3312_s5  ;;  %v950_v13 = vrot.slane %v413_v5, 1  ;;  %v3874_v5 = vsel %vm555_vm1, %v617_v43, %v619_v48 }
  0x99   : > { %5185 = vst [vmem:[#allocation7_spill] sm:$0xff] %v3789_v27  ;;  %v3866_v4 = vsel %vm474_vm0, %v744_v37, %v745_v26 }
  0x9a   : > { %2913 = vrot.lane.b32.xlu0 %v2912_v36, %s3312_s5  ;;  %v3795_v34 = vpop.permute.xlu1 %2638  ;;  %v909_v36 = vsel %vm474_vm0, %v907_v7, %v908_v39  ;;  %v951_v45 = vsel %vm474_vm0, %v948_v11, %v950_v13  ;;  %v827_v39 = vrot.slane %v368_v14, 2  ;;  %v3886_v11 = vld [vmem:[%s3362_s23 + $0x420] sm:$0xff]  ;;  %v784_v14 = vrot.slane %v3841_v41, 2 }
  0x9b   : > { %5186 = vst [vmem:[#allocation8_spill] sm:$0xff] %v3795_v34  ;;  %v2967_v17 = vpack.i.bf16 %v911_v22, %v909_v36  ;;  %v2962_v40 = vpack.i.bf16 %v951_v45, %v949_v55  ;;  %v3911_v36 = vld [vmem:[%s3362_s23 + $0x360] sm:$0xff]  ;;  %v3914_v22 = vld [vmem:[%s3362_s23 + $0x368] sm:$0xff]  ;;  %v787_v55 = vrot.slane %v3859_v9, 2 }
  0x9c   : > { %v3799_v56 = vpop.permute.xlu0 %2633  ;;  %2928 = vrot.lane.b32.xlu1 %v2927_v33, %s3307_s26  ;;  %v616_v33 = vrot.slane %v5189_v35, 2 }
  0x9d   : > { %5187 = vst [vmem:[#allocation9_spill] sm:$0xff] %v3799_v56  ;;  %v829_v56 = vrot.slane %v3966_v29, 2 }
  0x9e   : > { %2923 = vrot.lane.b32.xlu0 %v2922_v49, %s3307_s26  ;;  %v3808_v53 = vpop.permute.xlu1 %2648  ;;  %v3844_v49 = vld [vmem:[%s3362_s23 + $0x1e8] sm:$0xff]  ;;  %v3871_v38 = vsel %vm555_vm1, %v616_v33, %v617_v43  ;;  %v952_v33 = vrot.slane %v3886_v11, 1 }
  0x9f   : > { %v705_v23 = vrot.slane %v3844_v49, 1 }
  0xa0   : > { %v3817_v51 = vpop.permute.xlu0 %2643  ;;  %2938 = vrot.lane.b32.xlu1 %v2937_v61, %s3308_s27  ;;  %v3853_v61 = vsel %vm555_vm1, %v1027_v0, %v1028_v63  ;;  %v3889_v63 = vld [vmem:[%s3362_s23 + $0x428] sm:$0xff]  ;;  %v785_v0 = vrot.slane %v3844_v49, 2 }
  0xa1   : > { %v2972_v3 = vpack.i.bf16 %v1031_v62, %v3853_v61  ;;  %v3908_v30 = vsel %vm474_vm0, %v704_v8, %v705_v23  ;;  %v953_v37 = vrot.slane %v3889_v63, 1  ;;  %v1033_v35 = vrot.slane %v3889_v63, 2  ;;  %v3243_v8 = vld [vmem:[%s3362_s23 + $0x140] sm:$0xff] }
  0xa2   : > { %2933 = vrot.lane.b32.xlu0 %v2932_v20, %s3308_s27  ;;  %v3827_v60 = vpop.permute.xlu1 %2658  ;;  %v824_v20 = vrot.slane %v3821_v16, 2  ;;  %v2982_v16 = vpack.i.bf16 %v3874_v5, %v3871_v38  ;;  %v3927_v48 = vsel %vm474_vm0, %v705_v23, %v707_v59  ;;  %v993_v61 = vrot.slane %v3914_v22, 2  ;;  %v3242_v23 = vld [vmem:[%s3362_s23 + $0x138] sm:$0xff]  ;;  %v371_v5 = vld [vmem:[%s3362_s23 + $0x2c8] sm:$0x3] }
  0xa3   : > { %5188 = vst [vmem:[#allocation10_spill] sm:$0xff] %v3827_v60  ;;  %v621_v9 = vrot.slane %v3242_v23, 2  ;;  %v622_v38 = vrot.slane %v3243_v8, 2  ;;  %v3954_v28 = vsel %vm555_vm1, %v785_v0, %v787_v55  ;;  %v347_v55 = vld [vmem:[%s3362_s23 + $0x208] sm:$0x3]  ;;  %v3246_v60 = vld [vmem:[%s3362_s23 + $0x30] sm:$0xff] }
  0xa4   : > { %v3830_v15 = vpop.permute.xlu0 %2653  ;;  %2948 = vrot.lane.b32.xlu1 %v2947_v6, %s3309_s28  ;;  %v3877_v6 = vsel %vm474_vm0, %v745_v26, %v747_v32  ;;  %v3905_v21 = vsel %vm555_vm1, %v824_v20, %v825_v18  ;;  %v3917_v26 = vsel %vm555_vm1, %v825_v18, %v827_v39  ;;  %v1032_v32 = vrot.slane %v3886_v11, 2 }
  0xa5   : > { %v915_v20 = vrot.slane %v392_v42, 1  ;;  %v3943_v39 = vsel %vm555_vm1, %v784_v14, %v785_v0  ;;  %v3007_v23 = vpack.i.bf16 %v3917_v26, %v3905_v21  ;;  %v3957_v14 = vsel %vm474_vm0, %v952_v33, %v953_v37  ;;  %v3980_v33 = vld [vmem:[%s3362_s23 + $0x2c0] sm:$0xff] }
  0xa6   : > { %2943 = vrot.lane.b32.xlu0 %v2942_v46, %s3309_s28  ;;  %v3847_v50 = vpop.permute.xlu1 %2668  ;;  %v2977_v46 = vpack.i.bf16 %v991_v19, %v989_v47  ;;  %v913_v47 = vrot.slane %v3914_v22, 1  ;;  %v992_v19 = vrot.slane %v3911_v36, 2  ;;  %v3974_v26 = vsel %vm555_vm1, %v1032_v32, %v1033_v35 }
  0xa7   : > { %5191 = vst [vmem:[#allocation2_spill] sm:$0xff] %v3847_v50  ;;  %v3994_v32 = vsel %vm555_vm1, %v621_v9, %v622_v38  ;;  %v752_v9 = vrot.slane %v371_v5, 1  ;;  %v830_v34 = vrot.slane %v3980_v33, 2 }
  0xa8   : > { %v3861_v10 = vpop.permute.xlu0 %2663  ;;  %2958 = vrot.lane.b32.xlu1 %v2957_v24, %s3310_s29  ;;  %v416_v24 = vld [vmem:[%s3362_s23 + $0x430] sm:$0x3] }
  0xa9   : > { %5192 = vst [vmem:[#allocation3_spill] sm:$0xff] %v3861_v10  ;;  %v955_v45 = vrot.slane %v416_v24, 1  ;;  %v1035_v18 = vrot.slane %v416_v24, 2  ;;  %v3245_v10 = vld [vmem:[%s3362_s23 + $0x38] sm:$0xff] }
  0xaa   : > { %2953 = vrot.lane.b32.xlu0 %v2952_v25, %s3310_s29  ;;  %v3880_v7 = vpop.permute.xlu1 %2678 }
  0xab   : > { %5193 = vst [vmem:[#allocation11_spill] sm:$0xff] %v3880_v7 }
  0xac   : > { %v3897_v25 = vpop.permute.xlu0 %2673  ;;  %2968 = vrot.lane.b32.xlu1 %v2967_v17, %s3311_s30  ;;  %v912_v17 = vrot.slane %v3911_v36, 1 }
  0xad   : > { %5194 = vst [vmem:[#allocation12_spill] sm:$0xff] %v3897_v25 }
  0xae   : > { %2963 = vrot.lane.b32.xlu0 %v2962_v40, %s3311_s30  ;;  %v3924_v43 = vpop.permute.xlu1 %2688  ;;  %v3244_v40 = vld [vmem:[%s3362_s23 + $0x148] sm:$0x3]  ;;  %v3977_v0 = vsel %vm474_vm0, %v912_v17, %v913_v47  ;;  %v3997_v17 = vsel %vm555_vm1, %v992_v19, %v993_v61  ;;  %v749_v19 = vrot.slane %v3966_v29, 1 }
  0xaf   : > { %v624_v59 = vrot.slane %v3244_v40, 2  ;;  %v3960_v40 = vld [vmem:[%s3362_s23 + $0x1f8] sm:$0xff] }
  0xb0   : > { %v3935_v62 = vpop.permute.xlu0 %2683  ;;  %2978 = vrot.lane.b32.xlu1 %v2977_v46, %s3312_s5  ;;  %v995_v46 = vrot.slane %v392_v42, 2  ;;  %v3963_v42 = vld [vmem:[%s3362_s23 + $0x200] sm:$0xff] }
  0xb1   : > { %v4000_v21 = vsel %vm555_vm1, %v622_v38, %v624_v59  ;;  %v790_v38 = vrot.slane %v3963_v42, 2  ;;  %v789_v59 = vrot.slane %v3960_v40, 2 }
  0xb2   : > { %2973 = vrot.lane.b32.xlu0 %v2972_v3, %s3312_s5  ;;  %v3947_v24 = vpop.permute.xlu1 %2698  ;;  %v3969_v3 = vsel %vm474_vm0, %v953_v37, %v955_v45  ;;  %v3988_v37 = vsel %vm555_vm1, %v1033_v35, %v1035_v18  ;;  %v3991_v45 = vsel %vm474_vm0, %v913_v47, %v915_v20  ;;  %v4003_v13 = vsel %vm555_vm1, %v993_v61, %v995_v46 }
  0xb3   : > { %5195 = vst [vmem:[#allocation13_spill] sm:$0xff] %v3947_v24  ;;  %v709_v35 = vrot.slane %v3960_v40, 1  ;;  %v750_v18 = vrot.slane %v3980_v33, 1  ;;  %v712_v20 = vrot.slane %v347_v55, 1  ;;  %v792_v46 = vrot.slane %v347_v55, 2 }
  0xb4   : > { %v3984_v8 = vpop.permute.xlu0 %2693  ;;  %2988 = vrot.lane.b32.xlu1 %v2987_v57, %s3307_s26  ;;  %v710_v57 = vrot.slane %v3963_v42, 1  ;;  %v832_v61 = vrot.slane %v371_v5, 2  ;;  %v5200_v5 = vpack.i.bf16 %v3844_v49, %v3841_v41  ;;  %v4087_v41 = vld [vmem:[%s3362_s23 + $0x448] sm:$0x3] }
  0xb5   : > { %5196 = vst [vmem:[#allocation14_spill] sm:$0xff] %v3984_v8  ;;  %v3254_v8 = vld [vmem:[%s3362_s23 + $0xd8] sm:$0xff] }
  0xb6   : > { %2983 = vrot.lane.b32.xlu0 %v2982_v16, %s3306_s25  ;;  %v4008_v47 = vpop.permute.xlu1 %2708  ;;  %v5199_v16 = vpack.i.bf16 %v3877_v6, %v3866_v4  ;;  %v4044_v25 = vsel %vm474_vm0, %v709_v35, %v710_v57  ;;  %v4047_v55 = vsel %vm474_vm0, %v710_v57, %v712_v20  ;;  %v4050_v4 = vsel %vm474_vm0, %v749_v19, %v750_v18  ;;  %v4066_v20 = vld [vmem:[%s3362_s23 + $0x378] sm:$0xff] }
  0xb7   : > { %5197 = vst [vmem:[#allocation15_spill] sm:$0xff] %v4008_v47  ;;  %v4053_v6 = vsel %vm474_vm0, %v750_v18, %v752_v9  ;;  %v4060_v35 = vsel %vm555_vm1, %v789_v59, %v790_v38  ;;  %v4063_v57 = vsel %vm555_vm1, %v790_v38, %v792_v46  ;;  %v4069_v19 = vld [vmem:[%s3362_s23 + $0x438] sm:$0xff]  ;;  %v4078_v9 = vsel %vm555_vm1, %v829_v56, %v830_v34  ;;  %v395_v46 = vld [vmem:[%s3362_s23 + $0x388] sm:$0x3] }
  0xb8   : > { %v4016_v2 = vpop.permute.xlu0 %2703  ;;  %2998 = vrot.lane.b32.xlu1 %v5199_v16, %s3308_s27  ;;  %v4035_v16 = vld [vmem:[%s3362_s23 + $0x380] sm:$0xff]  ;;  %v4081_v49 = vsel %vm555_vm1, %v830_v34, %v832_v61  ;;  %v2615_v47 = vunpack.i.l.bf16 %v3763_v54  ;;  %v5203_v34 = vpack.i.bf16 %v3927_v48, %v3908_v30  ;;  %v920_v48 = vrot.slane %v395_v46, 1 }
  0xb9   : > { %5198 = vst [vmem:[#allocation16_spill] sm:$0xff] %v4016_v2  ;;  %v918_v59 = vrot.slane %v4035_v16, 1  ;;  %v998_v38 = vrot.slane %v4035_v16, 2  ;;  %v997_v2 = vrot.slane %v4066_v20, 2  ;;  %v1000_v30 = vrot.slane %v395_v46, 2 }
  0xba   : > { %2993 = vrot.lane.b32.xlu0 %v5200_v5, %s3307_s26  ;;  %v4041_v7 = vpop.permute.xlu1 %2718  ;;  %v4072_v5 = vld [vmem:[%s3362_s23 + $0x440] sm:$0xff]  ;;  %v4127_v12 = vsel %vm1820_vm2, %v3246_v60, %v2615_v47  ;;  %v2605_v56 = vunpack.i.l.bf16 %v3767_v52  ;;  %v2611_v46 = vunpack.i.h.bf16 %v3780_v1 }
  0xbb   : > { %5201 = vst [vmem:[#allocation17_spill] sm:$0xff] %v4041_v7  ;;  %v2616_v7 = vunpack.i.h.bf16 %v3763_v54  ;;  %v917_v54 = vrot.slane %v4066_v20, 1  ;;  %v958_v50 = vrot.slane %v4072_v5, 1  ;;  %v1038_v27 = vrot.slane %v4072_v5, 2  ;;  %5207 = vst [vmem:[#allocation21_spill] sm:$0xff] %v4127_v12 }
  0xbc   : > { %v4074_v18 = vpop.permute.xlu0 %2713  ;;  %3008 = vrot.lane.b32.xlu1 %v3007_v23, %s3309_s28  ;;  %v957_v23 = vrot.slane %v4069_v19, 1  ;;  %v4152_v12 = vld [vmem:[%s3362_s23 + $0x2e0] sm:$0x3] }
  0xbd   : > { %5202 = vst [vmem:[#allocation18_spill] sm:$0xff] %v4074_v18  ;;  %v5205_v18 = vpack.i.bf16 %v3889_v63, %v3886_v11  ;;  %v4123_v24 = vsel %vm1820_vm2, %v3245_v10, %v2616_v7  ;;  %v2606_v11 = vunpack.i.h.bf16 %v3767_v52  ;;  %v1037_v63 = vrot.slane %v4069_v19, 2 }
  0xbe   : > { %3003 = vrot.lane.b32.xlu0 %v5203_v34, %s3308_s27  ;;  %v4099_v61 = vpop.permute.xlu1 %2728  ;;  %v960_v34 = vrot.slane %v4087_v41, 1  ;;  %5206 = vst [vmem:[#allocation20_spill] sm:$0xff] %v4123_v24  ;;  %v5208_v10 = vpack.i.bf16 %v3954_v28, %v3943_v39  ;;  %v4146_v7 = vsel %vm474_vm0, %v917_v54, %v918_v59  ;;  %v4149_v47 = vsel %vm474_vm0, %v957_v23, %v958_v50 }
  0xbf   : > { %5204 = vst [vmem:[#allocation19_spill] sm:$0xff] %v4099_v61  ;;  %v2610_v52 = vunpack.i.l.bf16 %v3780_v1  ;;  %v4156_v24 = vsel %vm474_vm0, %v918_v59, %v920_v48  ;;  %v1040_v39 = vrot.slane %v4087_v41, 2  ;;  %v5211_v23 = vpack.i.bf16 %v3969_v3, %v3957_v14  ;;  %v3247_v41 = vld [vmem:[%s3362_s23 + $0x8] sm:$0xff]  ;;  %v3250_v3 = vld [vmem:[%s3362_s23] sm:$0xff]  ;;  %v3252_v61 = vld [vmem:[%s3362_s23 + $0x18] sm:$0xff] }
  0xc0   : > { %v4111_v31 = vpop.permute.xlu0 %2723  ;;  %3018 = vrot.lane.b32.xlu1 %v5205_v18, %s3310_s29  ;;  %v4132_v18 = vld [vmem:[%s3362_s23 + $0x2d0] sm:$0xff]  ;;  %v4159_v28 = vsel %vm474_vm0, %v958_v50, %v960_v34  ;;  %v4172_v1 = vsel %vm555_vm1, %v998_v38, %v1000_v30  ;;  %v755_v59 = vrot.slane %v4135_v44, 1  ;;  %v4178_v48 = vsel %vm1820_vm2, %v3247_v41, %v2606_v11  ;;  %v3251_v30 = vld [vmem:[%s3362_s23 + $0x20] sm:$0xff] }
  0xc1   : > { %v754_v50 = vrot.slane %v4132_v18, 1  ;;  %v3248_v34 = vld [vmem:[%s3362_s23 + $0x150] sm:$0xff]  ;;  %v5213_v11 = vpack.i.bf16 %v3914_v22, %v3911_v36  ;;  %v4211_v36 = vsel %vm555_vm1, %v1038_v27, %v1040_v39  ;;  %v2646_v39 = vunpack.i.h.bf16 %v3817_v51 }
  0xc2   : > { %3013 = vrot.lane.b32.xlu0 %v5208_v10, %s3309_s28  ;;  %v4143_v60 = vpop.permute.xlu1 %2738  ;;  %v4169_v10 = vsel %vm555_vm1, %v997_v2, %v998_v38  ;;  %v757_v2 = vrot.slane %v4152_v12, 1  ;;  %v4185_v38 = vsel %vm1820_vm2, %v3250_v3, %v2605_v56  ;;  %v4203_v56 = vsel %vm1820_vm2, %v3252_v61, %v2610_v52  ;;  %v4214_v22 = vld [vmem:[%s3362_s23 + $0x210] sm:$0xff] }
  0xc3   : > { %5209 = vst [vmem:[#allocation22_spill] sm:$0xff] %v4143_v60  ;;  %v626_v60 = vrot.slane %v3248_v34, 2  ;;  %5214 = vst [vmem:[#allocation25_spill] sm:$0xff] %v4203_v56  ;;  %v4208_v3 = vsel %vm555_vm1, %v1037_v63, %v1038_v27  ;;  %v2650_v34 = vunpack.i.l.bf16 %v3808_v53  ;;  %v5215_v63 = vpack.i.bf16 %v3988_v37, %v3974_v26 }
  0xc4   : > { %v4162_v54 = vpop.permute.xlu0 %2733  ;;  %3028 = vrot.lane.b32.xlu1 %v5211_v23, %s3311_s30  ;;  %v4189_v23 = vsel %vm1820_vm2, %v3251_v30, %v2611_v46  ;;  %v4217_v30 = vld [vmem:[%s3362_s23 + $0x218] sm:$0xff]  ;;  %v835_v27 = vrot.slane %v4135_v44, 2  ;;  %v4229_v52 = vsel %vm474_vm0, %v754_v50, %v755_v59  ;;  %v5217_v46 = vrot.slane %v3565_v58, 2 }
  0xc5   : > { %5210 = vst [vmem:[#allocation23_spill] sm:$0xff] %v4162_v54  ;;  %v3249_v54 = vld [vmem:[%s3362_s23 + $0x158] sm:$0xff]  ;;  %5212 = vst [vmem:[#allocation24_spill] sm:$0xff] %v4189_v23  ;;  %v4241_v26 = vsel %vm474_vm0, %v755_v59, %v757_v2  ;;  %v2645_v37 = vunpack.i.l.bf16 %v3817_v51  ;;  %v5219_v50 = vpack.i.bf16 %v3991_v45, %v3977_v0  ;;  %v715_v58 = vrot.slane %v4217_v30, 1  ;;  %v3253_v2 = vld [vmem:[%s3362_s23 + $0xe0] sm:$0xff] }
  0xc6   : > { %v627_v14 = vrot.slane %v3249_v54, 2  ;;  %3023 = vrot.lane.b32.xlu0 %v5213_v11, %s3310_s29  ;;  %v4195_v41 = vpop.permute.xlu1 %2748  ;;  %v2651_v11 = vunpack.i.h.bf16 %v3808_v53  ;;  %5216 = vst [vmem:[#allocation26_spill] sm:$0xff] %v4229_v52  ;;  %5218 = vst [vmem:[#allocation27_spill] sm:$0xff] %v4241_v26  ;;  %v837_v45 = vrot.slane %v4152_v12, 2  ;;  %v4268_v23 = vsel %vm1820_vm2, %v3254_v8, %v2650_v34  ;;  %v4302_v12 = vld [vmem:[%s3362_s23 + $0x458] sm:$0xff] }
  0xc7   : > { %5221 = vst [vmem:[#allocation29_spill] sm:$0xff] %v4268_v23  ;;  %v5222_v51 = vpack.i.bf16 %v4000_v21, %v3994_v32  ;;  %v2656_v8 = vunpack.i.h.bf16 %v3830_v15  ;;  %v3256_v21 = vld [vmem:[%s3362_s23 + $0xc0] sm:$0xff]  ;;  %v2750_v52 = vunpack.i.l.bf16 %v4195_v41 }
  0xc8   : > { %v4221_v61 = vpop.permute.xlu0 %2743  ;;  %3038 = vrot.lane.b32.xlu1 %v5215_v63, %s3312_s5  ;;  %v4233_v53 = vsel %vm555_vm1, %v626_v60, %v627_v14  ;;  %v4238_v54 = vsel %vm555_vm1, %v627_v14, %v5217_v46  ;;  %v834_v60 = vrot.slane %v4132_v18, 2  ;;  %v714_v14 = vrot.slane %v4214_v22, 1  ;;  %v4254_v46 = vld [vmem:[%s3362_s23 + $0x220] sm:$0x3] }
  0xc9   : > { %v717_v0 = vrot.slane %v4254_v46, 1  ;;  %v1837_v32 = vsel %vm1820_vm2, %v3256_v21, %v2645_v37  ;;  %v2686_v21 = vunpack.i.h.bf16 %v3935_v62  ;;  %v5224_v37 = vpack.i.bf16 %v3963_v42, %v3960_v40 }
  0xca   : > { %3033 = vrot.lane.b32.xlu0 %v5219_v50, %s3311_s30  ;;  %v4248_v63 = vpop.permute.xlu1 %2758  ;;  %v4264_v50 = vsel %vm1820_vm2, %v3253_v2, %v2651_v11  ;;  %v3255_v2 = vld [vmem:[%s3362_s23 + $0xc8] sm:$0xff]  ;;  %v4299_v34 = vsel %vm474_vm0, %v714_v14, %v715_v58  ;;  %v2751_v14 = vunpack.i.h.bf16 %v4195_v41  ;;  %v2746_v41 = vunpack.i.h.bf16 %v4221_v61 }
  0xcb   : > { %5220 = vst [vmem:[#allocation28_spill] sm:$0xff] %v4264_v50  ;;  %v1838_v59 = vsel %vm1820_vm2, %v3255_v2, %v2646_v39  ;;  %v4296_v2 = vsel %vm555_vm1, %v834_v60, %v835_v27  ;;  %v2726_v39 = vunpack.i.h.bf16 %v4111_v31  ;;  %v2725_v60 = vunpack.i.l.bf16 %v4111_v31 }
  0xcc   : > { %v4270_v56 = vpop.permute.xlu0 %2753  ;;  %3048 = vrot.lane.b32.xlu1 %v5222_v51, %s3306_s25  ;;  %v5223_v51 = vpack.i.bf16 %v4003_v13, %v3997_v17  ;;  %v2685_v13 = vunpack.i.l.bf16 %v3935_v62  ;;  %v4308_v17 = vsel %vm555_vm1, %v835_v27, %v837_v45  ;;  %v3257_v62 = vld [vmem:[%s3362_s23 + $0xf8] sm:$0xff]  ;;  %v4326_v45 = vsel %vm474_vm0, %v715_v58, %v717_v0 }
  0xcd   : > { %v4323_v27 = vsel %vm1820_vm2, %v3257_v62, %v2656_v8  ;;  %v963_v31 = vrot.slane %v4302_v12, 1  ;;  %v2745_v50 = vunpack.i.l.bf16 %v4221_v61  ;;  %v5225_v40 = vpack.i.bf16 %v3980_v33, %v3966_v29 }
  0xce   : > { %3043 = vrot.lane.b32.xlu0 %v5223_v51, %s3312_s5  ;;  %v4292_v11 = vpop.permute.xlu1 %2768  ;;  %v4311_v51 = vld [vmem:[%s3362_s23 + $0x450] sm:$0xff]  ;;  %v797_v58 = vrot.slane %v4254_v46, 2  ;;  %v1854_v0 = vsel %vm1853_vm3, %v4185_v38, %v2685_v13  ;;  %v2761_v62 = vunpack.i.h.bf16 %v4248_v63  ;;  %v2760_v61 = vunpack.i.l.bf16 %v4248_v63 }
  0xcf   : > { %v1870_v23 = vsel %vm1853_vm3, %v1837_v32, %v2725_v60  ;;  %v1871_v29 = vsel %vm1853_vm3, %v1838_v59, %v2726_v39  ;;  %v1887_v33 = vsel %vm1886_vm4, %v1854_v0, %v2750_v52  ;;  %v5226_v38 = vpack.i.bf16 %v4047_v55, %v4044_v25 }
  0xd0   : > { %v2764_v26 = vpop.permute.xlu0 %2763  ;;  %3058 = vrot.lane.b32.xlu1 %v5224_v37, %s3307_s26  ;;  %v1855_v37 = vsel %vm1853_vm3, %v4178_v48, %v2686_v21  ;;  %v2756_v48 = vunpack.i.h.bf16 %v4270_v56  ;;  %v2755_v21 = vunpack.i.l.bf16 %v4270_v56  ;;  %v2771_v63 = vunpack.i.h.bf16 %v4292_v11 }
  0xd1   : > { %v2770_v32 = vunpack.i.l.bf16 %v4292_v11  ;;  %v1903_v59 = vsel %vm1886_vm4, %v1870_v23, %v2745_v50  ;;  %v1904_v52 = vsel %vm1886_vm4, %v1871_v29, %v2746_v41  ;;  %v2766_v39 = vunpack.i.h.bf16 %v2764_v26 }
  0xd2   : > { %3053 = vrot.lane.b32.xlu0 %v5225_v40, %s3307_s26  ;;  %v2779_v42 = vpop.permute.xlu1 %2778  ;;  %v1888_v40 = vsel %vm1886_vm4, %v1855_v37, %v2751_v14  ;;  %v2765_v13 = vunpack.i.l.bf16 %v2764_v26  ;;  %v5227_v25 = vpack.i.bf16 %v4053_v6, %v4050_v4  ;;  %v1920_v60 = vsel %vm1919_vm5, %v1887_v33, %v2760_v61 }
  0xd3   : > { %v1921_v56 = vsel %vm1919_vm5, %v1888_v40, %v2761_v62  ;;  %v2781_v14 = vunpack.i.h.bf16 %v2779_v42  ;;  %v2780_v0 = vunpack.i.l.bf16 %v2779_v42  ;;  %v5228_v26 = vpack.i.bf16 %v4063_v57, %v4060_v35 }
  0xd4   : > { %v2774_v8 = vpop.permute.xlu0 %2773  ;;  %3068 = vrot.lane.b32.xlu1 %v5226_v38, %s3308_s27  ;;  %v1936_v4 = vsel %vm1919_vm5, %v1903_v59, %v2755_v21  ;;  %v1937_v6 = vsel %vm1919_vm5, %v1904_v52, %v2756_v48  ;;  %v1953_v41 = vsel %vm1952_vm6, %v1920_v60, %v2770_v32  ;;  %v1954_v62 = vsel %vm1952_vm6, %v1921_v56, %v2771_v63  ;;  %v422_v63 = vld [vmem:[%s3362_s23 + $0x460] sm:$0x3] }
  0xd5   : > { %v2776_v37 = vunpack.i.h.bf16 %v2774_v8  ;;  %v2775_v11 = vunpack.i.l.bf16 %v2774_v8  ;;  %v1969_v42 = vsel %vm1952_vm6, %v1936_v4, %v2765_v13  ;;  %v1970_v8 = vsel %vm1952_vm6, %v1937_v6, %v2766_v39  ;;  %v4390_v13 = vld [vmem:[%s3362_s23 + $0x398] sm:$0xff] }
  0xd6   : > { %3063 = vrot.lane.b32.xlu0 %v5227_v25, %s3308_s27  ;;  %v2789_v55 = vpop.permute.xlu1 %2788  ;;  %v5229_v35 = vpack.i.bf16 %v4081_v49, %v4078_v9  ;;  %v1986_v33 = vsel %vm1985_vm7, %v1953_v41, %v2780_v0  ;;  %v1987_v40 = vsel %vm1985_vm7, %v1954_v62, %v2781_v14  ;;  %v5230_v9 = vpack.i.bf16 %v4035_v16, %v4066_v20  ;;  %v4395_v14 = vld [vmem:[%s3362_s23 + $0x390] sm:$0xff]  ;;  %v4398_v0 = vld [vmem:[%s3362_s23 + $0x3a0] sm:$0x3] }
  0xd7   : > { %v2791_v38 = vunpack.i.h.bf16 %v2789_v55  ;;  %v2790_v23 = vunpack.i.l.bf16 %v2789_v55  ;;  %v2002_v32 = vsel %vm1985_vm7, %v1969_v42, %v2775_v11  ;;  %v2003_v59 = vsel %vm1985_vm7, %v1970_v8, %v2776_v37 }
  0xd8   : > { %v2784_v50 = vpop.permute.xlu0 %2783  ;;  %3078 = vrot.lane.b32.xlu1 %v5228_v26, %s3309_s28  ;;  %v5231_v37 = vpack.i.bf16 %v4072_v5, %v4069_v19  ;;  %v923_v5 = vrot.slane %v4390_v13, 1  ;;  %v5234_v41 = vpack.i.bf16 %v4156_v24, %v4146_v7  ;;  %v922_v42 = vrot.slane %v4395_v14, 1 }
  0xd9   : > { %v2786_v61 = vunpack.i.h.bf16 %v2784_v50  ;;  %v2785_v29 = vunpack.i.l.bf16 %v2784_v50  ;;  %v2019_v52 = vsel %vm2018_vm8, %v1986_v33, %v2790_v23  ;;  %v2020_v39 = vsel %vm2018_vm8, %v1987_v40, %v2791_v38 }
  0xda   : > { %3073 = vrot.lane.b32.xlu0 %v5229_v35, %s3309_s28  ;;  %v2799_v57 = vpop.permute.xlu1 %2798  ;;  %v1042_v38 = vrot.slane %v4311_v51, 2  ;;  %v965_v23 = vrot.slane %v422_v63, 1  ;;  %v1045_v8 = vrot.slane %v422_v63, 2  ;;  %v5235_v35 = vunpack.i.l.bf16 %v3830_v15 }
  0xdb   : > { %v2801_v48 = vunpack.i.h.bf16 %v2799_v57  ;;  %v2800_v21 = vunpack.i.l.bf16 %v2799_v57  ;;  %v2035_v16 = vsel %vm2018_vm8, %v2002_v32, %v2785_v29  ;;  %v2036_v20 = vsel %vm2018_vm8, %v2003_v59, %v2786_v61  ;;  %v3258_v29 = vld [vmem:[%s3362_s23 + $0xf0] sm:$0xff] }
  0xdc   : > { %v2794_v49 = vpop.permute.xlu0 %2793  ;;  %3088 = vrot.lane.b32.xlu1 %v5230_v9, %s3310_s29  ;;  %v925_v61 = vrot.slane %v4398_v0, 1  ;;  %v4430_v57 = vsel %vm1820_vm2, %v3258_v29, %v5235_v35  ;;  %v3137_v33 = vpack.i.bf16 %v4308_v17, %v4296_v2  ;;  %v5236_v40 = vrot.slane %v4217_v30, 2  ;;  %v5247_v29 = vld [vmem:[#allocation14_spill] sm:$0xff] }
  0xdd   : > { %v2796_v25 = vunpack.i.h.bf16 %v2794_v49  ;;  %v2795_v55 = vunpack.i.l.bf16 %v2794_v49  ;;  %v2052_v60 = vsel %vm2051_vm9, %v2019_v52, %v2800_v21  ;;  %v2053_v56 = vsel %vm2051_vm9, %v2020_v39, %v2801_v48 }
  0xde   : > { %3083 = vrot.lane.b32.xlu0 %v5231_v37, %s3310_s29  ;;  %v4404_v11 = vpop.permute.xlu1 %2808  ;;  %v2524_v19 = vpack.c.bf16 %v2053_v56, %v2052_v60  ;;  %v5237_v24 = vrot.slane %v4214_v22, 2  ;;  %v5238_v48 = vmov %v5236_v40  ;;  %v2691_v15 = vunpack.i.h.bf16 %v3924_v43 }
  0xdf   : > { %v2068_v50 = vsel %vm2051_vm9, %v2035_v16, %v2795_v55  ;;  %v2069_v26 = vsel %vm2051_vm9, %v2036_v20, %v2796_v25  ;;  %v4446_v21 = vsel %vm555_vm1, %v5238_v48, %v797_v58  ;;  %v2690_v63 = vunpack.i.l.bf16 %v3924_v43  ;;  %v3259_v16 = vld [vmem:[%s3362_s23 + $0x168] sm:$0xff] }
  0xe0   : > { %v4418_v6 = vpop.permute.xlu0 %2803  ;;  %3098 = vrot.lane.b32.xlu1 %v5234_v41, %s3311_s30  ;;  %v2521_v62 = vpack.c.bf16 %v2069_v26, %v2068_v50  ;;  %v4439_v7 = vsel %vm555_vm1, %v5237_v24, %v5236_v40  ;;  %v5239_v32 = vpack.i.bf16 %v4159_v28, %v4149_v47  ;;  %v5178_v46 = vrot.slane %v4390_v13, 2  ;;  %v5244_v50 = vld [vmem:[#allocation25_spill] sm:$0xff]  ;;  %v4534_v24 = vld [vmem:[%s3362_s23 + $0x228] sm:$0xff] }
  0xe1   : > { %v1002_v58 = vrot.slane %v4395_v14, 2  ;;  %v3132_v43 = vpack.i.bf16 %v4326_v45, %v4299_v34  ;;  %v3147_v47 = vpack.i.bf16 %v4302_v12, %v4311_v51  ;;  %v5240_v28 = vrot.slane %v4311_v51, 1  ;;  %v5248_v48 = vld [vmem:[#allocation19_spill] sm:$0xff] }
  0xe2   : > { %3093 = vrot.lane.b32.xlu0 %v5239_v32, %s3311_s30  ;;  %2523 = vmatprep.subr.msk.bf16.mxu0 %vm4413_vm11, %v2521_v62  ;;  %v4456_v59 = vpop.permute.xlu1 %2818  ;;  %v4476_v39 = vsel %vm474_vm0, %v963_v31, %v965_v23  ;;  %v5241_v9 = vpack.i.bf16 %v4172_v1, %v4169_v10  ;;  %v5242_v25 = vrot.slane %v4302_v12, 2  ;;  %v4498_v37 = vsel %vm474_vm0, %v923_v5, %v925_v61  ;;  %v4525_v61 = vld [vmem:[%s3362_s23 + $0x230] sm:$0xff] }
  0xe3   : > { %2526 = vmatpush3.bf16.xpose.msk.msra.mxu0 %vm4413_vm11, %v2524_v19  ;;  %v4471_v52 = vsel %vm474_vm0, %v5240_v28, %v963_v31  ;;  %v4495_v31 = vsel %vm474_vm0, %v922_v42, %v923_v5  ;;  %v3142_v10 = vpack.i.bf16 %v4446_v21, %v4439_v7  ;;  %v631_v20 = vrot.slane %v3259_v16, 2  ;;  %v5245_v19 = vld [vmem:[#allocation24_spill] sm:$0xff] }
  0xe4   : > { %v4478_v49 = vpop.permute.xlu0 %2813  ;;  %3108 = vrot.lane.b32.xlu1 %v5241_v9, %s3312_s5  ;;  %v4487_v55 = vsel %vm555_vm1, %v1042_v38, %v5242_v25  ;;  %v5243_v60 = vmov %v5242_v25  ;;  %v4506_v38 = vld [vmem:[%s3362_s23 + $0x170] sm:$0xff]  ;;  %v1856_v26 = vsel %vm1853_vm3, %v5244_v50, %v2690_v63  ;;  %v1857_v5 = vsel %vm1853_vm3, %v5245_v19, %v2691_v15  ;;  %v4545_v25 = vld [vmem:[%s3362_s23 + $0x2e8] sm:$0xff]  ;;  %v5252_v19 = vld [vmem:[#allocation29_spill] sm:$0xff] }
  0xe5   : > { %v4492_v56 = vsel %vm555_vm1, %v5243_v60, %v1045_v8  ;;  %v5179_v23 = vrot.slane %v4506_v38, 2  ;;  %v5246_v41 = vpack.i.bf16 %v4211_v36, %v4208_v3  ;;  %v3157_v42 = vpack.i.bf16 %v4476_v39, %v4471_v52  ;;  %v4548_v60 = vld [vmem:[%s3362_s23 + $0x2f0] sm:$0xff] }
  0xe6   : > { %v2829_v62 = vpop.permute.xlu1 %2828  ;;  %v4522_v8 = vsel %vm555_vm1, %v1002_v58, %v5178_v46  ;;  %v2696_v35 = vunpack.i.h.bf16 %v5247_v29  ;;  %v2731_v15 = vunpack.i.h.bf16 %v5248_v48  ;;  %v2730_v63 = vunpack.i.l.bf16 %v5248_v48  ;;  %v5251_v1 = vld [vmem:[#allocation28_spill] sm:$0xff]  ;;  %v5254_v46 = vld [vmem:[#allocation26_spill] sm:$0xff] }
  0xe7   : > { %3103 = vrot.lane.b32.xlu0 %v5246_v41, %s3312_s5  ;;  %v2811_v32 = vunpack.i.h.bf16 %v4404_v11  ;;  %v2810_v58 = vunpack.i.l.bf16 %v4404_v11  ;;  %v5249_v9 = vpack.i.bf16 %v4135_v44, %v4132_v18  ;;  %v4553_v16 = vsel %vm555_vm1, %v631_v20, %v5179_v23  ;;  %v5253_v20 = vld [vmem:[#allocation27_spill] sm:$0xff]  ;;  %v5258_v7 = vld [vmem:[#allocation4_spill] sm:$0xff] }
  0xe8   : > { %v2824_v28 = vpop.permute.xlu0 %2823  ;;  %v2806_v41 = vunpack.i.h.bf16 %v4418_v6  ;;  %v2805_v44 = vunpack.i.l.bf16 %v4418_v6  ;;  %v5250_v18 = vpack.i.bf16 %v4238_v54, %v4233_v53  ;;  %v2821_v36 = vunpack.i.h.bf16 %v4456_v59 }
  0xe9   : > { %3118 = vrot.lane.b32.xlu1 %v5249_v9, %s3307_s26  ;;  %v2820_v3 = vunpack.i.l.bf16 %v4456_v59  ;;  %v1873_v6 = vsel %vm1853_vm3, %v5251_v1, %v2731_v15  ;;  %v1872_v54 = vsel %vm1853_vm3, %v5252_v19, %v2730_v63  ;;  %v1889_v53 = vsel %vm1886_vm4, %v1856_v26, %v2810_v58 }
  0xea   : > { %v2839_v48 = vpop.permute.xlu1 %2838  ;;  %v5255_v50 = vpack.i.bf16 %v5253_v20, %v5254_v46  ;;  %v2816_v59 = vunpack.i.h.bf16 %v4478_v49  ;;  %v2815_v11 = vunpack.i.l.bf16 %v4478_v49  ;;  %v2831_v40 = vunpack.i.h.bf16 %v2829_v62 }
  0xeb   : > { %3113 = vrot.lane.b32.xlu0 %v5250_v18, %s3306_s25  ;;  %v1890_v18 = vsel %vm1886_vm4, %v1857_v5, %v2811_v32  ;;  %v2830_v23 = vunpack.i.l.bf16 %v2829_v62  ;;  %v1906_v1 = vsel %vm1886_vm4, %v1873_v6, %v2806_v41  ;;  %v1905_v15 = vsel %vm1886_vm4, %v1872_v54, %v2805_v44  ;;  %v353_v54 = vld [vmem:[%s3362_s23 + $0x238] sm:$0x3] }
  0xec   : > { %v2834_v9 = vpop.permute.xlu0 %2833  ;;  %v2826_v63 = vunpack.i.h.bf16 %v2824_v28  ;;  %v2825_v26 = vunpack.i.l.bf16 %v2824_v28  ;;  %v5256_v5 = vpack.i.bf16 %v4217_v30, %v4214_v22  ;;  %v1922_v46 = vsel %vm1919_vm5, %v1889_v53, %v2820_v3 }
  0xed   : > { %3128 = vrot.lane.b32.xlu1 %v5255_v50, %s3308_s27  ;;  %v1923_v58 = vsel %vm1919_vm5, %v1890_v18, %v2821_v36  ;;  %v2841_v50 = vunpack.i.h.bf16 %v2839_v48  ;;  %v2840_v49 = vunpack.i.l.bf16 %v2839_v48  ;;  %v2836_v19 = vunpack.i.h.bf16 %v2834_v9 }
  0xee   : > { %v2849_v32 = vpop.permute.xlu1 %2848  ;;  %v2835_v62 = vunpack.i.l.bf16 %v2834_v9  ;;  %v1938_v22 = vsel %vm1919_vm5, %v1905_v15, %v2815_v11  ;;  %v1939_v30 = vsel %vm1919_vm5, %v1906_v1, %v2816_v59  ;;  %v1955_v3 = vsel %vm1952_vm6, %v1922_v46, %v2830_v23 }
  0xef   : > { %3123 = vrot.lane.b32.xlu0 %v5256_v5, %s3307_s26  ;;  %v2851_v20 = vunpack.i.h.bf16 %v2849_v32  ;;  %v2850_v41 = vunpack.i.l.bf16 %v2849_v32  ;;  %v1956_v36 = vsel %vm1952_vm6, %v1923_v58, %v2831_v40  ;;  %v1971_v28 = vsel %vm1952_vm6, %v1938_v22, %v2825_v26  ;;  %v377_v40 = vld [vmem:[%s3362_s23 + $0x2f8] sm:$0x3] }
  0xf0   : > { %v2844_v6 = vpop.permute.xlu0 %2843  ;;  %v1972_v44 = vsel %vm1952_vm6, %v1939_v30, %v2826_v63  ;;  %v1988_v17 = vsel %vm1985_vm7, %v1955_v3, %v2840_v49  ;;  %v2004_v53 = vsel %vm1985_vm7, %v1971_v28, %v2835_v62  ;;  %v722_v46 = vrot.slane %v353_v54, 1  ;;  %v5257_v49 = vld [vmem:[#allocation20_spill] sm:$0xff] }
  0xf1   : > { %3138 = vrot.lane.b32.xlu1 %v3137_v33, %s3309_s28  ;;  %v2846_v48 = vunpack.i.h.bf16 %v2844_v6  ;;  %v2845_v9 = vunpack.i.l.bf16 %v2844_v6  ;;  %v1989_v33 = vsel %vm1985_vm7, %v1956_v36, %v2841_v50  ;;  %v2005_v18 = vsel %vm1985_vm7, %v1972_v44, %v2836_v19 }
  0xf2   : > { %v2859_v2 = vpop.permute.xlu1 %2858  ;;  %v2021_v59 = vsel %vm2018_vm8, %v1988_v17, %v2850_v41  ;;  %v2022_v1 = vsel %vm2018_vm8, %v1989_v33, %v2851_v20  ;;  %v762_v12 = vrot.slane %v377_v40, 1  ;;  %v802_v50 = vrot.slane %v353_v54, 2  ;;  %v5271_v33 = vld [vmem:[#allocation23_spill] sm:$0xff] }
  0xf3   : > { %3133 = vrot.lane.b32.xlu0 %v3132_v43, %s3308_s27  ;;  %v2861_v11 = vunpack.i.h.bf16 %v2859_v2  ;;  %v2860_v23 = vunpack.i.l.bf16 %v2859_v2  ;;  %v2037_v26 = vsel %vm2018_vm8, %v2004_v53, %v2845_v9  ;;  %v2038_v5 = vsel %vm2018_vm8, %v2005_v18, %v2846_v48 }
  0xf4   : > { %v2854_v15 = vpop.permute.xlu0 %2853  ;;  %v4632_v19 = vsel %vm1853_vm3, %v5257_v49, %v2696_v35  ;;  %v5259_v21 = vrot.slane %v5258_v7, 2  ;;  %v5261_v6 = vrot.slane %v4398_v0, 2  ;;  %v5262_v22 = vrot.slane %v4390_v13, 2 }
  0xf5   : > { %3148 = vrot.lane.b32.xlu1 %v3147_v47, %s3310_s29  ;;  %v2054_v34 = vsel %vm2051_vm9, %v2021_v59, %v2860_v23  ;;  %v2055_v45 = vsel %vm2051_vm9, %v2022_v1, %v2861_v11  ;;  %v2856_v43 = vunpack.i.h.bf16 %v2854_v15  ;;  %v2855_v63 = vunpack.i.l.bf16 %v2854_v15  ;;  %v4701_v59 = vld [vmem:[%s3362_s23 + $0x3b0] sm:$0xff]  ;;  %v5275_v15 = vld [vmem:[#allocation21_spill] sm:$0xff] }
  0xf6   : > { %v4624_v32 = vpop.permute.xlu1 %2868  ;;  %v2530_v51 = vpack.c.bf16 %v2055_v45, %v2054_v34  ;;  %v1006_v35 = vsel %vm555_vm1, %v5262_v22, %v5261_v6  ;;  %v840_v30 = vrot.slane %v4548_v60, 2  ;;  %v839_v3 = vrot.slane %v4545_v25, 2 }
  0xf7   : > { %3143 = vrot.lane.b32.xlu0 %v3142_v10, %s3309_s28  ;;  %v2070_v47 = vsel %vm2051_vm9, %v2037_v26, %v2855_v63  ;;  %v2071_v58 = vsel %vm2051_vm9, %v2038_v5, %v2856_v43  ;;  %v5260_v10 = vrot.slane %v4506_v38, 2  ;;  %v5263_v52 = vrot.slane %v4525_v61, 1 }
  0xf8   : > { %v2527_v62 = vpack.c.bf16 %v2071_v58, %v2070_v47  ;;  %v4634_v20 = vpop.permute.xlu0 %2863  ;;  %v5264_v39 = vrot.slane %v4534_v24, 1  ;;  %v842_v38 = vrot.slane %v377_v40, 2  ;;  %v5265_v0 = vpack.i.bf16 %v4390_v13, %v4395_v14  ;;  %v4746_v47 = vld [vmem:[%s3362_s23 + $0x468] sm:$0xff]  ;;  %v4749_v58 = vld [vmem:[%s3362_s23 + $0x470] sm:$0xff] }
  0xf9   : > { %3158 = vrot.lane.b32.xlu1 %v3157_v42, %s3311_s30  ;;  %v635_v41 = vsel %vm555_vm1, %v5260_v10, %v5259_v21  ;;  %v5266_v28 = vmov %v5263_v52  ;;  %v5267_v48 = vrot.slane %v4548_v60, 1  ;;  %v5268_v9 = vrot.slane %v4545_v25, 1 }
  0xfa   : > { %v4657_v42 = vsel %vm474_vm0, %v5264_v39, %v5263_v52  ;;  %2529 = vmatprep.subr.msk.bf16.mxu0 %vm4413_vm11, %v2527_v62  ;;  %v4665_v36 = vpop.permute.xlu1 %2878  ;;  %v4670_v44 = vsel %vm474_vm0, %v5266_v28, %v722_v46  ;;  %v5269_v13 = vrot.slane %v4525_v61, 2  ;;  %v5270_v14 = vrot.slane %v4534_v24, 2 }
  0xfb   : > { %3153 = vrot.lane.b32.xlu0 %v5265_v0, %s3310_s29  ;;  %v4677_v2 = vsel %vm474_vm0, %v5268_v9, %v5267_v48  ;;  %v2736_v11 = vunpack.i.h.bf16 %v5271_v33  ;;  %v2735_v23 = vunpack.i.l.bf16 %v5271_v33  ;;  %2532 = vmatpush3.bf16.xpose.msk.msra.mxu0 %vm4413_vm11, %v2530_v51  ;;  %v5272_v54 = vmov %v5267_v48 }
  0xfc   : > { %v4684_v17 = vsel %vm555_vm1, %v5270_v14, %v5269_v13  ;;  %v4693_v40 = vsel %vm474_vm0, %v5272_v54, %v762_v12  ;;  %v5273_v53 = vmov %v5269_v13  ;;  %v5274_v1 = vunpack.i.l.bf16 %v5247_v29  ;;  %v4707_v45 = vpop.permute.xlu0 %2873  ;;  %v4718_v29 = vld [vmem:[%s3362_s23 + $0x3a8] sm:$0xff] }
  0xfd   : > { %v4698_v18 = vsel %vm555_vm1, %v5273_v53, %v802_v50  ;;  %v5276_v43 = vpack.i.bf16 %v4492_v56, %v4487_v55  ;;  %v3177_v63 = vpack.i.bf16 %v635_v41, %v4553_v16  ;;  %v3172_v26 = vpack.i.bf16 %v1006_v35, %v4522_v8  ;;  %v4731_v16 = vld [vmem:[%s3362_s23 + $0x3b8] sm:$0x3] }
  0xfe   : > { %v1858_v34 = vsel %vm1853_vm3, %v5275_v15, %v5274_v1  ;;  %v3187_v5 = vpack.i.bf16 %v4525_v61, %v4534_v24  ;;  %v3182_v46 = vpack.i.bf16 %v4548_v60, %v4545_v25  ;;  %v3197_v12 = vpack.i.bf16 %v4670_v44, %v4657_v42  ;;  %v4737_v61 = vpop.permute.xlu1 %2888  ;;  %v4765_v41 = vld [vmem:[%s3362_s23 + $0x478] sm:$0x3] }
  0xff   : > { %3168 = vrot.lane.b32.xlu1 %v5276_v43, %s3312_s5  ;;  %v4725_v55 = vsel %vm555_vm1, %v839_v3, %v840_v30  ;;  %v4728_v56 = vsel %vm555_vm1, %v840_v30, %v842_v38  ;;  %v5277_v8 = vpack.i.bf16 %v4498_v37, %v4495_v31  ;;  %v3192_v24 = vpack.i.bf16 %v4693_v40, %v4677_v2 }
 0x100   : > { %v3207_v25 = vpack.i.bf16 %v4698_v18, %v4684_v17  ;;  %v928_v60 = vrot.slane %v4701_v59, 1  ;;  %v1008_v51 = vrot.slane %v4701_v59, 2  ;;  %v1874_v31 = vsel %vm1853_vm3, %v4430_v57, %v2735_v23  ;;  %v2884_v21 = vpop.permute.xlu0 %2883 }
 0x101   : > { %3163 = vrot.lane.b32.xlu0 %v5277_v8, %s3311_s30  ;;  %v1875_v37 = vsel %vm1853_vm3, %v4323_v27, %v2736_v11  ;;  %v3217_v50 = vpack.i.bf16 %v4701_v59, %v4718_v29  ;;  %v927_v49 = vrot.slane %v4718_v29, 1  ;;  %v2871_v62 = vunpack.i.h.bf16 %v4624_v32 }
 0x102   : > { %v2870_v7 = vunpack.i.l.bf16 %v4624_v32  ;;  %v3202_v10 = vpack.i.bf16 %v4728_v56, %v4725_v55  ;;  %v930_v57 = vrot.slane %v4731_v16, 1  ;;  %v1007_v27 = vrot.slane %v4718_v29, 2  ;;  %v2899_v3 = vpop.permute.xlu1 %2898 }
 0x103   : > { %3178 = vrot.lane.b32.xlu1 %v3177_v63, %s3306_s25  ;;  %v968_v6 = vrot.slane %v4749_v58, 1  ;;  %v1048_v22 = vrot.slane %v4749_v58, 2  ;;  %v3212_v35 = vpack.i.bf16 %v4749_v58, %v4746_v47  ;;  %v2866_v32 = vunpack.i.h.bf16 %v4634_v20  ;;  %v5279_v58 = vld [vmem:[#allocation10_spill] sm:$0xff] }
 0x104   : > { %v2865_v30 = vunpack.i.l.bf16 %v4634_v20  ;;  %v967_v52 = vrot.slane %v4746_v47, 1  ;;  %v1047_v39 = vrot.slane %v4746_v47, 2  ;;  %v2881_v42 = vunpack.i.h.bf16 %v4665_v36  ;;  %v2894_v48 = vpop.permute.xlu0 %2893 }
 0x105   : > { %3173 = vrot.lane.b32.xlu0 %v3172_v26, %s3312_s5  ;;  %v2880_v38 = vunpack.i.l.bf16 %v4665_v36  ;;  %v4780_v0 = vsel %vm474_vm0, %v927_v49, %v928_v60  ;;  %v970_v28 = vrot.slane %v4765_v41, 1  ;;  %v1891_v44 = vsel %vm1886_vm4, %v1858_v34, %v2870_v7 }
 0x106   : > { %v1892_v20 = vsel %vm1886_vm4, %v4632_v19, %v2871_v62  ;;  %v4788_v9 = vsel %vm474_vm0, %v928_v60, %v930_v57  ;;  %v1010_v13 = vrot.slane %v4731_v16, 2  ;;  %v2876_v36 = vunpack.i.h.bf16 %v4707_v45  ;;  %v2909_v1 = vpop.permute.xlu1 %2908 }
 0x107   : > { %3188 = vrot.lane.b32.xlu1 %v3187_v5, %s3307_s26  ;;  %v2875_v14 = vunpack.i.l.bf16 %v4707_v45  ;;  %v2891_v33 = vunpack.i.h.bf16 %v4737_v61  ;;  %v2890_v11 = vunpack.i.l.bf16 %v4737_v61  ;;  %v1907_v23 = vsel %vm1886_vm4, %v1874_v31, %v2865_v30 }
 0x108   : > { %v1908_v19 = vsel %vm1886_vm4, %v1875_v37, %v2866_v32  ;;  %v2886_v54 = vunpack.i.h.bf16 %v2884_v21  ;;  %v2885_v53 = vunpack.i.l.bf16 %v2884_v21  ;;  %v1924_v15 = vsel %vm1919_vm5, %v1891_v44, %v2880_v38  ;;  %v2904_v8 = vpop.permute.xlu0 %2903 }
 0x109   : > { %3183 = vrot.lane.b32.xlu0 %v3182_v46, %s3307_s26  ;;  %v1925_v34 = vsel %vm1919_vm5, %v1892_v20, %v2881_v42  ;;  %v2901_v43 = vunpack.i.h.bf16 %v2899_v3  ;;  %v2900_v63 = vunpack.i.l.bf16 %v2899_v3  ;;  %v2896_v45 = vunpack.i.h.bf16 %v2894_v48 }
 0x10a   : > { %v2895_v26 = vunpack.i.l.bf16 %v2894_v48  ;;  %v2911_v5 = vunpack.i.h.bf16 %v2909_v1  ;;  %v2910_v16 = vunpack.i.l.bf16 %v2909_v1  ;;  %v1940_v61 = vsel %vm1919_vm5, %v1907_v23, %v2875_v14 }
 0x10b   : > { %3198 = vrot.lane.b32.xlu1 %v3197_v12, %s3308_s27  ;;  %v1941_v60 = vsel %vm1919_vm5, %v1908_v19, %v2876_v36  ;;  %v1957_v46 = vsel %vm1952_vm6, %v1924_v15, %v2890_v11  ;;  %v1958_v31 = vsel %vm1952_vm6, %v1925_v34, %v2891_v33  ;;  %v1973_v37 = vsel %vm1952_vm6, %v1940_v61, %v2885_v53  ;;  %v2919_v12 = vpop.permute.xlu1 %2918  ;;  %v5281_v15 = vld [vmem:[#allocation22_spill] sm:$0xff] }
 0x10c   : > { %v1974_v49 = vsel %vm1952_vm6, %v1941_v60, %v2886_v54  ;;  %v2906_v62 = vunpack.i.h.bf16 %v2904_v8  ;;  %v2905_v7 = vunpack.i.l.bf16 %v2904_v8  ;;  %v1990_v21 = vsel %vm1985_vm7, %v1957_v46, %v2900_v63  ;;  %v2914_v20 = vpop.permute.xlu0 %2913  ;;  %v3262_v8 = vld [vmem:[%s3362_s23 + $0x48] sm:$0xff]  ;;  %v3263_v60 = vld [vmem:[%s3362_s23 + $0x110] sm:$0xff] }
 0x10d   : > { %3193 = vrot.lane.b32.xlu0 %v3192_v24, %s3308_s27  ;;  %v1991_v57 = vsel %vm1985_vm7, %v1958_v31, %v2901_v43  ;;  %v2921_v32 = vunpack.i.h.bf16 %v2919_v12  ;;  %v2920_v30 = vunpack.i.l.bf16 %v2919_v12  ;;  %v2006_v3 = vsel %vm1985_vm7, %v1973_v37, %v2895_v26  ;;  %v3264_v31 = vld [vmem:[%s3362_s23 + $0x108] sm:$0xff] }
 0x10e   : > { %v2007_v42 = vsel %vm1985_vm7, %v1974_v49, %v2896_v45  ;;  %v2023_v38 = vsel %vm2018_vm8, %v1990_v21, %v2910_v16  ;;  %v2024_v44 = vsel %vm2018_vm8, %v1991_v57, %v2911_v5  ;;  %v2916_v24 = vunpack.i.h.bf16 %v2914_v20  ;;  %v3261_v5 = vld [vmem:[%s3362_s23 + $0x50] sm:$0xff] }
 0x10f   : > { %3208 = vrot.lane.b32.xlu1 %v3207_v25, %s3309_s28  ;;  %v2056_v2 = vsel %vm2051_vm9, %v2023_v38, %v2920_v30  ;;  %v2057_v40 = vsel %vm2051_vm9, %v2024_v44, %v2921_v32  ;;  %v2915_v48 = vunpack.i.l.bf16 %v2914_v20  ;;  %v2039_v36 = vsel %vm2018_vm8, %v2006_v3, %v2905_v7  ;;  %v2929_v33 = vpop.permute.xlu1 %2928 }
 0x110   : > { %v2040_v14 = vsel %vm2018_vm8, %v2007_v42, %v2906_v62  ;;  %v969_v17 = vsel %vm474_vm0, %v967_v52, %v968_v6  ;;  %v971_v18 = vsel %vm474_vm0, %v968_v6, %v970_v28  ;;  %v2536_v25 = vpack.c.bf16 %v2057_v40, %v2056_v2  ;;  %v2924_v53 = vpop.permute.xlu0 %2923 }
 0x111   : > { %3203 = vrot.lane.b32.xlu0 %v3202_v10, %s3309_s28  ;;  %v2072_v11 = vsel %vm2051_vm9, %v2039_v36, %v2915_v48  ;;  %v2073_v23 = vsel %vm2051_vm9, %v2040_v14, %v2916_v24  ;;  %v1050_v19 = vrot.slane %v4765_v41, 2  ;;  %v3227_v55 = vpack.i.bf16 %v4788_v9, %v4780_v0  ;;  %v5280_v9 = vld [vmem:[#allocation13_spill] sm:$0xff] }
 0x112   : > { %v2533_v54 = vpack.c.bf16 %v2073_v23, %v2072_v11  ;;  %v1009_v56 = vsel %vm555_vm1, %v1007_v27, %v1008_v51  ;;  %v1011_v10 = vsel %vm555_vm1, %v1008_v51, %v1010_v13  ;;  %v3222_v41 = vpack.i.bf16 %v971_v18, %v969_v17  ;;  %v4871_v51 = vld [vmem:[%s5150_s1] sm:$0xff] }
 0x113   : > { %3218 = vrot.lane.b32.xlu1 %v3217_v50, %s3310_s29  ;;  %v2939_v50 = vpop.permute.xlu1 %2938  ;;  %v1049_v59 = vsel %vm555_vm1, %v1047_v39, %v1048_v22  ;;  %v1051_v29 = vsel %vm555_vm1, %v1048_v22, %v1050_v19  ;;  %v3237_v6 = vpack.i.bf16 %v1011_v10, %v1009_v56  ;;  %2519 = vmatprep.mubr.msk.f32.mxu0 %vm2085_vm10, %v4871_v51  ;;  %v2661_v22 = vunpack.i.h.bf16 %v5279_v58 }
 0x114   : > { %2535 = vmatprep.subr.msk.bf16.mxu0 %vm4413_vm11, %v2533_v54  ;;  %v2934_v27 = vpop.permute.xlu0 %2933  ;;  %v2660_v39 = vunpack.i.l.bf16 %v5279_v58  ;;  %v3232_v28 = vpack.i.bf16 %v1051_v29, %v1049_v59  ;;  %v2701_v13 = vunpack.i.h.bf16 %v5280_v9  ;;  %v2700_v1 = vunpack.i.l.bf16 %v5280_v9 }
 0x115   : > { %3213 = vrot.lane.b32.xlu0 %v3212_v35, %s3310_s29  ;;  %2538 = vmatpush3.bf16.xpose.msk.msra.mxu0 %vm4413_vm11, %v2536_v25  ;;  %v5278_v35 = vld [vmem:[#allocation5_spill] sm:$0xff]  ;;  %v2741_v34 = vunpack.i.h.bf16 %v5281_v15  ;;  %v2740_v43 = vunpack.i.l.bf16 %v5281_v15  ;;  %v2931_v63 = vunpack.i.h.bf16 %v2929_v33  ;;  %v2930_v45 = vunpack.i.l.bf16 %v2929_v33 }
 0x116   : > { %v2621_v47 = vunpack.i.h.bf16 %v5278_v35  ;;  %v2620_v52 = vunpack.i.l.bf16 %v5278_v35  ;;  %v1844_v46 = vsel %vm1820_vm2, %v3263_v60, %v2661_v22  ;;  %v1843_v37 = vsel %vm1820_vm2, %v3264_v31, %v2660_v39 }
 0x117   : > { %3228 = vrot.lane.b32.xlu1 %v3227_v55, %s3311_s30  ;;  %v2949_v0 = vpop.permute.xlu1 %2948  ;;  %v2926_v49 = vunpack.i.h.bf16 %v2924_v53  ;;  %v2925_v62 = vunpack.i.l.bf16 %v2924_v53  ;;  %v2941_v57 = vunpack.i.h.bf16 %v2939_v50  ;;  %v2940_v32 = vunpack.i.l.bf16 %v2939_v50 }
 0x118   : > { %v2944_v26 = vpop.permute.xlu0 %2943  ;;  %v1828_v16 = vsel %vm1820_vm2, %v3261_v5, %v2621_v47  ;;  %v1827_v61 = vsel %vm1820_vm2, %v3262_v8, %v2620_v52  ;;  %v1877_v30 = vsel %vm1853_vm3, %v1844_v46, %v2741_v34  ;;  %v1876_v3 = vsel %vm1853_vm3, %v1843_v37, %v2740_v43 }
 0x119   : > { %3223 = vrot.lane.b32.xlu0 %v3222_v41, %s3311_s30  ;;  %v1861_v12 = vsel %vm1853_vm3, %v1828_v16, %v2701_v13  ;;  %v1860_v21 = vsel %vm1853_vm3, %v1827_v61, %v2700_v1  ;;  %v2936_v20 = vunpack.i.h.bf16 %v2934_v27  ;;  %v2935_v2 = vunpack.i.l.bf16 %v2934_v27 }
 0x11a   : > { %v1893_v42 = vsel %vm1886_vm4, %v1860_v21, %v2930_v45  ;;  %v1894_v38 = vsel %vm1886_vm4, %v1861_v12, %v2931_v63  ;;  %v2951_v40 = vunpack.i.h.bf16 %v2949_v0  ;;  %v2950_v24 = vunpack.i.l.bf16 %v2949_v0 }
 0x11b   : > { %3238 = vrot.lane.b32.xlu1 %v3237_v6, %s3312_s5  ;;  %v2959_v7 = vpop.permute.xlu1 %2958  ;;  %v1910_v48 = vsel %vm1886_vm4, %v1877_v30, %v2926_v49  ;;  %v1909_v36 = vsel %vm1886_vm4, %v1876_v3, %v2925_v62  ;;  %v2946_v14 = vunpack.i.h.bf16 %v2944_v26  ;;  %v2945_v33 = vunpack.i.l.bf16 %v2944_v26  ;;  %v5282_v62 = vld [vmem:[#allocation3_spill] sm:$0xff] }
 0x11c   : > { %v2954_v44 = vpop.permute.xlu0 %2953  ;;  %v1926_v18 = vsel %vm1919_vm5, %v1893_v42, %v2940_v32  ;;  %v1927_v25 = vsel %vm1919_vm5, %v1894_v38, %v2941_v57  ;;  %v2961_v11 = vunpack.i.h.bf16 %v2959_v7  ;;  %v2960_v23 = vunpack.i.l.bf16 %v2959_v7  ;;  %v5283_v30 = vld [vmem:[#allocation7_spill] sm:$0xff] }
 0x11d   : > { %3233 = vrot.lane.b32.xlu0 %v3232_v28, %s3312_s5  ;;  %v2956_v19 = vunpack.i.h.bf16 %v2954_v44  ;;  %v2955_v54 = vunpack.i.l.bf16 %v2954_v44  ;;  %v1942_v10 = vsel %vm1919_vm5, %v1909_v36, %v2935_v2  ;;  %v1943_v50 = vsel %vm1919_vm5, %v1910_v48, %v2936_v20  ;;  %v3265_v44 = vld [vmem:[%s3362_s23 + $0x120] sm:$0xff]  ;;  %v5284_v2 = vld [vmem:[#allocation16_spill] sm:$0xff]  ;;  %v3266_v48 = vld [vmem:[%s3362_s23 + $0x128] sm:$0xff] }
 0x11e   : > { %v1959_v41 = vsel %vm1952_vm6, %v1926_v18, %v2950_v24  ;;  %v1960_v59 = vsel %vm1952_vm6, %v1927_v25, %v2951_v40  ;;  %v1975_v29 = vsel %vm1952_vm6, %v1942_v10, %v2945_v33  ;;  %v1976_v27 = vsel %vm1952_vm6, %v1943_v50, %v2946_v14 }
 0x11f   : > { %v2969_v17 = vpop.permute.xlu1 %2968  ;;  %v1992_v52 = vsel %vm1985_vm7, %v1959_v41, %v2960_v23  ;;  %v1993_v58 = vsel %vm1985_vm7, %v1960_v59, %v2961_v11  ;;  %v2008_v0 = vsel %vm1985_vm7, %v1975_v29, %v2955_v54  ;;  %v2009_v28 = vsel %vm1985_vm7, %v1976_v27, %v2956_v19  ;;  %v3267_v54 = vld [vmem:[%s3362_s23 + $0x68] sm:$0xff] }
 0x120   : > { %v2971_v53 = vunpack.i.h.bf16 %v2969_v17  ;;  %v2970_v55 = vunpack.i.l.bf16 %v2969_v17  ;;  %v2964_v56 = vpop.permute.xlu0 %2963  ;;  %v2665_v7 = vunpack.i.l.bf16 %v5282_v62  ;;  %v2666_v12 = vunpack.i.h.bf16 %v5282_v62 }
 0x121   : > { %v2966_v6 = vunpack.i.h.bf16 %v2964_v56  ;;  %v2965_v35 = vunpack.i.l.bf16 %v2964_v56  ;;  %v2626_v3 = vunpack.i.h.bf16 %v5283_v30  ;;  %v2625_v42 = vunpack.i.l.bf16 %v5283_v30 }
 0x122   : > { %v2025_v9 = vsel %vm2018_vm8, %v1992_v52, %v2970_v55  ;;  %v2026_v13 = vsel %vm2018_vm8, %v1993_v58, %v2971_v53  ;;  %v1845_v20 = vsel %vm1820_vm2, %v3265_v44, %v2665_v7  ;;  %v2706_v40 = vunpack.i.h.bf16 %v5284_v2  ;;  %v3268_v55 = vld [vmem:[%s3362_s23 + $0x60] sm:$0xff] }
 0x123   : > { %v2979_v47 = vpop.permute.xlu1 %2978  ;;  %v2041_v45 = vsel %vm2018_vm8, %v2008_v0, %v2965_v35  ;;  %v2042_v26 = vsel %vm2018_vm8, %v2009_v28, %v2966_v6  ;;  %v2705_v24 = vunpack.i.l.bf16 %v5284_v2  ;;  %v1846_v36 = vsel %vm1820_vm2, %v3266_v48, %v2666_v12 }
 0x124   : > { %v2981_v22 = vunpack.i.h.bf16 %v2979_v47  ;;  %v2980_v39 = vunpack.i.l.bf16 %v2979_v47  ;;  %v2974_v1 = vpop.permute.xlu0 %2973  ;;  %v1830_v53 = vsel %vm1820_vm2, %v3267_v54, %v2626_v3  ;;  %v1829_v56 = vsel %vm1820_vm2, %v3268_v55, %v2625_v42  ;;  %v5286_v55 = vld [vmem:[#allocation2_spill] sm:$0xff] }
 0x125   : > { %v2976_v43 = vunpack.i.h.bf16 %v2974_v1  ;;  %v2975_v63 = vunpack.i.l.bf16 %v2974_v1  ;;  %v1862_v59 = vsel %vm1853_vm3, %v1829_v56, %v2705_v24  ;;  %v1863_v29 = vsel %vm1853_vm3, %v1830_v53, %v2706_v40 }
 0x126   : > { %v2058_v15 = vsel %vm2051_vm9, %v2025_v9, %v2980_v39  ;;  %v2059_v34 = vsel %vm2051_vm9, %v2026_v13, %v2981_v22  ;;  %v2671_v56 = vunpack.i.h.bf16 %v5286_v55 }
 0x127   : > { %v2989_v5 = vpop.permute.xlu1 %2988  ;;  %v2542_v16 = vpack.c.bf16 %v2059_v34, %v2058_v15  ;;  %v2074_v8 = vsel %vm2051_vm9, %v2041_v45, %v2975_v63  ;;  %v2075_v61 = vsel %vm2051_vm9, %v2042_v26, %v2976_v43 }
 0x128   : > { %v2539_v60 = vpack.c.bf16 %v2075_v61, %v2074_v8  ;;  %v2984_v46 = vpop.permute.xlu0 %2983  ;;  %v2991_v14 = vunpack.i.h.bf16 %v2989_v5  ;;  %v2990_v33 = vunpack.i.l.bf16 %v2989_v5 }
 0x129   : > { %v2985_v21 = vunpack.i.l.bf16 %v2984_v46  ;;  %v2986_v32 = vunpack.i.h.bf16 %v2984_v46 }
 0x12a   : > { %2541 = vmatprep.subr.msk.bf16.mxu0 %vm4413_vm11, %v2539_v60 }
 0x12b   : > { %v2999_v31 = vpop.permute.xlu1 %2998  ;;  %2544 = vmatpush3.bf16.xpose.msk.msra.mxu0 %vm4413_vm11, %v2542_v16  ;;  %v1878_v17 = vsel %vm1853_vm3, %v1845_v20, %v2985_v21  ;;  %v1879_v25 = vsel %vm1853_vm3, %v1846_v36, %v2986_v32 }
 0x12c   : > { %v4927_v37 = vpop.permute.xlu0 %2993  ;;  %v3001_v11 = vunpack.i.h.bf16 %v2999_v31  ;;  %v3000_v23 = vunpack.i.l.bf16 %v2999_v31  ;;  %v1911_v35 = vsel %vm1886_vm4, %v1878_v17, %v2990_v33  ;;  %v1912_v47 = vsel %vm1886_vm4, %v1879_v25, %v2991_v14 }
 0x12d   : > { %v2995_v19 = vunpack.i.l.bf16 %v4927_v37  ;;  %v2996_v28 = vunpack.i.h.bf16 %v4927_v37 }
 0x12e   : > { %v1944_v39 = vsel %vm1919_vm5, %v1911_v35, %v3000_v23  ;;  %v1945_v0 = vsel %vm1919_vm5, %v1912_v47, %v3001_v11 }
 0x12f   : > { %v3009_v49 = vpop.permute.xlu1 %3008  ;;  %v1895_v9 = vsel %vm1886_vm4, %v1862_v59, %v2995_v19  ;;  %v1896_v7 = vsel %vm1886_vm4, %v1863_v29, %v2996_v28  ;;  %v5285_v19 = vld [vmem:[#allocation6_spill] sm:$0xff] }
 0x130   : > { %v4931_v57 = vpop.permute.xlu0 %3003  ;;  %v3011_v10 = vunpack.i.h.bf16 %v3009_v49  ;;  %v3010_v50 = vunpack.i.l.bf16 %v3009_v49  ;;  %v2631_v54 = vunpack.i.h.bf16 %v5285_v19  ;;  %v2630_v53 = vunpack.i.l.bf16 %v5285_v19  ;;  %v3271_v28 = vld [vmem:[%s3362_s23 + $0x140] sm:$0xff] }
 0x131   : > { %v3006_v15 = vunpack.i.h.bf16 %v4931_v57  ;;  %v3005_v34 = vunpack.i.l.bf16 %v4931_v57 }
 0x132   : > { %v1977_v13 = vsel %vm1952_vm6, %v1944_v39, %v3010_v50  ;;  %v1978_v1 = vsel %vm1952_vm6, %v1945_v0, %v3011_v10  ;;  %v2670_v10 = vunpack.i.l.bf16 %v5286_v55  ;;  %v3270_v39 = vld [vmem:[%s3362_s23 + $0x78] sm:$0xff] }
 0x133   : > { %v3019_v38 = vpop.permute.xlu1 %3018  ;;  %v1928_v30 = vsel %vm1919_vm5, %v1895_v9, %v3005_v34  ;;  %v1929_v3 = vsel %vm1919_vm5, %v1896_v7, %v3006_v15  ;;  %v1831_v0 = vsel %vm1820_vm2, %v3270_v39, %v2630_v53  ;;  %v1848_v9 = vsel %vm1820_vm2, %v3271_v28, %v2671_v56 }
 0x134   : > { %v3014_v18 = vpop.permute.xlu0 %3013  ;;  %v3021_v27 = vunpack.i.h.bf16 %v3019_v38  ;;  %v3020_v6 = vunpack.i.l.bf16 %v3019_v38 }
 0x135   : > { %v3016_v16 = vunpack.i.h.bf16 %v3014_v18  ;;  %v3015_v8 = vunpack.i.l.bf16 %v3014_v18 }
 0x136   : > { %v2010_v63 = vsel %vm1985_vm7, %v1977_v13, %v3020_v6  ;;  %v2011_v45 = vsel %vm1985_vm7, %v1978_v1, %v3021_v27  ;;  %v3272_v13 = vld [vmem:[%s3362_s23 + $0x138] sm:$0xff] }
 0x137   : > { %v3029_v41 = vpop.permute.xlu1 %3028  ;;  %v1961_v42 = vsel %vm1952_vm6, %v1928_v30, %v3015_v8  ;;  %v1962_v38 = vsel %vm1952_vm6, %v1929_v3, %v3016_v16  ;;  %v1847_v1 = vsel %vm1820_vm2, %v3272_v13, %v2670_v10 }
 0x138   : > { %v3031_v52 = vunpack.i.h.bf16 %v3029_v41  ;;  %v3030_v58 = vunpack.i.l.bf16 %v3029_v41  ;;  %v3024_v22 = vpop.permute.xlu0 %3023  ;;  %v5287_v41 = vld [vmem:[#allocation15_spill] sm:$0xff] }
 0x139   : > { %v3026_v31 = vunpack.i.h.bf16 %v3024_v22  ;;  %v3025_v37 = vunpack.i.l.bf16 %v3024_v22  ;;  %v2711_v59 = vunpack.i.h.bf16 %v5287_v41  ;;  %v2710_v29 = vunpack.i.l.bf16 %v5287_v41 }
 0x13a   : > { %v2043_v61 = vsel %vm2018_vm8, %v2010_v63, %v3030_v58  ;;  %v2044_v60 = vsel %vm2018_vm8, %v2011_v45, %v3031_v52  ;;  %v3269_v58 = vld [vmem:[%s3362_s23 + $0x80] sm:$0xff] }
 0x13b   : > { %v3039_v43 = vpop.permute.xlu1 %3038  ;;  %v1994_v20 = vsel %vm1985_vm7, %v1961_v42, %v3025_v37  ;;  %v1995_v2 = vsel %vm1985_vm7, %v1962_v38, %v3026_v31  ;;  %v1832_v22 = vsel %vm1820_vm2, %v3269_v58, %v2631_v54  ;;  %v1864_v45 = vsel %vm1853_vm3, %v1831_v0, %v2710_v29 }
 0x13c   : > { %v3041_v26 = vunpack.i.h.bf16 %v3039_v43  ;;  %v3040_v5 = vunpack.i.l.bf16 %v3039_v43  ;;  %v3034_v46 = vpop.permute.xlu0 %3033  ;;  %v1865_v63 = vsel %vm1853_vm3, %v1832_v22, %v2711_v59 }
 0x13d   : > { %v3036_v21 = vunpack.i.h.bf16 %v3034_v46  ;;  %v3035_v57 = vunpack.i.l.bf16 %v3034_v46 }
 0x13e   : > { %v2076_v49 = vsel %vm2051_vm9, %v2043_v61, %v3040_v5  ;;  %v2077_v62 = vsel %vm2051_vm9, %v2044_v60, %v3041_v26 }
 0x13f   : > { %v2545_v12 = vpack.c.bf16 %v2077_v62, %v2076_v49  ;;  %v3049_v32 = vpop.permute.xlu1 %3048  ;;  %v2027_v48 = vsel %vm2018_vm8, %v1994_v20, %v3035_v57  ;;  %v2028_v36 = vsel %vm2018_vm8, %v1995_v2, %v3036_v21 }
 0x140   : > { %v3044_v44 = vpop.permute.xlu0 %3043  ;;  %v3051_v27 = vunpack.i.h.bf16 %v3049_v32  ;;  %v3050_v6 = vunpack.i.l.bf16 %v3049_v32 }
 0x141   : > { %2547 = vmatprep.subr.msk.bf16.mxu0 %vm4413_vm11, %v2545_v12  ;;  %v3046_v40 = vunpack.i.h.bf16 %v3044_v44  ;;  %v3045_v24 = vunpack.i.l.bf16 %v3044_v44 }
 0x142   : > { %v1881_v16 = vsel %vm1853_vm3, %v1848_v9, %v3051_v27  ;;  %v1880_v8 = vsel %vm1853_vm3, %v1847_v1, %v3050_v6 }
 0x143   : > { %v3059_v14 = vpop.permute.xlu1 %3058  ;;  %v2060_v33 = vsel %vm2051_vm9, %v2027_v48, %v3045_v24  ;;  %v2061_v17 = vsel %vm2051_vm9, %v2028_v36, %v3046_v40 }
 0x144   : > { %v2548_v18 = vpack.c.bf16 %v2061_v17, %v2060_v33  ;;  %v3054_v25 = vpop.permute.xlu0 %3053  ;;  %v3061_v35 = vunpack.i.h.bf16 %v3059_v14  ;;  %v3060_v47 = vunpack.i.l.bf16 %v3059_v14 }
 0x145   : > { %v3056_v15 = vunpack.i.h.bf16 %v3054_v25  ;;  %v3055_v34 = vunpack.i.l.bf16 %v3054_v25 }
 0x146   : > { %2550 = vmatpush3.bf16.xpose.msk.msra.mxu0 %vm4413_vm11, %v2548_v18  ;;  %v1897_v61 = vsel %vm1886_vm4, %v1864_v45, %v3060_v47  ;;  %v1898_v60 = vsel %vm1886_vm4, %v1865_v63, %v3061_v35 }
 0x147   : > { %v3069_v11 = vpop.permute.xlu1 %3068  ;;  %v1914_v7 = vsel %vm1886_vm4, %v1881_v16, %v3056_v15  ;;  %v1913_v12 = vsel %vm1886_vm4, %v1880_v8, %v3055_v34  ;;  %v5288_v34 = vld [vmem:[#allocation12_spill] sm:$0xff]  ;;  %v5289_v16 = vld [vmem:[#allocation9_spill] sm:$0xff] }
 0x148   : > { %v3064_v23 = vpop.permute.xlu0 %3063  ;;  %v3071_v26 = vunpack.i.h.bf16 %v3069_v11  ;;  %v3070_v5 = vunpack.i.l.bf16 %v3069_v11  ;;  %v2676_v63 = vunpack.i.h.bf16 %v5288_v34  ;;  %v2636_v8 = vunpack.i.h.bf16 %v5289_v16 }
 0x149   : > { %v3066_v31 = vunpack.i.h.bf16 %v3064_v23  ;;  %v3065_v37 = vunpack.i.l.bf16 %v3064_v23 }
 0x14a   : > { %v1930_v30 = vsel %vm1919_vm5, %v1897_v61, %v3070_v5  ;;  %v1931_v3 = vsel %vm1919_vm5, %v1898_v60, %v3071_v26  ;;  %v2635_v61 = vunpack.i.l.bf16 %v5289_v16 }
 0x14b   : > { %v3079_v50 = vpop.permute.xlu1 %3078  ;;  %v1946_v48 = vsel %vm1919_vm5, %v1913_v12, %v3065_v37  ;;  %v1947_v36 = vsel %vm1919_vm5, %v1914_v7, %v3066_v31  ;;  %v5290_v37 = vld [vmem:[#allocation18_spill] sm:$0xff]  ;;  %v3274_v7 = vld [vmem:[%s3362_s23 + $0x158] sm:$0xff] }
 0x14c   : > { %v3074_v52 = vpop.permute.xlu0 %3073  ;;  %v3081_v49 = vunpack.i.h.bf16 %v3079_v50  ;;  %v3080_v62 = vunpack.i.l.bf16 %v3079_v50  ;;  %v1850_v12 = vsel %vm1820_vm2, %v3274_v7, %v2676_v63 }
 0x14d   : > { %v3076_v21 = vunpack.i.h.bf16 %v3074_v52  ;;  %v3075_v57 = vunpack.i.l.bf16 %v3074_v52 }
 0x14e   : > { %v1963_v14 = vsel %vm1952_vm6, %v1930_v30, %v3080_v62  ;;  %v1964_v33 = vsel %vm1952_vm6, %v1931_v3, %v3081_v49  ;;  %v2716_v49 = vunpack.i.h.bf16 %v5290_v37  ;;  %v2715_v62 = vunpack.i.l.bf16 %v5290_v37 }
 0x14f   : > { %v3089_v43 = vpop.permute.xlu1 %3088  ;;  %v1979_v17 = vsel %vm1952_vm6, %v1946_v48, %v3075_v57  ;;  %v1980_v18 = vsel %vm1952_vm6, %v1947_v36, %v3076_v21 }
 0x150   : > { %v3084_v46 = vpop.permute.xlu0 %3083  ;;  %v3091_v42 = vunpack.i.h.bf16 %v3089_v43  ;;  %v3090_v38 = vunpack.i.l.bf16 %v3089_v43  ;;  %v2675_v43 = vunpack.i.l.bf16 %v5288_v34 }
 0x151   : > { %v3086_v44 = vunpack.i.h.bf16 %v3084_v46  ;;  %v3085_v20 = vunpack.i.l.bf16 %v3084_v46  ;;  %v3273_v46 = vld [vmem:[%s3362_s23 + $0x150] sm:$0xff] }
 0x152   : > { %v1996_v19 = vsel %vm1985_vm7, %v1963_v14, %v3090_v38  ;;  %v1997_v54 = vsel %vm1985_vm7, %v1964_v33, %v3091_v42  ;;  %v1849_v31 = vsel %vm1820_vm2, %v3273_v46, %v2675_v43 }
 0x153   : > { %v3099_v32 = vpop.permute.xlu1 %3098  ;;  %v2012_v56 = vsel %vm1985_vm7, %v1979_v17, %v3085_v20  ;;  %v2013_v10 = vsel %vm1985_vm7, %v1980_v18, %v3086_v44  ;;  %v3275_v20 = vld [vmem:[%s3362_s23 + $0x98] sm:$0xff] }
 0x154   : > { %v3101_v2 = vunpack.i.h.bf16 %v3099_v32  ;;  %v3100_v40 = vunpack.i.l.bf16 %v3099_v32  ;;  %v3094_v24 = vpop.permute.xlu0 %3093 }
 0x155   : > { %v3096_v25 = vunpack.i.h.bf16 %v3094_v24  ;;  %v3095_v11 = vunpack.i.l.bf16 %v3094_v24 }
 0x156   : > { %v2029_v50 = vsel %vm2018_vm8, %v1996_v19, %v3100_v40  ;;  %v2030_v41 = vsel %vm2018_vm8, %v1997_v54, %v3101_v2  ;;  %v1834_v2 = vsel %vm1820_vm2, %v3275_v20, %v2636_v8  ;;  %v3276_v40 = vld [vmem:[%s3362_s23 + $0x90] sm:$0xff] }
 0x157   : > { %v3109_v23 = vpop.permute.xlu1 %3108  ;;  %v2045_v47 = vsel %vm2018_vm8, %v2012_v56, %v3095_v11  ;;  %v2046_v52 = vsel %vm2018_vm8, %v2013_v10, %v3096_v25  ;;  %v1833_v24 = vsel %vm1820_vm2, %v3276_v40, %v2635_v61  ;;  %v1867_v17 = vsel %vm1853_vm3, %v1834_v2, %v2716_v49  ;;  %v5292_v40 = vld [vmem:[#allocation11_spill] sm:$0xff] }
 0x158   : > { %v3111_v53 = vunpack.i.h.bf16 %v3109_v23  ;;  %v3110_v55 = vunpack.i.l.bf16 %v3109_v23  ;;  %v1866_v33 = vsel %vm1853_vm3, %v1833_v24, %v2715_v62  ;;  %v2681_v24 = vunpack.i.h.bf16 %v5292_v40 }
 0x159   : > { %v3104_v59 = vpop.permute.xlu0 %3103 }
 0x15a   : > { %v2062_v29 = vsel %vm2051_vm9, %v2029_v50, %v3110_v55  ;;  %v2063_v27 = vsel %vm2051_vm9, %v2030_v41, %v3111_v53  ;;  %v3106_v6 = vunpack.i.h.bf16 %v3104_v59  ;;  %v3105_v35 = vunpack.i.l.bf16 %v3104_v59 }
 0x15b   : > { %v3119_v58 = vpop.permute.xlu1 %3118  ;;  %v2554_v22 = vpack.c.bf16 %v2063_v27, %v2062_v29 }
 0x15c   : > { %v2078_v39 = vsel %vm2051_vm9, %v2045_v47, %v3105_v35  ;;  %v2079_v0 = vsel %vm2051_vm9, %v2046_v52, %v3106_v6  ;;  %v3121_v21 = vunpack.i.h.bf16 %v3119_v58  ;;  %v3120_v57 = vunpack.i.l.bf16 %v3119_v58 }
 0x15d   : > { %v2551_v28 = vpack.c.bf16 %v2079_v0, %v2078_v39  ;;  %v3114_v9 = vpop.permute.xlu0 %3113 }
 0x15e   : > { %v3115_v45 = vunpack.i.l.bf16 %v3114_v9  ;;  %v3116_v5 = vunpack.i.h.bf16 %v3114_v9 }
 0x15f   : > { %2553 = vmatprep.subr.msk.bf16.mxu0 %vm4413_vm11, %v2551_v28  ;;  %v3129_v13 = vpop.permute.xlu1 %3128 }
 0x160   : > { %2556 = vmatpush3.bf16.xpose.msk.msra.mxu0 %vm4413_vm11, %v2554_v22  ;;  %v1882_v32 = vsel %vm1853_vm3, %v1849_v31, %v3115_v45  ;;  %v1883_v3 = vsel %vm1853_vm3, %v1850_v12, %v3116_v5  ;;  %v3131_v42 = vunpack.i.h.bf16 %v3129_v13  ;;  %v3130_v38 = vunpack.i.l.bf16 %v3129_v13 }
 0x161   : > { %v5027_v1 = vpop.permute.xlu0 %3123  ;;  %v1915_v11 = vsel %vm1886_vm4, %v1882_v32, %v3120_v57  ;;  %v1916_v23 = vsel %vm1886_vm4, %v1883_v3, %v3121_v21 }
 0x162   : > { %v3125_v44 = vunpack.i.l.bf16 %v5027_v1  ;;  %v1948_v55 = vsel %vm1919_vm5, %v1915_v11, %v3130_v38  ;;  %v1949_v56 = vsel %vm1919_vm5, %v1916_v23, %v3131_v42  ;;  %v3126_v10 = vunpack.i.h.bf16 %v5027_v1 }
 0x163   : > { %v3139_v15 = vpop.permute.xlu1 %3138 }
 0x164   : > { %v3141_v48 = vunpack.i.h.bf16 %v3139_v15  ;;  %v3140_v36 = vunpack.i.l.bf16 %v3139_v15  ;;  %v1899_v50 = vsel %vm1886_vm4, %v1866_v33, %v3125_v44  ;;  %v1900_v43 = vsel %vm1886_vm4, %v1867_v17, %v3126_v10  ;;  %v5291_v44 = vld [vmem:[#allocation8_spill] sm:$0xff] }
 0x165   : > { %v5031_v26 = vpop.permute.xlu0 %3133  ;;  %v2641_v20 = vunpack.i.h.bf16 %v5291_v44  ;;  %v2640_v2 = vunpack.i.l.bf16 %v5291_v44  ;;  %v3279_v10 = vld [vmem:[%s3362_s23 + $0x170] sm:$0xff] }
 0x166   : > { %v1981_v41 = vsel %vm1952_vm6, %v1948_v55, %v3140_v36  ;;  %v1982_v59 = vsel %vm1952_vm6, %v1949_v56, %v3141_v48  ;;  %v3136_v29 = vunpack.i.h.bf16 %v5031_v26  ;;  %v3135_v27 = vunpack.i.l.bf16 %v5031_v26  ;;  %v3278_v55 = vld [vmem:[%s3362_s23 + $0xa8] sm:$0xff] }
 0x167   : > { %v3149_v60 = vpop.permute.xlu1 %3148  ;;  %v2680_v48 = vunpack.i.l.bf16 %v5292_v40  ;;  %v1835_v56 = vsel %vm1820_vm2, %v3278_v55, %v2640_v2 }
 0x168   : > { %v3151_v18 = vunpack.i.h.bf16 %v3149_v60  ;;  %v3150_v25 = vunpack.i.l.bf16 %v3149_v60  ;;  %v1932_v16 = vsel %vm1919_vm5, %v1899_v50, %v3135_v27  ;;  %v1933_v8 = vsel %vm1919_vm5, %v1900_v43, %v3136_v29 }
 0x169   : > { %v3144_v30 = vpop.permute.xlu0 %3143  ;;  %v1852_v50 = vsel %vm1820_vm2, %v3279_v10, %v2681_v24 }
 0x16a   : > { %v2014_v35 = vsel %vm1985_vm7, %v1981_v41, %v3150_v25  ;;  %v2015_v47 = vsel %vm1985_vm7, %v1982_v59, %v3151_v18  ;;  %v3146_v22 = vunpack.i.h.bf16 %v3144_v30  ;;  %v3145_v39 = vunpack.i.l.bf16 %v3144_v30  ;;  %v3280_v41 = vld [vmem:[%s3362_s23 + $0x168] sm:$0xff] }
 0x16b   : > { %v3159_v14 = vpop.permute.xlu1 %3158  ;;  %v1851_v59 = vsel %vm1820_vm2, %v3280_v41, %v2680_v48 }
 0x16c   : > { %v3161_v19 = vunpack.i.h.bf16 %v3159_v14  ;;  %v3160_v54 = vunpack.i.l.bf16 %v3159_v14  ;;  %v1965_v61 = vsel %vm1952_vm6, %v1932_v16, %v3145_v39  ;;  %v1966_v60 = vsel %vm1952_vm6, %v1933_v8, %v3146_v22  ;;  %v5293_v14 = vld [vmem:[#allocation17_spill] sm:$0xff] }
 0x16d   : > { %v3154_v53 = vpop.permute.xlu0 %3153  ;;  %v2721_v33 = vunpack.i.h.bf16 %v5293_v14  ;;  %v2720_v17 = vunpack.i.l.bf16 %v5293_v14 }
 0x16e   : > { %v2047_v0 = vsel %vm2018_vm8, %v2014_v35, %v3160_v54  ;;  %v2048_v28 = vsel %vm2018_vm8, %v2015_v47, %v3161_v19  ;;  %v3156_v13 = vunpack.i.h.bf16 %v3154_v53  ;;  %v3155_v1 = vunpack.i.l.bf16 %v3154_v53  ;;  %v3277_v54 = vld [vmem:[%s3362_s23 + $0xb0] sm:$0xff] }
 0x16f   : > { %v1836_v53 = vsel %vm1820_vm2, %v3277_v54, %v2641_v20  ;;  %v1868_v47 = vsel %vm1853_vm3, %v1835_v56, %v2720_v17 }
 0x170   : > { %v1998_v31 = vsel %vm1985_vm7, %v1965_v61, %v3155_v1  ;;  %v1999_v37 = vsel %vm1985_vm7, %v1966_v60, %v3156_v13  ;;  %v1869_v35 = vsel %vm1853_vm3, %v1836_v53, %v2721_v33 }
 0x171   : > { %v3169_v6 = vpop.permute.xlu1 %3168 }
 0x172   : > { %v3171_v52 = vunpack.i.h.bf16 %v3169_v6  ;;  %v3170_v58 = vunpack.i.l.bf16 %v3169_v6 }
 0x173   : > { %v3164_v9 = vpop.permute.xlu0 %3163 }
 0x174   : > { %v2080_v15 = vsel %vm2051_vm9, %v2047_v0, %v3170_v58  ;;  %v2081_v34 = vsel %vm2051_vm9, %v2048_v28, %v3171_v52  ;;  %v3166_v45 = vunpack.i.h.bf16 %v3164_v9  ;;  %v3165_v26 = vunpack.i.l.bf16 %v3164_v9 }
 0x175   : > { %v2557_v63 = vpack.c.bf16 %v2081_v34, %v2080_v15  ;;  %v3179_v5 = vpop.permute.xlu1 %3178 }
 0x176   : > { %v2031_v7 = vsel %vm2018_vm8, %v1998_v31, %v3165_v26  ;;  %v2032_v12 = vsel %vm2018_vm8, %v1999_v37, %v3166_v45  ;;  %v3181_v18 = vunpack.i.h.bf16 %v3179_v5  ;;  %v3180_v25 = vunpack.i.l.bf16 %v3179_v5 }
 0x177   : > { %v3174_v46 = vpop.permute.xlu0 %3173  ;;  %2559 = vmatprep.subr.msk.bf16.mxu0 %vm4413_vm11, %v2557_v63 }
 0x178   : > { %v3176_v49 = vunpack.i.h.bf16 %v3174_v46  ;;  %v3175_v62 = vunpack.i.l.bf16 %v3174_v46  ;;  %v1885_v22 = vsel %vm1853_vm3, %v1852_v50, %v3181_v18  ;;  %v1884_v39 = vsel %vm1853_vm3, %v1851_v59, %v3180_v25 }
 0x179   : > { %v3189_v21 = vpop.permute.xlu1 %3188 }
 0x17a   : > { %v2064_v57 = vsel %vm2051_vm9, %v2031_v7, %v3175_v62  ;;  %v2065_v32 = vsel %vm2051_vm9, %v2032_v12, %v3176_v49  ;;  %v3191_v11 = vunpack.i.h.bf16 %v3189_v21  ;;  %v3190_v23 = vunpack.i.l.bf16 %v3189_v21 }
 0x17b   : > { %v2560_v30 = vpack.c.bf16 %v2065_v32, %v2064_v57  ;;  %v3184_v3 = vpop.permute.xlu0 %3183 }
 0x17c   : > { %v3186_v29 = vunpack.i.h.bf16 %v3184_v3  ;;  %v3185_v27 = vunpack.i.l.bf16 %v3184_v3  ;;  %v1901_v0 = vsel %vm1886_vm4, %v1868_v47, %v3190_v23  ;;  %v1902_v28 = vsel %vm1886_vm4, %v1869_v35, %v3191_v11 }
 0x17d   : > { %2562 = vmatpush3.bf16.xpose.msk.msra.mxu0 %vm4413_vm11, %v2560_v30  ;;  %v3199_v42 = vpop.permute.xlu1 %3198 }
 0x17e   : > { %v3201_v52 = vunpack.i.h.bf16 %v3199_v42  ;;  %v3200_v58 = vunpack.i.l.bf16 %v3199_v42  ;;  %v1918_v43 = vsel %vm1886_vm4, %v1885_v22, %v3186_v29  ;;  %v1917_v63 = vsel %vm1886_vm4, %v1884_v39, %v3185_v27 }
 0x17f   : > { %v3194_v38 = vpop.permute.xlu0 %3193 }
 0x180   : > { %v3196_v13 = vunpack.i.h.bf16 %v3194_v38  ;;  %v3195_v1 = vunpack.i.l.bf16 %v3194_v38  ;;  %v1934_v16 = vsel %vm1919_vm5, %v1901_v0, %v3200_v58  ;;  %v1935_v8 = vsel %vm1919_vm5, %v1902_v28, %v3201_v52 }
 0x181   : > { %v3209_v36 = vpop.permute.xlu1 %3208 }
 0x182   : > { %v3211_v15 = vunpack.i.h.bf16 %v3209_v36  ;;  %v3210_v34 = vunpack.i.l.bf16 %v3209_v36  ;;  %v1950_v7 = vsel %vm1919_vm5, %v1917_v63, %v3195_v1  ;;  %v1951_v12 = vsel %vm1919_vm5, %v1918_v43, %v3196_v13 }
 0x183   : > { %v3204_v19 = vpop.permute.xlu0 %3203 }
 0x184   : > { %v3206_v45 = vunpack.i.h.bf16 %v3204_v19  ;;  %v3205_v26 = vunpack.i.l.bf16 %v3204_v19  ;;  %v1967_v21 = vsel %vm1952_vm6, %v1934_v16, %v3210_v34  ;;  %v1968_v57 = vsel %vm1952_vm6, %v1935_v8, %v3211_v15 }
 0x185   : > { %v3219_v6 = vpop.permute.xlu1 %3218 }
 0x186   : > { %v3221_v61 = vunpack.i.h.bf16 %v3219_v6  ;;  %v3220_v60 = vunpack.i.l.bf16 %v3219_v6  ;;  %v1983_v32 = vsel %vm1952_vm6, %v1950_v7, %v3205_v26  ;;  %v1984_v30 = vsel %vm1952_vm6, %v1951_v12, %v3206_v45 }
 0x187   : > { %v3214_v9 = vpop.permute.xlu0 %3213 }
 0x188   : > { %v3216_v46 = vunpack.i.h.bf16 %v3214_v9  ;;  %v3215_v31 = vunpack.i.l.bf16 %v3214_v9  ;;  %v2000_v44 = vsel %vm1985_vm7, %v1967_v21, %v3220_v60  ;;  %v2001_v20 = vsel %vm1985_vm7, %v1968_v57, %v3221_v61 }
 0x189   : > { %v3229_v5 = vpop.permute.xlu1 %3228 }
 0x18a   : > { %v3231_v37 = vunpack.i.h.bf16 %v3229_v5  ;;  %v3230_v49 = vunpack.i.l.bf16 %v3229_v5  ;;  %v2016_v24 = vsel %vm1985_vm7, %v1983_v32, %v3215_v31  ;;  %v2017_v48 = vsel %vm1985_vm7, %v1984_v30, %v3216_v46 }
 0x18b   : > { %v3224_v62 = vpop.permute.xlu0 %3223 }
 0x18c   : > { %v3226_v3 = vunpack.i.h.bf16 %v3224_v62  ;;  %v3225_v42 = vunpack.i.l.bf16 %v3224_v62  ;;  %v2033_v36 = vsel %vm2018_vm8, %v2000_v44, %v3230_v49  ;;  %v2034_v14 = vsel %vm2018_vm8, %v2001_v20, %v3231_v37 }
 0x18d   : > { %v3239_v38 = vpop.permute.xlu1 %3238 }
 0x18e   : > { %v3241_v2 = vunpack.i.h.bf16 %v3239_v38  ;;  %v3240_v40 = vunpack.i.l.bf16 %v3239_v38  ;;  %v2049_v23 = vsel %vm2018_vm8, %v2016_v24, %v3225_v42  ;;  %v2050_v19 = vsel %vm2018_vm8, %v2017_v48, %v3226_v3 }
 0x18f   : > { %v3234_v33 = vpop.permute.xlu0 %3233 }
 0x190   : > { %v2066_v17 = vsel %vm2051_vm9, %v2033_v36, %v3240_v40  ;;  %v2067_v18 = vsel %vm2051_vm9, %v2034_v14, %v3241_v2  ;;  %v3236_v25 = vunpack.i.h.bf16 %v3234_v33  ;;  %v3235_v11 = vunpack.i.l.bf16 %v3234_v33 }
 0x191   : > { %v2566_v54 = vpack.c.bf16 %v2067_v18, %v2066_v17 }
 0x192   : > { %v2082_v53 = vsel %vm2051_vm9, %v2049_v23, %v3235_v11  ;;  %v2083_v55 = vsel %vm2051_vm9, %v2050_v19, %v3236_v25 }
 0x193   : > { %v2563_v56 = vpack.c.bf16 %v2083_v55, %v2082_v53 }
 0x195   : > { %2565 = vmatprep.subr.msk.bf16.mxu0 %vm4413_vm11, %v2563_v56 }
 0x196   : > { %2568 = vmatpush3.bf16.xpose.msk.msra.mxu0 %vm4413_vm11, %v2566_v54 }
 0x19d   : > { %2520 = vmatmul.mubr.msk.f32.vlgmr.msra.gmra.mrb[0].mxu0 %vm2085_vm10, %v4871_v51 }
 0x270   : > { %v2251_v10 = vpop.f32.mrb[0].mxu0 }
 0x271   : > { %v2263_v50 = vmul.f32 %v2251_v10, %v2251_v10  ;;  %v2253_v41 = vpop.f32.mrb[1].mxu0  ;;  %2256 = vst [vmem:[%s266_s11] sm:$0xff] %v2251_v10 }
 0x272   : > { %2257 = vst [vmem:[%s266_s11 + $0x8] sm:$0xff] %v2253_v41  ;;  %v2258_v59 = vadd.f32 %v2253_v41, %v2251_v10  ;;  %v2264_v29 = vmul.f32 %v2253_v41, %v2253_v41 }
 0x274   : > { %v2265_v27 = vadd.f32 %v2264_v29, %v2263_v50  ;;  %2259 = vadd.xlane.f32.xlu0 %v2258_v59 }
 0x276   : > { %2266 = vadd.xlane.f32.xlu1 %v2265_v27 }
 0x301   : > { %v2260_v4 = vpop.xlane.xlu0 %2259 }
 0x302   : > { %2262 = vst.msk [vmem:[%s274_s19] sm:$0xff] %vm2261_vm12, %v2260_v4 }
 0x303   : > { %v2267_v51 = vpop.xlane.xlu1 %2266 }
 0x304   : > { %2268 = vst.msk [vmem:[%s281_s22] sm:$0xff] %vm2261_vm12, %v2267_v51 }
 0x305 PF: > { %s15_s17 = sadd.s32 1, %s3303_s17   ;;  %s5294_s15 = smov %s3299_s16 }
 0x306   : > { %p12_p6 = scmp.ge.s32.totalorder %s15_s17, 4   ;;  %s5295_s16 = smov %s5297_s18 }
 0x308   :  { %14 = sbr.rel (!%p12_p6) target bundleno = 2 (0x2), region = 82 }

// kernel: domain_double_conv_forward.5
= control target key start
LH: loop header
LB: loop body
LE: loop exit
PB: predicated region body
PF: predicated region fallthrough
CT: control target
= control target key end

     0   :  { %s403_s12 = smov 0   ;;  %s405_s13 = smov 0   ;;  %s442_s0 = inlined_call_operand.vmem [shape: f32[2,8,256], index: 0, kind: input, shape index: {}]   ;;  %s443_s1 = inlined_call_operand.vmem [shape: f32[8,1], index: 1, kind: input, shape index: {}]   ;;  %s444_s2 = inlined_call_operand.vmem [shape: f32[8,1], index: 2, kind: input, shape index: {}]   ;;  %s445_s3 = inlined_call_operand.vmem [shape: f32[2,8,256], index: 3, kind: output, shape index: {}]  }
   0x1   :  { %s407_s14 = smov 0  }
   0x2 LB: > { %s25_s15 = sadd.s32 1, %s376_s13  ;;  %p323_p0 = scmp.ge.s32.totalorder %s380_s14, 1  ;;  %s380_s14 = sphi %s407_s14, %s13_s14   ;;  %s376_s13 = sphi %s405_s13, %s447_s13   ;;  %s372_s12 = sphi %s403_s12, %s446_s12  }
   0x3   : > { %p27_p1 = scmp.ge.s32.totalorder %s25_s15, 2  ;;  %p158_p2 = scmp.lt.s32.totalorder %s380_s14, 3 }
   0x5   : > { %s449_s15 = smov (%p27_p1, %s25_s15), 0  ;;  %p159_p3 = pnand %p323_p0, %p158_p2 }
   0x6   : > { %v212_v0 = vld [vmem:[%s443_s1] sm:$0xff] (!%p159_p3)  ;;  %v382_v1 = vmov (!%p159_p3), 0   ;;  %p191_p4 = scmp.lt.s32.totalorder (!%p159_p3), %s372_s12, 1 }
   0x7   : > { %162 = sbr.rel (%p159_p3) target bundleno = 145 (0x91), region = 32  ;;  %357 = vset.pattern.permute.xlu0 (!%p159_p3), %v382_v1  ;;  %v220_v2 = vld [vmem:[%s444_s2] sm:$0xff] (!%p159_p3) }
   0x8   : > { %215 = vperm.xlu0 (!%p159_p3), %357, %v212_v0  }
   0xc   : > { %223 = vperm.xlu0 (!%p159_p3), %357, %v220_v2  }
   0xe   : > { %s451_s12 = smov (!%p191_p4, %s372_s12), 1 }
   0xf   : > { %s330_s20 = sshll.u32 %s451_s12, 4 }
  0x10   : > { %s198_s23 = scalar_lea.vmem %s442_s0, %s330_s20  ;;  %s208_s26 = scalar_lea.vmem %s445_s3, %s330_s20 }
  0x11   : > { %v210_v4 = vld [vmem:[%s198_s23] sm:$0xff]  ;;  %v211_v5 = vld [vmem:[%s198_s23 + $0x8] sm:$0xff] }
  0x87   : > { %v216_v3 = vpop.permute.xlu0 %215 }
  0x88   : > { %v218_v6 = vmul.f32 %v216_v3, %v210_v4  ;;  %v219_v7 = vmul.f32 %v216_v3, %v211_v5 }
  0x8b   : > { %v224_v8 = vpop.permute.xlu0 %223 }
  0x8c   : > { %v226_v9 = vadd.f32 %v224_v8, %v218_v6  ;;  %v227_v10 = vadd.f32 %v224_v8, %v219_v7 }
  0x8e   : > { %v228_v11 = vmax.f32 %v226_v9, 0.0  ;;  %v229_v12 = vmax.f32 %v227_v10, 0.0 }
  0x90   : > { %230 = vst [vmem:[%s208_s26] sm:$0xff] %v228_v11  ;;  %231 = vst [vmem:[%s208_s26 + $0x8] sm:$0xff] %v229_v12 }
  0x91 PF: > { %s13_s14 = sadd.s32 1, %s380_s14   ;;  %s446_s12 = smov %s376_s13 }
  0x92   : > { %p10_p5 = scmp.ge.s32.totalorder %s13_s14, 4   ;;  %s447_s13 = smov %s449_s15 }
  0x94   :  { %12 = sbr.rel (!%p10_p5) target bundleno = 2 (0x2), region = 62 }

// kernel: domain_double_conv_forward.4
= control target key start
LH: loop header
LB: loop body
LE: loop exit
PB: predicated region body
PF: predicated region fallthrough
CT: control target
= control target key end

     0   :  { %s4710_s21 = smov 0   ;;  %s4712_s22 = smov 0   ;;  %s6765_s0 = inlined_call_operand.vmem [shape: f32[6,16,18,8], index: 0, kind: input, shape index: {}]   ;;  %s6766_s1 = inlined_call_operand.vmem [shape: f32[8,72], index: 1, kind: input, shape index: {}]   ;;  %s6767_s2 = inlined_call_operand.vmem [shape: f32[1,8], index: 2, kind: input, shape index: {}]   ;;  %s6768_s3 = inlined_call_operand.vmem [shape: f32[1,8], index: 3, kind: input, shape index: {}]   ;;  %s6769_s4 = inlined_call_operand.vmem [shape: f32[2,8,256], index: 4, kind: output, shape index: {0}]   ;;  %s6770_s5 = inlined_call_operand.vmem [shape: f32[2,1,8,1], index: 5, kind: output, shape index: {1}]   ;;  %s6771_s6 = inlined_call_operand.vmem [shape: f32[2,1,8,1], index: 6, kind: output, shape index: {2}]  }
   0x1   :  { %s4714_s23 = smov 0  }
   0x2 LB: > { %s29_s24 = sadd.s32 1, %s4660_s22  ;;  %p3836_p0 = scmp.ge.s32.totalorder %s4664_s23, 1  ;;  %s4664_s23 = sphi %s4714_s23, %s17_s23   ;;  %s4660_s22 = sphi %s4712_s22, %s6865_s22   ;;  %s4656_s21 = sphi %s4710_s21, %s6864_s21  }
   0x3   : > { %p31_p1 = scmp.ge.s32.totalorder %s29_s24, 2  ;;  %p245_p2 = scmp.lt.s32.totalorder %s4664_s23, 3 }
   0x5   : > { %s6867_s24 = smov (%p31_p1, %s29_s24), 0  ;;  %p246_p3 = pnand %p3836_p0, %p245_p2 }
   0x7   : > { %249 = sbr.rel (%p246_p3) target bundleno = 857 (0x359), region = 36 }
   0xe   : > { %s299_s25 = smul.u32 3, %s4656_s21  ;;  %v973_v0 = vlaneseq  ;;  %v6772_v1 = vmov 0.0   ;;  %s4667_s26 = smov 8   ;;  %v4741_v5 = vld [vmem:[%s6767_s2] ss:$0 sm:$0xff]  ;;  %vm1865_vm0 = vcmask 1046528  }
   0xf   : > { %v1866_v2 = vrot.slane %v6772_v1, 1  ;;  %v4754_v7 = vld [vmem:[%s6768_s3] ss:$0 sm:$0xff]  ;;  %v4804_v46 = vrot.slane %v6772_v1, 2  ;;  %vm1946_vm3 = vcmask 1045504   ;;  %s4668_s11 = smov 16  }
  0x10   : > { %p301_p4 = scmp.lt.s32.totalorder %s299_s25, 5  ;;  %v4734_v4 = vshrl.u32 %v973_v0, 7  ;;  %s4669_s12 = smov 24   ;;  %vm3211_vm4 = vcmask 64512   ;;  %vm3244_vm5 = vcmask 130048   ;;  %vm3277_vm6 = vcmask 195584  }
  0x11   : > { %v4732_v3 = vpack.i.bf16 %v1866_v2, %v1866_v2  ;;  %s4670_s13 = smov 32   ;;  %s4671_s14 = smov 40   ;;  %vm3310_vm7 = vcmask 261120   ;;  %vm3343_vm8 = vcmask 326656   ;;  %vm3376_vm9 = vcmask 392192  }
  0x12   : > { %s6869_s25 = smov (!%p301_p4, %s299_s25), 5  ;;  %v4744_v6 = vadd.s32 16, %v4734_v4  ;;  %vm1115_vm1 = vcmp.ge.s32.totalorder %v4734_v4, 1  ;;  %s4672_s17 = smov 48   ;;  %vm3409_vm10 = vcmask 457728   ;;  %vm3442_vm11 = vcmask 523264  }
  0x13   : > { %6800 = vst [vmem:[#allocation2_spill] sm:$0xff] %v4732_v3  ;;  %3997 = vrot.lane.b32.xlu0 %v4732_v3, %s4667_s26  ;;  %s3962_s27 = smul.u32 384, %s6869_s25  ;;  %s4673_s20 = smov 56   ;;  %vm3476_vm12 = vcmask 588800   ;;  %vm3652_vm14 = vcmask 7168  }
  0x14   : > { %vm1258_vm2 = vcmp.le.s32.totalorder %v4744_v6, 16  ;;  %s4674_s25 = smov 64   ;;  %vm6097_vm13 = vmpackc.low %vm3476_vm12, %vm3476_vm12  ;;  %p313_p5 = scmp.lt.s32.totalorder %s4656_s21, 1 }
  0x15   : > { %s4749_s8 = scalar_lea.vmem %s6765_s0, %s3962_s27 }
  0x16   : > { %v342_v8 = vld [vmem:[%s4749_s8 + $0x30] sm:$0xff]  ;;  %v343_v9 = vld [vmem:[%s4749_s8 + $0x38] sm:$0xff]  ;;  %v344_v10 = vld [vmem:[%s4749_s8 + $0x40] sm:$0x3]  ;;  %s6871_s21 = smov (!%p313_p5, %s4656_s21), 1 }
  0x17   : > { %v493_v11 = vmul.f32 %v4741_v5, %v342_v8  ;;  %v494_v12 = vmul.f32 %v4741_v5, %v343_v9  ;;  %v495_v13 = vmul.f32 %v4741_v5, %v344_v10  ;;  %v339_v14 = vld [vmem:[%s4749_s8 + $0x18] sm:$0xff]  ;;  %v340_v15 = vld [vmem:[%s4749_s8 + $0x20] sm:$0xff]  ;;  %v341_v16 = vld [vmem:[%s4749_s8 + $0x28] sm:$0x3]  ;;  %s3840_s16 = sshll.u32 %s6871_s21, 3 }
  0x18   : > { %v490_v17 = vmul.f32 %v4741_v5, %v339_v14  ;;  %v491_v18 = vmul.f32 %v4741_v5, %v340_v15  ;;  %v492_v19 = vmul.f32 %v4741_v5, %v341_v16  ;;  %v345_v20 = vld [vmem:[%s4749_s8 + $0x48] sm:$0xff]  ;;  %v346_v21 = vld [vmem:[%s4749_s8 + $0x50] sm:$0xff]  ;;  %v347_v22 = vld [vmem:[%s4749_s8 + $0x58] sm:$0x3]  ;;  %s328_s19 = scalar_lea.vmem %s6770_s5, %s3840_s16 }
  0x19   : > { %v644_v23 = vadd.f32 %v4754_v7, %v493_v11  ;;  %v645_v24 = vadd.f32 %v4754_v7, %v494_v12  ;;  %v646_v25 = vadd.f32 %v4754_v7, %v495_v13  ;;  %v496_v26 = vmul.f32 %v4741_v5, %v345_v20  ;;  %v348_v51 = vld [vmem:[%s4749_s8 + $0x60] sm:$0xff]  ;;  %v349_v52 = vld [vmem:[%s4749_s8 + $0x68] sm:$0xff]  ;;  %v350_v61 = vld [vmem:[%s4749_s8 + $0x70] sm:$0x3] }
  0x1a   : > { %v641_v27 = vadd.f32 %v4754_v7, %v490_v17  ;;  %v642_v28 = vadd.f32 %v4754_v7, %v491_v18  ;;  %v643_v29 = vadd.f32 %v4754_v7, %v492_v19  ;;  %v497_v30 = vmul.f32 %v4741_v5, %v346_v21  ;;  %v351_v8 = vld [vmem:[%s4749_s8 + $0x78] sm:$0xff]  ;;  %v352_v9 = vld [vmem:[%s4749_s8 + $0x80] sm:$0xff]  ;;  %v353_v10 = vld [vmem:[%s4749_s8 + $0x88] sm:$0x3] }
  0x1b   : > { %v788_v31 = vmax.f32 %v644_v23, 0.0  ;;  %v4781_v32 = vmax.f32 %v645_v24, 0.0  ;;  %v790_v33 = vmax.f32 %v646_v25, 0.0  ;;  %v498_v34 = vmul.f32 %v4741_v5, %v347_v22  ;;  %v354_v23 = vld [vmem:[%s4749_s8 + $0x90] sm:$0xff] }
  0x1c   : > { %v785_v35 = vmax.f32 %v641_v27, 0.0  ;;  %v4784_v36 = vmax.f32 %v642_v28, 0.0  ;;  %v787_v37 = vmax.f32 %v643_v29, 0.0  ;;  %v647_v38 = vadd.f32 %v4754_v7, %v496_v26 }
  0x1d   : > { %v4789_v39 = vsel %vm1115_vm1, %v788_v31, 0.0  ;;  %v4793_v40 = vsel %vm1258_vm2, %v790_v33, 0.0  ;;  %v1877_v41 = vrot.slane %v4781_v32, 1  ;;  %v648_v42 = vadd.f32 %v4754_v7, %v497_v30  ;;  %v355_v33 = vld [vmem:[%s4749_s8 + $0x98] sm:$0xff] }
  0x1e   : > { %v1876_v43 = vrot.slane %v4789_v39, 1  ;;  %v1879_v44 = vrot.slane %v4793_v40, 1  ;;  %v4801_v45 = vsel %vm1115_vm1, %v785_v35, 0.0  ;;  %v4808_v47 = vsel %vm1258_vm2, %v787_v37, 0.0 }
  0x1f   : > { %v1871_v48 = vrot.slane %v4801_v45, 1  ;;  %v1872_v49 = vrot.slane %v4784_v36, 1  ;;  %v649_v50 = vadd.f32 %v4754_v7, %v498_v34  ;;  %v1874_v55 = vrot.slane %v4808_v47, 1  ;;  %v356_v34 = vld [vmem:[%s4749_s8 + $0xa0] sm:$0x3] }
  0x20   : > { %v1878_v53 = vsel %vm1865_vm0, %v1876_v43, %v1877_v41  ;;  %v1880_v54 = vsel %vm1865_vm0, %v1877_v41, %v1879_v44  ;;  %v791_v56 = vmax.f32 %v647_v38, 0.0  ;;  %v4819_v59 = vmax.f32 %v648_v42, 0.0 }
  0x21   : > { %v4006_v57 = vpack.i.bf16 %v1880_v54, %v1878_v53  ;;  %v1873_v58 = vsel %vm1865_vm0, %v1871_v48, %v1872_v49  ;;  %v793_v60 = vmax.f32 %v649_v50, 0.0  ;;  %v1875_v62 = vsel %vm1865_vm0, %v1872_v49, %v1874_v55  ;;  %v357_v53 = vld [vmem:[%s4749_s8 + $0xa8] sm:$0xff] }
  0x22   : > { %v4825_v63 = vsel %vm1115_vm1, %v791_v56, 0.0  ;;  %v499_v0 = vmul.f32 %v4741_v5, %v348_v51  ;;  %v500_v2 = vmul.f32 %v4741_v5, %v349_v52  ;;  %v4001_v11 = vpack.i.bf16 %v1875_v62, %v1873_v58 }
  0x23   : > { %4007 = vrot.lane.b32.xlu1 %v4006_v57, %s4667_s26  ;;  %v4835_v12 = vsel %vm1258_vm2, %v793_v60, 0.0  ;;  %v1881_v13 = vrot.slane %v4825_v63, 1  ;;  %v1882_v14 = vrot.slane %v4819_v59, 1  ;;  %v501_v16 = vmul.f32 %v4741_v5, %v350_v61 }
  0x24   : > { %v1884_v15 = vrot.slane %v4835_v12, 1  ;;  %v650_v17 = vadd.f32 %v4754_v7, %v499_v0  ;;  %v651_v18 = vadd.f32 %v4754_v7, %v500_v2  ;;  %4002 = vrot.lane.b32.xlu0 %v4001_v11, %s4667_s26  ;;  %v502_v20 = vmul.f32 %v4741_v5, %v351_v8  ;;  %v358_v0 = vld [vmem:[%s4749_s8 + $0xb0] sm:$0xff] }
  0x25   : > { %v1883_v19 = vsel %vm1865_vm0, %v1881_v13, %v1882_v14  ;;  %v503_v21 = vmul.f32 %v4741_v5, %v352_v9  ;;  %v504_v22 = vmul.f32 %v4741_v5, %v353_v10  ;;  %v652_v25 = vadd.f32 %v4754_v7, %v501_v16  ;;  %v359_v10 = vld [vmem:[%s4749_s8 + $0xb8] sm:$0x3] }
  0x26   : > { %v1885_v24 = vsel %vm1865_vm0, %v1882_v14, %v1884_v15  ;;  %v794_v26 = vmax.f32 %v650_v17, 0.0  ;;  %v4851_v27 = vmax.f32 %v651_v18, 0.0  ;;  %v653_v29 = vadd.f32 %v4754_v7, %v502_v20  ;;  %v360_v17 = vld [vmem:[%s4749_s8 + $0xc0] sm:$0xff]  ;;  %v361_v18 = vld [vmem:[%s4749_s8 + $0xc8] sm:$0xff] }
  0x27   : > { %v4011_v28 = vpack.i.bf16 %v1885_v24, %v1883_v19  ;;  %v654_v30 = vadd.f32 %v4754_v7, %v503_v21  ;;  %v655_v31 = vadd.f32 %v4754_v7, %v504_v22  ;;  %v796_v35 = vmax.f32 %v652_v25, 0.0 }
  0x28   : > { %v4860_v37 = vsel %vm1115_vm1, %v794_v26, 0.0  ;;  %v1887_v38 = vrot.slane %v4851_v27, 1  ;;  %v505_v41 = vmul.f32 %v4741_v5, %v354_v23  ;;  %v797_v43 = vmax.f32 %v653_v29, 0.0 }
  0x29   : > { %4012 = vrot.lane.b32.xlu1 %v4011_v28, %s4667_s26  ;;  %v1886_v42 = vrot.slane %v4860_v37, 1  ;;  %v4866_v44 = vmax.f32 %v654_v30, 0.0  ;;  %v799_v48 = vmax.f32 %v655_v31, 0.0  ;;  %v4870_v49 = vsel %vm1258_vm2, %v796_v35, 0.0  ;;  %v362_v28 = vld [vmem:[%s4749_s8 + $0xd0] sm:$0x3] }
  0x2a   : > { %v506_v50 = vmul.f32 %v4741_v5, %v355_v33  ;;  %v507_v51 = vmul.f32 %v4741_v5, %v356_v34  ;;  %v656_v52 = vadd.f32 %v4754_v7, %v505_v41  ;;  %v1889_v55 = vrot.slane %v4870_v49, 1  ;;  %v363_v34 = vld [vmem:[%s4749_s8 + $0xd8] sm:$0xff] }
  0x2b   : > { %6801 = vst [vmem:[#allocation3_spill] sm:$0xff] %v4866_v44  ;;  %v1888_v54 = vsel %vm1865_vm0, %v1886_v42, %v1887_v38  ;;  %v4880_v56 = vsel %vm1115_vm1, %v797_v43, 0.0  ;;  %v4884_v57 = vsel %vm1258_vm2, %v799_v48, 0.0  ;;  %v1892_v60 = vrot.slane %v4866_v44, 1 }
  0x2c   : > { %6802 = vst [vmem:[#allocation4_spill] sm:$0xff] %v4880_v56  ;;  %v1891_v58 = vrot.slane %v4880_v56, 1  ;;  %v1894_v61 = vrot.slane %v4884_v57, 1  ;;  %v657_v62 = vadd.f32 %v4754_v7, %v506_v50  ;;  %v1890_v2 = vsel %vm1865_vm0, %v1887_v38, %v1889_v55 }
  0x2d   : > { %v658_v8 = vadd.f32 %v4754_v7, %v507_v51  ;;  %v800_v9 = vmax.f32 %v656_v52, 0.0  ;;  %v508_v11 = vmul.f32 %v4741_v5, %v357_v53  ;;  %v4016_v13 = vpack.i.bf16 %v1890_v2, %v1888_v54  ;;  %v364_v52 = vld [vmem:[%s4749_s8 + $0xe0] sm:$0xff] }
  0x2e   : > { %v1893_v14 = vsel %vm1865_vm0, %v1891_v58, %v1892_v60  ;;  %v1895_v15 = vsel %vm1865_vm0, %v1892_v60, %v1894_v61  ;;  %v4897_v16 = vmax.f32 %v657_v62, 0.0  ;;  %v509_v22 = vmul.f32 %v4741_v5, %v358_v0  ;;  %v365_v58 = vld [vmem:[%s4749_s8 + $0xe8] sm:$0x3] }
  0x2f   : > { %v4021_v19 = vpack.i.bf16 %v1895_v15, %v1893_v14  ;;  %v802_v20 = vmax.f32 %v658_v8, 0.0  ;;  %v4903_v21 = vsel %vm1115_vm1, %v800_v9, 0.0  ;;  %4017 = vrot.lane.b32.xlu0 %v4016_v13, %s4667_s26  ;;  %v510_v25 = vmul.f32 %v4741_v5, %v359_v10 }
  0x30   : > { %6803 = vst [vmem:[#allocation5_spill] sm:$0xff] %v4897_v16  ;;  %6804 = vst [vmem:[#allocation6_spill] sm:$0xff] %v4903_v21  ;;  %v1896_v23 = vrot.slane %v4903_v21, 1  ;;  %v1897_v24 = vrot.slane %v4897_v16, 1  ;;  %v659_v26 = vadd.f32 %v4754_v7, %v508_v11  ;;  %v660_v30 = vadd.f32 %v4754_v7, %v509_v22 }
  0x31   : > { %4022 = vrot.lane.b32.xlu1 %v4021_v19, %s4667_s26  ;;  %v4915_v29 = vsel %vm1258_vm2, %v802_v20, 0.0  ;;  %v511_v31 = vmul.f32 %v4741_v5, %v360_v17  ;;  %v512_v33 = vmul.f32 %v4741_v5, %v361_v18  ;;  %v661_v41 = vadd.f32 %v4754_v7, %v510_v25 }
  0x32   : > { %v1898_v35 = vsel %vm1865_vm0, %v1896_v23, %v1897_v24  ;;  %v1899_v38 = vrot.slane %v4915_v29, 1  ;;  %v803_v42 = vmax.f32 %v659_v26, 0.0  ;;  %v4924_v43 = vmax.f32 %v660_v30, 0.0  ;;  %v366_v23 = vld [vmem:[%s4749_s8 + $0xf0] sm:$0xff] }
  0x33   : > { %v513_v48 = vmul.f32 %v4741_v5, %v362_v28  ;;  %v662_v50 = vadd.f32 %v4754_v7, %v511_v31  ;;  %v663_v51 = vadd.f32 %v4754_v7, %v512_v33  ;;  %v805_v54 = vmax.f32 %v661_v41, 0.0  ;;  %v368_v31 = vld [vmem:[%s4749_s8 + $0x100] sm:$0x3] }
  0x34   : > { %6805 = vst [vmem:[#allocation7_spill] sm:$0xff] %v4924_v43  ;;  %v1900_v53 = vsel %vm1865_vm0, %v1897_v24, %v1899_v38  ;;  %v4933_v55 = vsel %vm1115_vm1, %v803_v42, 0.0  ;;  %v514_v60 = vmul.f32 %v4741_v5, %v363_v34  ;;  %v1902_v0 = vrot.slane %v4924_v43, 1  ;;  %v367_v24 = vld [vmem:[%s4749_s8 + $0xf8] sm:$0xff] }
  0x35   : > { %6806 = vst [vmem:[#allocation8_spill] sm:$0xff] %v4933_v55  ;;  %v4026_v61 = vpack.i.bf16 %v1900_v53, %v1898_v35  ;;  %v1901_v62 = vrot.slane %v4933_v55, 1  ;;  %v664_v2 = vadd.f32 %v4754_v7, %v513_v48  ;;  %v4942_v8 = vsel %vm1258_vm2, %v805_v54, 0.0 }
  0x36   : > { %v806_v9 = vmax.f32 %v662_v50, 0.0  ;;  %v4944_v10 = vmax.f32 %v663_v51, 0.0  ;;  %v515_v11 = vmul.f32 %v4741_v5, %v364_v52  ;;  %v1904_v14 = vrot.slane %v4942_v8, 1  ;;  %v369_v51 = vld [vmem:[%s4749_s8 + $0x108] sm:$0xff] }
  0x37   : > { %4027 = vrot.lane.b32.xlu0 %v4026_v61, %s4667_s26  ;;  %v1903_v13 = vsel %vm1865_vm0, %v1901_v62, %v1902_v0  ;;  %v808_v15 = vmax.f32 %v664_v2, 0.0  ;;  %v516_v17 = vmul.f32 %v4741_v5, %v365_v58  ;;  %v665_v20 = vadd.f32 %v4754_v7, %v514_v60  ;;  %v370_v60 = vld [vmem:[%s4749_s8 + $0x110] sm:$0xff]  ;;  %v371_v61 = vld [vmem:[%s4749_s8 + $0x118] sm:$0x3] }
  0x38   : > { %v4953_v18 = vsel %vm1115_vm1, %v806_v9, 0.0  ;;  %v1907_v19 = vrot.slane %v4944_v10, 1  ;;  %v666_v22 = vadd.f32 %v4754_v7, %v515_v11  ;;  %v1905_v25 = vsel %vm1865_vm0, %v1902_v0, %v1904_v14 }
  0x39   : > { %v4963_v26 = vsel %vm1258_vm2, %v808_v15, 0.0  ;;  %v1906_v28 = vrot.slane %v4953_v18, 1  ;;  %v667_v30 = vadd.f32 %v4754_v7, %v516_v17  ;;  %v4031_v33 = vpack.i.bf16 %v1905_v25, %v1903_v13 }
  0x3a   : > { %v1909_v34 = vrot.slane %v4963_v26, 1  ;;  %v809_v35 = vmax.f32 %v665_v20, 0.0  ;;  %v4969_v38 = vmax.f32 %v666_v22, 0.0  ;;  %v517_v48 = vmul.f32 %v4741_v5, %v366_v23 }
  0x3b   : > { %v1908_v41 = vsel %vm1865_vm0, %v1906_v28, %v1907_v19  ;;  %v811_v42 = vmax.f32 %v667_v30, 0.0  ;;  %v518_v50 = vmul.f32 %v4741_v5, %v367_v24  ;;  %4032 = vrot.lane.b32.xlu1 %v4031_v33, %s4667_s26  ;;  %v519_v58 = vmul.f32 %v4741_v5, %v368_v31  ;;  %v372_v30 = vld [vmem:[%s4749_s8 + $0x120] sm:$0xff] }
  0x3c   : > { %v1910_v52 = vsel %vm1865_vm0, %v1907_v19, %v1909_v34  ;;  %v4979_v53 = vsel %vm1115_vm1, %v809_v35, 0.0  ;;  %v1912_v54 = vrot.slane %v4969_v38, 1  ;;  %v668_v9 = vadd.f32 %v4754_v7, %v517_v48 }
  0x3d   : > { %v4036_v62 = vpack.i.bf16 %v1910_v52, %v1908_v41  ;;  %v4987_v0 = vsel %vm1258_vm2, %v811_v42, 0.0  ;;  %v1911_v2 = vrot.slane %v4979_v53, 1  ;;  %v669_v13 = vadd.f32 %v4754_v7, %v518_v50  ;;  %v373_v41 = vld [vmem:[%s4749_s8 + $0x128] sm:$0xff]  ;;  %v374_v42 = vld [vmem:[%s4749_s8 + $0x130] sm:$0x3] }
  0x3e   : > { %v1914_v11 = vrot.slane %v4987_v0, 1  ;;  %v670_v14 = vadd.f32 %v4754_v7, %v519_v58  ;;  %v520_v15 = vmul.f32 %v4741_v5, %v369_v51  ;;  %v812_v19 = vmax.f32 %v668_v9, 0.0 }
  0x3f   : > { %4037 = vrot.lane.b32.xlu0 %v4036_v62, %s4667_s26  ;;  %v1913_v17 = vsel %vm1865_vm0, %v1911_v2, %v1912_v54  ;;  %v521_v20 = vmul.f32 %v4741_v5, %v370_v60  ;;  %v522_v22 = vmul.f32 %v4741_v5, %v371_v61  ;;  %v5000_v24 = vmax.f32 %v669_v13, 0.0  ;;  %v375_v13 = vld [vmem:[%s4749_s8 + $0x138] sm:$0xff] }
  0x40   : > { %v1915_v23 = vsel %vm1865_vm0, %v1912_v54, %v1914_v11  ;;  %v814_v25 = vmax.f32 %v670_v14, 0.0  ;;  %v671_v28 = vadd.f32 %v4754_v7, %v520_v15  ;;  %v5006_v33 = vsel %vm1115_vm1, %v812_v19, 0.0  ;;  %v376_v14 = vld [vmem:[%s4749_s8 + $0x140] sm:$0xff] }
  0x41   : > { %v4041_v31 = vpack.i.bf16 %v1915_v23, %v1913_v17  ;;  %v672_v34 = vadd.f32 %v4754_v7, %v521_v20  ;;  %v673_v35 = vadd.f32 %v4754_v7, %v522_v22  ;;  %v1916_v50 = vrot.slane %v5006_v33, 1  ;;  %v377_v22 = vld [vmem:[%s4749_s8 + $0x148] sm:$0x3] }
  0x42   : > { %v5014_v48 = vsel %vm1258_vm2, %v814_v25, 0.0  ;;  %v1917_v51 = vrot.slane %v5000_v24, 1  ;;  %v815_v52 = vmax.f32 %v671_v28, 0.0  ;;  %v523_v61 = vmul.f32 %v4741_v5, %v372_v30 }
  0x43   : > { %4042 = vrot.lane.b32.xlu1 %v4041_v31, %s4667_s26  ;;  %v1919_v54 = vrot.slane %v5014_v48, 1  ;;  %v5020_v58 = vmax.f32 %v672_v34, 0.0  ;;  %v817_v60 = vmax.f32 %v673_v35, 0.0  ;;  %v524_v9 = vmul.f32 %v4741_v5, %v373_v41 }
  0x44   : > { %v1918_v62 = vsel %vm1865_vm0, %v1916_v50, %v1917_v51  ;;  %v5026_v2 = vsel %vm1115_vm1, %v815_v52, 0.0  ;;  %v525_v11 = vmul.f32 %v4741_v5, %v374_v42  ;;  %v674_v28 = vadd.f32 %v4754_v7, %v523_v61  ;;  %v378_v42 = vld [vmem:[%s4749_s8 + $0x150] sm:$0xff] }
  0x45   : > { %v1920_v15 = vsel %vm1865_vm0, %v1917_v51, %v1919_v54  ;;  %v5035_v17 = vsel %vm1258_vm2, %v817_v60, 0.0  ;;  %v1921_v19 = vrot.slane %v5026_v2, 1  ;;  %v1922_v20 = vrot.slane %v5020_v58, 1 }
  0x46   : > { %v4046_v23 = vpack.i.bf16 %v1920_v15, %v1918_v62  ;;  %v1924_v25 = vrot.slane %v5035_v17, 1  ;;  %v675_v30 = vadd.f32 %v4754_v7, %v524_v9  ;;  %v676_v34 = vadd.f32 %v4754_v7, %v525_v11  ;;  %v379_v11 = vld [vmem:[%s4749_s8 + $0x158] sm:$0xff] }
  0x47   : > { %v1923_v31 = vsel %vm1865_vm0, %v1921_v19, %v1922_v20  ;;  %v526_v35 = vmul.f32 %v4741_v5, %v375_v13  ;;  %v527_v41 = vmul.f32 %v4741_v5, %v376_v14  ;;  %v818_v51 = vmax.f32 %v674_v28, 0.0  ;;  %v380_v13 = vld [vmem:[%s4749_s8 + $0x160] sm:$0x3] }
  0x48   : > { %4047 = vrot.lane.b32.xlu0 %v4046_v23, %s4667_s26  ;;  %v1925_v50 = vsel %vm1865_vm0, %v1922_v20, %v1924_v25  ;;  %v5050_v52 = vmax.f32 %v675_v30, 0.0  ;;  %v528_v54 = vmul.f32 %v4741_v5, %v377_v22  ;;  %v820_v61 = vmax.f32 %v676_v34, 0.0 }
  0x49   : > { %v4051_v60 = vpack.i.bf16 %v1925_v50, %v1923_v31  ;;  %v677_v62 = vadd.f32 %v4754_v7, %v526_v35  ;;  %v678_v9 = vadd.f32 %v4754_v7, %v527_v41  ;;  %v5059_v14 = vsel %vm1115_vm1, %v818_v51, 0.0 }
  0x4a   : > { %v1927_v15 = vrot.slane %v5050_v52, 1  ;;  %v679_v19 = vadd.f32 %v4754_v7, %v528_v54  ;;  %v529_v20 = vmul.f32 %v4741_v5, %v378_v42  ;;  %v5067_v22 = vsel %vm1258_vm2, %v820_v61, 0.0  ;;  %v381_v54 = vld [vmem:[%s4749_s8 + $0x168] sm:$0xff] }
  0x4b   : > { %4052 = vrot.lane.b32.xlu1 %v4051_v60, %s4667_s26  ;;  %v1926_v23 = vrot.slane %v5059_v14, 1  ;;  %v821_v25 = vmax.f32 %v677_v62, 0.0  ;;  %v5070_v28 = vmax.f32 %v678_v9, 0.0  ;;  %v1929_v30 = vrot.slane %v5067_v22, 1  ;;  %v382_v60 = vld [vmem:[%s4749_s8 + $0x170] sm:$0xff] }
  0x4c   : > { %v823_v31 = vmax.f32 %v679_v19, 0.0  ;;  %v530_v34 = vmul.f32 %v4741_v5, %v379_v11  ;;  %v531_v35 = vmul.f32 %v4741_v5, %v380_v13  ;;  %v680_v51 = vadd.f32 %v4754_v7, %v529_v20  ;;  %v383_v13 = vld [vmem:[%s4749_s8 + $0x178] sm:$0x3] }
  0x4d   : > { %6807 = vst [vmem:[#allocation9_spill] sm:$0xff] %v5070_v28  ;;  %v1928_v41 = vsel %vm1865_vm0, %v1926_v23, %v1927_v15  ;;  %v5078_v42 = vsel %vm1115_vm1, %v821_v25, 0.0  ;;  %v1932_v50 = vrot.slane %v5070_v28, 1  ;;  %v1930_v61 = vsel %vm1865_vm0, %v1927_v15, %v1929_v30 }
  0x4e   : > { %6808 = vst [vmem:[#allocation10_spill] sm:$0xff] %v5078_v42  ;;  %v5087_v62 = vsel %vm1258_vm2, %v823_v31, 0.0  ;;  %v1931_v9 = vrot.slane %v5078_v42, 1  ;;  %v681_v11 = vadd.f32 %v4754_v7, %v530_v34  ;;  %v4056_v19 = vpack.i.bf16 %v1930_v61, %v1928_v41 }
  0x4f   : > { %6809 = vst [vmem:[#allocation11_spill] sm:$0xff] %v5087_v62  ;;  %v1934_v23 = vrot.slane %v5087_v62, 1  ;;  %v682_v25 = vadd.f32 %v4754_v7, %v531_v35  ;;  %v824_v20 = vmax.f32 %v680_v51, 0.0  ;;  %v532_v15 = vmul.f32 %v4741_v5, %v381_v54 }
  0x50   : > { %v1933_v1 = vsel %vm1865_vm0, %v1931_v9, %v1932_v50  ;;  %v5095_v3 = vmax.f32 %v681_v11, 0.0  ;;  %v533_v30 = vmul.f32 %v4741_v5, %v382_v60  ;;  %4057 = vrot.lane.b32.xlu0 %v4056_v19, %s4667_s26  ;;  %v534_v35 = vmul.f32 %v4741_v5, %v383_v13 }
  0x51   : > { %v1935_v31 = vsel %vm1865_vm0, %v1932_v50, %v1934_v23  ;;  %v826_v34 = vmax.f32 %v682_v25, 0.0  ;;  %v5103_v41 = vsel %vm1115_vm1, %v824_v20, 0.0  ;;  %v683_v54 = vadd.f32 %v4754_v7, %v532_v15 }
  0x52   : > { %6810 = vst [vmem:[#allocation12_spill] sm:$0xff] %v5095_v3  ;;  %6811 = vst [vmem:[#allocation13_spill] sm:$0xff] %v5103_v41  ;;  %v4061_v51 = vpack.i.bf16 %v1935_v31, %v1933_v1  ;;  %v1936_v61 = vrot.slane %v5103_v41, 1  ;;  %v1937_v9 = vrot.slane %v5095_v3, 1  ;;  %v1960_v60 = vrot.slane %v4793_v40, 2 }
  0x53   : > { %v5112_v11 = vsel %vm1258_vm2, %v826_v34, 0.0  ;;  %v684_v50 = vadd.f32 %v4754_v7, %v533_v30  ;;  %v685_v19 = vadd.f32 %v4754_v7, %v534_v35  ;;  %v827_v23 = vmax.f32 %v683_v54, 0.0 }
  0x54   : > { %4062 = vrot.lane.b32.xlu1 %v4061_v51, %s4667_s26  ;;  %v1938_v1 = vsel %vm1865_vm0, %v1936_v61, %v1937_v9  ;;  %v1939_v13 = vrot.slane %v5112_v11, 1  ;;  %v1952_v25 = vrot.slane %v4801_v45, 2  ;;  %v1953_v15 = vrot.slane %v4784_v36, 2 }
  0x55   : > { %v5120_v20 = vmax.f32 %v684_v50, 0.0  ;;  %v829_v40 = vmax.f32 %v685_v19, 0.0  ;;  %v1955_v31 = vrot.slane %v4808_v47, 2  ;;  %v5127_v34 = vsel %vm1115_vm1, %v827_v23, 0.0 }
  0x56   : > { %v1940_v30 = vsel %vm1865_vm0, %v1937_v9, %v1939_v13  ;;  %6813 = vst [vmem:[#allocation15_spill] sm:$0xff] %v5127_v34  ;;  %v1957_v35 = vrot.slane %v4789_v39, 2  ;;  %v1958_v51 = vrot.slane %v4781_v32, 2  ;;  %v1941_v50 = vrot.slane %v5127_v34, 1 }
  0x57   : > { %6812 = vst [vmem:[#allocation14_spill] sm:$0xff] %v5120_v20  ;;  %v4066_v61 = vpack.i.bf16 %v1940_v30, %v1938_v1  ;;  %v5133_v54 = vsel %vm1258_vm2, %v829_v40, 0.0  ;;  %v1942_v19 = vrot.slane %v5120_v20, 1  ;;  %v5140_v9 = vpack.i.bf16 %v4804_v46, %v4804_v46 }
  0x58   : > { %v1944_v47 = vrot.slane %v5133_v54, 1  ;;  %v1954_v13 = vsel %vm1946_vm3, %v1952_v25, %v1953_v15  ;;  %v1956_v23 = vsel %vm1946_vm3, %v1953_v15, %v1955_v31  ;;  %v1959_v30 = vsel %vm1946_vm3, %v1957_v35, %v1958_v51 }
  0x59   : > { %4067 = vrot.lane.b32.xlu0 %v4066_v61, %s4667_s26  ;;  %v1943_v1 = vsel %vm1865_vm0, %v1941_v50, %v1942_v19  ;;  %v4081_v40 = vpack.i.bf16 %v1956_v23, %v1954_v13  ;;  %v1961_v34 = vsel %vm1946_vm3, %v1958_v51, %v1960_v60  ;;  %v1962_v41 = vrot.slane %v4825_v63, 2 }
  0x5a   : > { %v1945_v20 = vsel %vm1865_vm0, %v1942_v19, %v1944_v47  ;;  %v4086_v3 = vpack.i.bf16 %v1961_v34, %v1959_v30  ;;  %v1963_v46 = vrot.slane %v4819_v59, 2  ;;  %v1965_v25 = vrot.slane %v4835_v12, 2 }
  0x5b   : > { %v4071_v62 = vpack.i.bf16 %v1945_v20, %v1943_v1  ;;  %v1967_v15 = vrot.slane %v4860_v37, 2  ;;  %v1968_v31 = vrot.slane %v4851_v27, 2  ;;  %v1970_v35 = vrot.slane %v4870_v49, 2 }
  0x5c   : > { %v1964_v61 = vsel %vm1946_vm3, %v1962_v41, %v1963_v46  ;;  %v1972_v60 = vrot.slane %v4880_v56, 2  ;;  %v1973_v51 = vrot.slane %v4866_v44, 2  ;;  %v1966_v12 = vsel %vm1946_vm3, %v1963_v46, %v1965_v25 }
  0x5d   : > { %4072 = vrot.lane.b32.xlu1 %v4071_v62, %s4667_s26  ;;  %4077 = vrot.lane.b32.xlu0 %v5140_v9, %s4668_s11  ;;  %v1969_v20 = vsel %vm1946_vm3, %v1967_v15, %v1968_v31  ;;  %v1975_v34 = vrot.slane %v4884_v57, 2  ;;  %v1977_v41 = vrot.slane %v4903_v21, 2  ;;  %v4091_v50 = vpack.i.bf16 %v1966_v12, %v1964_v61  ;;  %v408_v12 = vld [vmem:[%s4749_s8 + $0x240] sm:$0xff]  ;;  %s335_s26 = scalar_lea.vmem %s6771_s6, %s3840_s16 }
  0x5e   : > { %v1971_v49 = vsel %vm1946_vm3, %v1968_v31, %v1970_v35  ;;  %v1978_v19 = vrot.slane %v4897_v16, 2  ;;  %v1974_v62 = vsel %vm1946_vm3, %v1972_v60, %v1973_v51  ;;  %v1980_v13 = vrot.slane %v4915_v29, 2  ;;  %v467_v16 = vld [vmem:[%s4749_s8 + $0x418] sm:$0x3] }
  0x5f   : > { %v4096_v47 = vpack.i.bf16 %v1971_v49, %v1969_v20  ;;  %v1982_v23 = vrot.slane %v4933_v55, 2  ;;  %v1976_v1 = vsel %vm1946_vm3, %v1973_v51, %v1975_v34  ;;  %v1983_v57 = vrot.slane %v4924_v43, 2  ;;  %v409_v49 = vld [vmem:[%s4749_s8 + $0x248] sm:$0xff] }
  0x60   : > { %v1979_v30 = vsel %vm1946_vm3, %v1977_v41, %v1978_v19  ;;  %v1985_v46 = vrot.slane %v4942_v8, 2  ;;  %v1981_v25 = vsel %vm1946_vm3, %v1978_v19, %v1980_v13  ;;  %v1987_v29 = vrot.slane %v4953_v18, 2 }
  0x61   : > { %4082 = vrot.lane.b32.xlu1 %v4081_v40, %s4668_s11  ;;  %4087 = vrot.lane.b32.xlu0 %v4086_v3, %s4668_s11  ;;  %v1988_v15 = vrot.slane %v4944_v10, 2  ;;  %v1990_v31 = vrot.slane %v4963_v26, 2  ;;  %v1984_v61 = vsel %vm1946_vm3, %v1982_v23, %v1983_v57  ;;  %v1992_v60 = vrot.slane %v4979_v53, 2 }
  0x62   : > { %v1986_v35 = vsel %vm1946_vm3, %v1983_v57, %v1985_v46  ;;  %v4101_v8 = vpack.i.bf16 %v1976_v1, %v1974_v62  ;;  %v4106_v40 = vpack.i.bf16 %v1981_v25, %v1979_v30  ;;  %v1993_v51 = vrot.slane %v4969_v38, 2  ;;  %v384_v1 = vld [vmem:[%s4749_s8 + $0x180] sm:$0xff]  ;;  %v385_v46 = vld [vmem:[%s4749_s8 + $0x188] sm:$0xff] }
  0x63   : > { %v1989_v3 = vsel %vm1946_vm3, %v1987_v29, %v1988_v15  ;;  %v1991_v20 = vsel %vm1946_vm3, %v1988_v15, %v1990_v31  ;;  %v1995_v34 = vrot.slane %v4987_v0, 2  ;;  %v1997_v26 = vrot.slane %v5006_v33, 2  ;;  %v410_v15 = vld [vmem:[%s4749_s8 + $0x250] sm:$0x3] }
  0x64   : > { %v1998_v41 = vrot.slane %v5000_v24, 2  ;;  %v4111_v19 = vpack.i.bf16 %v1986_v35, %v1984_v61  ;;  %v2000_v62 = vrot.slane %v5014_v48, 2  ;;  %v2002_v13 = vrot.slane %v5026_v2, 2  ;;  %v386_v31 = vld [vmem:[%s4749_s8 + $0x190] sm:$0x3] }
  0x65   : > { %4092 = vrot.lane.b32.xlu1 %v4091_v50, %s4668_s11  ;;  %4097 = vrot.lane.b32.xlu0 %v4096_v47, %s4668_s11  ;;  %v2003_v23 = vrot.slane %v5020_v58, 2  ;;  %v1994_v0 = vsel %vm1946_vm3, %v1992_v60, %v1993_v51  ;;  %v1996_v30 = vsel %vm1946_vm3, %v1993_v51, %v1995_v34  ;;  %v2005_v57 = vrot.slane %v5035_v17, 2 }
  0x66   : > { %v559_v50 = vmul.f32 %v4741_v5, %v408_v12  ;;  %v4116_v25 = vpack.i.bf16 %v1991_v20, %v1989_v3  ;;  %v1999_v47 = vsel %vm1946_vm3, %v1997_v26, %v1998_v41  ;;  %v2001_v29 = vsel %vm1946_vm3, %v1998_v41, %v2000_v62  ;;  %v457_v62 = vld [vmem:[%s4749_s8 + $0x3c8] sm:$0xff] }
  0x67   : > { %v560_v48 = vmul.f32 %v4741_v5, %v409_v49  ;;  %v5208_v61 = vsel %vm1946_vm3, %v2002_v13, %v2003_v23  ;;  %v5211_v35 = vsel %vm1946_vm3, %v2003_v23, %v2005_v57  ;;  %v535_v60 = vmul.f32 %v4741_v5, %v384_v1  ;;  %v456_v49 = vld [vmem:[%s4749_s8 + $0x3c0] sm:$0xff] }
  0x68   : > { %v710_v17 = vadd.f32 %v4754_v7, %v559_v50  ;;  %v4121_v3 = vpack.i.bf16 %v1996_v30, %v1994_v0  ;;  %v536_v12 = vmul.f32 %v4741_v5, %v385_v46  ;;  %v561_v26 = vmul.f32 %v4741_v5, %v410_v15 }
  0x69   : > { %4102 = vrot.lane.b32.xlu1 %v4101_v8, %s4668_s11  ;;  %4107 = vrot.lane.b32.xlu0 %v4106_v40, %s4668_s11  ;;  %v711_v51 = vadd.f32 %v4754_v7, %v560_v48  ;;  %v686_v34 = vadd.f32 %v4754_v7, %v535_v60  ;;  %v537_v41 = vmul.f32 %v4741_v5, %v386_v31 }
  0x6a   : > { %v854_v20 = vmax.f32 %v710_v17, 0.0  ;;  %v4126_v13 = vpack.i.bf16 %v2001_v29, %v1999_v47  ;;  %v4131_v8 = vpack.i.bf16 %v5211_v35, %v5208_v61  ;;  %v687_v40 = vadd.f32 %v4754_v7, %v536_v12 }
  0x6b   : > { %v855_v23 = vmax.f32 %v711_v51, 0.0  ;;  %v830_v0 = vmax.f32 %v686_v34, 0.0  ;;  %v712_v30 = vadd.f32 %v4754_v7, %v561_v26  ;;  %v688_v57 = vadd.f32 %v4754_v7, %v537_v41 }
  0x6c   : > { %v1745_v1 = vsel %vm1115_vm1, %v854_v20, 0.0  ;;  %v831_v46 = vmax.f32 %v687_v40, 0.0  ;;  %v607_v47 = vmul.f32 %v4741_v5, %v456_v49  ;;  %v608_v29 = vmul.f32 %v4741_v5, %v457_v62 }
  0x6d   : > { %4112 = vrot.lane.b32.xlu1 %v4111_v19, %s4668_s11  ;;  %4117 = vrot.lane.b32.xlu0 %v4116_v25, %s4668_s11  ;;  %v2115_v50 = vrot.slane %v1745_v1, 1  ;;  %v1721_v48 = vsel %vm1115_vm1, %v830_v0, 0.0  ;;  %v856_v15 = vmax.f32 %v712_v30, 0.0  ;;  %v2116_v31 = vrot.slane %v855_v23, 1  ;;  %v432_v30 = vld [vmem:[%s4749_s8 + $0x300] sm:$0xff] }
  0x6e   : > { %v832_v61 = vmax.f32 %v688_v57, 0.0  ;;  %v4136_v35 = vpack.i.bf16 %v855_v23, %v1745_v1  ;;  %v2195_v17 = vrot.slane %v1745_v1, 2  ;;  %v2075_v60 = vrot.slane %v1721_v48, 1 }
  0x6f   : > { %v2076_v51 = vrot.slane %v831_v46, 1  ;;  %v2155_v19 = vrot.slane %v1721_v48, 2  ;;  %v1747_v25 = vsel %vm1258_vm2, %v856_v15, 0.0  ;;  %v2196_v20 = vrot.slane %v855_v23, 2  ;;  %v433_v15 = vld [vmem:[%s4749_s8 + $0x308] sm:$0xff] }
  0x70   : > { %v1723_v12 = vsel %vm1258_vm2, %v832_v61, 0.0  ;;  %v2117_v34 = vsel %vm1865_vm0, %v2115_v50, %v2116_v31  ;;  %v2118_v26 = vrot.slane %v1747_v25, 1  ;;  %v2198_v49 = vrot.slane %v1747_v25, 2  ;;  %v458_v61 = vld [vmem:[%s4749_s8 + $0x3d0] sm:$0x3] }
  0x71   : > { %4122 = vrot.lane.b32.xlu1 %v4121_v3, %s4668_s11  ;;  %4127 = vrot.lane.b32.xlu0 %v4126_v13, %s4668_s11  ;;  %v2078_v41 = vrot.slane %v1723_v12, 1  ;;  %v4141_v62 = vpack.i.bf16 %v831_v46, %v1721_v48  ;;  %v2156_v40 = vrot.slane %v831_v46, 2  ;;  %v2158_v1 = vrot.slane %v1723_v12, 2  ;;  %v434_v50 = vld [vmem:[%s4749_s8 + $0x310] sm:$0x3] }
  0x72   : > { %v758_v0 = vadd.f32 %v4754_v7, %v607_v47  ;;  %v2119_v23 = vsel %vm1865_vm0, %v2116_v31, %v2118_v26  ;;  %v2077_v57 = vsel %vm1865_vm0, %v2075_v60, %v2076_v51  ;;  %v759_v13 = vadd.f32 %v4754_v7, %v608_v29 }
  0x73   : > { %v2079_v3 = vsel %vm1865_vm0, %v2076_v51, %v2078_v41  ;;  %v4146_v55 = vpack.i.bf16 %v2119_v23, %v2117_v34  ;;  %v2197_v48 = vsel %vm1946_vm3, %v2195_v17, %v2196_v20  ;;  %v2199_v46 = vsel %vm1946_vm3, %v2196_v20, %v2198_v49  ;;  %v411_v20 = vld [vmem:[%s4749_s8 + $0x258] sm:$0xff]  ;;  %v412_v41 = vld [vmem:[%s4749_s8 + $0x260] sm:$0xff] }
  0x74   : > { %v5256_v47 = vsel %vm1946_vm3, %v2155_v19, %v2156_v40  ;;  %v2159_v29 = vsel %vm1946_vm3, %v2156_v40, %v2158_v1  ;;  %v902_v31 = vmax.f32 %v758_v0, 0.0  ;;  %v903_v60 = vmax.f32 %v759_v13, 0.0 }
  0x75   : > { %4132 = vrot.lane.b32.xlu1 %v4131_v8, %s4668_s11  ;;  %4137 = vrot.lane.b32.xlu0 %v4136_v35, %s4669_s12  ;;  %v583_v51 = vmul.f32 %v4741_v5, %v432_v30  ;;  %v4151_v25 = vpack.i.bf16 %v2079_v3, %v2077_v57  ;;  %v584_v17 = vmul.f32 %v4741_v5, %v433_v15 }
  0x76   : > { %v609_v12 = vmul.f32 %v4741_v5, %v458_v61  ;;  %v585_v19 = vmul.f32 %v4741_v5, %v434_v50  ;;  %v4156_v34 = vpack.i.bf16 %v2199_v46, %v2197_v48  ;;  %v4161_v8 = vpack.i.bf16 %v2159_v29, %v5256_v47 }
  0x77   : > { %v1793_v35 = vsel %vm1115_vm1, %v902_v31, 0.0  ;;  %v734_v26 = vadd.f32 %v4754_v7, %v583_v51  ;;  %v735_v40 = vadd.f32 %v4754_v7, %v584_v17  ;;  %v2324_v1 = vrot.slane %v903_v60, 1 }
  0x78   : > { %v2323_v49 = vrot.slane %v1793_v35, 1  ;;  %v2404_v0 = vrot.slane %v903_v60, 2  ;;  %v760_v23 = vadd.f32 %v4754_v7, %v609_v12  ;;  %v736_v57 = vadd.f32 %v4754_v7, %v585_v19  ;;  %v387_v19 = vld [vmem:[%s4749_s8 + $0x198] sm:$0xff] }
  0x79   : > { %4142 = vrot.lane.b32.xlu1 %v4141_v62, %s4669_s12  ;;  %4147 = vrot.lane.b32.xlu0 %v4146_v55, %s4670_s13  ;;  %v878_v30 = vmax.f32 %v734_v26, 0.0  ;;  %v562_v3 = vmul.f32 %v4741_v5, %v411_v20  ;;  %v4166_v13 = vpack.i.bf16 %v903_v60, %v1793_v35  ;;  %v2403_v15 = vrot.slane %v1793_v35, 2 }
  0x7a   : > { %v879_v61 = vmax.f32 %v735_v40, 0.0  ;;  %v563_v50 = vmul.f32 %v4741_v5, %v412_v41  ;;  %v904_v62 = vmax.f32 %v760_v23, 0.0  ;;  %v880_v46 = vmax.f32 %v736_v57, 0.0  ;;  %v388_v57 = vld [vmem:[%s4749_s8 + $0x1a0] sm:$0xff] }
  0x7b   : > { %v1769_v48 = vsel %vm1115_vm1, %v878_v30, 0.0  ;;  %v713_v55 = vadd.f32 %v4754_v7, %v562_v3  ;;  %v2325_v31 = vsel %vm1865_vm0, %v2323_v49, %v2324_v1  ;;  %v2405_v26 = vsel %vm1946_vm3, %v2403_v15, %v2404_v0  ;;  %v5301_v3 = vld [vmem:[%s6767_s2] ss:$0 sm:$0xff] }
  0x7c   : > { %v2283_v47 = vrot.slane %v1769_v48, 1  ;;  %v2363_v29 = vrot.slane %v1769_v48, 2  ;;  %v2284_v51 = vrot.slane %v879_v61, 1  ;;  %v1795_v5 = vsel %vm1258_vm2, %v904_v62, 0.0 }
  0x7d   : > { %4152 = vrot.lane.b32.xlu1 %v4151_v25, %s4670_s13  ;;  %4157 = vrot.lane.b32.xlu0 %v4156_v34, %s4671_s14  ;;  %v1771_v60 = vsel %vm1258_vm2, %v880_v46, 0.0  ;;  %v2364_v17 = vrot.slane %v879_v61, 2  ;;  %v714_v12 = vadd.f32 %v4754_v7, %v563_v50  ;;  %v2326_v20 = vrot.slane %v1795_v5, 1  ;;  %v413_v50 = vld [vmem:[%s4749_s8 + $0x268] sm:$0x3] }
  0x7e   : > { %v2286_v35 = vrot.slane %v1771_v60, 1  ;;  %v2406_v25 = vrot.slane %v1795_v5, 2  ;;  %v2285_v41 = vsel %vm1865_vm0, %v2283_v47, %v2284_v51  ;;  %v2366_v34 = vrot.slane %v1771_v60, 2  ;;  %v459_v47 = vld [vmem:[%s4749_s8 + $0x3d8] sm:$0xff] }
  0x7f   : > { %v857_v49 = vmax.f32 %v713_v55, 0.0  ;;  %v5292_v40 = vmax.f32 %v714_v12, 0.0  ;;  %v2327_v30 = vsel %vm1865_vm0, %v2324_v1, %v2326_v20  ;;  %v538_v15 = vmul.f32 %v5301_v3, %v387_v19  ;;  %v389_v55 = vld [vmem:[%s4749_s8 + $0x1a8] sm:$0x3]  ;;  %v460_v19 = vld [vmem:[%s4749_s8 + $0x3e0] sm:$0xff] }
  0x80   : > { %v2287_v23 = vsel %vm1865_vm0, %v2284_v51, %v2286_v35  ;;  %v2407_v7 = vsel %vm1946_vm3, %v2404_v0, %v2406_v25  ;;  %v4171_v1 = vpack.i.bf16 %v879_v61, %v1769_v48  ;;  %v4176_v62 = vpack.i.bf16 %v2327_v30, %v2325_v31 }
  0x81   : > { %4162 = vrot.lane.b32.xlu1 %v4161_v8, %s4671_s14  ;;  %4167 = vrot.lane.b32.xlu0 %v4166_v13, %s4672_s17  ;;  %v2365_v46 = vsel %vm1946_vm3, %v2363_v29, %v2364_v17  ;;  %v1748_v0 = vsel %vm1115_vm1, %v857_v49, 0.0  ;;  %v4181_v51 = vpack.i.bf16 %v2287_v23, %v2285_v41  ;;  %v4186_v5 = vpack.i.bf16 %v2407_v7, %v2405_v26  ;;  %v5318_v13 = vld [vmem:[%s6768_s3] ss:$0 sm:$0xff] }
  0x82   : > { %v2367_v60 = vsel %vm1946_vm3, %v2364_v17, %v2366_v34  ;;  %v2120_v12 = vrot.slane %v1748_v0, 1  ;;  %v2200_v20 = vrot.slane %v1748_v0, 2  ;;  %v539_v8 = vmul.f32 %v5301_v3, %v388_v57 }
  0x83   : > { %v689_v61 = vadd.f32 %v5318_v13, %v538_v15  ;;  %v564_v48 = vmul.f32 %v5301_v3, %v413_v50  ;;  %v2121_v29 = vrot.slane %v5292_v40, 1  ;;  %v540_v31 = vmul.f32 %v5301_v3, %v389_v55 }
  0x84   : > { %v2201_v17 = vrot.slane %v5292_v40, 2  ;;  %v610_v35 = vmul.f32 %v5301_v3, %v459_v47  ;;  %v690_v26 = vadd.f32 %v5318_v13, %v539_v8  ;;  %v611_v34 = vmul.f32 %v5301_v3, %v460_v19  ;;  %v435_v8 = vld [vmem:[%s4749_s8 + $0x318] sm:$0xff] }
  0x85   : > { %4172 = vrot.lane.b32.xlu1 %v4171_v1, %s4672_s17  ;;  %4177 = vrot.lane.b32.xlu0 %v4176_v62, %s4673_s20  ;;  %v833_v25 = vmax.f32 %v689_v61, 0.0  ;;  %v715_v41 = vadd.f32 %v5318_v13, %v564_v48  ;;  %v4191_v49 = vpack.i.bf16 %v2367_v60, %v2365_v46  ;;  %v4196_v30 = vpack.i.bf16 %v5292_v40, %v1748_v0 }
  0x86   : > { %v691_v23 = vadd.f32 %v5318_v13, %v540_v31  ;;  %v761_v7 = vadd.f32 %v5318_v13, %v610_v35  ;;  %v834_v57 = vmax.f32 %v690_v26, 0.0  ;;  %v762_v1 = vadd.f32 %v5318_v13, %v611_v34  ;;  %v436_v34 = vld [vmem:[%s4749_s8 + $0x320] sm:$0xff] }
  0x87   : > { %v1724_v15 = vsel %vm1115_vm1, %v833_v25, 0.0  ;;  %v859_v50 = vmax.f32 %v715_v41, 0.0  ;;  %v2122_v55 = vsel %vm1865_vm0, %v2120_v12, %v2121_v29  ;;  %v2202_v60 = vsel %vm1946_vm3, %v2200_v20, %v2201_v17 }
  0x88   : > { %v2080_v62 = vrot.slane %v1724_v15, 1  ;;  %v835_v47 = vmax.f32 %v691_v23, 0.0  ;;  %v905_v19 = vmax.f32 %v761_v7, 0.0  ;;  %v2160_v40 = vrot.slane %v1724_v15, 2  ;;  %v461_v7 = vld [vmem:[%s4749_s8 + $0x3e8] sm:$0x3] }
  0x89   : > { %4182 = vrot.lane.b32.xlu1 %v4181_v51, %s4673_s20  ;;  %4187 = vrot.lane.b32.xlu0 %v4186_v5, %s4674_s25  ;;  %v1750_v46 = vsel %vm1258_vm2, %v859_v50, 0.0  ;;  %v2081_v0 = vrot.slane %v834_v57, 1  ;;  %v2161_v31 = vrot.slane %v834_v57, 2  ;;  %v5347_v26 = vmax.f32 %v762_v1, 0.0 }
  0x8a   : > { %v2123_v61 = vrot.slane %v1750_v46, 1  ;;  %v1726_v12 = vsel %vm1258_vm2, %v835_v47, 0.0  ;;  %v2203_v48 = vrot.slane %v1750_v46, 2  ;;  %v5353_v20 = vsel %vm1115_vm1, %v905_v19, 0.0  ;;  %v414_v47 = vld [vmem:[%s4749_s8 + $0x270] sm:$0xff] }
  0x8b   : > { %v2082_v51 = vsel %vm1865_vm0, %v2080_v62, %v2081_v0  ;;  %v2083_v5 = vrot.slane %v1726_v12, 1  ;;  %v2163_v35 = vrot.slane %v1726_v12, 2  ;;  %v586_v23 = vmul.f32 %v5301_v3, %v435_v8  ;;  %v415_v12 = vld [vmem:[%s4749_s8 + $0x278] sm:$0xff] }
  0x8c   : > { %v2124_v25 = vsel %vm1865_vm0, %v2121_v29, %v2123_v61  ;;  %v2204_v41 = vsel %vm1946_vm3, %v2201_v17, %v2203_v48  ;;  %v4201_v50 = vpack.i.bf16 %v834_v57, %v1724_v15  ;;  %v437_v29 = vld [vmem:[%s4749_s8 + $0x328] sm:$0x3]  ;;  %v2162_v61 = vsel %vm1946_vm3, %v2160_v40, %v2161_v31 }
  0x8d   : > { %4192 = vrot.lane.b32.xlu1 %v4191_v49, %s4674_s25  ;;  %4197 = vrot.lane.b32.xlu0 %v4196_v30, %s4669_s12  ;;  %v4206_v1 = vpack.i.bf16 %v2124_v25, %v2122_v55  ;;  %v2084_v62 = vsel %vm1865_vm0, %v2081_v0, %v2083_v5  ;;  %v4216_v46 = vpack.i.bf16 %v2204_v41, %v2202_v60  ;;  %v2328_v19 = vrot.slane %v5353_v20, 1 }
  0x8e   : > { %v4211_v17 = vpack.i.bf16 %v2084_v62, %v2082_v51  ;;  %v2164_v8 = vsel %vm1946_vm3, %v2161_v31, %v2163_v35  ;;  %v587_v48 = vmul.f32 %v5301_v3, %v436_v34  ;;  %v737_v49 = vadd.f32 %v5318_v13, %v586_v23 }
  0x8f   : > { %v612_v30 = vmul.f32 %v5301_v3, %v461_v7  ;;  %v4226_v57 = vpack.i.bf16 %v5347_v26, %v5353_v20  ;;  %v2329_v15 = vrot.slane %v5347_v26, 1  ;;  %v588_v55 = vmul.f32 %v5301_v3, %v437_v29 }
  0x90   : > { %v565_v40 = vmul.f32 %v5301_v3, %v414_v47  ;;  %v738_v0 = vadd.f32 %v5318_v13, %v587_v48  ;;  %v881_v60 = vmax.f32 %v737_v49, 0.0  ;;  %v566_v51 = vmul.f32 %v5301_v3, %v415_v12  ;;  %v390_v49 = vld [vmem:[%s4749_s8 + $0x1b0] sm:$0xff] }
  0x91   : > { %4202 = vrot.lane.b32.xlu1 %v4201_v50, %s4669_s12  ;;  %4207 = vrot.lane.b32.xlu0 %v4206_v1, %s4670_s13  ;;  %v763_v31 = vadd.f32 %v5318_v13, %v612_v30  ;;  %v2408_v5 = vrot.slane %v5353_v20, 2  ;;  %v739_v35 = vadd.f32 %v5318_v13, %v588_v55  ;;  %v2409_v25 = vrot.slane %v5347_v26, 2 }
  0x92   : > { %v716_v41 = vadd.f32 %v5318_v13, %v565_v40  ;;  %v882_v34 = vmax.f32 %v738_v0, 0.0  ;;  %v1772_v23 = vsel %vm1115_vm1, %v881_v60, 0.0  ;;  %v717_v50 = vadd.f32 %v5318_v13, %v566_v51  ;;  %v391_v51 = vld [vmem:[%s4749_s8 + $0x1b8] sm:$0xff] }
  0x93   : > { %v907_v7 = vmax.f32 %v763_v31, 0.0  ;;  %v4221_v1 = vpack.i.bf16 %v2164_v8, %v2162_v61  ;;  %v2288_v62 = vrot.slane %v1772_v23, 1  ;;  %v2330_v29 = vsel %vm1865_vm0, %v2328_v19, %v2329_v15 }
  0x94   : > { %v883_v47 = vmax.f32 %v739_v35, 0.0  ;;  %v2368_v26 = vrot.slane %v1772_v23, 2  ;;  %v2289_v12 = vrot.slane %v882_v34, 1  ;;  %v860_v48 = vmax.f32 %v716_v41, 0.0  ;;  %v416_v41 = vld [vmem:[%s4749_s8 + $0x280] sm:$0x3] }
  0x95   : > { %4212 = vrot.lane.b32.xlu1 %v4211_v17, %s4670_s13  ;;  %4217 = vrot.lane.b32.xlu0 %v4216_v46, %s4671_s14  ;;  %v1798_v20 = vsel %vm1258_vm2, %v907_v7, 0.0  ;;  %v2369_v19 = vrot.slane %v882_v34, 2  ;;  %v4231_v55 = vpack.i.bf16 %v882_v34, %v1772_v23  ;;  %v2410_v46 = vsel %vm1946_vm3, %v2408_v5, %v2409_v25 }
  0x96   : > { %v2331_v30 = vrot.slane %v1798_v20, 1  ;;  %v1774_v61 = vsel %vm1258_vm2, %v883_v47, 0.0  ;;  %v2411_v8 = vrot.slane %v1798_v20, 2  ;;  %v5396_v40 = vmax.f32 %v717_v50, 0.0 }
  0x97   : > { %v2291_v17 = vrot.slane %v1774_v61, 1  ;;  %v2371_v31 = vrot.slane %v1774_v61, 2  ;;  %v541_v35 = vmul.f32 %v5301_v3, %v390_v49  ;;  %v2290_v23 = vsel %vm1865_vm0, %v2288_v62, %v2289_v12  ;;  %v462_v61 = vld [vmem:[%s4749_s8 + $0x3f0] sm:$0xff] }
  0x98   : > { %v2332_v0 = vsel %vm1865_vm0, %v2329_v15, %v2331_v30  ;;  %v2412_v60 = vsel %vm1946_vm3, %v2409_v25, %v2411_v8  ;;  %v1751_v7 = vsel %vm1115_vm1, %v860_v48, 0.0  ;;  %v392_v15 = vld [vmem:[%s4749_s8 + $0x1c0] sm:$0x3]  ;;  %v2370_v25 = vsel %vm1946_vm3, %v2368_v26, %v2369_v19 }
  0x99   : > { %4222 = vrot.lane.b32.xlu1 %v4221_v1, %s4671_s14  ;;  %4227 = vrot.lane.b32.xlu0 %v4226_v57, %s4672_s17  ;;  %v4236_v34 = vpack.i.bf16 %v2332_v0, %v2330_v29  ;;  %v2292_v5 = vsel %vm1865_vm0, %v2289_v12, %v2291_v17  ;;  %v4246_v50 = vpack.i.bf16 %v2412_v60, %v2410_v46  ;;  %v2125_v62 = vrot.slane %v1751_v7, 1  ;;  %v463_v60 = vld [vmem:[%s4749_s8 + $0x3f8] sm:$0xff] }
  0x9a   : > { %v542_v47 = vmul.f32 %v5301_v3, %v391_v51  ;;  %v692_v20 = vadd.f32 %v5318_v13, %v541_v35  ;;  %v567_v1 = vmul.f32 %v5301_v3, %v416_v41  ;;  %v4241_v57 = vpack.i.bf16 %v2292_v5, %v2290_v23 }
  0x9b   : > { %v2372_v29 = vsel %vm1946_vm3, %v2369_v19, %v2371_v31  ;;  %v543_v12 = vmul.f32 %v5301_v3, %v392_v15  ;;  %v2126_v30 = vrot.slane %v5396_v40, 1  ;;  %v4256_v8 = vpack.i.bf16 %v5396_v40, %v1751_v7  ;;  %v5434_v15 = vpop.permute.xlu0 %3997 }
  0x9c   : > { %v693_v26 = vadd.f32 %v5318_v13, %v542_v47  ;;  %v836_v48 = vmax.f32 %v692_v20, 0.0  ;;  %v718_v49 = vadd.f32 %v5318_v13, %v567_v1  ;;  %v2205_v17 = vrot.slane %v1751_v7, 2 }
  0x9d   : > { %4232 = vrot.lane.b32.xlu1 %v4231_v55, %s4672_s17  ;;  %4237 = vrot.lane.b32.xlu0 %v4236_v34, %s4673_s20  ;;  %v694_v19 = vadd.f32 %v5318_v13, %v543_v12  ;;  %v4251_v31 = vpack.i.bf16 %v2372_v29, %v2370_v25  ;;  %v2206_v35 = vrot.slane %v5396_v40, 2  ;;  %v613_v41 = vmul.f32 %v5301_v3, %v462_v61 }
  0x9e   : > { %v837_v46 = vmax.f32 %v693_v26, 0.0  ;;  %v1727_v0 = vsel %vm1115_vm1, %v836_v48, 0.0  ;;  %v862_v55 = vmax.f32 %v718_v49, 0.0  ;;  %v2127_v5 = vsel %vm1865_vm0, %v2125_v62, %v2126_v30 }
  0x9f   : > { %v838_v51 = vmax.f32 %v694_v19, 0.0  ;;  %v2085_v34 = vrot.slane %v1727_v0, 1  ;;  %v614_v20 = vmul.f32 %v5301_v3, %v463_v60  ;;  %v2165_v1 = vrot.slane %v1727_v0, 2  ;;  %v5445_v19 = vpop.permute.xlu1 %4007  ;;  %v439_v60 = vld [vmem:[%s4749_s8 + $0x338] sm:$0xff] }
  0xa0   : > { %v1753_v23 = vsel %vm1258_vm2, %v862_v55, 0.0  ;;  %v2086_v7 = vrot.slane %v837_v46, 1  ;;  %v2166_v29 = vrot.slane %v837_v46, 2  ;;  %v764_v12 = vadd.f32 %v5318_v13, %v613_v41  ;;  %v438_v55 = vld [vmem:[%s4749_s8 + $0x330] sm:$0xff] }
  0xa1   : > { %4242 = vrot.lane.b32.xlu1 %v4241_v57, %s4673_s20  ;;  %4247 = vrot.lane.b32.xlu0 %v4246_v50, %s4674_s25  ;;  %v2128_v47 = vrot.slane %v1753_v23, 1  ;;  %v1729_v25 = vsel %vm1258_vm2, %v838_v51, 0.0  ;;  %v2208_v40 = vrot.slane %v1753_v23, 2  ;;  %v765_v62 = vadd.f32 %v5318_v13, %v614_v20 }
  0xa2   : > { %v2088_v50 = vrot.slane %v1729_v25, 1  ;;  %v4261_v26 = vpack.i.bf16 %v837_v46, %v1727_v0  ;;  %v2207_v49 = vsel %vm1946_vm3, %v2205_v17, %v2206_v35  ;;  %v2168_v61 = vrot.slane %v1729_v25, 2 }
  0xa3   : > { %v2129_v57 = vsel %vm1865_vm0, %v2126_v30, %v2128_v47  ;;  %v2087_v30 = vsel %vm1865_vm0, %v2085_v34, %v2086_v7  ;;  %v2209_v41 = vsel %vm1946_vm3, %v2206_v35, %v2208_v40  ;;  %v908_v23 = vmax.f32 %v764_v12, 0.0 }
  0xa4   : > { %v4266_v48 = vpack.i.bf16 %v2129_v57, %v2127_v5  ;;  %v2089_v51 = vsel %vm1865_vm0, %v2086_v7, %v2088_v50  ;;  %v909_v46 = vmax.f32 %v765_v62, 0.0  ;;  %v589_v0 = vmul.f32 %v5301_v3, %v438_v55  ;;  %v464_v5 = vld [vmem:[%s4749_s8 + $0x400] sm:$0x3] }
  0xa5   : > { %4252 = vrot.lane.b32.xlu1 %v4251_v31, %s4674_s25  ;;  %4257 = vrot.lane.b32.xlu0 %v4256_v8, %s4669_s12  ;;  %v5452_v31 = vpop.permute.xlu0 %4002  ;;  %v2167_v8 = vsel %vm1946_vm3, %v2165_v1, %v2166_v29  ;;  %v590_v17 = vmul.f32 %v5301_v3, %v439_v60  ;;  %v4271_v34 = vpack.i.bf16 %v2089_v51, %v2087_v30  ;;  %v1799_v35 = vsel %vm1115_vm1, %v908_v23, 0.0  ;;  %v5466_v1 = vpop.permute.xlu1 %4012 }
  0xa6   : > { %v4276_v47 = vpack.i.bf16 %v2209_v41, %v2207_v49  ;;  %v2169_v7 = vsel %vm1946_vm3, %v2166_v29, %v2168_v61  ;;  %v740_v25 = vadd.f32 %v5318_v13, %v589_v0  ;;  %v615_v20 = vmul.f32 %v5301_v3, %v464_v5  ;;  %v440_v61 = vld [vmem:[%s4749_s8 + $0x340] sm:$0x3] }
  0xa7   : > { %v741_v40 = vadd.f32 %v5318_v13, %v590_v17  ;;  %v4281_v50 = vpack.i.bf16 %v2169_v7, %v2167_v8  ;;  %v4286_v57 = vpack.i.bf16 %v909_v46, %v1799_v35  ;;  %v2333_v29 = vrot.slane %v1799_v35, 1 }
  0xa8   : > { %v884_v12 = vmax.f32 %v740_v25, 0.0  ;;  %v2413_v60 = vrot.slane %v1799_v35, 2  ;;  %v2414_v51 = vrot.slane %v909_v46, 2  ;;  %v591_v41 = vmul.f32 %v5301_v3, %v440_v61  ;;  %v417_v35 = vld [vmem:[%s4749_s8 + $0x288] sm:$0xff]  ;;  %v418_v25 = vld [vmem:[%s4749_s8 + $0x290] sm:$0xff] }
  0xa9   : > { %4262 = vrot.lane.b32.xlu1 %v4261_v26, %s4669_s12  ;;  %4267 = vrot.lane.b32.xlu0 %v4266_v48, %s4670_s13  ;;  %v885_v62 = vmax.f32 %v741_v40, 0.0  ;;  %v766_v26 = vadd.f32 %v5318_v13, %v615_v20  ;;  %v2334_v48 = vrot.slane %v909_v46, 1  ;;  %v5471_v49 = vpop.permute.xlu0 %4017  ;;  %v5482_v5 = vpop.permute.xlu1 %4022 }
  0xaa   : > { %v1775_v55 = vsel %vm1115_vm1, %v884_v12, 0.0  ;;  %6814 = vst [vmem:[#allocation16_spill] sm:$0xff] %v5482_v5  ;;  %v2415_v20 = vsel %vm1946_vm3, %v2413_v60, %v2414_v51 }
  0xab   : > { %v910_v30 = vmax.f32 %v766_v26, 0.0  ;;  %v4291_v23 = vpack.i.bf16 %v885_v62, %v1775_v55  ;;  %v2293_v8 = vrot.slane %v1775_v55, 1  ;;  %v2335_v17 = vsel %vm1865_vm0, %v2333_v29, %v2334_v48 }
  0xac   : > { %v2294_v7 = vrot.slane %v885_v62, 1  ;;  %v2373_v40 = vrot.slane %v1775_v55, 2  ;;  %v2374_v29 = vrot.slane %v885_v62, 2  ;;  %v569_v55 = vmul.f32 %v5301_v3, %v418_v25 }
  0xad   : > { %4272 = vrot.lane.b32.xlu1 %v4271_v34, %s4670_s13  ;;  %4277 = vrot.lane.b32.xlu0 %v4276_v47, %s4671_s14  ;;  %v1801_v0 = vsel %vm1258_vm2, %v910_v30, 0.0  ;;  %v742_v47 = vadd.f32 %v5318_v13, %v591_v41  ;;  %v568_v30 = vmul.f32 %v5301_v3, %v417_v35  ;;  %v419_v35 = vld [vmem:[%s4749_s8 + $0x298] sm:$0x3] }
  0xae   : > { %v2336_v34 = vrot.slane %v1801_v0, 1  ;;  %v2416_v46 = vrot.slane %v1801_v0, 2  ;;  %v2295_v41 = vsel %vm1865_vm0, %v2293_v8, %v2294_v7 }
  0xaf   : > { %v886_v12 = vmax.f32 %v742_v47, 0.0  ;;  %v719_v62 = vadd.f32 %v5318_v13, %v568_v30  ;;  %v393_v47 = vld [vmem:[%s4749_s8 + $0x1c8] sm:$0xff] }
  0xb0   : > { %v2417_v26 = vsel %vm1946_vm3, %v2414_v51, %v2416_v46  ;;  %v394_v46 = vld [vmem:[%s4749_s8 + $0x1d0] sm:$0xff] }
  0xb1   : > { %4282 = vrot.lane.b32.xlu1 %v4281_v50, %s4671_s14  ;;  %4287 = vrot.lane.b32.xlu0 %v4286_v57, %s4672_s17  ;;  %v5488_v50 = vpop.permute.xlu0 %4027  ;;  %v2337_v57 = vsel %vm1865_vm0, %v2334_v48, %v2336_v34  ;;  %v1777_v60 = vsel %vm1258_vm2, %v886_v12, 0.0  ;;  %v4306_v48 = vpack.i.bf16 %v2417_v26, %v2415_v20  ;;  %v5501_v34 = vpop.permute.xlu1 %4032  ;;  %v863_v20 = vmax.f32 %v719_v62, 0.0 }
  0xb2   : > { %6815 = vst [vmem:[#allocation17_spill] sm:$0xff] %v5488_v50  ;;  %v4296_v61 = vpack.i.bf16 %v2337_v57, %v2335_v17  ;;  %v2296_v51 = vrot.slane %v1777_v60, 1  ;;  %v2376_v0 = vrot.slane %v1777_v60, 2  ;;  %6816 = vst [vmem:[#allocation18_spill] sm:$0xff] %v5501_v34  ;;  %v2375_v17 = vsel %vm1946_vm3, %v2373_v40, %v2374_v29 }
  0xb3   : > { %v1754_v40 = vsel %vm1115_vm1, %v863_v20, 0.0  ;;  %v4000_v60 = vunpack.i.h.bf16 %v5434_v15  ;;  %v4010_v62 = vunpack.i.h.bf16 %v5445_v19  ;;  %v4005_v20 = vunpack.i.h.bf16 %v5452_v31 }
  0xb4   : > { %v2297_v25 = vsel %vm1865_vm0, %v2294_v7, %v2296_v51  ;;  %v2377_v8 = vsel %vm1946_vm3, %v2374_v29, %v2376_v0  ;;  %v544_v7 = vmul.f32 %v5301_v3, %v393_v47  ;;  %v545_v29 = vmul.f32 %v5301_v3, %v394_v46  ;;  %v395_v46 = vld [vmem:[%s4749_s8 + $0x1d8] sm:$0x3] }
  0xb5   : > { %4292 = vrot.lane.b32.xlu1 %v4291_v23, %s4672_s17  ;;  %4297 = vrot.lane.b32.xlu0 %v4296_v61, %s4673_s20  ;;  %v720_v23 = vadd.f32 %v5318_v13, %v569_v55  ;;  %v5509_v12 = vpop.permute.xlu0 %4037  ;;  %v4301_v30 = vpack.i.bf16 %v2297_v25, %v2295_v41  ;;  %v570_v55 = vmul.f32 %v5301_v3, %v419_v35  ;;  %v3999_v51 = vunpack.i.l.bf16 %v5434_v15  ;;  %v5526_v25 = vpop.permute.xlu1 %4042 }
  0xb6   : > { %v4311_v0 = vpack.i.bf16 %v2377_v8, %v2375_v17  ;;  %v4009_v35 = vunpack.i.l.bf16 %v5445_v19  ;;  %v2130_v15 = vrot.slane %v1754_v40, 1  ;;  %v4004_v19 = vunpack.i.l.bf16 %v5452_v31 }
  0xb7   : > { %v864_v57 = vmax.f32 %v720_v23, 0.0  ;;  %v696_v23 = vadd.f32 %v5318_v13, %v545_v29  ;;  %v721_v47 = vadd.f32 %v5318_v13, %v570_v55  ;;  %v5535_v29 = vsel %vm3211_vm4, 0.0, %v4000_v60 }
  0xb8   : > { %v5538_v55 = vsel %vm3211_vm4, 0.0, %v3999_v51  ;;  %v546_v43 = vmul.f32 %v5301_v3, %v395_v46  ;;  %v5553_v31 = vsel %vm3211_vm4, %v4789_v39, %v4009_v35 }
  0xb9   : > { %4307 = vrot.lane.b32.xlu0 %v4306_v48, %s4674_s25  ;;  %4302 = vrot.lane.b32.xlu1 %v4301_v30, %s4673_s20  ;;  %v4316_v41 = vpack.i.bf16 %v864_v57, %v1754_v40  ;;  %v695_v48 = vadd.f32 %v5318_v13, %v544_v7  ;;  %v2131_v61 = vrot.slane %v864_v57, 1  ;;  %v2210_v30 = vrot.slane %v1754_v40, 2 }
  0xba   : > { %v840_v8 = vmax.f32 %v696_v23, 0.0  ;;  %v865_v26 = vmax.f32 %v721_v47, 0.0  ;;  %v5532_v7 = vpop.permute.xlu0 %4047  ;;  %v5545_v40 = vsel %vm3211_vm4, %v4781_v32, %v4010_v62  ;;  %v5558_v32 = vsel %vm3211_vm4, %v4784_v36, %v4005_v20  ;;  %v466_v36 = vld [vmem:[%s4749_s8 + $0x410] sm:$0xff] }
  0xbb   : > { %v839_v17 = vmax.f32 %v695_v48, 0.0  ;;  %v2211_v48 = vrot.slane %v864_v57, 2  ;;  %v697_v62 = vadd.f32 %v5318_v13, %v546_v43  ;;  %v5566_v57 = vsel %vm3211_vm4, %v4801_v45, %v4004_v19 }
  0xbc   : > { %v1756_v60 = vsel %vm1258_vm2, %v865_v26, 0.0  ;;  %v4015_v43 = vunpack.i.h.bf16 %v5466_v1  ;;  %v4014_v45 = vunpack.i.l.bf16 %v5466_v1  ;;  %v4020_v19 = vunpack.i.h.bf16 %v5471_v49 }
  0xbd   : > { %4317 = vrot.lane.b32.xlu0 %v4316_v41, %s4669_s12  ;;  %4312 = vrot.lane.b32.xlu1 %v4311_v0, %s4674_s25  ;;  %v1730_v41 = vsel %vm1115_vm1, %v839_v17, 0.0  ;;  %v2132_v0 = vsel %vm1865_vm0, %v2130_v15, %v2131_v61  ;;  %v2133_v23 = vrot.slane %v1756_v60, 1  ;;  %v2212_v47 = vsel %vm1946_vm3, %v2210_v30, %v2211_v48  ;;  %v5562_v46 = vpop.permute.xlu1 %4052  ;;  %v465_v17 = vld [vmem:[%s4749_s8 + $0x408] sm:$0xff] }
  0xbe   : > { %v4321_v51 = vpack.i.bf16 %v840_v8, %v1730_v41  ;;  %v2213_v26 = vrot.slane %v1756_v60, 2  ;;  %v2090_v39 = vrot.slane %v1730_v41, 1  ;;  %v2091_v15 = vrot.slane %v840_v8, 1 }
  0xbf   : > { %v2134_v35 = vsel %vm1865_vm0, %v2131_v61, %v2133_v23  ;;  %v841_v30 = vmax.f32 %v697_v62, 0.0  ;;  %v2170_v21 = vrot.slane %v1730_v41, 2  ;;  %v2171_v23 = vrot.slane %v840_v8, 2 }
  0xc0   : > { %v4326_v20 = vpack.i.bf16 %v2134_v35, %v2132_v0  ;;  %v2214_v60 = vsel %vm1946_vm3, %v2211_v48, %v2213_v26  ;;  %v616_v0 = vmul.f32 %v5301_v3, %v465_v17  ;;  %v617_v62 = vmul.f32 %v5301_v3, %v466_v36  ;;  %v441_v48 = vld [vmem:[%s4749_s8 + $0x348] sm:$0xff]  ;;  %v442_v36 = vld [vmem:[%s4749_s8 + $0x350] sm:$0xff] }
  0xc1   : > { %4322 = vrot.lane.b32.xlu1 %v4321_v51, %s4669_s12  ;;  %v4336_v51 = vpack.i.bf16 %v2214_v60, %v2212_v47  ;;  %v1732_v61 = vsel %vm1258_vm2, %v841_v30, 0.0  ;;  %v4019_v26 = vunpack.i.l.bf16 %v5471_v49  ;;  %v2092_v1 = vsel %vm1865_vm0, %v2090_v39, %v2091_v15 }
  0xc2   : > { %v5574_v34 = vpop.permute.xlu0 %4057  ;;  %4327 = vrot.lane.b32.xlu0 %v4326_v20, %s4670_s13  ;;  %v2093_v35 = vrot.slane %v1732_v61, 1  ;;  %v2173_v41 = vrot.slane %v1732_v61, 2  ;;  %v5588_v47 = vsel %vm3211_vm4, %v4819_v59, %v4015_v43  ;;  %v4040_v20 = vunpack.i.h.bf16 %v5509_v12 }
  0xc3   : > { %v767_v8 = vadd.f32 %v5318_v13, %v616_v0  ;;  %v768_v17 = vadd.f32 %v5318_v13, %v617_v62  ;;  %v2172_v49 = vsel %vm1946_vm3, %v2170_v21, %v2171_v23  ;;  %v592_v61 = vmul.f32 %v5301_v3, %v441_v48 }
  0xc4   : > { %v2094_v60 = vsel %vm1865_vm0, %v2091_v15, %v2093_v35  ;;  %v2174_v39 = vsel %vm1946_vm3, %v2171_v23, %v2173_v41  ;;  %v5603_v59 = vsel %vm3211_vm4, %v4825_v63, %v4014_v45  ;;  %v5610_v15 = vsel %vm3211_vm4, %v4851_v27, %v4020_v19 }
  0xc5   : > { %v4331_v43 = vpack.i.bf16 %v2094_v60, %v2092_v1  ;;  %v911_v0 = vmax.f32 %v767_v8, 0.0  ;;  %v912_v62 = vmax.f32 %v768_v17, 0.0  ;;  %v5614_v21 = vsel %vm3211_vm4, %v4860_v37, %v4019_v26 }
  0xc6   : > { %v5593_v30 = vpop.permute.xlu1 %4062  ;;  %4337 = vrot.lane.b32.xlu0 %v4336_v51, %s4671_s14  ;;  %v4039_v23 = vunpack.i.l.bf16 %v5509_v12  ;;  %v593_v63 = vmul.f32 %v5301_v3, %v442_v36  ;;  %v4341_v45 = vpack.i.bf16 %v2174_v39, %v2172_v49  ;;  %v743_v48 = vadd.f32 %v5318_v13, %v592_v61 }
  0xc7   : > { %6817 = vst [vmem:[#allocation19_spill] sm:$0xff] %v5593_v30  ;;  %4332 = vrot.lane.b32.xlu1 %v4331_v43, %s4670_s13  ;;  %v1802_v51 = vsel %vm1115_vm1, %v911_v0, 0.0  ;;  %v618_v1 = vmul.f32 %v5301_v3, %v467_v16  ;;  %v5625_v27 = vsel %vm3211_vm4, %v4944_v10, %v4040_v20  ;;  %v4045_v37 = vunpack.i.h.bf16 %v5526_v25  ;;  %v443_v43 = vld [vmem:[%s4749_s8 + $0x358] sm:$0x3] }
  0xc8   : > { %v4044_v12 = vunpack.i.l.bf16 %v5526_v25  ;;  %v4346_v19 = vpack.i.bf16 %v912_v62, %v1802_v51  ;;  %v4050_v26 = vunpack.i.h.bf16 %v5532_v7  ;;  %v744_v35 = vadd.f32 %v5318_v13, %v593_v63 }
  0xc9   : > { %v887_v41 = vmax.f32 %v743_v48, 0.0  ;;  %v769_v8 = vadd.f32 %v5318_v13, %v618_v1  ;;  %v4049_v10 = vunpack.i.l.bf16 %v5532_v7  ;;  %v4055_v20 = vunpack.i.h.bf16 %v5562_v46 }
  0xca   : > { %v2338_v36 = vrot.slane %v1802_v51, 1  ;;  %4347 = vrot.lane.b32.xlu0 %v4346_v19, %s4672_s17  ;;  %v2339_v25 = vrot.slane %v912_v62, 1  ;;  %v4054_v60 = vunpack.i.l.bf16 %v5562_v46  ;;  %v5641_v49 = vmax.f32 %v744_v35, 0.0 }
  0xcb   : > { %v5606_v50 = vpop.permute.xlu0 %4067  ;;  %4342 = vrot.lane.b32.xlu1 %v4341_v45, %s4671_s14  ;;  %v1778_v39 = vsel %vm1115_vm1, %v887_v41, 0.0  ;;  %v913_v61 = vmax.f32 %v769_v8, 0.0  ;;  %v5648_v7 = vsel %vm3211_vm4, %v4953_v18, %v4039_v23  ;;  %v5652_v0 = vsel %vm3211_vm4, %v4969_v38, %v4045_v37 }
  0xcc   : > { %6818 = vst [vmem:[#allocation20_spill] sm:$0xff] %v5606_v50  ;;  %v4060_v63 = vunpack.i.h.bf16 %v5574_v34  ;;  %v2418_v46 = vrot.slane %v1802_v51, 2  ;;  %v5657_v45 = vsel %vm3211_vm4, %v4979_v53, %v4044_v12  ;;  %v5661_v48 = vsel %vm3211_vm4, %v5000_v24, %v4050_v26 }
  0xcd   : > { %v4351_v1 = vpack.i.bf16 %v5641_v49, %v1778_v39  ;;  %v1804_v18 = vsel %vm1258_vm2, %v913_v61, 0.0  ;;  %v2340_v37 = vsel %vm1865_vm0, %v2338_v36, %v2339_v25  ;;  %v594_v19 = vmul.f32 %v5301_v3, %v443_v43 }
  0xce   : > { %v2341_v51 = vrot.slane %v1804_v18, 1  ;;  %v2419_v53 = vrot.slane %v912_v62, 2  ;;  %v5674_v12 = vsel %vm3211_vm4, %v5006_v33, %v4049_v10  ;;  %v5678_v24 = vsel %vm3211_vm4, %v5020_v58, %v4055_v20 }
  0xcf   : > { %v5632_v17 = vpop.permute.xlu1 %4072  ;;  %v5634_v16 = vpop.permute.xlu0 %4077  ;;  %v5682_v26 = vsel %vm3211_vm4, %v5026_v2, %v4054_v60  ;;  %4352 = vrot.lane.b32.xlu1 %v4351_v1, %s4672_s17  ;;  %v2421_v35 = vrot.slane %v1804_v18, 2  ;;  %v5687_v41 = vsel %vm3211_vm4, %v5050_v52, %v4060_v63  ;;  %v745_v33 = vadd.f32 %v5318_v13, %v594_v19 }
  0xd0   : > { %6819 = vst [vmem:[#allocation21_spill] sm:$0xff] %v5632_v17  ;;  %6820 = vst [vmem:[#allocation22_spill] sm:$0xff] %v5687_v41  ;;  %v2342_v62 = vsel %vm1865_vm0, %v2339_v25, %v2341_v51  ;;  %v2420_v8 = vsel %vm1946_vm3, %v2418_v46, %v2419_v53  ;;  %v2298_v10 = vrot.slane %v1778_v39, 1  ;;  %v2299_v20 = vrot.slane %v5641_v49, 1 }
  0xd1   : > { %v4356_v58 = vpack.i.bf16 %v2342_v62, %v2340_v37  ;;  %v2422_v2 = vsel %vm1946_vm3, %v2419_v53, %v2421_v35  ;;  %v4059_v61 = vunpack.i.l.bf16 %v5574_v34  ;;  %v2378_v43 = vrot.slane %v1778_v39, 2 }
  0xd2   : > { %v889_v63 = vmax.f32 %v745_v33, 0.0  ;;  %v4366_v1 = vpack.i.bf16 %v2422_v2, %v2420_v8  ;;  %v2379_v25 = vrot.slane %v5641_v49, 2  ;;  %v2007_v46 = vrot.slane %v5059_v14, 2  ;;  %v396_v2 = vld [vmem:[%s4749_s8 + $0x1e0] sm:$0xff] }
  0xd3   : > { %v5666_v23 = vpop.permute.xlu1 %4082  ;;  %v5668_v38 = vpop.permute.xlu0 %4087  ;;  %4357 = vrot.lane.b32.xlu0 %v4356_v58, %s4673_s20  ;;  %v2008_v18 = vrot.slane %v5050_v52, 2  ;;  %v2010_v37 = vrot.slane %v5067_v22, 2  ;;  %v4080_v51 = vunpack.i.h.bf16 %v5634_v16  ;;  %v4079_v34 = vunpack.i.l.bf16 %v5634_v16  ;;  %v421_v58 = vld [vmem:[%s4749_s8 + $0x2a8] sm:$0xff] }
  0xd4   : > { %v1780_v39 = vsel %vm1258_vm2, %v889_v63, 0.0  ;;  %v2300_v19 = vsel %vm1865_vm0, %v2298_v10, %v2299_v20  ;;  %v5716_v62 = vsel %vm3211_vm4, %v5059_v14, %v4059_v61  ;;  %v4085_v16 = vunpack.i.h.bf16 %v5666_v23  ;;  %v420_v10 = vld [vmem:[%s4749_s8 + $0x2a0] sm:$0xff]  ;;  %v397_v14 = vld [vmem:[%s4749_s8 + $0x1e8] sm:$0xff] }
  0xd5   : > { %v2301_v49 = vrot.slane %v1780_v39, 1  ;;  %v2381_v53 = vrot.slane %v1780_v39, 2  ;;  %v2009_v52 = vsel %vm1946_vm3, %v2007_v46, %v2008_v18  ;;  %6823 = vst [vmem:[#allocation25_spill] sm:$0xff] %v5716_v62  ;;  %v4084_v33 = vunpack.i.l.bf16 %v5666_v23 }
  0xd6   : > { %v2011_v8 = vsel %vm1946_vm3, %v2008_v18, %v2010_v37  ;;  %v2380_v46 = vsel %vm1946_vm3, %v2378_v43, %v2379_v25  ;;  %v5731_v61 = vsel %vm3244_vm5, %v5535_v29, %v4080_v51  ;;  %v4090_v18 = vunpack.i.h.bf16 %v5668_v38 }
  0xd7   : > { %v5694_v36 = vpop.permute.xlu1 %4092  ;;  %v5696_v60 = vpop.permute.xlu0 %4097  ;;  %v2302_v63 = vsel %vm1865_vm0, %v2299_v20, %v2301_v49  ;;  %4367 = vrot.lane.b32.xlu0 %v4366_v1, %s4674_s25  ;;  %v2382_v39 = vsel %vm1946_vm3, %v2379_v25, %v2381_v53  ;;  %v4376_v17 = vpack.i.bf16 %v2011_v8, %v2009_v52  ;;  %v4089_v37 = vunpack.i.l.bf16 %v5668_v38 }
  0xd8   : > { %v4361_v23 = vpack.i.bf16 %v2302_v63, %v2300_v19  ;;  %v5737_v20 = vsel %vm3244_vm5, %v5538_v55, %v4079_v34  ;;  %v571_v43 = vmul.f32 %v5301_v3, %v420_v10  ;;  %v572_v1 = vmul.f32 %v5301_v3, %v421_v58  ;;  %v422_v10 = vld [vmem:[%s4749_s8 + $0x2b0] sm:$0x3] }
  0xd9   : > { %v547_v25 = vmul.f32 %v5301_v3, %v396_v2  ;;  %v5747_v38 = vsel %vm3244_vm5, %v5566_v57, %v4084_v33  ;;  %v4371_v51 = vpack.i.bf16 %v2382_v39, %v2380_v46  ;;  %v4095_v55 = vunpack.i.h.bf16 %v5694_v36  ;;  %v398_v57 = vld [vmem:[%s4749_s8 + $0x1f0] sm:$0x3] }
  0xda   : > { %4362 = vrot.lane.b32.xlu1 %v4361_v23, %s4673_s20  ;;  %v548_v34 = vmul.f32 %v5301_v3, %v397_v14  ;;  %v5753_v19 = vsel %vm3244_vm5, %v5558_v32, %v4085_v16  ;;  %v722_v53 = vadd.f32 %v5318_v13, %v571_v43  ;;  %v723_v52 = vadd.f32 %v5318_v13, %v572_v1 }
  0xdb   : > { %v5710_v35 = vpop.permute.xlu1 %4102  ;;  %v5712_v22 = vpop.permute.xlu0 %4107  ;;  %4377 = vrot.lane.b32.xlu0 %v4376_v17, %s4668_s11  ;;  %v698_v8 = vadd.f32 %v5318_v13, %v547_v25  ;;  %v5763_v33 = vsel %vm3244_vm5, %v5545_v40, %v4090_v18  ;;  %v5767_v58 = vsel %vm3244_vm5, %v5553_v31, %v4089_v37  ;;  %v4094_v32 = vunpack.i.l.bf16 %v5694_v36 }
  0xdc   : > { %6821 = vst [vmem:[#allocation23_spill] sm:$0xff] %v5710_v35  ;;  %6822 = vst [vmem:[#allocation24_spill] sm:$0xff] %v5712_v22  ;;  %v699_v17 = vadd.f32 %v5318_v13, %v548_v34  ;;  %v4100_v16 = vunpack.i.h.bf16 %v5696_v60  ;;  %v866_v2 = vmax.f32 %v722_v53, 0.0  ;;  %v867_v63 = vmax.f32 %v723_v52, 0.0  ;;  %v444_v22 = vld [vmem:[%s4749_s8 + $0x360] sm:$0xff] }
  0xdd   : > { %v842_v46 = vmax.f32 %v698_v8, 0.0  ;;  %v5779_v40 = vsel %vm3244_vm5, %v5588_v47, %v4095_v55  ;;  %v573_v36 = vmul.f32 %v5301_v3, %v422_v10  ;;  %v549_v23 = vmul.f32 %v5301_v3, %v398_v57 }
  0xde   : > { %4372 = vrot.lane.b32.xlu1 %v4371_v51, %s4674_s25  ;;  %v843_v31 = vmax.f32 %v699_v17, 0.0  ;;  %v1757_v37 = vsel %vm1115_vm1, %v866_v2, 0.0  ;;  %v2136_v1 = vrot.slane %v867_v63, 1  ;;  %v5790_v25 = vsel %vm3244_vm5, %v5603_v59, %v4094_v32 }
  0xdf   : > { %v5742_v49 = vpop.permute.xlu1 %4112  ;;  %v4118_v29 = vpop.permute.xlu0 %4117  ;;  %v1733_v43 = vsel %vm1115_vm1, %v842_v46, 0.0  ;;  %v4381_v47 = vpack.i.bf16 %v867_v63, %v1757_v37  ;;  %v2135_v51 = vrot.slane %v1757_v37, 1  ;;  %v5794_v34 = vsel %vm3244_vm5, %v5610_v15, %v4100_v16 }
  0xe0   : > { %6824 = vst [vmem:[#allocation26_spill] sm:$0xff] %v5742_v49  ;;  %v4386_v55 = vpack.i.bf16 %v843_v31, %v1733_v43  ;;  %6825 = vst [vmem:[#allocation27_spill] sm:$0xff] %v5794_v34  ;;  %v2095_v3 = vrot.slane %v1733_v43, 1  ;;  %v724_v53 = vadd.f32 %v5318_v13, %v573_v36  ;;  %v700_v52 = vadd.f32 %v5318_v13, %v549_v23 }
  0xe1   : > { %v2215_v57 = vrot.slane %v1757_v37, 2  ;;  %v2175_v59 = vrot.slane %v1733_v43, 2  ;;  %v2137_v32 = vsel %vm1865_vm0, %v2135_v51, %v2136_v1  ;;  %v2096_v17 = vrot.slane %v843_v31, 1 }
  0xe2   : > { %4382 = vrot.lane.b32.xlu1 %v4381_v47, %s4669_s12  ;;  %4387 = vrot.lane.b32.xlu0 %v4386_v55, %s4669_s12  ;;  %v868_v15 = vmax.f32 %v724_v53, 0.0  ;;  %v844_v16 = vmax.f32 %v700_v52, 0.0  ;;  %v4120_v2 = vunpack.i.h.bf16 %v4118_v29  ;;  %v4119_v46 = vunpack.i.l.bf16 %v4118_v29 }
  0xe3   : > { %v5772_v39 = vpop.permute.xlu1 %4122  ;;  %v5774_v14 = vpop.permute.xlu0 %4127  ;;  %v2097_v36 = vsel %vm1865_vm0, %v2095_v3, %v2096_v17  ;;  %v2216_v13 = vrot.slane %v867_v63, 2  ;;  %v2176_v23 = vrot.slane %v843_v31, 2 }
  0xe4   : > { %v4125_v18 = vunpack.i.h.bf16 %v5772_v39  ;;  %v1759_v37 = vsel %vm1258_vm2, %v868_v15, 0.0  ;;  %v1735_v43 = vsel %vm1258_vm2, %v844_v16, 0.0  ;;  %v3261_v47 = vsel %vm3244_vm5, %v5648_v7, %v4119_v46 }
  0xe5   : > { %v3262_v51 = vsel %vm3244_vm5, %v5625_v27, %v4120_v2  ;;  %v2138_v31 = vrot.slane %v1759_v37, 1  ;;  %v2098_v55 = vrot.slane %v1735_v43, 1  ;;  %v2217_v3 = vsel %vm1946_vm3, %v2215_v57, %v2216_v13  ;;  %v468_v57 = vld [vmem:[%s4749_s8 + $0x420] sm:$0xff] }
  0xe6   : > { %v2218_v53 = vrot.slane %v1759_v37, 2  ;;  %v2177_v52 = vsel %vm1946_vm3, %v2175_v59, %v2176_v23  ;;  %v2178_v15 = vrot.slane %v1735_v43, 2  ;;  %v5823_v7 = vsel %vm3244_vm5, %v5652_v0, %v4125_v18  ;;  %v469_v37 = vld [vmem:[%s4749_s8 + $0x428] sm:$0xff] }
  0xe7   : > { %v5798_v8 = vpop.permute.xlu1 %4132  ;;  %v5800_v10 = vpop.permute.xlu0 %4137  ;;  %v4124_v27 = vunpack.i.l.bf16 %v5772_v39  ;;  %v2139_v16 = vsel %vm1865_vm0, %v2136_v1, %v2138_v31  ;;  %v2099_v2 = vsel %vm1865_vm0, %v2096_v17, %v2098_v55  ;;  %v4130_v49 = vunpack.i.h.bf16 %v5774_v14  ;;  %v445_v0 = vld [vmem:[%s4749_s8 + $0x368] sm:$0xff]  ;;  %v470_v31 = vld [vmem:[%s4749_s8 + $0x430] sm:$0x3]  ;;  %v5869_v55 = vld [vmem:[%s6768_s3] ss:$0 sm:$0xff] }
  0xe8   : > { %v2219_v46 = vsel %vm1946_vm3, %v2216_v13, %v2218_v53  ;;  %v4391_v50 = vpack.i.bf16 %v2139_v16, %v2137_v32  ;;  %v4396_v59 = vpack.i.bf16 %v2099_v2, %v2097_v36  ;;  %v2179_v56 = vsel %vm1946_vm3, %v2176_v23, %v2178_v15  ;;  %v5853_v36 = vld [vmem:[%s6767_s2] ss:$0 sm:$0xff] }
  0xe9   : > { %v4401_v43 = vpack.i.bf16 %v2219_v46, %v2217_v3  ;;  %v4406_v1 = vpack.i.bf16 %v2179_v56, %v2177_v52  ;;  %v5841_v17 = vsel %vm3244_vm5, %v5657_v45, %v4124_v27  ;;  %v4129_v13 = vunpack.i.l.bf16 %v5774_v14  ;;  %v446_v52 = vld [vmem:[%s4749_s8 + $0x370] sm:$0x3] }
  0xea   : > { %v5846_v32 = vsel %vm3244_vm5, %v5661_v48, %v4130_v49  ;;  %4392 = vrot.lane.b32.xlu1 %v4391_v50, %s4670_s13  ;;  %4397 = vrot.lane.b32.xlu0 %v4396_v59, %s4670_s13  ;;  %v619_v56 = vmul.f32 %v5853_v36, %v468_v57  ;;  %v620_v45 = vmul.f32 %v5853_v36, %v469_v37  ;;  %v4135_v23 = vunpack.i.h.bf16 %v5798_v8 }
  0xeb   : > { %v5815_v29 = vpop.permute.xlu1 %4142  ;;  %v5817_v63 = vpop.permute.xlu0 %4147  ;;  %v595_v14 = vmul.f32 %v5853_v36, %v444_v22  ;;  %v5861_v48 = vsel %vm3244_vm5, %v5674_v12, %v4129_v13  ;;  %v596_v50 = vmul.f32 %v5853_v36, %v445_v0  ;;  %v4134_v49 = vunpack.i.l.bf16 %v5798_v8 }
  0xec   : > { %v770_v3 = vadd.f32 %v5869_v55, %v619_v56  ;;  %v771_v22 = vadd.f32 %v5869_v55, %v620_v45  ;;  %v5876_v12 = vsel %vm3244_vm5, %v5678_v24, %v4135_v23  ;;  %v4140_v2 = vunpack.i.h.bf16 %v5800_v10 }
  0xed   : > { %v746_v53 = vadd.f32 %v5869_v55, %v595_v14  ;;  %v747_v27 = vadd.f32 %v5869_v55, %v596_v50  ;;  %v5886_v16 = vsel %vm3244_vm5, %v5682_v26, %v4134_v49  ;;  %v4139_v46 = vunpack.i.l.bf16 %v5800_v10 }
  0xee   : > { %4402 = vrot.lane.b32.xlu1 %v4401_v43, %s4671_s14  ;;  %4407 = vrot.lane.b32.xlu0 %v4406_v1, %s4671_s14  ;;  %v914_v24 = vmax.f32 %v770_v3, 0.0  ;;  %v915_v57 = vmax.f32 %v771_v22, 0.0  ;;  %v621_v59 = vmul.f32 %v5853_v36, %v470_v31  ;;  %v3295_v56 = vsel %vm3277_vm6, %v3262_v51, %v4140_v2 }
  0xef   : > { %v5835_v18 = vpop.permute.xlu1 %4152  ;;  %v5837_v39 = vpop.permute.xlu0 %4157  ;;  %v890_v37 = vmax.f32 %v746_v53, 0.0  ;;  %v891_v0 = vmax.f32 %v747_v27, 0.0  ;;  %v3294_v13 = vsel %vm3277_vm6, %v3261_v47, %v4139_v46  ;;  %v597_v26 = vmul.f32 %v5853_v36, %v446_v52 }
  0xf0   : > { %v1805_v45 = vsel %vm1115_vm1, %v914_v24, 0.0  ;;  %v772_v43 = vadd.f32 %v5869_v55, %v621_v59  ;;  %v2344_v1 = vrot.slane %v915_v57, 1  ;;  %v4145_v2 = vunpack.i.h.bf16 %v5815_v29 }
  0xf1   : > { %v1781_v10 = vsel %vm1115_vm1, %v890_v37, 0.0  ;;  %v4411_v50 = vpack.i.bf16 %v915_v57, %v1805_v45  ;;  %v2343_v49 = vrot.slane %v1805_v45, 1  ;;  %v2423_v47 = vrot.slane %v1805_v45, 2 }
  0xf2   : > { %v4416_v31 = vpack.i.bf16 %v891_v0, %v1781_v10  ;;  %v2303_v51 = vrot.slane %v1781_v10, 1  ;;  %v2383_v3 = vrot.slane %v1781_v10, 2  ;;  %v916_v22 = vmax.f32 %v772_v43, 0.0 }
  0xf3   : > { %v5879_v15 = vpop.permute.xlu1 %4162  ;;  %v5881_v8 = vpop.permute.xlu0 %4167  ;;  %v748_v53 = vadd.f32 %v5869_v55, %v597_v26  ;;  %4412 = vrot.lane.b32.xlu1 %v4411_v50, %s4672_s17  ;;  %v2345_v52 = vsel %vm1865_vm0, %v2343_v49, %v2344_v1  ;;  %v2304_v27 = vrot.slane %v891_v0, 1  ;;  %v4144_v46 = vunpack.i.l.bf16 %v5815_v29 }
  0xf4   : > { %4417 = vrot.lane.b32.xlu0 %v4416_v31, %s4672_s17  ;;  %v1807_v24 = vsel %vm1258_vm2, %v916_v22, 0.0  ;;  %v4150_v59 = vunpack.i.h.bf16 %v5817_v63  ;;  %v3279_v29 = vsel %vm3277_vm6, %v5731_v61, %v4145_v2  ;;  %v4149_v31 = vunpack.i.l.bf16 %v5817_v63 }
  0xf5   : > { %v892_v37 = vmax.f32 %v748_v53, 0.0  ;;  %v2346_v10 = vrot.slane %v1807_v24, 1  ;;  %v2305_v43 = vsel %vm1865_vm0, %v2303_v51, %v2304_v27  ;;  %v3278_v50 = vsel %vm3277_vm6, %v5737_v20, %v4144_v46 }
  0xf6   : > { %v3328_v22 = vsel %vm3310_vm7, %v3295_v56, %v4150_v59  ;;  %v2424_v53 = vrot.slane %v915_v57, 2  ;;  %v2426_v5 = vrot.slane %v1807_v24, 2  ;;  %v2384_v30 = vrot.slane %v891_v0, 2  ;;  %v424_v24 = vld [vmem:[%s4749_s8 + $0x2c0] sm:$0xff] }
  0xf7   : > { %v5901_v14 = vpop.permute.xlu1 %4172  ;;  %v5903_v23 = vpop.permute.xlu0 %4177  ;;  %v1783_v49 = vsel %vm1258_vm2, %v892_v37, 0.0  ;;  %v2347_v35 = vsel %vm1865_vm0, %v2344_v1, %v2346_v10  ;;  %v3327_v20 = vsel %vm3310_vm7, %v3294_v13, %v4149_v31  ;;  %v4155_v0 = vunpack.i.h.bf16 %v5835_v18 }
  0xf8   : > { %v2306_v44 = vrot.slane %v1783_v49, 1  ;;  %v4421_v51 = vpack.i.bf16 %v2347_v35, %v2345_v52  ;;  %v2425_v61 = vsel %vm1946_vm3, %v2423_v47, %v2424_v53  ;;  %v2386_v2 = vrot.slane %v1783_v49, 2  ;;  %v423_v52 = vld [vmem:[%s4749_s8 + $0x2b8] sm:$0xff]  ;;  %v6826_v49 = vld [vmem:[#allocation11_spill] sm:$0xff] }
  0xf9   : > { %v2427_v57 = vsel %vm1946_vm3, %v2424_v53, %v2426_v5  ;;  %v2385_v56 = vsel %vm1946_vm3, %v2383_v3, %v2384_v30  ;;  %v4154_v47 = vunpack.i.l.bf16 %v5835_v18  ;;  %v3312_v10 = vsel %vm3310_vm7, %v3279_v29, %v4155_v0  ;;  %v400_v0 = vld [vmem:[%s4749_s8 + $0x200] sm:$0xff] }
  0xfa   : > { %v2307_v63 = vsel %vm1865_vm0, %v2304_v27, %v2306_v44  ;;  %4422 = vrot.lane.b32.xlu1 %v4421_v51, %s4673_s20  ;;  %v4431_v1 = vpack.i.bf16 %v2427_v57, %v2425_v61  ;;  %v2387_v13 = vsel %vm1946_vm3, %v2384_v30, %v2386_v2  ;;  %v4160_v44 = vunpack.i.h.bf16 %v5837_v39 }
  0xfb   : > { %v5914_v45 = vpop.permute.xlu1 %4182  ;;  %v5916_v26 = vpop.permute.xlu0 %4187  ;;  %v4426_v35 = vpack.i.bf16 %v2307_v63, %v2305_v43  ;;  %v4436_v59 = vpack.i.bf16 %v2387_v13, %v2385_v56  ;;  %v3311_v5 = vsel %vm3310_vm7, %v3278_v50, %v4154_v47  ;;  %v4159_v3 = vunpack.i.l.bf16 %v5837_v39  ;;  %v399_v63 = vld [vmem:[%s4749_s8 + $0x1f8] sm:$0xff] }
  0xfc   : > { %v2012_v27 = vrot.slane %v5078_v42, 2  ;;  %v2013_v30 = vrot.slane %v5070_v28, 2  ;;  %v3361_v29 = vsel %vm3343_vm8, %v3328_v22, %v4160_v44  ;;  %v2015_v31 = vrot.slane %v6826_v49, 2  ;;  %v471_v42 = vld [vmem:[%s4749_s8 + $0x438] sm:$0xff] }
  0xfd   : > { %4427 = vrot.lane.b32.xlu0 %v4426_v35, %s4673_s20  ;;  %v574_v53 = vmul.f32 %v5853_v36, %v423_v52  ;;  %v575_v50 = vmul.f32 %v5853_v36, %v424_v24  ;;  %v3360_v39 = vsel %vm3343_vm8, %v3327_v20, %v4159_v3  ;;  %v4165_v61 = vunpack.i.h.bf16 %v5879_v15  ;;  %v425_v35 = vld [vmem:[%s4749_s8 + $0x2c8] sm:$0x3] }
  0xfe   : > { %4432 = vrot.lane.b32.xlu1 %v4431_v1, %s4674_s25  ;;  %v2014_v51 = vsel %vm1946_vm3, %v2012_v27, %v2013_v30  ;;  %v4164_v2 = vunpack.i.l.bf16 %v5879_v15  ;;  %v2016_v57 = vsel %vm1946_vm3, %v2013_v30, %v2015_v31  ;;  %v4170_v47 = vunpack.i.h.bf16 %v5881_v8 }
  0xff   : > { %v5930_v46 = vpop.permute.xlu1 %4192  ;;  %v5932_v37 = vpop.permute.xlu0 %4197  ;;  %v725_v22 = vadd.f32 %v5869_v55, %v574_v53  ;;  %v726_v56 = vadd.f32 %v5869_v55, %v575_v50  ;;  %v4441_v1 = vpack.i.bf16 %v2016_v57, %v2014_v51  ;;  %v3345_v13 = vsel %vm3343_vm8, %v3312_v10, %v4165_v61 }
 0x100   : > { %v3344_v20 = vsel %vm3343_vm8, %v3311_v5, %v4164_v2  ;;  %v4169_v3 = vunpack.i.l.bf16 %v5881_v8  ;;  %v550_v27 = vmul.f32 %v5853_v36, %v399_v63  ;;  %v551_v10 = vmul.f32 %v5853_v36, %v400_v0  ;;  %v401_v2 = vld [vmem:[%s4749_s8 + $0x208] sm:$0x3] }
 0x101   : > { %4437 = vrot.lane.b32.xlu0 %v4436_v59, %s4674_s25  ;;  %v869_v24 = vmax.f32 %v725_v22, 0.0  ;;  %v870_v44 = vmax.f32 %v726_v56, 0.0  ;;  %v5981_v59 = vsel %vm3376_vm9, %v3361_v29, %v4170_v47  ;;  %v576_v5 = vmul.f32 %v5853_v36, %v425_v35 }
 0x102   : > { %4442 = vrot.lane.b32.xlu1 %v4441_v1, %s4668_s11  ;;  %v4175_v30 = vunpack.i.h.bf16 %v5901_v14  ;;  %v5989_v31 = vsel %vm3376_vm9, %v3360_v39, %v4169_v3  ;;  %v701_v8 = vadd.f32 %v5869_v55, %v550_v27  ;;  %v702_v29 = vadd.f32 %v5869_v55, %v551_v10 }
 0x103   : > { %v5950_v18 = vpop.permute.xlu1 %4202  ;;  %v5952_v43 = vpop.permute.xlu0 %4207  ;;  %v1760_v49 = vsel %vm1115_vm1, %v869_v24, 0.0  ;;  %v2141_v53 = vrot.slane %v870_v44, 1  ;;  %v727_v56 = vadd.f32 %v5869_v55, %v576_v5  ;;  %v4174_v0 = vunpack.i.l.bf16 %v5901_v14 }
 0x104   : > { %v4446_v50 = vpack.i.bf16 %v870_v44, %v1760_v49  ;;  %v2140_v51 = vrot.slane %v1760_v49, 1  ;;  %v2220_v61 = vrot.slane %v1760_v49, 2  ;;  %v845_v22 = vmax.f32 %v701_v8, 0.0 }
 0x105   : > { %v3378_v39 = vsel %vm3376_vm9, %v3345_v13, %v4175_v30  ;;  %v846_v35 = vmax.f32 %v702_v29, 0.0  ;;  %v871_v27 = vmax.f32 %v727_v56, 0.0  ;;  %v3377_v10 = vsel %vm3376_vm9, %v3344_v20, %v4174_v0 }
 0x106   : > { %4447 = vrot.lane.b32.xlu0 %v4446_v50, %s4669_s12  ;;  %v2142_v1 = vsel %vm1865_vm0, %v2140_v51, %v2141_v53  ;;  %v1736_v3 = vsel %vm1115_vm1, %v845_v22, 0.0  ;;  %v552_v5 = vmul.f32 %v5853_v36, %v401_v2  ;;  %v2221_v22 = vrot.slane %v870_v44, 2 }
 0x107   : > { %v5973_v15 = vpop.permute.xlu1 %4212  ;;  %v5975_v52 = vpop.permute.xlu0 %4217  ;;  %v4451_v14 = vpack.i.bf16 %v846_v35, %v1736_v3  ;;  %v2100_v49 = vrot.slane %v1736_v3, 1  ;;  %v2180_v13 = vrot.slane %v1736_v3, 2  ;;  %v2101_v30 = vrot.slane %v846_v35, 1 }
 0x108   : > { %v1762_v51 = vsel %vm1258_vm2, %v871_v27, 0.0  ;;  %v703_v29 = vadd.f32 %v5869_v55, %v552_v5  ;;  %v4185_v0 = vunpack.i.h.bf16 %v5914_v45  ;;  %v2222_v47 = vsel %vm1946_vm3, %v2220_v61, %v2221_v22 }
 0x109   : > { %4452 = vrot.lane.b32.xlu1 %v4451_v14, %s4669_s12  ;;  %v2143_v20 = vrot.slane %v1762_v51, 1  ;;  %v2102_v2 = vsel %vm1865_vm0, %v2100_v49, %v2101_v30  ;;  %v2223_v56 = vrot.slane %v1762_v51, 2  ;;  %v4184_v24 = vunpack.i.l.bf16 %v5914_v45  ;;  %v472_v51 = vld [vmem:[%s4749_s8 + $0x440] sm:$0xff] }
 0x10a   : > { %v847_v3 = vmax.f32 %v703_v29, 0.0  ;;  %v6026_v14 = vsel %vm3409_vm10, %v3378_v39, %v4185_v0  ;;  %v4189_v49 = vunpack.i.l.bf16 %v5916_v26  ;;  %v623_v0 = vmul.f32 %v5853_v36, %v472_v51 }
 0x10b   : > { %v5994_v63 = vpop.permute.xlu1 %4222  ;;  %v5996_v57 = vpop.permute.xlu0 %4227  ;;  %v2144_v44 = vsel %vm1865_vm0, %v2141_v53, %v2143_v20  ;;  %v2224_v5 = vsel %vm1946_vm3, %v2221_v22, %v2223_v56  ;;  %v6037_v53 = vsel %vm3409_vm10, %v3377_v10, %v4184_v24  ;;  %v2181_v22 = vrot.slane %v846_v35, 2 }
 0x10c   : > { %v4456_v45 = vpack.i.bf16 %v2144_v44, %v2142_v1  ;;  %v1738_v29 = vsel %vm1258_vm2, %v847_v3, 0.0  ;;  %v4466_v27 = vpack.i.bf16 %v2224_v5, %v2222_v47  ;;  %v622_v56 = vmul.f32 %v5853_v36, %v471_v42  ;;  %v447_v47 = vld [vmem:[%s4749_s8 + $0x378] sm:$0xff]  ;;  %v448_v44 = vld [vmem:[%s4749_s8 + $0x380] sm:$0xff]  ;;  %v473_v5 = vld [vmem:[%s4749_s8 + $0x448] sm:$0x3] }
 0x10d   : > { %v2103_v39 = vrot.slane %v1738_v29, 1  ;;  %v2183_v20 = vrot.slane %v1738_v29, 2  ;;  %v4200_v3 = vunpack.i.h.bf16 %v5932_v37  ;;  %v2182_v10 = vsel %vm1946_vm3, %v2180_v13, %v2181_v22 }
 0x10e   : > { %4457 = vrot.lane.b32.xlu0 %v4456_v45, %s4670_s13  ;;  %v773_v42 = vadd.f32 %v5869_v55, %v622_v56  ;;  %v774_v1 = vadd.f32 %v5869_v55, %v623_v0  ;;  %v598_v13 = vmul.f32 %v5853_v36, %v447_v47 }
 0x10f   : > { %v6009_v8 = vpop.permute.xlu1 %4232  ;;  %v6011_v50 = vpop.permute.xlu0 %4237  ;;  %v2104_v24 = vsel %vm1865_vm0, %v2101_v30, %v2103_v39  ;;  %v2184_v35 = vsel %vm1946_vm3, %v2181_v22, %v2183_v20  ;;  %v3297_v62 = vsel %vm3277_vm6, %v5823_v7, %v4200_v3  ;;  %v4199_v30 = vunpack.i.l.bf16 %v5932_v37 }
 0x110   : > { %v4461_v29 = vpack.i.bf16 %v2104_v24, %v2102_v2  ;;  %v4471_v34 = vpack.i.bf16 %v2184_v35, %v2182_v10  ;;  %v917_v41 = vmax.f32 %v773_v42, 0.0  ;;  %v599_v39 = vmul.f32 %v5853_v36, %v448_v44 }
 0x111   : > { %v918_v22 = vmax.f32 %v774_v1, 0.0  ;;  %v624_v2 = vmul.f32 %v5853_v36, %v473_v5  ;;  %v6827_v20 = vunpack.i.l.bf16 %v5903_v23  ;;  %v6828_v7 = vunpack.i.h.bf16 %v5903_v23 }
 0x112   : > { %4462 = vrot.lane.b32.xlu1 %v4461_v29, %s4670_s13  ;;  %4467 = vrot.lane.b32.xlu0 %v4466_v27, %s4671_s14  ;;  %v1808_v0 = vsel %vm1115_vm1, %v917_v41, 0.0  ;;  %v3296_v3 = vsel %vm3277_vm6, %v5841_v17, %v4199_v30  ;;  %v749_v27 = vadd.f32 %v5869_v55, %v598_v13  ;;  %v750_v1 = vadd.f32 %v5869_v55, %v599_v39 }
 0x113   : > { %v6030_v28 = vpop.permute.xlu1 %4242  ;;  %v6032_v61 = vpop.permute.xlu0 %4247  ;;  %v3426_v56 = vsel %vm3409_vm10, %v5989_v31, %v6827_v20  ;;  %v3427_v37 = vsel %vm3409_vm10, %v5981_v59, %v6828_v7  ;;  %v4476_v31 = vpack.i.bf16 %v918_v22, %v1808_v0  ;;  %v2348_v24 = vrot.slane %v1808_v0, 1 }
 0x114   : > { %v2428_v23 = vrot.slane %v1808_v0, 2  ;;  %v775_v10 = vadd.f32 %v5869_v55, %v624_v2  ;;  %v893_v59 = vmax.f32 %v749_v27, 0.0  ;;  %v6084_v35 = vmax.f32 %v750_v1, 0.0 }
 0x115   : > { %v2349_v41 = vrot.slane %v918_v22, 1  ;;  %v3459_v42 = vsel %vm3442_vm11, %v3426_v56, %v4189_v49  ;;  %v6829_v5 = vunpack.i.h.bf16 %v5916_v26  ;;  %v4205_v2 = vunpack.i.h.bf16 %v5950_v18  ;;  %v449_v49 = vld [vmem:[%s4749_s8 + $0x388] sm:$0x3] }
 0x116   : > { %4472 = vrot.lane.b32.xlu1 %v4471_v34, %s4671_s14  ;;  %4477 = vrot.lane.b32.xlu0 %v4476_v31, %s4672_s17  ;;  %v919_v17 = vmax.f32 %v775_v10, 0.0  ;;  %v1784_v30 = vsel %vm1115_vm1, %v893_v59, 0.0  ;;  %v4204_v1 = vunpack.i.l.bf16 %v5950_v18  ;;  %v4209_v10 = vunpack.i.l.bf16 %v5952_v43 }
 0x117   : > { %v6052_v45 = vpop.permute.xlu1 %4252  ;;  %v6054_v51 = vpop.permute.xlu0 %4257  ;;  %v3460_v29 = vsel %vm3442_vm11, %v3427_v37, %v6829_v5  ;;  %v2350_v13 = vsel %vm1865_vm0, %v2348_v24, %v2349_v41  ;;  %v4481_v56 = vpack.i.bf16 %v6084_v35, %v1784_v30  ;;  %v2308_v7 = vrot.slane %v1784_v30, 1 }
 0x118   : > { %v3914_v39 = vpack.c.bf16 %v3460_v29, %v3459_v42  ;;  %v2388_v37 = vrot.slane %v1784_v30, 2  ;;  %v1810_v0 = vsel %vm1258_vm2, %v919_v17, 0.0  ;;  %v3281_v31 = vsel %vm3277_vm6, %v5753_v19, %v4205_v2 }
 0x119   : > { %v2351_v27 = vrot.slane %v1810_v0, 1  ;;  %v4210_v24 = vunpack.i.h.bf16 %v5952_v43  ;;  %v600_v59 = vmul.f32 %v5853_v36, %v449_v49  ;;  %v2309_v42 = vrot.slane %v6084_v35, 1 }
 0x11a   : > { %3916 = vmatprep.subr.msk.bf16.mxu0 %vm6097_vm13, %v3914_v39  ;;  %4482 = vrot.lane.b32.xlu1 %v4481_v56, %s4672_s17  ;;  %v2429_v17 = vrot.slane %v918_v22, 2  ;;  %v3280_v29 = vsel %vm3277_vm6, %v5747_v38, %v4204_v1  ;;  %v2431_v30 = vrot.slane %v1810_v0, 2  ;;  %v3329_v43 = vsel %vm3310_vm7, %v3296_v3, %v4209_v10 }
 0x11b   : > { %v6079_v47 = vpop.permute.xlu1 %4262  ;;  %v6081_v44 = vpop.permute.xlu0 %4267  ;;  %v2352_v5 = vsel %vm1865_vm0, %v2349_v41, %v2351_v27  ;;  %v3330_v18 = vsel %vm3310_vm7, %v3297_v62, %v4210_v24  ;;  %v751_v49 = vadd.f32 %v5869_v55, %v600_v59  ;;  %v2310_v56 = vsel %vm1865_vm0, %v2308_v7, %v2309_v42  ;;  %v6834_v59 = vld [vmem:[#allocation13_spill] sm:$0xff] }
 0x11c   : > { %v4486_v2 = vpack.i.bf16 %v2352_v5, %v2350_v13  ;;  %v2430_v22 = vsel %vm1946_vm3, %v2428_v23, %v2429_v17  ;;  %v2432_v41 = vsel %vm1946_vm3, %v2429_v17, %v2431_v30  ;;  %v6832_v38 = vunpack.i.l.bf16 %v5930_v46  ;;  %v6835_v5 = vld [vmem:[#allocation12_spill] sm:$0xff] }
 0x11d   : > { %v6833_v0 = vunpack.i.h.bf16 %v5930_v46  ;;  %v895_v3 = vmax.f32 %v751_v49, 0.0  ;;  %v4496_v27 = vpack.i.bf16 %v2432_v41, %v2430_v22  ;;  %v4215_v7 = vunpack.i.h.bf16 %v5973_v15 }
 0x11e   : > { %v3443_v62 = vsel %vm3442_vm11, %v6037_v53, %v6832_v38  ;;  %4487 = vrot.lane.b32.xlu0 %v4486_v2, %s4673_s20  ;;  %v4214_v23 = vunpack.i.l.bf16 %v5973_v15  ;;  %v4220_v24 = vunpack.i.h.bf16 %v5975_v52  ;;  %v4219_v10 = vunpack.i.l.bf16 %v5975_v52 }
 0x11f   : > { %v6103_v20 = vpop.permute.xlu1 %4272  ;;  %v6105_v26 = vpop.permute.xlu0 %4277  ;;  %v3444_v13 = vsel %vm3442_vm11, %v6026_v14, %v6833_v0  ;;  %v2389_v53 = vrot.slane %v6084_v35, 2  ;;  %v1786_v46 = vsel %vm1258_vm2, %v895_v3, 0.0  ;;  %v3314_v14 = vsel %vm3310_vm7, %v3281_v31, %v4215_v7 }
 0x120   : > { %v3917_v1 = vpack.c.bf16 %v3444_v13, %v3443_v62  ;;  %v2017_v17 = vrot.slane %v6834_v59, 2  ;;  %v2018_v30 = vrot.slane %v6835_v5, 2  ;;  %v2311_v2 = vrot.slane %v1786_v46, 1  ;;  %v475_v59 = vld [vmem:[%s4749_s8 + $0x458] sm:$0xff] }
 0x121   : > { %v3313_v52 = vsel %vm3310_vm7, %v3280_v29, %v4214_v23  ;;  %v3362_v35 = vsel %vm3343_vm8, %v3329_v43, %v4219_v10  ;;  %v3363_v49 = vsel %vm3343_vm8, %v3330_v18, %v4220_v24  ;;  %v2390_v31 = vsel %vm1946_vm3, %v2388_v37, %v2389_v53  ;;  %v426_v29 = vld [vmem:[%s4749_s8 + $0x2d0] sm:$0xff] }
 0x122   : > { %3919 = vmatpush3.bf16.xpose.msk.msra.mxu0 %vm6097_vm13, %v3917_v1  ;;  %4497 = vrot.lane.b32.xlu0 %v4496_v27, %s4674_s25  ;;  %v2391_v41 = vrot.slane %v1786_v46, 2  ;;  %v2019_v38 = vsel %vm1946_vm3, %v2017_v17, %v2018_v30  ;;  %v6836_v62 = vrot.slane %v5112_v11, 2  ;;  %v2312_v43 = vsel %vm1865_vm0, %v2309_v42, %v2311_v2  ;;  %v427_v1 = vld [vmem:[%s4749_s8 + $0x2d8] sm:$0xff]  ;;  %v402_v24 = vld [vmem:[%s4749_s8 + $0x210] sm:$0xff] }
 0x123   : > { %v6124_v19 = vpop.permute.xlu1 %4282  ;;  %v6126_v39 = vpop.permute.xlu0 %4287  ;;  %v4225_v18 = vunpack.i.h.bf16 %v5994_v63  ;;  %v4224_v3 = vunpack.i.l.bf16 %v5994_v63  ;;  %v4491_v27 = vpack.i.bf16 %v2312_v43, %v2310_v56  ;;  %v4230_v37 = vunpack.i.h.bf16 %v5996_v57  ;;  %v403_v11 = vld [vmem:[%s4749_s8 + $0x218] sm:$0xff] }
 0x124   : > { %v2021_v0 = vsel %vm1946_vm3, %v2018_v30, %v6836_v62  ;;  %v2392_v7 = vsel %vm1946_vm3, %v2389_v53, %v2391_v41  ;;  %v4229_v23 = vunpack.i.l.bf16 %v5996_v57  ;;  %v577_v17 = vmul.f32 %v5853_v36, %v426_v29  ;;  %v404_v29 = vld [vmem:[%s4749_s8 + $0x220] sm:$0x3] }
 0x125   : > { %v4506_v13 = vpack.i.bf16 %v2021_v0, %v2019_v38  ;;  %v4501_v10 = vpack.i.bf16 %v2392_v7, %v2390_v31  ;;  %v3346_v46 = vsel %vm3343_vm8, %v3313_v52, %v4224_v3  ;;  %v3347_v42 = vsel %vm3343_vm8, %v3314_v14, %v4225_v18  ;;  %4492 = vrot.lane.b32.xlu1 %v4491_v27, %s4673_s20  ;;  %v428_v38 = vld [vmem:[%s4749_s8 + $0x2e0] sm:$0x3] }
 0x126   : > { %v3395_v63 = vsel %vm3376_vm9, %v3362_v35, %v4229_v23  ;;  %v3396_v56 = vsel %vm3376_vm9, %v3363_v49, %v4230_v37  ;;  %v578_v57 = vmul.f32 %v5853_v36, %v427_v1  ;;  %v4235_v53 = vunpack.i.h.bf16 %v6009_v8 }
 0x127   : > { %v6154_v15 = vpop.permute.xlu1 %4292  ;;  %v6159_v22 = vpop.permute.xlu0 %4297  ;;  %4507 = vrot.lane.b32.xlu0 %v4506_v13, %s4668_s11  ;;  %v728_v14 = vadd.f32 %v5869_v55, %v577_v17  ;;  %v553_v52 = vmul.f32 %v5853_v36, %v402_v24  ;;  %v554_v31 = vmul.f32 %v5853_v36, %v403_v11  ;;  %v4234_v41 = vunpack.i.l.bf16 %v6009_v8 }
 0x128   : > { %v729_v35 = vadd.f32 %v5869_v55, %v578_v57  ;;  %v3380_v49 = vsel %vm3376_vm9, %v3347_v42, %v4235_v53  ;;  %v4240_v62 = vunpack.i.h.bf16 %v6011_v50  ;;  %v4239_v0 = vunpack.i.l.bf16 %v6011_v50 }
 0x129   : > { %v872_v43 = vmax.f32 %v728_v14, 0.0  ;;  %v704_v13 = vadd.f32 %v5869_v55, %v553_v52  ;;  %v705_v18 = vadd.f32 %v5869_v55, %v554_v31  ;;  %v3379_v3 = vsel %vm3376_vm9, %v3346_v46, %v4234_v41  ;;  %4502 = vrot.lane.b32.xlu1 %v4501_v10, %s4674_s25 }
 0x12a   : > { %v873_v8 = vmax.f32 %v729_v35, 0.0  ;;  %v3428_v1 = vsel %vm3409_vm10, %v3395_v63, %v4239_v0  ;;  %v3429_v27 = vsel %vm3409_vm10, %v3396_v56, %v4240_v62  ;;  %v579_v7 = vmul.f32 %v5853_v36, %v428_v38 }
 0x12b   : > { %v6186_v30 = vpop.permute.xlu1 %4302  ;;  %v6188_v2 = vpop.permute.xlu0 %4307  ;;  %v1763_v50 = vsel %vm1115_vm1, %v872_v43, 0.0  ;;  %v848_v37 = vmax.f32 %v704_v13, 0.0  ;;  %v849_v23 = vmax.f32 %v705_v18, 0.0  ;;  %v555_v24 = vmul.f32 %v5853_v36, %v404_v29 }
 0x12c   : > { %v4511_v11 = vpack.i.bf16 %v873_v8, %v1763_v50  ;;  %v2145_v42 = vrot.slane %v1763_v50, 1  ;;  %v2225_v17 = vrot.slane %v1763_v50, 2  ;;  %v730_v46 = vadd.f32 %v5869_v55, %v579_v7 }
 0x12d   : > { %v1739_v63 = vsel %vm1115_vm1, %v848_v37, 0.0  ;;  %v2146_v56 = vrot.slane %v873_v8, 1  ;;  %v706_v53 = vadd.f32 %v5869_v55, %v555_v24  ;;  %v2106_v14 = vrot.slane %v849_v23, 1 }
 0x12e   : > { %4512 = vrot.lane.b32.xlu1 %v4511_v11, %s4669_s12  ;;  %v4516_v52 = vpack.i.bf16 %v849_v23, %v1739_v63  ;;  %v2105_v31 = vrot.slane %v1739_v63, 1  ;;  %v2185_v41 = vrot.slane %v1739_v63, 2  ;;  %v874_v38 = vmax.f32 %v730_v46, 0.0 }
 0x12f   : > { %v6211_v10 = vpop.permute.xlu1 %4312  ;;  %v6213_v57 = vpop.permute.xlu0 %4317  ;;  %v2147_v35 = vsel %vm1865_vm0, %v2145_v42, %v2146_v56  ;;  %v850_v62 = vmax.f32 %v706_v53, 0.0  ;;  %v4245_v0 = vunpack.i.h.bf16 %v6030_v28  ;;  %v4244_v29 = vunpack.i.l.bf16 %v6030_v28 }
 0x130   : > { %4517 = vrot.lane.b32.xlu0 %v4516_v52, %s4669_s12  ;;  %v1765_v43 = vsel %vm1258_vm2, %v874_v38, 0.0  ;;  %v2107_v13 = vsel %vm1865_vm0, %v2105_v31, %v2106_v14  ;;  %v4250_v18 = vunpack.i.h.bf16 %v6032_v61  ;;  %v4249_v7 = vunpack.i.l.bf16 %v6032_v61 }
 0x131   : > { %v2148_v50 = vrot.slane %v1765_v43, 1  ;;  %v1741_v37 = vsel %vm1258_vm2, %v850_v62, 0.0  ;;  %v3412_v24 = vsel %vm3409_vm10, %v3379_v3, %v4244_v29  ;;  %v3413_v28 = vsel %vm3409_vm10, %v3380_v49, %v4245_v0 }
 0x132   : > { %v2108_v11 = vrot.slane %v1741_v37, 1  ;;  %v3461_v42 = vsel %vm3442_vm11, %v3428_v1, %v4249_v7  ;;  %v3462_v46 = vsel %vm3442_vm11, %v3429_v27, %v4250_v18  ;;  %v2226_v63 = vrot.slane %v873_v8, 2  ;;  %v474_v27 = vld [vmem:[%s4749_s8 + $0x450] sm:$0xff] }
 0x133   : > { %v6234_v53 = vpop.permute.xlu1 %4322  ;;  %v2149_v52 = vsel %vm1865_vm0, %v2146_v56, %v2148_v50  ;;  %v3920_v31 = vpack.c.bf16 %v3462_v46, %v3461_v42  ;;  %v2228_v38 = vrot.slane %v1765_v43, 2  ;;  %v2186_v3 = vrot.slane %v849_v23, 2  ;;  %v450_v56 = vld [vmem:[%s4749_s8 + $0x390] sm:$0xff]  ;;  %v451_v43 = vld [vmem:[%s4749_s8 + $0x398] sm:$0xff] }
 0x134   : > { %v6236_v61 = vpop.permute.xlu0 %4327  ;;  %v4521_v62 = vpack.i.bf16 %v2149_v52, %v2147_v35  ;;  %v2109_v49 = vsel %vm1865_vm0, %v2106_v14, %v2108_v11  ;;  %v2227_v1 = vsel %vm1946_vm3, %v2225_v17, %v2226_v63  ;;  %v2188_v0 = vrot.slane %v1741_v37, 2 }
 0x135   : > { %v4526_v8 = vpack.i.bf16 %v2109_v49, %v2107_v13  ;;  %v2229_v29 = vsel %vm1946_vm3, %v2226_v63, %v2228_v38  ;;  %v2187_v18 = vsel %vm1946_vm3, %v2185_v41, %v2186_v3  ;;  %v4255_v7 = vunpack.i.h.bf16 %v6052_v45  ;;  %3922 = vmatprep.subr.msk.bf16.mxu0 %vm6097_vm13, %v3920_v31 }
 0x136   : > { %4522 = vrot.lane.b32.xlu1 %v4521_v62, %s4670_s13  ;;  %v4531_v23 = vpack.i.bf16 %v2229_v29, %v2227_v1  ;;  %v2189_v14 = vsel %vm1946_vm3, %v2186_v3, %v2188_v0  ;;  %v4254_v17 = vunpack.i.l.bf16 %v6052_v45  ;;  %v4260_v35 = vunpack.i.h.bf16 %v6054_v51  ;;  %v476_v29 = vld [vmem:[%s4749_s8 + $0x460] sm:$0x3] }
 0x137   : > { %4527 = vrot.lane.b32.xlu0 %v4526_v8, %s4670_s13  ;;  %v4536_v41 = vpack.i.bf16 %v2189_v14, %v2187_v18  ;;  %v3446_v13 = vsel %vm3442_vm11, %v3413_v28, %v4255_v7  ;;  %v4259_v50 = vunpack.i.l.bf16 %v6054_v51  ;;  %v625_v37 = vmul.f32 %v5853_v36, %v474_v27 }
 0x138   : > { %v3445_v11 = vsel %vm3442_vm11, %v3412_v24, %v4254_v17  ;;  %v3299_v42 = vsel %vm3277_vm6, %v5846_v32, %v4260_v35  ;;  %v626_v46 = vmul.f32 %v5853_v36, %v475_v59  ;;  %v601_v45 = vmul.f32 %v5853_v36, %v450_v56  ;;  %v6265_v52 = vpop.permute.xlu0 %4337 }
 0x139   : > { %v6263_v63 = vpop.permute.xlu1 %4332  ;;  %v3923_v31 = vpack.c.bf16 %v3446_v13, %v3445_v11  ;;  %v3298_v28 = vsel %vm3277_vm6, %v5861_v48, %v4259_v50  ;;  %v776_v51 = vadd.f32 %v5869_v55, %v625_v37  ;;  %v602_v38 = vmul.f32 %v5853_v36, %v451_v43 }
 0x13a   : > { %4532 = vrot.lane.b32.xlu1 %v4531_v23, %s4671_s14  ;;  %v777_v32 = vadd.f32 %v5869_v55, %v626_v46  ;;  %v752_v59 = vadd.f32 %v5869_v55, %v601_v45  ;;  %v4265_v24 = vunpack.i.h.bf16 %v6079_v47  ;;  %v4264_v3 = vunpack.i.l.bf16 %v6079_v47  ;;  %v452_v23 = vld [vmem:[%s4749_s8 + $0x3a0] sm:$0x3] }
 0x13b   : > { %4537 = vrot.lane.b32.xlu0 %v4536_v41, %s4671_s14  ;;  %v920_v62 = vmax.f32 %v776_v51, 0.0  ;;  %v753_v48 = vadd.f32 %v5869_v55, %v602_v38  ;;  %v4270_v49 = vunpack.i.h.bf16 %v6081_v44  ;;  %v4269_v1 = vunpack.i.l.bf16 %v6081_v44  ;;  %3925 = vmatpush3.bf16.xpose.msk.msra.mxu0 %vm6097_vm13, %v3923_v31 }
 0x13c   : > { %v921_v0 = vmax.f32 %v777_v32, 0.0  ;;  %v896_v27 = vmax.f32 %v752_v59, 0.0  ;;  %v3282_v8 = vsel %vm3277_vm6, %v5767_v58, %v4264_v3  ;;  %v3283_v47 = vsel %vm3277_vm6, %v5763_v33, %v4265_v24  ;;  %v6296_v41 = vpop.permute.xlu0 %4347 }
 0x13d   : > { %v1811_v18 = vsel %vm1115_vm1, %v920_v62, 0.0  ;;  %v897_v7 = vmax.f32 %v753_v48, 0.0  ;;  %v3331_v56 = vsel %vm3310_vm7, %v3298_v28, %v4269_v1  ;;  %v3332_v44 = vsel %vm3310_vm7, %v3299_v42, %v4270_v49  ;;  %v6294_v58 = vpop.permute.xlu1 %4342 }
 0x13e   : > { %v4541_v14 = vpack.i.bf16 %v921_v0, %v1811_v18  ;;  %v2353_v17 = vrot.slane %v1811_v18, 1  ;;  %v2433_v35 = vrot.slane %v1811_v18, 2  ;;  %v1787_v43 = vsel %vm1115_vm1, %v896_v27, 0.0 }
 0x13f   : > { %v4546_v33 = vpack.i.bf16 %v897_v7, %v1787_v43  ;;  %v2313_v13 = vrot.slane %v1787_v43, 1  ;;  %v2393_v50 = vrot.slane %v1787_v43, 2  ;;  %v627_v37 = vmul.f32 %v5853_v36, %v476_v29 }
 0x140   : > { %4542 = vrot.lane.b32.xlu1 %v4541_v14, %s4672_s17  ;;  %v2354_v11 = vrot.slane %v921_v0, 1  ;;  %v603_v42 = vmul.f32 %v5853_v36, %v452_v23  ;;  %v2314_v46 = vrot.slane %v897_v7, 1  ;;  %v4275_v45 = vunpack.i.h.bf16 %v6103_v20 }
 0x141   : > { %4547 = vrot.lane.b32.xlu0 %v4546_v33, %s4672_s17  ;;  %v778_v31 = vadd.f32 %v5869_v55, %v627_v37  ;;  %v4274_v28 = vunpack.i.l.bf16 %v6103_v20  ;;  %v4280_v51 = vunpack.i.h.bf16 %v6105_v26  ;;  %v4279_v38 = vunpack.i.l.bf16 %v6105_v26  ;;  %v6315_v18 = vpop.permute.xlu1 %4352 }
 0x142   : > { %v2355_v32 = vsel %vm1865_vm0, %v2353_v17, %v2354_v11  ;;  %v754_v59 = vadd.f32 %v5869_v55, %v603_v42  ;;  %v2315_v24 = vsel %vm1865_vm0, %v2313_v13, %v2314_v46  ;;  %v3316_v3 = vsel %vm3310_vm7, %v3283_v47, %v4275_v45 }
 0x143   : > { %v922_v62 = vmax.f32 %v778_v31, 0.0  ;;  %v3315_v48 = vsel %vm3310_vm7, %v3282_v8, %v4274_v28  ;;  %v3364_v49 = vsel %vm3343_vm8, %v3331_v56, %v4279_v38  ;;  %v3365_v1 = vsel %vm3343_vm8, %v3332_v44, %v4280_v51  ;;  %v429_v31 = vld [vmem:[%s4749_s8 + $0x2e8] sm:$0xff]  ;;  %v430_v28 = vld [vmem:[%s4749_s8 + $0x2f0] sm:$0xff] }
 0x144   : > { %v898_v20 = vmax.f32 %v754_v59, 0.0  ;;  %v2434_v27 = vrot.slane %v921_v0, 2  ;;  %v2394_v29 = vrot.slane %v897_v7, 2  ;;  %v4285_v26 = vunpack.i.h.bf16 %v6124_v19 }
 0x145   : > { %v6317_v23 = vpop.permute.xlu0 %4357  ;;  %v1813_v14 = vsel %vm1258_vm2, %v922_v62, 0.0  ;;  %v4284_v47 = vunpack.i.l.bf16 %v6124_v19  ;;  %v4290_v8 = vunpack.i.h.bf16 %v6126_v39  ;;  %v4289_v56 = vunpack.i.l.bf16 %v6126_v39 }
 0x146   : > { %v2356_v44 = vrot.slane %v1813_v14, 1  ;;  %v1789_v0 = vsel %vm1258_vm2, %v898_v20, 0.0  ;;  %v2435_v7 = vsel %vm1946_vm3, %v2433_v35, %v2434_v27  ;;  %v2436_v17 = vrot.slane %v1813_v14, 2  ;;  %v6837_v20 = vld [vmem:[#allocation15_spill] sm:$0xff] }
 0x147   : > { %v2316_v43 = vrot.slane %v1789_v0, 1  ;;  %v2395_v33 = vsel %vm1946_vm3, %v2393_v50, %v2394_v29  ;;  %v2396_v13 = vrot.slane %v1789_v0, 2  ;;  %v3348_v37 = vsel %vm3343_vm8, %v3315_v48, %v4284_v47  ;;  %v405_v50 = vld [vmem:[%s4749_s8 + $0x228] sm:$0xff] }
 0x148   : > { %v2357_v19 = vsel %vm1865_vm0, %v2354_v11, %v2356_v44  ;;  %v2437_v42 = vsel %vm1946_vm3, %v2434_v27, %v2436_v17  ;;  %v3349_v39 = vsel %vm3343_vm8, %v3316_v3, %v4285_v26  ;;  %v3397_v45 = vsel %vm3376_vm9, %v3364_v49, %v4289_v56 }
 0x149   : > { %v4551_v51 = vpack.i.bf16 %v2357_v19, %v2355_v32  ;;  %v2317_v35 = vsel %vm1865_vm0, %v2314_v46, %v2316_v43  ;;  %v4561_v38 = vpack.i.bf16 %v2437_v42, %v2435_v7  ;;  %v2397_v59 = vsel %vm1946_vm3, %v2394_v29, %v2396_v13  ;;  %v6342_v3 = vpop.permute.xlu0 %4367  ;;  %v6838_v32 = vld [vmem:[#allocation14_spill] sm:$0xff] }
 0x14a   : > { %v4556_v62 = vpack.i.bf16 %v2317_v35, %v2315_v24  ;;  %v4566_v48 = vpack.i.bf16 %v2397_v59, %v2395_v33  ;;  %v3398_v11 = vsel %vm3376_vm9, %v3365_v1, %v4290_v8  ;;  %v2022_v27 = vrot.slane %v6837_v20, 2  ;;  %v406_v8 = vld [vmem:[%s4749_s8 + $0x230] sm:$0xff]  ;;  %v431_v33 = vld [vmem:[%s4749_s8 + $0x2f8] sm:$0x3] }
 0x14b   : > { %4552 = vrot.lane.b32.xlu1 %v4551_v51, %s4673_s20  ;;  %v2023_v46 = vrot.slane %v6838_v32, 2  ;;  %v580_v49 = vmul.f32 %v5853_v36, %v429_v31  ;;  %v581_v29 = vmul.f32 %v5853_v36, %v430_v28  ;;  %v4295_v24 = vunpack.i.h.bf16 %v6154_v15  ;;  %v6370_v31 = vld [vmem:[%s6767_s2] ss:$0 sm:$0xff] }
 0x14c   : > { %v6340_v14 = vpop.permute.xlu1 %4362  ;;  %4557 = vrot.lane.b32.xlu0 %v4556_v62, %s4673_s20  ;;  %v4294_v1 = vunpack.i.l.bf16 %v6154_v15  ;;  %v4300_v26 = vunpack.i.h.bf16 %v6159_v22  ;;  %v4299_v47 = vunpack.i.l.bf16 %v6159_v22  ;;  %v556_v56 = vmul.f32 %v5853_v36, %v405_v50 }
 0x14d   : > { %v2024_v44 = vsel %vm1946_vm3, %v2022_v27, %v2023_v46  ;;  %v6839_v0 = vrot.slane %v5133_v54, 2  ;;  %v731_v17 = vadd.f32 %v5869_v55, %v580_v49  ;;  %v732_v43 = vadd.f32 %v5869_v55, %v581_v29 }
 0x14e   : > { %v3381_v15 = vsel %vm3376_vm9, %v3348_v37, %v4294_v1  ;;  %v3382_v19 = vsel %vm3376_vm9, %v3349_v39, %v4295_v24  ;;  %v3430_v22 = vsel %vm3409_vm10, %v3397_v45, %v4299_v47  ;;  %v3431_v54 = vsel %vm3409_vm10, %v3398_v11, %v4300_v26  ;;  %v6377_v37 = vld [vmem:[%s6768_s3] ss:$0 sm:$0xff]  ;;  %v407_v26 = vld [vmem:[%s4749_s8 + $0x238] sm:$0x3] }
 0x14f   : > { %v2026_v7 = vsel %vm1946_vm3, %v2023_v46, %v6839_v0  ;;  %4562 = vrot.lane.b32.xlu1 %v4561_v38, %s4674_s25  ;;  %v875_v36 = vmax.f32 %v731_v17, 0.0  ;;  %v876_v42 = vmax.f32 %v732_v43, 0.0  ;;  %v557_v55 = vmul.f32 %v6370_v31, %v406_v8  ;;  %v6385_v38 = vpop.permute.xlu0 %4377 }
 0x150   : > { %v4571_v13 = vpack.i.bf16 %v2026_v7, %v2024_v44  ;;  %4567 = vrot.lane.b32.xlu0 %v4566_v48, %s4674_s25  ;;  %v707_v39 = vadd.f32 %v6377_v37, %v556_v56  ;;  %v582_v45 = vmul.f32 %v6370_v31, %v431_v33  ;;  %v4305_v28 = vunpack.i.h.bf16 %v6186_v30  ;;  %v6383_v35 = vpop.permute.xlu1 %4372 }
 0x151   : > { %v4304_v51 = vunpack.i.l.bf16 %v6186_v30  ;;  %v1766_v59 = vsel %vm1115_vm1, %v875_v36, 0.0  ;;  %v708_v50 = vadd.f32 %v6377_v37, %v557_v55  ;;  %v2151_v62 = vrot.slane %v876_v42, 1 }
 0x152   : > { %v4310_v48 = vunpack.i.h.bf16 %v6188_v2  ;;  %v4576_v11 = vpack.i.bf16 %v876_v42, %v1766_v59  ;;  %v2150_v27 = vrot.slane %v1766_v59, 1  ;;  %v2230_v46 = vrot.slane %v1766_v59, 2 }
 0x153   : > { %v851_v49 = vmax.f32 %v707_v39, 0.0  ;;  %4572 = vrot.lane.b32.xlu1 %v4571_v13, %s4668_s11  ;;  %v852_v30 = vmax.f32 %v708_v50, 0.0  ;;  %v733_v29 = vadd.f32 %v6377_v37, %v582_v45  ;;  %v3414_v24 = vsel %vm3409_vm10, %v3381_v15, %v4304_v51 }
 0x154   : > { %v3415_v1 = vsel %vm3409_vm10, %v3382_v19, %v4305_v28  ;;  %4577 = vrot.lane.b32.xlu0 %v4576_v11, %s4669_s12  ;;  %v2152_v8 = vsel %vm1865_vm0, %v2150_v27, %v2151_v62  ;;  %v4309_v56 = vunpack.i.l.bf16 %v6188_v2  ;;  %v3464_v44 = vsel %vm3442_vm11, %v3431_v54, %v4310_v48  ;;  %v6404_v36 = vpop.permute.xlu1 %4382  ;;  %v6406_v55 = vpop.permute.xlu0 %4387 }
 0x155   : > { %v1742_v47 = vsel %vm1115_vm1, %v851_v49, 0.0  ;;  %v877_v43 = vmax.f32 %v733_v29, 0.0  ;;  %v558_v13 = vmul.f32 %v6370_v31, %v407_v26  ;;  %v2111_v15 = vrot.slane %v852_v30, 1 }
 0x156   : > { %v4581_v0 = vpack.i.bf16 %v852_v30, %v1742_v47  ;;  %v2110_v7 = vrot.slane %v1742_v47, 1  ;;  %v2190_v17 = vrot.slane %v1742_v47, 2  ;;  %v3463_v33 = vsel %vm3442_vm11, %v3430_v22, %v4309_v56  ;;  %v453_v56 = vld [vmem:[%s4749_s8 + $0x3a8] sm:$0xff] }
 0x157   : > { %v2231_v19 = vrot.slane %v876_v42, 2  ;;  %v1768_v2 = vsel %vm1258_vm2, %v877_v43, 0.0  ;;  %v3926_v54 = vpack.c.bf16 %v3464_v44, %v3463_v33  ;;  %v4315_v39 = vunpack.i.h.bf16 %v6211_v10 }
 0x158   : > { %4582 = vrot.lane.b32.xlu1 %v4581_v0, %s4669_s12  ;;  %v4314_v45 = vunpack.i.l.bf16 %v6211_v10  ;;  %v2153_v28 = vrot.slane %v1768_v2, 1  ;;  %v709_v22 = vadd.f32 %v6377_v37, %v558_v13  ;;  %v2112_v42 = vsel %vm1865_vm0, %v2110_v7, %v2111_v15  ;;  %s3879_s12 = sshll.u32 %s6871_s21, 4 }
 0x159   : > { %v2232_v51 = vsel %vm1946_vm3, %v2230_v46, %v2231_v19  ;;  %v2233_v59 = vrot.slane %v1768_v2, 2  ;;  %v3448_v48 = vsel %vm3442_vm11, %v3415_v1, %v4315_v39  ;;  %v4320_v11 = vunpack.i.h.bf16 %v6213_v57  ;;  %3928 = vmatprep.subr.msk.bf16.mxu0 %vm6097_vm13, %v3926_v54  ;;  %s320_s15 = scalar_lea.vmem %s6769_s4, %s3879_s12 }
 0x15a   : > { %v3447_v50 = vsel %vm3442_vm11, %v3414_v24, %v4314_v45  ;;  %v2154_v10 = vsel %vm1865_vm0, %v2151_v62, %v2153_v28  ;;  %v853_v27 = vmax.f32 %v709_v22, 0.0  ;;  %v4319_v29 = vunpack.i.l.bf16 %v6213_v57  ;;  %v454_v62 = vld [vmem:[%s4749_s8 + $0x3b0] sm:$0xff]  ;;  %v455_v45 = vld [vmem:[%s4749_s8 + $0x3b8] sm:$0x3] }
 0x15b   : > { %v3929_v49 = vpack.c.bf16 %v3448_v48, %v3447_v50  ;;  %v4586_v26 = vpack.i.bf16 %v2154_v10, %v2152_v8  ;;  %v2234_v46 = vsel %vm1946_vm3, %v2231_v19, %v2233_v59  ;;  %v3301_v24 = vsel %vm3277_vm6, %v5876_v12, %v4320_v11 }
 0x15c   : > { %v2191_v47 = vrot.slane %v852_v30, 2  ;;  %v1744_v1 = vsel %vm1258_vm2, %v853_v27, 0.0  ;;  %v4596_v44 = vpack.i.bf16 %v2234_v46, %v2232_v51  ;;  %v3300_v0 = vsel %vm3277_vm6, %v5886_v16, %v4319_v29  ;;  %v6434_v57 = vpop.permute.xlu1 %4392  ;;  %v6436_v8 = vpop.permute.xlu0 %4397 }
 0x15d   : > { %3931 = vmatpush3.bf16.xpose.msk.msra.mxu0 %vm6097_vm13, %v3929_v49  ;;  %4587 = vrot.lane.b32.xlu0 %v4586_v26, %s4670_s13  ;;  %v2113_v12 = vrot.slane %v1744_v1, 1  ;;  %v2193_v7 = vrot.slane %v1744_v1, 2  ;;  %v4325_v43 = vunpack.i.h.bf16 %v6234_v53  ;;  %v4324_v33 = vunpack.i.l.bf16 %v6234_v53 }
 0x15e   : > { %v2192_v30 = vsel %vm1946_vm3, %v2190_v17, %v2191_v47  ;;  %v4330_v16 = vunpack.i.h.bf16 %v6236_v61  ;;  %v4329_v13 = vunpack.i.l.bf16 %v6236_v61  ;;  %v604_v19 = vmul.f32 %v6370_v31, %v453_v56 }
 0x15f   : > { %v2114_v2 = vsel %vm1865_vm0, %v2111_v15, %v2113_v12  ;;  %v2194_v54 = vsel %vm1946_vm3, %v2191_v47, %v2193_v7  ;;  %v3285_v39 = vsel %vm3277_vm6, %v5779_v40, %v4325_v43  ;;  %v605_v17 = vmul.f32 %v6370_v31, %v454_v62 }
 0x160   : > { %v4591_v28 = vpack.i.bf16 %v2114_v2, %v2112_v42  ;;  %v4601_v22 = vpack.i.bf16 %v2194_v54, %v2192_v30  ;;  %v3284_v53 = vsel %vm3277_vm6, %v5790_v25, %v4324_v33  ;;  %v3333_v51 = vsel %vm3310_vm7, %v3300_v0, %v4329_v13  ;;  %v6464_v11 = vpop.permute.xlu1 %4402  ;;  %v6466_v10 = vpop.permute.xlu0 %4407  ;;  %v6841_v2 = vld [vmem:[#allocation2_spill] sm:$0xff] }
 0x161   : > { %4597 = vrot.lane.b32.xlu0 %v4596_v44, %s4671_s14  ;;  %v3334_v61 = vsel %vm3310_vm7, %v3301_v24, %v4330_v16  ;;  %v755_v15 = vadd.f32 %v6377_v37, %v604_v19  ;;  %v756_v59 = vadd.f32 %v6377_v37, %v605_v17  ;;  %v4335_v40 = vunpack.i.h.bf16 %v6263_v63 }
 0x162   : > { %4592 = vrot.lane.b32.xlu1 %v4591_v28, %s4670_s13  ;;  %v4334_v42 = vunpack.i.l.bf16 %v6263_v63  ;;  %v4340_v50 = vunpack.i.h.bf16 %v6265_v52  ;;  %v4339_v25 = vunpack.i.l.bf16 %v6265_v52  ;;  %v606_v48 = vmul.f32 %v6370_v31, %v455_v45 }
 0x163   : > { %v899_v27 = vmax.f32 %v755_v15, 0.0  ;;  %v900_v49 = vmax.f32 %v756_v59, 0.0  ;;  %v3318_v29 = vsel %vm3310_vm7, %v3285_v39, %v4335_v40  ;;  %v6840_v52 = vmov 0.0  }
 0x164   : > { %v3317_v26 = vsel %vm3310_vm7, %v3284_v53, %v4334_v42  ;;  %v3366_v46 = vsel %vm3343_vm8, %v3333_v51, %v4339_v25  ;;  %v3367_v63 = vsel %vm3343_vm8, %v3334_v61, %v4340_v50  ;;  %v757_v24 = vadd.f32 %v6377_v37, %v606_v48  ;;  %v6504_v53 = vld [vmem:[%s6766_s1] sm:$0xff] }
 0x165   : > { %4607 = vrot.lane.b32.xlu0 %v6840_v52, %s4672_s17  ;;  %v1790_v31 = vsel %vm1115_vm1, %v899_v27, 0.0  ;;  %v2319_v47 = vrot.slane %v900_v49, 1  ;;  %v4345_v56 = vunpack.i.h.bf16 %v6294_v58  ;;  %v4344_v1 = vunpack.i.l.bf16 %v6294_v58  ;;  %v6488_v13 = vpop.permute.xlu1 %4412  ;;  %3912 = vmatprep.mubr.msk.f32.mxu0 %vm3476_vm12, %v6504_v53 }
 0x166   : > { %4602 = vrot.lane.b32.xlu1 %v4601_v22, %s4671_s14  ;;  %v4611_v44 = vpack.i.bf16 %v900_v49, %v1790_v31  ;;  %v2318_v0 = vrot.slane %v1790_v31, 1  ;;  %v2398_v62 = vrot.slane %v1790_v31, 2  ;;  %v901_v12 = vmax.f32 %v757_v24, 0.0  ;;  %v6490_v19 = vpop.permute.xlu0 %4417 }
 0x167   : > { %v3350_v30 = vsel %vm3343_vm8, %v3317_v26, %v4344_v1  ;;  %v3351_v37 = vsel %vm3343_vm8, %v3318_v29, %v4345_v56  ;;  %v4350_v7 = vunpack.i.h.bf16 %v6296_v41  ;;  %v4349_v4 = vunpack.i.l.bf16 %v6296_v41 }
 0x168   : > { %v1792_v43 = vsel %vm1258_vm2, %v901_v12, 0.0  ;;  %v2320_v33 = vsel %vm1865_vm0, %v2318_v0, %v2319_v47  ;;  %v2399_v58 = vrot.slane %v900_v49, 2  ;;  %v4355_v16 = vunpack.i.h.bf16 %v6315_v18 }
 0x169   : > { %4617 = vrot.lane.b32.xlu0 %v6841_v2, %s4673_s20  ;;  %v2321_v54 = vrot.slane %v1792_v43, 1  ;;  %v3399_v39 = vsel %vm3376_vm9, %v3366_v46, %v4349_v4  ;;  %v3400_v41 = vsel %vm3376_vm9, %v3367_v63, %v4350_v7  ;;  %v2401_v17 = vrot.slane %v1792_v43, 2  ;;  %v6845_v2 = vld [vmem:[#allocation27_spill] sm:$0xff] }
 0x16a   : > { %4612 = vrot.lane.b32.xlu1 %v4611_v44, %s4672_s17  ;;  %v2400_v6 = vsel %vm1946_vm3, %v2398_v62, %v2399_v58  ;;  %v4354_v45 = vunpack.i.l.bf16 %v6315_v18  ;;  %v3384_v28 = vsel %vm3376_vm9, %v3351_v37, %v4355_v16  ;;  %v4360_v22 = vunpack.i.h.bf16 %v6317_v23  ;;  %v6843_v62 = vld [vmem:[#allocation22_spill] sm:$0xff] }
 0x16b   : > { %v2322_v51 = vsel %vm1865_vm0, %v2319_v47, %v2321_v54  ;;  %v2402_v61 = vsel %vm1946_vm3, %v2399_v58, %v2401_v17  ;;  %v4359_v15 = vunpack.i.l.bf16 %v6317_v23  ;;  %v4365_v59 = vunpack.i.h.bf16 %v6340_v14 }
 0x16c   : > { %v4621_v18 = vpack.i.bf16 %v2322_v51, %v2320_v33  ;;  %v4631_v40 = vpack.i.bf16 %v2402_v61, %v2400_v6  ;;  %v3383_v42 = vsel %vm3376_vm9, %v3350_v30, %v4354_v45  ;;  %v3433_v50 = vsel %vm3409_vm10, %v3400_v41, %v4360_v22  ;;  %v6525_v63 = vpop.permute.xlu1 %4422  ;;  %v6844_v30 = vld [vmem:[#allocation25_spill] sm:$0xff] }
 0x16d   : > { %4627 = vrot.lane.b32.xlu0 %v5140_v9, %s4674_s25  ;;  %v3432_v25 = vsel %vm3409_vm10, %v3399_v39, %v4359_v15  ;;  %v4364_v48 = vunpack.i.l.bf16 %v6340_v14  ;;  %v3417_v23 = vsel %vm3409_vm10, %v3384_v28, %v4365_v59  ;;  %v4370_v27 = vunpack.i.h.bf16 %v6342_v3 }
 0x16e   : > { %4622 = vrot.lane.b32.xlu1 %v4621_v18, %s4673_s20  ;;  %v4369_v49 = vunpack.i.l.bf16 %v6342_v3  ;;  %v4375_v29 = vunpack.i.h.bf16 %v6383_v35  ;;  %v4374_v26 = vunpack.i.l.bf16 %v6383_v35  ;;  %v4380_v46 = vunpack.i.h.bf16 %v6385_v38 }
 0x16f   : > { %v6527_v9 = vpop.permute.xlu0 %4427  ;;  %v3416_v14 = vsel %vm3409_vm10, %v3383_v42, %v4364_v48  ;;  %v3466_v24 = vsel %vm3442_vm11, %v3433_v50, %v4370_v27  ;;  %v4379_v52 = vunpack.i.l.bf16 %v6385_v38  ;;  %v4385_v31 = vunpack.i.h.bf16 %v6404_v36 }
 0x170   : > { %v6842_v3 = vunpack.i.l.bf16 %v5696_v60  ;;  %v3465_v35 = vsel %vm3442_vm11, %v3432_v25, %v4369_v49  ;;  %v3449_v56 = vsel %vm3442_vm11, %v3416_v14, %v4374_v26  ;;  %v3450_v1 = vsel %vm3442_vm11, %v3417_v23, %v4375_v29  ;;  %v4433_v39 = vpop.permute.xlu1 %4432 }
 0x171   : > { %v3932_v44 = vpack.c.bf16 %v3466_v24, %v3465_v35  ;;  %v3935_v0 = vpack.c.bf16 %v3450_v1, %v3449_v56  ;;  %v3270_v12 = vsel %vm3244_vm5, %v6843_v62, %v4380_v46  ;;  %v4384_v38 = vunpack.i.l.bf16 %v6404_v36 }
 0x172   : > { %v3253_v47 = vsel %vm3244_vm5, %v5614_v21, %v6842_v3  ;;  %4632 = vrot.lane.b32.xlu1 %v4631_v40, %s4674_s25  ;;  %v3269_v60 = vsel %vm3244_vm5, %v6844_v30, %v4379_v52  ;;  %v4390_v21 = vunpack.i.h.bf16 %v6406_v55  ;;  %v4389_v37 = vunpack.i.l.bf16 %v6406_v55  ;;  %v6846_v30 = vld [vmem:[#allocation19_spill] sm:$0xff] }
 0x173   : > { %v4395_v7 = vunpack.i.h.bf16 %v6434_v57  ;;  %3934 = vmatprep.subr.msk.bf16.mxu0 %vm6097_vm13, %v3932_v44  ;;  %v3303_v4 = vsel %vm3277_vm6, %v3270_v12, %v4385_v31  ;;  %v4394_v43 = vunpack.i.l.bf16 %v6434_v57  ;;  %v4400_v36 = vunpack.i.h.bf16 %v6436_v8  ;;  %v4438_v41 = vpop.permute.xlu0 %4437 }
 0x174   : > { %v4399_v33 = vunpack.i.l.bf16 %v6436_v8  ;;  %v3302_v58 = vsel %vm3277_vm6, %v3269_v60, %v4384_v38  ;;  %v3286_v16 = vsel %vm3277_vm6, %v3253_v47, %v4389_v37  ;;  %v3287_v55 = vsel %vm3277_vm6, %v6845_v2, %v4390_v21  ;;  %3937 = vmatpush3.bf16.xpose.msk.msra.mxu0 %vm6097_vm13, %v3935_v0  ;;  %v4443_v29 = vpop.permute.xlu1 %4442  ;;  %v6849_v2 = vld [vmem:[#allocation10_spill] sm:$0xff] }
 0x175   : > { %v4405_v54 = vunpack.i.h.bf16 %v6464_v11  ;;  %v3335_v57 = vsel %vm3310_vm7, %v3302_v58, %v4394_v43  ;;  %v3336_v17 = vsel %vm3310_vm7, %v3303_v4, %v4395_v7  ;;  %v4404_v6 = vunpack.i.l.bf16 %v6464_v11  ;;  %v6848_v58 = vld [vmem:[#allocation9_spill] sm:$0xff] }
 0x176   : > { %v3319_v8 = vsel %vm3310_vm7, %v3286_v16, %v4399_v33  ;;  %v3320_v45 = vsel %vm3310_vm7, %v3287_v55, %v4400_v36  ;;  %v4410_v28 = vunpack.i.h.bf16 %v6466_v10  ;;  %v4409_v22 = vunpack.i.l.bf16 %v6466_v10  ;;  %v6847_v36 = vld [vmem:[#allocation16_spill] sm:$0xff] }
 0x177   : > { %v4415_v51 = vunpack.i.h.bf16 %v6488_v13  ;;  %v3369_v61 = vsel %vm3343_vm8, %v3336_v17, %v4405_v54  ;;  %v4414_v15 = vunpack.i.l.bf16 %v6488_v13  ;;  %v4420_v59 = vunpack.i.h.bf16 %v6490_v19 }
 0x178   : > { %v4419_v18 = vunpack.i.l.bf16 %v6490_v19  ;;  %v3368_v40 = vsel %vm3343_vm8, %v3335_v57, %v4404_v6  ;;  %v3352_v11 = vsel %vm3343_vm8, %v3319_v8, %v4409_v22  ;;  %v3353_v42 = vsel %vm3343_vm8, %v3320_v45, %v4410_v28  ;;  %v4448_v26 = vpop.permute.xlu0 %4447 }
 0x179   : > { %v4425_v50 = vunpack.i.h.bf16 %v6525_v63  ;;  %v3401_v10 = vsel %vm3376_vm9, %v3368_v40, %v4414_v15  ;;  %v3402_v25 = vsel %vm3376_vm9, %v3369_v61, %v4415_v51  ;;  %v4424_v13 = vunpack.i.l.bf16 %v6525_v63 }
 0x17a   : > { %v3385_v48 = vsel %vm3376_vm9, %v3352_v11, %v4419_v18  ;;  %v3386_v23 = vsel %vm3376_vm9, %v3353_v42, %v4420_v59  ;;  %v4430_v19 = vunpack.i.h.bf16 %v6527_v9  ;;  %v4429_v27 = vunpack.i.l.bf16 %v6527_v9  ;;  %v6850_v11 = vld [vmem:[#allocation3_spill] sm:$0xff] }
 0x17b   : > { %v4435_v49 = vunpack.i.h.bf16 %v4433_v39  ;;  %v3435_v46 = vsel %vm3409_vm10, %v3402_v25, %v4425_v50  ;;  %v4434_v14 = vunpack.i.l.bf16 %v4433_v39  ;;  %v4440_v24 = vunpack.i.h.bf16 %v4438_v41  ;;  %v6595_v0 = vpop.permute.xlu1 %4452 }
 0x17c   : > { %v4439_v52 = vunpack.i.l.bf16 %v4438_v41  ;;  %v3434_v31 = vsel %vm3409_vm10, %v3401_v10, %v4424_v13  ;;  %v3418_v3 = vsel %vm3409_vm10, %v3385_v48, %v4429_v27  ;;  %v3419_v63 = vsel %vm3409_vm10, %v3386_v23, %v4430_v19  ;;  %v6851_v48 = vld [vmem:[#allocation23_spill] sm:$0xff] }
 0x17d   : > { %v3468_v47 = vsel %vm3442_vm11, %v3435_v46, %v4435_v49  ;;  %v3467_v35 = vsel %vm3442_vm11, %v3434_v31, %v4434_v14  ;;  %v3452_v56 = vsel %vm3442_vm11, %v3419_v63, %v4440_v24  ;;  %v4065_v60 = vunpack.i.h.bf16 %v6846_v30 }
 0x17e   : > { %v3451_v9 = vsel %vm3442_vm11, %v3418_v3, %v4439_v52  ;;  %v3938_v1 = vpack.c.bf16 %v3468_v47, %v3467_v35  ;;  %v4064_v21 = vunpack.i.l.bf16 %v6846_v30  ;;  %v4445_v7 = vunpack.i.h.bf16 %v4443_v29 }
 0x17f   : > { %v3941_v44 = vpack.c.bf16 %v3452_v56, %v3451_v9  ;;  %v4444_v4 = vunpack.i.l.bf16 %v4443_v29  ;;  %v4025_v33 = vunpack.i.h.bf16 %v6847_v36  ;;  %v3239_v16 = vsel %vm3211_vm4, %v6848_v58, %v4065_v60  ;;  %v6852_v56 = vld [vmem:[#allocation4_spill] sm:$0xff] }
 0x180   : > { %3940 = vmatprep.subr.msk.bf16.mxu0 %vm6097_vm13, %v3938_v1  ;;  %v4458_v62 = vpop.permute.xlu0 %4457  ;;  %v3238_v55 = vsel %vm3211_vm4, %v6849_v2, %v4064_v21  ;;  %v4450_v54 = vunpack.i.h.bf16 %v4448_v26  ;;  %v4449_v39 = vunpack.i.l.bf16 %v4448_v26  ;;  %v3272_v41 = vsel %vm3244_vm5, %v3239_v16, %v4445_v7 }
 0x181   : > { %3943 = vmatpush3.bf16.xpose.msk.msra.mxu0 %vm6097_vm13, %v3941_v44  ;;  %v3271_v57 = vsel %vm3244_vm5, %v3238_v55, %v4444_v4  ;;  %v4460_v17 = vunpack.i.h.bf16 %v4458_v62  ;;  %v4459_v8 = vunpack.i.l.bf16 %v4458_v62  ;;  %v3223_v42 = vsel %vm3211_vm4, %v6850_v11, %v4025_v33 }
 0x182   : > { %v3305_v61 = vsel %vm3277_vm6, %v3272_v41, %v4450_v54  ;;  %v3304_v15 = vsel %vm3277_vm6, %v3271_v57, %v4449_v39  ;;  %v4024_v50 = vunpack.i.l.bf16 %v6847_v36  ;;  %v4105_v13 = vunpack.i.h.bf16 %v6851_v48 }
 0x183   : > { %v3337_v10 = vsel %vm3310_vm7, %v3304_v15, %v4459_v8  ;;  %v3338_v25 = vsel %vm3310_vm7, %v3305_v61, %v4460_v17  ;;  %v4104_v23 = vunpack.i.l.bf16 %v6851_v48  ;;  %v4455_v24 = vunpack.i.h.bf16 %v6595_v0  ;;  %v6855_v48 = vld [vmem:[#allocation24_spill] sm:$0xff] }
 0x184   : > { %v4468_v12 = vpop.permute.xlu0 %4467  ;;  %v6599_v38 = vpop.permute.xlu1 %4462  ;;  %v4454_v52 = vunpack.i.l.bf16 %v6595_v0  ;;  %v3222_v1 = vsel %vm3211_vm4, %v6852_v56, %v4024_v50  ;;  %v3256_v0 = vsel %vm3244_vm5, %v3223_v42, %v4105_v13  ;;  %v6854_v50 = vld [vmem:[#allocation20_spill] sm:$0xff]  ;;  %v4110_v13 = vunpack.i.h.bf16 %v6855_v48 }
 0x185   : > { %v4470_v6 = vunpack.i.h.bf16 %v4468_v12  ;;  %v4469_v45 = vunpack.i.l.bf16 %v4468_v12  ;;  %v4465_v63 = vunpack.i.h.bf16 %v6599_v38  ;;  %v4464_v47 = vunpack.i.l.bf16 %v6599_v38 }
 0x186   : > { %v3255_v60 = vsel %vm3244_vm5, %v3222_v1, %v4104_v23  ;;  %v3289_v38 = vsel %vm3277_vm6, %v3256_v0, %v4455_v24  ;;  %v4109_v23 = vunpack.i.l.bf16 %v6855_v48  ;;  %v6857_v24 = vld [vmem:[#allocation6_spill] sm:$0xff] }
 0x187   : > { %v3370_v19 = vsel %vm3343_vm8, %v3337_v10, %v4469_v45  ;;  %v3371_v27 = vsel %vm3343_vm8, %v3338_v25, %v4470_v6  ;;  %v3288_v7 = vsel %vm3277_vm6, %v3255_v60, %v4454_v52  ;;  %v4070_v10 = vunpack.i.h.bf16 %v6854_v50 }
 0x188   : > { %v4478_v37 = vpop.permute.xlu0 %4477  ;;  %v4473_v43 = vpop.permute.xlu1 %4472  ;;  %v3321_v33 = vsel %vm3310_vm7, %v3288_v7, %v4464_v47  ;;  %v4069_v25 = vunpack.i.l.bf16 %v6854_v50 }
 0x189   : > { %v4480_v22 = vunpack.i.h.bf16 %v4478_v37  ;;  %v4479_v51 = vunpack.i.l.bf16 %v4478_v37  ;;  %v4475_v44 = vunpack.i.h.bf16 %v4473_v43  ;;  %v4474_v62 = vunpack.i.l.bf16 %v4473_v43 }
 0x18a   : > { %v3322_v43 = vsel %vm3310_vm7, %v3289_v38, %v4465_v63  ;;  %v3241_v47 = vsel %vm3211_vm4, %v6835_v5, %v4070_v10 }
 0x18b   : > { %v3403_v29 = vsel %vm3376_vm9, %v3370_v19, %v4479_v51  ;;  %v3404_v26 = vsel %vm3376_vm9, %v3371_v27, %v4480_v22  ;;  %v3354_v58 = vsel %vm3343_vm8, %v3321_v33, %v4474_v62  ;;  %v3355_v16 = vsel %vm3343_vm8, %v3322_v43, %v4475_v44 }
 0x18c   : > { %v4483_v59 = vpop.permute.xlu1 %4482 }
 0x18d   : > { %v4485_v21 = vunpack.i.h.bf16 %v4483_v59  ;;  %v4484_v37 = vunpack.i.l.bf16 %v4483_v59 }
 0x18f   : > { %v3387_v55 = vsel %vm3376_vm9, %v3354_v58, %v4484_v37  ;;  %v3388_v54 = vsel %vm3376_vm9, %v3355_v16, %v4485_v21 }
 0x190   : > { %v4488_v28 = vpop.permute.xlu0 %4487 }
 0x191   : > { %v4490_v18 = vunpack.i.h.bf16 %v4488_v28  ;;  %v4489_v40 = vunpack.i.l.bf16 %v4488_v28 }
 0x193   : > { %v3436_v31 = vsel %vm3409_vm10, %v3403_v29, %v4489_v40  ;;  %v3437_v3 = vsel %vm3409_vm10, %v3404_v26, %v4490_v18  ;;  %v6853_v40 = vld [vmem:[#allocation17_spill] sm:$0xff] }
 0x194   : > { %v4498_v49 = vpop.permute.xlu0 %4497  ;;  %v4030_v11 = vunpack.i.h.bf16 %v6853_v40  ;;  %v4029_v42 = vunpack.i.l.bf16 %v6853_v40 }
 0x195   : > { %v4500_v46 = vunpack.i.h.bf16 %v4498_v49  ;;  %v4499_v14 = vunpack.i.l.bf16 %v4498_v49 }
 0x196   : > { %v3224_v52 = vsel %vm3211_vm4, %v6857_v24, %v4029_v42 }
 0x197   : > { %v3469_v35 = vsel %vm3442_vm11, %v3436_v31, %v4499_v14  ;;  %v3470_v9 = vsel %vm3442_vm11, %v3437_v3, %v4500_v46  ;;  %v4493_v12 = vpop.permute.xlu1 %4492  ;;  %v6856_v46 = vld [vmem:[#allocation5_spill] sm:$0xff]  ;;  %v3257_v56 = vsel %vm3244_vm5, %v3224_v52, %v4109_v23 }
 0x198   : > { %v3944_v30 = vpack.c.bf16 %v3470_v9, %v3469_v35  ;;  %v4495_v4 = vunpack.i.h.bf16 %v4493_v12  ;;  %v4494_v36 = vunpack.i.l.bf16 %v4493_v12  ;;  %v3225_v14 = vsel %vm3211_vm4, %v6856_v46, %v4030_v11  ;;  %v6858_v35 = vld [vmem:[#allocation13_spill] sm:$0xff] }
 0x199   : > { %v4508_v28 = vpop.permute.xlu0 %4507  ;;  %v3240_v9 = vsel %vm3211_vm4, %v6858_v35, %v4069_v25  ;;  %v3258_v1 = vsel %vm3244_vm5, %v3225_v14, %v4110_v13 }
 0x19a   : > { %3946 = vmatprep.subr.msk.bf16.mxu0 %vm6097_vm13, %v3944_v30  ;;  %v3420_v57 = vsel %vm3409_vm10, %v3387_v55, %v4494_v36  ;;  %v3421_v17 = vsel %vm3409_vm10, %v3388_v54, %v4495_v4  ;;  %v4510_v19 = vunpack.i.h.bf16 %v4508_v28  ;;  %v4509_v27 = vunpack.i.l.bf16 %v4508_v28 }
 0x19b   : > { %v4503_v2 = vpop.permute.xlu1 %4502 }
 0x19c   : > { %v4505_v39 = vunpack.i.h.bf16 %v4503_v2  ;;  %v4504_v41 = vunpack.i.l.bf16 %v4503_v2  ;;  %v3273_v44 = vsel %vm3244_vm5, %v3240_v9, %v4509_v27  ;;  %v3274_v62 = vsel %vm3244_vm5, %v3241_v47, %v4510_v19  ;;  %v6859_v9 = vld [vmem:[#allocation21_spill] sm:$0xff] }
 0x19e   : > { %v3453_v8 = vsel %vm3442_vm11, %v3420_v57, %v4504_v41  ;;  %v3454_v6 = vsel %vm3442_vm11, %v3421_v17, %v4505_v39 }
 0x19f   : > { %v3947_v45 = vpack.c.bf16 %v3454_v6, %v3453_v8 }
 0x1a0   : > { %v4513_v22 = vpop.permute.xlu1 %4512 }
 0x1a1   : > { %3949 = vmatpush3.bf16.xpose.msk.msra.mxu0 %vm6097_vm13, %v3947_v45  ;;  %v4515_v49 = vunpack.i.h.bf16 %v4513_v22  ;;  %v4514_v29 = vunpack.i.l.bf16 %v4513_v22 }
 0x1a2   : > { %v4518_v51 = vpop.permute.xlu0 %4517 }
 0x1a3   : > { %v4520_v31 = vunpack.i.h.bf16 %v4518_v51  ;;  %v4519_v3 = vunpack.i.l.bf16 %v4518_v51  ;;  %v3306_v0 = vsel %vm3277_vm6, %v3273_v44, %v4514_v29  ;;  %v3307_v60 = vsel %vm3277_vm6, %v3274_v62, %v4515_v49 }
 0x1a5   : > { %v3290_v5 = vsel %vm3277_vm6, %v3257_v56, %v4519_v3  ;;  %v3291_v7 = vsel %vm3277_vm6, %v3258_v1, %v4520_v31  ;;  %v4075_v56 = vunpack.i.h.bf16 %v6859_v9  ;;  %v4074_v1 = vunpack.i.l.bf16 %v6859_v9 }
 0x1a8   : > { %v4523_v61 = vpop.permute.xlu1 %4522 }
 0x1a9   : > { %v4528_v15 = vpop.permute.xlu0 %4527  ;;  %v4525_v12 = vunpack.i.h.bf16 %v4523_v61  ;;  %v4524_v30 = vunpack.i.l.bf16 %v4523_v61 }
 0x1aa   : > { %v4530_v21 = vunpack.i.h.bf16 %v4528_v15  ;;  %v4529_v37 = vunpack.i.l.bf16 %v4528_v15 }
 0x1ab   : > { %v3339_v2 = vsel %vm3310_vm7, %v3306_v0, %v4524_v30  ;;  %v3340_v55 = vsel %vm3310_vm7, %v3307_v60, %v4525_v12  ;;  %v6860_v30 = vld [vmem:[#allocation18_spill] sm:$0xff] }
 0x1ac   : > { %v4533_v59 = vpop.permute.xlu1 %4532  ;;  %v3323_v57 = vsel %vm3310_vm7, %v3290_v5, %v4529_v37  ;;  %v3324_v17 = vsel %vm3310_vm7, %v3291_v7, %v4530_v21  ;;  %v4035_v0 = vunpack.i.h.bf16 %v6860_v30  ;;  %v4034_v60 = vunpack.i.l.bf16 %v6860_v30  ;;  %v6861_v21 = vld [vmem:[#allocation26_spill] sm:$0xff] }
 0x1ad   : > { %v4538_v18 = vpop.permute.xlu0 %4537  ;;  %v4535_v38 = vunpack.i.h.bf16 %v4533_v59  ;;  %v4534_v4 = vunpack.i.l.bf16 %v4533_v59  ;;  %v4115_v37 = vunpack.i.h.bf16 %v6861_v21  ;;  %v4114_v5 = vunpack.i.l.bf16 %v6861_v21 }
 0x1ae   : > { %v4540_v36 = vunpack.i.h.bf16 %v4538_v18  ;;  %v4539_v33 = vunpack.i.l.bf16 %v4538_v18 }
 0x1af   : > { %v3372_v45 = vsel %vm3343_vm8, %v3339_v2, %v4534_v4  ;;  %v3373_v28 = vsel %vm3343_vm8, %v3340_v55, %v4535_v38  ;;  %v3243_v38 = vsel %vm3211_vm4, %v6838_v32, %v4075_v56  ;;  %v3242_v4 = vsel %vm3211_vm4, %v6837_v20, %v4074_v1 }
 0x1b0   : > { %v3356_v61 = vsel %vm3343_vm8, %v3323_v57, %v4539_v33  ;;  %v3357_v15 = vsel %vm3343_vm8, %v3324_v17, %v4540_v36 }
 0x1b2   : > { %v4543_v26 = vpop.permute.xlu1 %4542 }
 0x1b3   : > { %v4548_v63 = vpop.permute.xlu0 %4547  ;;  %v4545_v43 = vunpack.i.h.bf16 %v4543_v26  ;;  %v4544_v58 = vunpack.i.l.bf16 %v4543_v26 }
 0x1b4   : > { %v4550_v54 = vunpack.i.h.bf16 %v4548_v63  ;;  %v4549_v39 = vunpack.i.l.bf16 %v4548_v63 }
 0x1b5   : > { %v3405_v59 = vsel %vm3376_vm9, %v3372_v45, %v4544_v58  ;;  %v3406_v18 = vsel %vm3376_vm9, %v3373_v28, %v4545_v43 }
 0x1b6   : > { %v3389_v11 = vsel %vm3376_vm9, %v3356_v61, %v4549_v39  ;;  %v3390_v42 = vsel %vm3376_vm9, %v3357_v15, %v4550_v54  ;;  %v6862_v54 = vld [vmem:[#allocation7_spill] sm:$0xff] }
 0x1b7   : > { %v3227_v39 = vsel %vm3211_vm4, %v6862_v54, %v4035_v0 }
 0x1bd   : > { %v4553_v16 = vpop.permute.xlu1 %4552 }
 0x1be   : > { %v4558_v41 = vpop.permute.xlu0 %4557  ;;  %v4555_v8 = vunpack.i.h.bf16 %v4553_v16  ;;  %v4554_v6 = vunpack.i.l.bf16 %v4553_v16 }
 0x1bf   : > { %v4560_v22 = vunpack.i.h.bf16 %v4558_v41  ;;  %v4559_v51 = vunpack.i.l.bf16 %v4558_v41  ;;  %v6863_v41 = vld [vmem:[#allocation8_spill] sm:$0xff] }
 0x1c0   : > { %v3438_v48 = vsel %vm3409_vm10, %v3405_v59, %v4554_v6  ;;  %v3439_v13 = vsel %vm3409_vm10, %v3406_v18, %v4555_v8  ;;  %v3226_v57 = vsel %vm3211_vm4, %v6863_v41, %v4034_v60  ;;  %v3260_v8 = vsel %vm3244_vm5, %v3227_v39, %v4115_v37 }
 0x1c1   : > { %v4563_v40 = vpop.permute.xlu1 %4562  ;;  %v3422_v27 = vsel %vm3409_vm10, %v3389_v11, %v4559_v51  ;;  %v3423_v49 = vsel %vm3409_vm10, %v3390_v42, %v4560_v22  ;;  %v3259_v20 = vsel %vm3244_vm5, %v3226_v57, %v4114_v5 }
 0x1c2   : > { %v4565_v50 = vunpack.i.h.bf16 %v4563_v40  ;;  %v4564_v10 = vunpack.i.l.bf16 %v4563_v40  ;;  %v4568_v25 = vpop.permute.xlu0 %4567 }
 0x1c3   : > { %v4570_v23 = vunpack.i.h.bf16 %v4568_v25  ;;  %v4569_v19 = vunpack.i.l.bf16 %v4568_v25 }
 0x1c4   : > { %v3471_v29 = vsel %vm3442_vm11, %v3438_v48, %v4564_v10  ;;  %v3472_v26 = vsel %vm3442_vm11, %v3439_v13, %v4565_v50 }
 0x1c5   : > { %v3950_v46 = vpack.c.bf16 %v3472_v26, %v3471_v29  ;;  %v3455_v14 = vsel %vm3442_vm11, %v3422_v27, %v4569_v19  ;;  %v3456_v24 = vsel %vm3442_vm11, %v3423_v49, %v4570_v23  ;;  %v4573_v31 = vpop.permute.xlu1 %4572 }
 0x1c6   : > { %v3953_v52 = vpack.c.bf16 %v3456_v24, %v3455_v14  ;;  %v4578_v3 = vpop.permute.xlu0 %4577  ;;  %v4575_v62 = vunpack.i.h.bf16 %v4573_v31  ;;  %v4574_v12 = vunpack.i.l.bf16 %v4573_v31 }
 0x1c7   : > { %3952 = vmatprep.subr.msk.bf16.mxu0 %vm6097_vm13, %v3950_v46  ;;  %v4580_v36 = vunpack.i.h.bf16 %v4578_v3  ;;  %v4579_v33 = vunpack.i.l.bf16 %v4578_v3 }
 0x1c8   : > { %3955 = vmatpush3.bf16.xpose.msk.msra.mxu0 %vm6097_vm13, %v3953_v52  ;;  %v3276_v58 = vsel %vm3244_vm5, %v3243_v38, %v4575_v62  ;;  %v3275_v16 = vsel %vm3244_vm5, %v3242_v4, %v4574_v12 }
 0x1c9   : > { %v3309_v22 = vsel %vm3277_vm6, %v3276_v58, %v4580_v36  ;;  %v3308_v51 = vsel %vm3277_vm6, %v3275_v16, %v4579_v33 }
 0x1ca   : > { %v4583_v63 = vpop.permute.xlu1 %4582 }
 0x1cb   : > { %v4585_v2 = vunpack.i.h.bf16 %v4583_v63  ;;  %v4584_v55 = vunpack.i.l.bf16 %v4583_v63 }
 0x1cd   : > { %v3292_v18 = vsel %vm3277_vm6, %v3259_v20, %v4584_v55  ;;  %v3293_v40 = vsel %vm3277_vm6, %v3260_v8, %v4585_v2 }
 0x1cf   : > { %v4588_v47 = vpop.permute.xlu0 %4587 }
 0x1d0   : > { %v4590_v17 = vunpack.i.h.bf16 %v4588_v47  ;;  %v4589_v32 = vunpack.i.l.bf16 %v4588_v47 }
 0x1d2   : > { %v3341_v50 = vsel %vm3310_vm7, %v3308_v51, %v4589_v32  ;;  %v3342_v10 = vsel %vm3310_vm7, %v3309_v22, %v4590_v17 }
 0x1d3   : > { %v4598_v35 = vpop.permute.xlu0 %4597 }
 0x1d4   : > { %v4593_v44 = vpop.permute.xlu1 %4592  ;;  %v4600_v6 = vunpack.i.h.bf16 %v4598_v35  ;;  %v4599_v45 = vunpack.i.l.bf16 %v4598_v35 }
 0x1d5   : > { %v4595_v25 = vunpack.i.h.bf16 %v4593_v44  ;;  %v4594_v48 = vunpack.i.l.bf16 %v4593_v44 }
 0x1d6   : > { %v3374_v13 = vsel %vm3343_vm8, %v3341_v50, %v4599_v45  ;;  %v3375_v23 = vsel %vm3343_vm8, %v3342_v10, %v4600_v6 }
 0x1d7   : > { %v4608_v7 = vpop.permute.xlu0 %4607  ;;  %v3325_v1 = vsel %vm3310_vm7, %v3292_v18, %v4594_v48  ;;  %v3326_v44 = vsel %vm3310_vm7, %v3293_v40, %v4595_v25 }
 0x1d8   : > { %v4603_v43 = vpop.permute.xlu1 %4602  ;;  %v4610_v61 = vunpack.i.h.bf16 %v4608_v7  ;;  %v4609_v15 = vunpack.i.l.bf16 %v4608_v7 }
 0x1d9   : > { %v4605_v19 = vunpack.i.h.bf16 %v4603_v43  ;;  %v4604_v27 = vunpack.i.l.bf16 %v4603_v43 }
 0x1da   : > { %v3407_v29 = vsel %vm3376_vm9, %v3374_v13, %v4609_v15  ;;  %v3408_v26 = vsel %vm3376_vm9, %v3375_v23, %v4610_v61 }
 0x1db   : > { %v4618_v28 = vpop.permute.xlu0 %4617  ;;  %v3358_v12 = vsel %vm3343_vm8, %v3325_v1, %v4604_v27  ;;  %v3359_v30 = vsel %vm3343_vm8, %v3326_v44, %v4605_v19 }
 0x1dc   : > { %v4613_v59 = vpop.permute.xlu1 %4612  ;;  %v4620_v11 = vunpack.i.h.bf16 %v4618_v28  ;;  %v4619_v42 = vunpack.i.l.bf16 %v4618_v28 }
 0x1dd   : > { %v4615_v52 = vunpack.i.h.bf16 %v4613_v59  ;;  %v4614_v31 = vunpack.i.l.bf16 %v4613_v59 }
 0x1de   : > { %v3440_v3 = vsel %vm3409_vm10, %v3407_v29, %v4619_v42  ;;  %v3441_v63 = vsel %vm3409_vm10, %v3408_v26, %v4620_v11 }
 0x1df   : > { %v4628_v49 = vpop.permute.xlu0 %4627  ;;  %v3391_v60 = vsel %vm3376_vm9, %v3358_v12, %v4614_v31  ;;  %v3392_v21 = vsel %vm3376_vm9, %v3359_v30, %v4615_v52 }
 0x1e0   : > { %v4623_v46 = vpop.permute.xlu1 %4622  ;;  %v4630_v14 = vunpack.i.h.bf16 %v4628_v49  ;;  %v4629_v24 = vunpack.i.l.bf16 %v4628_v49 }
 0x1e1   : > { %v4625_v47 = vunpack.i.h.bf16 %v4623_v46  ;;  %v4624_v35 = vunpack.i.l.bf16 %v4623_v46 }
 0x1e2   : > { %v3473_v9 = vsel %vm3442_vm11, %v3440_v3, %v4629_v24  ;;  %v3474_v56 = vsel %vm3442_vm11, %v3441_v63, %v4630_v14 }
 0x1e3   : > { %v3956_v62 = vpack.c.bf16 %v3474_v56, %v3473_v9  ;;  %v3424_v7 = vsel %vm3409_vm10, %v3391_v60, %v4624_v35  ;;  %v3425_v38 = vsel %vm3409_vm10, %v3392_v21, %v4625_v47 }
 0x1e4   : > { %v4633_v0 = vpop.permute.xlu1 %4632 }
 0x1e5   : > { %v4635_v37 = vunpack.i.h.bf16 %v4633_v0  ;;  %v4634_v5 = vunpack.i.l.bf16 %v4633_v0  ;;  %3958 = vmatprep.subr.msk.bf16.mxu0 %vm6097_vm13, %v3956_v62 }
 0x1e7   : > { %v3457_v4 = vsel %vm3442_vm11, %v3424_v7, %v4634_v5  ;;  %v3458_v36 = vsel %vm3442_vm11, %v3425_v38, %v4635_v37 }
 0x1e8   : > { %v3959_v33 = vpack.c.bf16 %v3458_v36, %v3457_v4 }
 0x1ea   : > { %3961 = vmatpush3.bf16.xpose.msk.msra.mxu0 %vm6097_vm13, %v3959_v33 }
 0x1f1   : > { %3913 = vmatmul.mubr.msk.f32.vlgmr.msra.gmra.mrb[0].mxu0 %vm3476_vm12, %v6504_v53 }
 0x2c4   : > { %v3642_v43 = vpop.f32.mrb[0].mxu0 }
 0x2c5   : > { %v3654_v58 = vmul.f32 %v3642_v43, %v3642_v43  ;;  %v3644_v16 = vpop.f32.mrb[1].mxu0  ;;  %3647 = vst [vmem:[%s320_s15] sm:$0xff] %v3642_v43 }
 0x2c6   : > { %3648 = vst [vmem:[%s320_s15 + $0x8] sm:$0xff] %v3644_v16  ;;  %v3649_v2 = vadd.f32 %v3644_v16, %v3642_v43  ;;  %v3655_v55 = vmul.f32 %v3644_v16, %v3644_v16 }
 0x2c8   : > { %v3656_v54 = vadd.f32 %v3655_v55, %v3654_v58  ;;  %3650 = vadd.xlane.f32.xlu0 %v3649_v2 }
 0x2ca   : > { %3657 = vadd.xlane.f32.xlu1 %v3656_v54 }
 0x355   : > { %v3651_v34 = vpop.xlane.xlu0 %3650 }
 0x356   : > { %3653 = vst.msk [vmem:[%s328_s19] sm:$0xff] %vm3652_vm14, %v3651_v34 }
 0x357   : > { %v3658_v53 = vpop.xlane.xlu1 %3657 }
 0x358   : > { %3659 = vst.msk [vmem:[%s335_s26] sm:$0xff] %vm3652_vm14, %v3658_v53 }
 0x359 PF: > { %s17_s23 = sadd.s32 1, %s4664_s23   ;;  %s6864_s21 = smov %s4660_s22 }
 0x35a   : > { %p14_p6 = scmp.ge.s32.totalorder %s17_s23, 4   ;;  %s6865_s22 = smov %s6867_s24 }
 0x35c   :  { %16 = sbr.rel (!%p14_p6) target bundleno = 2 (0x2), region = 90 }

</bundles_post_ra>
